<compile_context>
chip_gen: v7x
topology: tpu7x:2x2x1
jax: 0.10.0
libtpu: 0.0.40
codegen_flags: <defaults>
</compile_context>

<pallas_src>
import functools

import jax
import jax.numpy as jnp
from jax import lax
from jax.experimental import pallas as pl
from jax.experimental.pallas import tpu as pltpu

LANE = 128


def _basic_block_kernel(x_ref, w1_ref, s1_ref, b1_ref, w2_ref, s2_ref, b2_ref,
                        out_ref, sw_ref, *, e_lambda):
    """One grid step processes G images.

    x_ref / out_ref blocks are (H, G, W, Cp): images sit side-by-side along W so the
    conv LHS flattens to a lane-dense (H*G*W, Cp) matrix with free reshapes.
    sw_ref: (3, H+2, G*W, Cp) bf16 scratch holding the three kw-shifted planes.
    """
    H, G, W, Cp = x_ref.shape
    GW = G * W
    M = H * GW
    f32 = jnp.float32

    # Halo rows (0 and H+1) of the shift buffers stay zero for both convs; the
    # interior rows are fully rewritten before each conv.  (Done every step so the
    # kernel is correct under a megacore 'parallel' split of the grid axis.)
    zrow = jnp.zeros((1, GW, Cp), sw_ref.dtype)
    for kw in range(3):
        sw_ref[kw, 0:1, :, :] = zrow
        sw_ref[kw, H + 1:H + 2, :, :] = zrow

    def put_shifts(src):
        # src: (H, G, W, Cp) bf16. Build the three kw-shifted, zero-padded-along-W
        # planes in registers and store each with one contiguous full-width store.
        zcol = jnp.zeros((H, G, 1, Cp), src.dtype)
        s_left = jnp.concatenate([zcol, src[:, :, :W - 1, :]], axis=2)   # kw = 0
        s_right = jnp.concatenate([src[:, :, 1:, :], zcol], axis=2)      # kw = 2
        sw_ref[0, 1:H + 1, :, :] = s_left.reshape(H, GW, Cp)
        sw_ref[1, 1:H + 1, :, :] = src.reshape(H, GW, Cp)
        sw_ref[2, 1:H + 1, :, :] = s_right.reshape(H, GW, Cp)

    def conv3x3(w_ref):
        # 9 MXU matmuls; per-tap LHS is a leading-axis (kh) view of the kw-shifted
        # buffer (true view, free reshape since GW is a multiple of 8).  Partials are
        # value-chained: no accumulator zero-init or VMEM read-modify-write.
        acc = None
        for kw in range(3):
            for kh in range(3):
                lhs = sw_ref[kw, kh:kh + H, :, :].reshape(M, Cp)
                part = jnp.dot(lhs, w_ref[kh * 3 + kw, :, :],
                               preferred_element_type=f32)
                acc = part if acc is None else acc + part
        return acc                                            # (M, Cp) f32

    xv = x_ref[...]                                           # (H, G, W, Cp) bf16

    # ---- conv1 + bn1 (folded) + relu ----
    put_shifts(xv)
    a1 = conv3x3(w1_ref)
    h1 = jnp.maximum(a1 * s1_ref[...] + b1_ref[...], 0.0)     # (M, Cp) f32

    # ---- conv2 (reuse shift buffers; halos are still zero) ----
    put_shifts(h1.reshape(H, G, W, Cp).astype(sw_ref.dtype))
    a2 = conv3x3(w2_ref).reshape(H, G, W, Cp)                 # f32

    # ---- SimAM: fused one-pass per-image spatial statistics ----
    hw = H * W
    s_sum = jnp.sum(jnp.sum(a2, axis=0, keepdims=True), axis=2, keepdims=True)
    s_sq = jnp.sum(jnp.sum(a2 * a2, axis=0, keepdims=True), axis=2, keepdims=True)
    mu = s_sum * (1.0 / hw)                                   # (1, G, 1, Cp)
    ssum = jnp.maximum(s_sq - hw * mu * mu, 0.0)              # clamp cancellation
    den = 4.0 * (ssum * (1.0 / (hw - 1)) + e_lambda)
    r = pl.reciprocal(den, approx=True)                       # EUP
    r = r * (2.0 - den * r)                                   # one Newton step
    y = (a2 - mu) ** 2 * r + 0.5
    a2 = a2 * jax.nn.sigmoid(y)

    # ---- bn2 (folded) + residual (same in-VMEM input block) + relu, bf16 store ----
    out = a2 * s2_ref[...] + b2_ref[...]
    out = jnp.maximum(out + xv.astype(f32), 0.0)
    out_ref[...] = out.astype(out_ref.dtype)


def _pick_group(batch, H, W, Cp):
    """Largest divisor G of batch keeping the per-step VMEM footprint small while
    targeting a matmul M dimension (G*H*W) of roughly >= 1024 rows."""
    budget = 24 * 1024 * 1024
    target_rows = 1024
    best = 1
    for g in range(1, batch + 1):
        if batch % g:
            continue
        blk = g * H * W * Cp * 2                 # bf16 in/out block
        sw = 3 * (H + 2) * g * W * Cp * 2        # shift scratch
        live = 2 * g * H * W * Cp * 4            # f32 values live in the body
        step = 4 * blk + sw + live               # in+out double-buffered + scratch
        if g > 1 and step > budget:
            break
        best = g
        if g * H * W >= target_rows:
            break
    return best


def basic_block_forward(x_nchw, w1_oihw, bn1_scale, bn1_bias,
                        w2_oihw, bn2_scale, bn2_bias, e_lambda=1e-4):
    """x_nchw: (B, C, H, W) float32. Returns (B, C, H, W) float32."""
    B, C, H, W = x_nchw.shape
    OC = w1_oihw.shape[0]
    assert OC == C, "stride=1 / downsample=None requires planes == inplanes"
    Cp = ((C + LANE - 1) // LANE) * LANE
    G = _pick_group(B, H, W, Cp)

    # NCHW -> (H, B, W, C) so each (H, G, W, Cp) block flattens to a lane-dense
    # (G*H*W, Cp) conv LHS inside the kernel; pad channels, cast to bf16.
    x = jnp.transpose(x_nchw, (2, 0, 3, 1))
    xp = jnp.pad(x, ((0, 0), (0, 0), (0, 0), (0, Cp - C))).astype(jnp.bfloat16)

    # OIHW -> (9, Cp_in, Cp_out) tap-major weights (index = kh*3 + kw), bf16.
    def pack_w(w):
        wt = jnp.transpose(w, (2, 3, 1, 0)).reshape(9, C, OC).astype(jnp.float32)
        wt = jnp.pad(wt, ((0, 0), (0, Cp - C), (0, Cp - OC)))
        return wt.astype(jnp.bfloat16)

    w1 = pack_w(w1_oihw)
    w2 = pack_w(w2_oihw)
    pad_c = lambda v: jnp.pad(v.astype(jnp.float32), (0, Cp - OC)).reshape(1, Cp)
    s1, b1 = pad_c(bn1_scale), pad_c(bn1_bias)
    s2, b2 = pad_c(bn2_scale), pad_c(bn2_bias)

    img_spec = pl.BlockSpec((H, G, W, Cp), lambda b: (0, b, 0, 0))
    # Constant index maps -> Pallas fetches weights/vectors once (no per-step DMA).
    w_spec = pl.BlockSpec((9, Cp, Cp), lambda b: (0, 0, 0))
    v_spec = pl.BlockSpec((1, Cp), lambda b: (0, 0))

    flops = 2 * 2 * 9 * B * H * W * Cp * Cp            # two 3x3 convs on the MXU
    bytes_accessed = (xp.size * 2 + B * H * W * Cp * 2
                      + (w1.size + w2.size) * 2 + 4 * Cp * 4)
    cost = pl.CostEstimate(flops=flops,
                           transcendentals=B * H * W * Cp,   # sigmoid
                           bytes_accessed=bytes_accessed)

    out = pl.pallas_call(
        functools.partial(_basic_block_kernel, e_lambda=e_lambda),
        out_shape=jax.ShapeDtypeStruct((H, B, W, Cp), jnp.bfloat16),
        grid=(B // G,),
        in_specs=[img_spec, w_spec, v_spec, v_spec, w_spec, v_spec, v_spec],
        out_specs=img_spec,
        scratch_shapes=[pltpu.VMEM((3, H + 2, G * W, Cp), jnp.bfloat16)],
        compiler_params=pltpu.CompilerParams(
            dimension_semantics=("parallel",),
            # Small-plane footprint is ~2-3 MiB; for large planes raise this on
            # v5e/v6e or row-tile with two-pass SimAM on v7x (64 MiB VMEM).
            vmem_limit_bytes=32 * 1024 * 1024),
        cost_estimate=cost,
    )(xp, w1, s1, b1, w2, s2, b2)

    out = out[..., :C]                                   # (H, B, W, C), drop channel pad
    return jnp.transpose(out, (1, 3, 0, 2)).astype(jnp.float32)


def reference_forward(x, w1, s1, b1, w2, s2, b2, e_lambda=1e-4):
    """Pure-JAX NCHW reference mirroring the PyTorch forward (convs in bf16 with
    f32 accumulation, matching the kernel's MXU-native precision)."""
    conv = lambda a, w: lax.conv_general_dilated(
        a.astype(jnp.bfloat16), w.astype(jnp.bfloat16),
        window_strides=(1, 1), padding=((1, 1), (1, 1)),
        dimension_numbers=("NCHW", "OIHW", "NCHW"),
        preferred_element_type=jnp.float32)
    bc = lambda v: v[None, :, None, None]

    xb = x.astype(jnp.bfloat16).astype(jnp.float32)   # kernel carries x in bf16
    out = conv(xb, w1)
    out = out * bc(s1) + bc(b1)
    out = jnp.maximum(out, 0.0)
    out = conv(out, w2)
    # simam
    _, _, H, W = out.shape
    n = float(H * W - 1)
    mu = out.mean(axis=(2, 3), keepdims=True)
    xms = (out - mu) ** 2
    y = xms / (4.0 * (xms.sum(axis=(2, 3), keepdims=True) / n + e_lambda)) + 0.5
    out = out * jax.nn.sigmoid(y)
    # bn2 + residual + relu
    out = out * bc(s2) + bc(b2)
    out = out + xb
    return jnp.maximum(out, 0.0)


if __name__ == "__main__":
    B, C, H, W = 2, 4, 16, 16   # inplanes = planes = 4, stride = 1
    key = jax.random.PRNGKey(0)
    kx, kw1, kw2, kg1, kb1, kg2, kb2, km1, kv1, km2, kv2 = jax.random.split(key, 11)

    x = jax.random.normal(kx, (B, C, H, W), jnp.float32)

    # Deterministic parameter init (PyTorch shapes: conv OIHW, BN per-channel).
    w1 = jax.random.normal(kw1, (C, C, 3, 3), jnp.float32) * 0.2
    w2 = jax.random.normal(kw2, (C, C, 3, 3), jnp.float32) * 0.2
    eps = 1e-5
    gamma1 = 1.0 + 0.1 * jax.random.normal(kg1, (C,), jnp.float32)
    beta1 = 0.1 * jax.random.normal(kb1, (C,), jnp.float32)
    mean1 = 0.1 * jax.random.normal(km1, (C,), jnp.float32)
    var1 = 1.0 + 0.1 * jnp.abs(jax.random.normal(kv1, (C,), jnp.float32))
    gamma2 = 1.0 + 0.1 * jax.random.normal(kg2, (C,), jnp.float32)
    beta2 = 0.1 * jax.random.normal(kb2, (C,), jnp.float32)
    mean2 = 0.1 * jax.random.normal(km2, (C,), jnp.float32)
    var2 = 1.0 + 0.1 * jnp.abs(jax.random.normal(kv2, (C,), jnp.float32))

    # Fold BN (inference mode) into per-channel scale/bias.
    # TODO(synk): training-mode BatchNorm (batch statistics) not implemented; inference BN used.
    s1 = gamma1 / jnp.sqrt(var1 + eps)
    b1 = beta1 - mean1 * s1
    s2 = gamma2 / jnp.sqrt(var2 + eps)
    b2 = beta2 - mean2 * s2

    y_kernel = jax.block_until_ready(
        basic_block_forward(x, w1, s1, b1, w2, s2, b2))
    y_ref = jax.block_until_ready(
        reference_forward(x, w1, s1, b1, w2, s2, b2))

    err = float(jnp.max(jnp.abs(y_kernel - y_ref)))
    if not bool(jnp.allclose(y_kernel, y_ref, atol=1e-2, rtol=1e-2)):
        raise AssertionError(f"mismatch: max abs err = {err}")
    print("KERNEL_OK")
</pallas_src>

<mosaic_0001>
module attributes {stable_mosaic.version = 11 : i64} {
  func.func @_basic_block_kernel(%arg0: i32, %arg1: memref<16x2x16x128xbf16, #tpu.memory_space<vmem>>, %arg2: memref<9x128x128xbf16, #tpu.memory_space<vmem>>, %arg3: memref<1x128xf32, #tpu.memory_space<vmem>>, %arg4: memref<1x128xf32, #tpu.memory_space<vmem>>, %arg5: memref<9x128x128xbf16, #tpu.memory_space<vmem>>, %arg6: memref<1x128xf32, #tpu.memory_space<vmem>>, %arg7: memref<1x128xf32, #tpu.memory_space<vmem>>, %arg8: memref<16x2x16x128xbf16, #tpu.memory_space<vmem>>, %arg9: memref<3x18x32x128xbf16, #tpu.memory_space<vmem>>) attributes {dimension_semantics = [#tpu.dimension_semantics<parallel>], iteration_bounds = array<i64: 1>, scalar_prefetch = 0 : i64, scratch_operands = 1 : i64, tpu.core_type = #tpu.core_type<tc>, window_params = [{transform_indices = @transform_0, window_bounds = array<i64: 16, 2, 16, 128>}, {pipeline_mode = #tpu.pipeline_mode<synchronous>, transform_indices = @transform_1, window_bounds = array<i64: 9, 128, 128>}, {pipeline_mode = #tpu.pipeline_mode<synchronous>, transform_indices = @transform_2, window_bounds = array<i64: 1, 128>}, {pipeline_mode = #tpu.pipeline_mode<synchronous>, transform_indices = @transform_3, window_bounds = array<i64: 1, 128>}, {pipeline_mode = #tpu.pipeline_mode<synchronous>, transform_indices = @transform_4, window_bounds = array<i64: 9, 128, 128>}, {pipeline_mode = #tpu.pipeline_mode<synchronous>, transform_indices = @transform_5, window_bounds = array<i64: 1, 128>}, {pipeline_mode = #tpu.pipeline_mode<synchronous>, transform_indices = @transform_6, window_bounds = array<i64: 1, 128>}, {transform_indices = @transform_7, window_bounds = array<i64: 16, 2, 16, 128>}]} {
    %cst = arith.constant 0.000000e+00 : bf16
    %0 = vector.broadcast %cst : bf16 to vector<1x32x128xbf16>
    %c0 = arith.constant 0 : index
    %c0_0 = arith.constant 0 : index
    %c0_1 = arith.constant 0 : index
    %c0_2 = arith.constant 0 : index
    %1 = vector.load %arg9[%c0, %c0_0, %c0_1, %c0_2] : memref<3x18x32x128xbf16, #tpu.memory_space<vmem>>, vector<1x1x32x128xbf16>
    %2 = vector.shape_cast %1 : vector<1x1x32x128xbf16> to vector<1x32x128xbf16>
    %3 = vector.shape_cast %0 : vector<1x32x128xbf16> to vector<1x1x32x128xbf16>
    tpu.vector_store %arg9[%c0, %c0_0, %c0_1, %c0_2], %3 {strides = array<i32>} : memref<3x18x32x128xbf16, #tpu.memory_space<vmem>>, vector<1x1x32x128xbf16>,
    %c0_3 = arith.constant 0 : index
    %c17 = arith.constant 17 : index
    %c0_4 = arith.constant 0 : index
    %c0_5 = arith.constant 0 : index
    %4 = vector.load %arg9[%c0_3, %c17, %c0_4, %c0_5] : memref<3x18x32x128xbf16, #tpu.memory_space<vmem>>, vector<1x1x32x128xbf16>
    %5 = vector.shape_cast %4 : vector<1x1x32x128xbf16> to vector<1x32x128xbf16>
    %6 = vector.shape_cast %0 : vector<1x32x128xbf16> to vector<1x1x32x128xbf16>
    tpu.vector_store %arg9[%c0_3, %c17, %c0_4, %c0_5], %6 {strides = array<i32>} : memref<3x18x32x128xbf16, #tpu.memory_space<vmem>>, vector<1x1x32x128xbf16>,
    %c1 = arith.constant 1 : index
    %c0_6 = arith.constant 0 : index
    %c0_7 = arith.constant 0 : index
    %c0_8 = arith.constant 0 : index
    %7 = vector.load %arg9[%c1, %c0_6, %c0_7, %c0_8] : memref<3x18x32x128xbf16, #tpu.memory_space<vmem>>, vector<1x1x32x128xbf16>
    %8 = vector.shape_cast %7 : vector<1x1x32x128xbf16> to vector<1x32x128xbf16>
    %9 = vector.shape_cast %0 : vector<1x32x128xbf16> to vector<1x1x32x128xbf16>
    tpu.vector_store %arg9[%c1, %c0_6, %c0_7, %c0_8], %9 {strides = array<i32>} : memref<3x18x32x128xbf16, #tpu.memory_space<vmem>>, vector<1x1x32x128xbf16>,
    %c1_9 = arith.constant 1 : index
    %c17_10 = arith.constant 17 : index
    %c0_11 = arith.constant 0 : index
    %c0_12 = arith.constant 0 : index
    %10 = vector.load %arg9[%c1_9, %c17_10, %c0_11, %c0_12] : memref<3x18x32x128xbf16, #tpu.memory_space<vmem>>, vector<1x1x32x128xbf16>
    %11 = vector.shape_cast %10 : vector<1x1x32x128xbf16> to vector<1x32x128xbf16>
    %12 = vector.shape_cast %0 : vector<1x32x128xbf16> to vector<1x1x32x128xbf16>
    tpu.vector_store %arg9[%c1_9, %c17_10, %c0_11, %c0_12], %12 {strides = array<i32>} : memref<3x18x32x128xbf16, #tpu.memory_space<vmem>>, vector<1x1x32x128xbf16>,
    %c2 = arith.constant 2 : index
    %c0_13 = arith.constant 0 : index
    %c0_14 = arith.constant 0 : index
    %c0_15 = arith.constant 0 : index
    %13 = vector.load %arg9[%c2, %c0_13, %c0_14, %c0_15] : memref<3x18x32x128xbf16, #tpu.memory_space<vmem>>, vector<1x1x32x128xbf16>
    %14 = vector.shape_cast %13 : vector<1x1x32x128xbf16> to vector<1x32x128xbf16>
    %15 = vector.shape_cast %0 : vector<1x32x128xbf16> to vector<1x1x32x128xbf16>
    tpu.vector_store %arg9[%c2, %c0_13, %c0_14, %c0_15], %15 {strides = array<i32>} : memref<3x18x32x128xbf16, #tpu.memory_space<vmem>>, vector<1x1x32x128xbf16>,
    %c2_16 = arith.constant 2 : index
    %c17_17 = arith.constant 17 : index
    %c0_18 = arith.constant 0 : index
    %c0_19 = arith.constant 0 : index
    %16 = vector.load %arg9[%c2_16, %c17_17, %c0_18, %c0_19] : memref<3x18x32x128xbf16, #tpu.memory_space<vmem>>, vector<1x1x32x128xbf16>
    %17 = vector.shape_cast %16 : vector<1x1x32x128xbf16> to vector<1x32x128xbf16>
    %18 = vector.shape_cast %0 : vector<1x32x128xbf16> to vector<1x1x32x128xbf16>
    tpu.vector_store %arg9[%c2_16, %c17_17, %c0_18, %c0_19], %18 {strides = array<i32>} : memref<3x18x32x128xbf16, #tpu.memory_space<vmem>>, vector<1x1x32x128xbf16>,
    %c0_20 = arith.constant 0 : index
    %c0_21 = arith.constant 0 : index
    %c0_22 = arith.constant 0 : index
    %c0_23 = arith.constant 0 : index
    %19 = vector.load %arg1[%c0_20, %c0_21, %c0_22, %c0_23] : memref<16x2x16x128xbf16, #tpu.memory_space<vmem>>, vector<16x2x16x128xbf16>
    %cst_24 = arith.constant 0.000000e+00 : bf16
    %20 = vector.broadcast %cst_24 : bf16 to vector<16x2x1x128xbf16>
    %21 = vector.extract_strided_slice %19 {offsets = [0, 0, 0, 0], sizes = [16, 2, 15, 128], strides = [1, 1, 1, 1]} : vector<16x2x16x128xbf16> to vector<16x2x15x128xbf16>
    %22 = tpu.concatenate %20, %21 in 2 : vector<16x2x1x128xbf16>, vector<16x2x15x128xbf16> -> vector<16x2x16x128xbf16>
    %23 = vector.extract_strided_slice %19 {offsets = [0, 0, 1, 0], sizes = [16, 2, 15, 128], strides = [1, 1, 1, 1]} : vector<16x2x16x128xbf16> to vector<16x2x15x128xbf16>
    %24 = tpu.concatenate %23, %20 in 2 : vector<16x2x15x128xbf16>, vector<16x2x1x128xbf16> -> vector<16x2x16x128xbf16>
    %25 = vector.shape_cast %22 : vector<16x2x16x128xbf16> to vector<16x32x128xbf16>
    %c0_25 = arith.constant 0 : index
    %c1_26 = arith.constant 1 : index
    %c0_27 = arith.constant 0 : index
    %c0_28 = arith.constant 0 : index
    %26 = vector.load %arg9[%c0_25, %c1_26, %c0_27, %c0_28] : memref<3x18x32x128xbf16, #tpu.memory_space<vmem>>, vector<1x16x32x128xbf16>
    %27 = vector.shape_cast %26 : vector<1x16x32x128xbf16> to vector<16x32x128xbf16>
    %28 = vector.shape_cast %25 : vector<16x32x128xbf16> to vector<1x16x32x128xbf16>
    tpu.vector_store %arg9[%c0_25, %c1_26, %c0_27, %c0_28], %28 {strides = array<i32>} : memref<3x18x32x128xbf16, #tpu.memory_space<vmem>>, vector<1x16x32x128xbf16>,
    %29 = vector.shape_cast %19 : vector<16x2x16x128xbf16> to vector<16x32x128xbf16>
    %c1_29 = arith.constant 1 : index
    %c1_30 = arith.constant 1 : index
    %c0_31 = arith.constant 0 : index
    %c0_32 = arith.constant 0 : index
    %30 = vector.load %arg9[%c1_29, %c1_30, %c0_31, %c0_32] : memref<3x18x32x128xbf16, #tpu.memory_space<vmem>>, vector<1x16x32x128xbf16>
    %31 = vector.shape_cast %30 : vector<1x16x32x128xbf16> to vector<16x32x128xbf16>
    %32 = vector.shape_cast %29 : vector<16x32x128xbf16> to vector<1x16x32x128xbf16>
    tpu.vector_store %arg9[%c1_29, %c1_30, %c0_31, %c0_32], %32 {strides = array<i32>} : memref<3x18x32x128xbf16, #tpu.memory_space<vmem>>, vector<1x16x32x128xbf16>,
    %33 = vector.shape_cast %24 : vector<16x2x16x128xbf16> to vector<16x32x128xbf16>
    %c2_33 = arith.constant 2 : index
    %c1_34 = arith.constant 1 : index
    %c0_35 = arith.constant 0 : index
    %c0_36 = arith.constant 0 : index
    %34 = vector.load %arg9[%c2_33, %c1_34, %c0_35, %c0_36] : memref<3x18x32x128xbf16, #tpu.memory_space<vmem>>, vector<1x16x32x128xbf16>
    %35 = vector.shape_cast %34 : vector<1x16x32x128xbf16> to vector<16x32x128xbf16>
    %36 = vector.shape_cast %33 : vector<16x32x128xbf16> to vector<1x16x32x128xbf16>
    tpu.vector_store %arg9[%c2_33, %c1_34, %c0_35, %c0_36], %36 {strides = array<i32>} : memref<3x18x32x128xbf16, #tpu.memory_space<vmem>>, vector<1x16x32x128xbf16>,
    %c0_37 = arith.constant 0 : index
    %c0_38 = arith.constant 0 : index
    %c0_39 = arith.constant 0 : index
    %c0_40 = arith.constant 0 : index
    %37 = vector.load %arg9[%c0_37, %c0_38, %c0_39, %c0_40] : memref<3x18x32x128xbf16, #tpu.memory_space<vmem>>, vector<1x16x32x128xbf16>
    %38 = vector.shape_cast %37 : vector<1x16x32x128xbf16> to vector<16x32x128xbf16>
    %39 = vector.shape_cast %38 : vector<16x32x128xbf16> to vector<512x128xbf16>
    %c0_41 = arith.constant 0 : index
    %c0_42 = arith.constant 0 : index
    %c0_43 = arith.constant 0 : index
    %40 = vector.load %arg2[%c0_41, %c0_42, %c0_43] : memref<9x128x128xbf16, #tpu.memory_space<vmem>>, vector<1x128x128xbf16>
    %41 = vector.shape_cast %40 : vector<1x128x128xbf16> to vector<128x128xbf16>
    %cst_44 = arith.constant dense<0.000000e+00> : vector<512x128xf32>
    %42 = tpu.matmul %39, %41, %cst_44 {dimension_numbers = #tpu.dot_dimension_numbers<[1], [0], [0], [1], [0, 0, 1, 1], [], []>} : vector<512x128xbf16>, vector<128x128xbf16>, vector<512x128xf32> -> vector<512x128xf32>
    %c0_45 = arith.constant 0 : index
    %c1_46 = arith.constant 1 : index
    %c0_47 = arith.constant 0 : index
    %c0_48 = arith.constant 0 : index
    %43 = vector.load %arg9[%c0_45, %c1_46, %c0_47, %c0_48] : memref<3x18x32x128xbf16, #tpu.memory_space<vmem>>, vector<1x16x32x128xbf16>
    %44 = vector.shape_cast %43 : vector<1x16x32x128xbf16> to vector<16x32x128xbf16>
    %45 = vector.shape_cast %44 : vector<16x32x128xbf16> to vector<512x128xbf16>
    %c3 = arith.constant 3 : index
    %c0_49 = arith.constant 0 : index
    %c0_50 = arith.constant 0 : index
    %46 = vector.load %arg2[%c3, %c0_49, %c0_50] : memref<9x128x128xbf16, #tpu.memory_space<vmem>>, vector<1x128x128xbf16>
    %47 = vector.shape_cast %46 : vector<1x128x128xbf16> to vector<128x128xbf16>
    %cst_51 = arith.constant dense<0.000000e+00> : vector<512x128xf32>
    %48 = tpu.matmul %45, %47, %cst_51 {dimension_numbers = #tpu.dot_dimension_numbers<[1], [0], [0], [1], [0, 0, 1, 1], [], []>} : vector<512x128xbf16>, vector<128x128xbf16>, vector<512x128xf32> -> vector<512x128xf32>
    %49 = arith.addf %42, %48 : vector<512x128xf32>
    %c0_52 = arith.constant 0 : index
    %c2_53 = arith.constant 2 : index
    %c0_54 = arith.constant 0 : index
    %c0_55 = arith.constant 0 : index
    %50 = vector.load %arg9[%c0_52, %c2_53, %c0_54, %c0_55] : memref<3x18x32x128xbf16, #tpu.memory_space<vmem>>, vector<1x16x32x128xbf16>
    %51 = vector.shape_cast %50 : vector<1x16x32x128xbf16> to vector<16x32x128xbf16>
    %52 = vector.shape_cast %51 : vector<16x32x128xbf16> to vector<512x128xbf16>
    %c6 = arith.constant 6 : index
    %c0_56 = arith.constant 0 : index
    %c0_57 = arith.constant 0 : index
    %53 = vector.load %arg2[%c6, %c0_56, %c0_57] : memref<9x128x128xbf16, #tpu.memory_space<vmem>>, vector<1x128x128xbf16>
    %54 = vector.shape_cast %53 : vector<1x128x128xbf16> to vector<128x128xbf16>
    %cst_58 = arith.constant dense<0.000000e+00> : vector<512x128xf32>
    %55 = tpu.matmul %52, %54, %cst_58 {dimension_numbers = #tpu.dot_dimension_numbers<[1], [0], [0], [1], [0, 0, 1, 1], [], []>} : vector<512x128xbf16>, vector<128x128xbf16>, vector<512x128xf32> -> vector<512x128xf32>
    %56 = arith.addf %49, %55 : vector<512x128xf32>
    %c1_59 = arith.constant 1 : index
    %c0_60 = arith.constant 0 : index
    %c0_61 = arith.constant 0 : index
    %c0_62 = arith.constant 0 : index
    %57 = vector.load %arg9[%c1_59, %c0_60, %c0_61, %c0_62] : memref<3x18x32x128xbf16, #tpu.memory_space<vmem>>, vector<1x16x32x128xbf16>
    %58 = vector.shape_cast %57 : vector<1x16x32x128xbf16> to vector<16x32x128xbf16>
    %59 = vector.shape_cast %58 : vector<16x32x128xbf16> to vector<512x128xbf16>
    %c1_63 = arith.constant 1 : index
    %c0_64 = arith.constant 0 : index
    %c0_65 = arith.constant 0 : index
    %60 = vector.load %arg2[%c1_63, %c0_64, %c0_65] : memref<9x128x128xbf16, #tpu.memory_space<vmem>>, vector<1x128x128xbf16>
    %61 = vector.shape_cast %60 : vector<1x128x128xbf16> to vector<128x128xbf16>
    %cst_66 = arith.constant dense<0.000000e+00> : vector<512x128xf32>
    %62 = tpu.matmul %59, %61, %cst_66 {dimension_numbers = #tpu.dot_dimension_numbers<[1], [0], [0], [1], [0, 0, 1, 1], [], []>} : vector<512x128xbf16>, vector<128x128xbf16>, vector<512x128xf32> -> vector<512x128xf32>
    %63 = arith.addf %56, %62 : vector<512x128xf32>
    %c1_67 = arith.constant 1 : index
    %c1_68 = arith.constant 1 : index
    %c0_69 = arith.constant 0 : index
    %c0_70 = arith.constant 0 : index
    %64 = vector.load %arg9[%c1_67, %c1_68, %c0_69, %c0_70] : memref<3x18x32x128xbf16, #tpu.memory_space<vmem>>, vector<1x16x32x128xbf16>
    %65 = vector.shape_cast %64 : vector<1x16x32x128xbf16> to vector<16x32x128xbf16>
    %66 = vector.shape_cast %65 : vector<16x32x128xbf16> to vector<512x128xbf16>
    %c4 = arith.constant 4 : index
    %c0_71 = arith.constant 0 : index
    %c0_72 = arith.constant 0 : index
    %67 = vector.load %arg2[%c4, %c0_71, %c0_72] : memref<9x128x128xbf16, #tpu.memory_space<vmem>>, vector<1x128x128xbf16>
    %68 = vector.shape_cast %67 : vector<1x128x128xbf16> to vector<128x128xbf16>
    %cst_73 = arith.constant dense<0.000000e+00> : vector<512x128xf32>
    %69 = tpu.matmul %66, %68, %cst_73 {dimension_numbers = #tpu.dot_dimension_numbers<[1], [0], [0], [1], [0, 0, 1, 1], [], []>} : vector<512x128xbf16>, vector<128x128xbf16>, vector<512x128xf32> -> vector<512x128xf32>
    %70 = arith.addf %63, %69 : vector<512x128xf32>
    %c1_74 = arith.constant 1 : index
    %c2_75 = arith.constant 2 : index
    %c0_76 = arith.constant 0 : index
    %c0_77 = arith.constant 0 : index
    %71 = vector.load %arg9[%c1_74, %c2_75, %c0_76, %c0_77] : memref<3x18x32x128xbf16, #tpu.memory_space<vmem>>, vector<1x16x32x128xbf16>
    %72 = vector.shape_cast %71 : vector<1x16x32x128xbf16> to vector<16x32x128xbf16>
    %73 = vector.shape_cast %72 : vector<16x32x128xbf16> to vector<512x128xbf16>
    %c7 = arith.constant 7 : index
    %c0_78 = arith.constant 0 : index
    %c0_79 = arith.constant 0 : index
    %74 = vector.load %arg2[%c7, %c0_78, %c0_79] : memref<9x128x128xbf16, #tpu.memory_space<vmem>>, vector<1x128x128xbf16>
    %75 = vector.shape_cast %74 : vector<1x128x128xbf16> to vector<128x128xbf16>
    %cst_80 = arith.constant dense<0.000000e+00> : vector<512x128xf32>
    %76 = tpu.matmul %73, %75, %cst_80 {dimension_numbers = #tpu.dot_dimension_numbers<[1], [0], [0], [1], [0, 0, 1, 1], [], []>} : vector<512x128xbf16>, vector<128x128xbf16>, vector<512x128xf32> -> vector<512x128xf32>
    %77 = arith.addf %70, %76 : vector<512x128xf32>
    %c2_81 = arith.constant 2 : index
    %c0_82 = arith.constant 0 : index
    %c0_83 = arith.constant 0 : index
    %c0_84 = arith.constant 0 : index
    %78 = vector.load %arg9[%c2_81, %c0_82, %c0_83, %c0_84] : memref<3x18x32x128xbf16, #tpu.memory_space<vmem>>, vector<1x16x32x128xbf16>
    %79 = vector.shape_cast %78 : vector<1x16x32x128xbf16> to vector<16x32x128xbf16>
    %80 = vector.shape_cast %79 : vector<16x32x128xbf16> to vector<512x128xbf16>
    %c2_85 = arith.constant 2 : index
    %c0_86 = arith.constant 0 : index
    %c0_87 = arith.constant 0 : index
    %81 = vector.load %arg2[%c2_85, %c0_86, %c0_87] : memref<9x128x128xbf16, #tpu.memory_space<vmem>>, vector<1x128x128xbf16>
    %82 = vector.shape_cast %81 : vector<1x128x128xbf16> to vector<128x128xbf16>
    %cst_88 = arith.constant dense<0.000000e+00> : vector<512x128xf32>
    %83 = tpu.matmul %80, %82, %cst_88 {dimension_numbers = #tpu.dot_dimension_numbers<[1], [0], [0], [1], [0, 0, 1, 1], [], []>} : vector<512x128xbf16>, vector<128x128xbf16>, vector<512x128xf32> -> vector<512x128xf32>
    %84 = arith.addf %77, %83 : vector<512x128xf32>
    %c2_89 = arith.constant 2 : index
    %c1_90 = arith.constant 1 : index
    %c0_91 = arith.constant 0 : index
    %c0_92 = arith.constant 0 : index
    %85 = vector.load %arg9[%c2_89, %c1_90, %c0_91, %c0_92] : memref<3x18x32x128xbf16, #tpu.memory_space<vmem>>, vector<1x16x32x128xbf16>
    %86 = vector.shape_cast %85 : vector<1x16x32x128xbf16> to vector<16x32x128xbf16>
    %87 = vector.shape_cast %86 : vector<16x32x128xbf16> to vector<512x128xbf16>
    %c5 = arith.constant 5 : index
    %c0_93 = arith.constant 0 : index
    %c0_94 = arith.constant 0 : index
    %88 = vector.load %arg2[%c5, %c0_93, %c0_94] : memref<9x128x128xbf16, #tpu.memory_space<vmem>>, vector<1x128x128xbf16>
    %89 = vector.shape_cast %88 : vector<1x128x128xbf16> to vector<128x128xbf16>
    %cst_95 = arith.constant dense<0.000000e+00> : vector<512x128xf32>
    %90 = tpu.matmul %87, %89, %cst_95 {dimension_numbers = #tpu.dot_dimension_numbers<[1], [0], [0], [1], [0, 0, 1, 1], [], []>} : vector<512x128xbf16>, vector<128x128xbf16>, vector<512x128xf32> -> vector<512x128xf32>
    %91 = arith.addf %84, %90 : vector<512x128xf32>
    %c2_96 = arith.constant 2 : index
    %c2_97 = arith.constant 2 : index
    %c0_98 = arith.constant 0 : index
    %c0_99 = arith.constant 0 : index
    %92 = vector.load %arg9[%c2_96, %c2_97, %c0_98, %c0_99] : memref<3x18x32x128xbf16, #tpu.memory_space<vmem>>, vector<1x16x32x128xbf16>
    %93 = vector.shape_cast %92 : vector<1x16x32x128xbf16> to vector<16x32x128xbf16>
    %94 = vector.shape_cast %93 : vector<16x32x128xbf16> to vector<512x128xbf16>
    %c8 = arith.constant 8 : index
    %c0_100 = arith.constant 0 : index
    %c0_101 = arith.constant 0 : index
    %95 = vector.load %arg2[%c8, %c0_100, %c0_101] : memref<9x128x128xbf16, #tpu.memory_space<vmem>>, vector<1x128x128xbf16>
    %96 = vector.shape_cast %95 : vector<1x128x128xbf16> to vector<128x128xbf16>
    %cst_102 = arith.constant dense<0.000000e+00> : vector<512x128xf32>
    %97 = tpu.matmul %94, %96, %cst_102 {dimension_numbers = #tpu.dot_dimension_numbers<[1], [0], [0], [1], [0, 0, 1, 1], [], []>} : vector<512x128xbf16>, vector<128x128xbf16>, vector<512x128xf32> -> vector<512x128xf32>
    %98 = arith.addf %91, %97 : vector<512x128xf32>
    %c0_103 = arith.constant 0 : index
    %c0_104 = arith.constant 0 : index
    %99 = vector.load %arg3[%c0_103, %c0_104] : memref<1x128xf32, #tpu.memory_space<vmem>>, vector<1x128xf32>
    %100 = vector.broadcast %99 : vector<1x128xf32> to vector<512x128xf32>
    %101 = arith.mulf %98, %100 : vector<512x128xf32>
    %c0_105 = arith.constant 0 : index
    %c0_106 = arith.constant 0 : index
    %102 = vector.load %arg4[%c0_105, %c0_106] : memref<1x128xf32, #tpu.memory_space<vmem>>, vector<1x128xf32>
    %103 = vector.broadcast %102 : vector<1x128xf32> to vector<512x128xf32>
    %104 = arith.addf %101, %103 : vector<512x128xf32>
    %cst_107 = arith.constant 0.000000e+00 : f32
    %105 = vector.broadcast %cst_107 : f32 to vector<512x128xf32>
    %106 = arith.maximumf %104, %105 : vector<512x128xf32>
    %107 = vector.shape_cast %106 : vector<512x128xf32> to vector<16x2x16x128xf32>
    %108 = arith.truncf %107 : vector<16x2x16x128xf32> to vector<16x2x16x128xbf16>
    %cst_108 = arith.constant 0.000000e+00 : bf16
    %109 = vector.broadcast %cst_108 : bf16 to vector<16x2x1x128xbf16>
    %110 = vector.extract_strided_slice %108 {offsets = [0, 0, 0, 0], sizes = [16, 2, 15, 128], strides = [1, 1, 1, 1]} : vector<16x2x16x128xbf16> to vector<16x2x15x128xbf16>
    %111 = tpu.concatenate %109, %110 in 2 : vector<16x2x1x128xbf16>, vector<16x2x15x128xbf16> -> vector<16x2x16x128xbf16>
    %112 = vector.extract_strided_slice %108 {offsets = [0, 0, 1, 0], sizes = [16, 2, 15, 128], strides = [1, 1, 1, 1]} : vector<16x2x16x128xbf16> to vector<16x2x15x128xbf16>
    %113 = tpu.concatenate %112, %109 in 2 : vector<16x2x15x128xbf16>, vector<16x2x1x128xbf16> -> vector<16x2x16x128xbf16>
    %114 = vector.shape_cast %111 : vector<16x2x16x128xbf16> to vector<16x32x128xbf16>
    %c0_109 = arith.constant 0 : index
    %c1_110 = arith.constant 1 : index
    %c0_111 = arith.constant 0 : index
    %c0_112 = arith.constant 0 : index
    %115 = vector.load %arg9[%c0_109, %c1_110, %c0_111, %c0_112] : memref<3x18x32x128xbf16, #tpu.memory_space<vmem>>, vector<1x16x32x128xbf16>
    %116 = vector.shape_cast %115 : vector<1x16x32x128xbf16> to vector<16x32x128xbf16>
    %117 = vector.shape_cast %114 : vector<16x32x128xbf16> to vector<1x16x32x128xbf16>
    tpu.vector_store %arg9[%c0_109, %c1_110, %c0_111, %c0_112], %117 {strides = array<i32>} : memref<3x18x32x128xbf16, #tpu.memory_space<vmem>>, vector<1x16x32x128xbf16>,
    %118 = vector.shape_cast %108 : vector<16x2x16x128xbf16> to vector<16x32x128xbf16>
    %c1_113 = arith.constant 1 : index
    %c1_114 = arith.constant 1 : index
    %c0_115 = arith.constant 0 : index
    %c0_116 = arith.constant 0 : index
    %119 = vector.load %arg9[%c1_113, %c1_114, %c0_115, %c0_116] : memref<3x18x32x128xbf16, #tpu.memory_space<vmem>>, vector<1x16x32x128xbf16>
    %120 = vector.shape_cast %119 : vector<1x16x32x128xbf16> to vector<16x32x128xbf16>
    %121 = vector.shape_cast %118 : vector<16x32x128xbf16> to vector<1x16x32x128xbf16>
    tpu.vector_store %arg9[%c1_113, %c1_114, %c0_115, %c0_116], %121 {strides = array<i32>} : memref<3x18x32x128xbf16, #tpu.memory_space<vmem>>, vector<1x16x32x128xbf16>,
    %122 = vector.shape_cast %113 : vector<16x2x16x128xbf16> to vector<16x32x128xbf16>
    %c2_117 = arith.constant 2 : index
    %c1_118 = arith.constant 1 : index
    %c0_119 = arith.constant 0 : index
    %c0_120 = arith.constant 0 : index
    %123 = vector.load %arg9[%c2_117, %c1_118, %c0_119, %c0_120] : memref<3x18x32x128xbf16, #tpu.memory_space<vmem>>, vector<1x16x32x128xbf16>
    %124 = vector.shape_cast %123 : vector<1x16x32x128xbf16> to vector<16x32x128xbf16>
    %125 = vector.shape_cast %122 : vector<16x32x128xbf16> to vector<1x16x32x128xbf16>
    tpu.vector_store %arg9[%c2_117, %c1_118, %c0_119, %c0_120], %125 {strides = array<i32>} : memref<3x18x32x128xbf16, #tpu.memory_space<vmem>>, vector<1x16x32x128xbf16>,
    %c0_121 = arith.constant 0 : index
    %c0_122 = arith.constant 0 : index
    %c0_123 = arith.constant 0 : index
    %c0_124 = arith.constant 0 : index
    %126 = vector.load %arg9[%c0_121, %c0_122, %c0_123, %c0_124] : memref<3x18x32x128xbf16, #tpu.memory_space<vmem>>, vector<1x16x32x128xbf16>
    %127 = vector.shape_cast %126 : vector<1x16x32x128xbf16> to vector<16x32x128xbf16>
    %128 = vector.shape_cast %127 : vector<16x32x128xbf16> to vector<512x128xbf16>
    %c0_125 = arith.constant 0 : index
    %c0_126 = arith.constant 0 : index
    %c0_127 = arith.constant 0 : index
    %129 = vector.load %arg5[%c0_125, %c0_126, %c0_127] : memref<9x128x128xbf16, #tpu.memory_space<vmem>>, vector<1x128x128xbf16>
    %130 = vector.shape_cast %129 : vector<1x128x128xbf16> to vector<128x128xbf16>
    %cst_128 = arith.constant dense<0.000000e+00> : vector<512x128xf32>
    %131 = tpu.matmul %128, %130, %cst_128 {dimension_numbers = #tpu.dot_dimension_numbers<[1], [0], [0], [1], [0, 0, 1, 1], [], []>} : vector<512x128xbf16>, vector<128x128xbf16>, vector<512x128xf32> -> vector<512x128xf32>
    %c0_129 = arith.constant 0 : index
    %c1_130 = arith.constant 1 : index
    %c0_131 = arith.constant 0 : index
    %c0_132 = arith.constant 0 : index
    %132 = vector.load %arg9[%c0_129, %c1_130, %c0_131, %c0_132] : memref<3x18x32x128xbf16, #tpu.memory_space<vmem>>, vector<1x16x32x128xbf16>
    %133 = vector.shape_cast %132 : vector<1x16x32x128xbf16> to vector<16x32x128xbf16>
    %134 = vector.shape_cast %133 : vector<16x32x128xbf16> to vector<512x128xbf16>
    %c3_133 = arith.constant 3 : index
    %c0_134 = arith.constant 0 : index
    %c0_135 = arith.constant 0 : index
    %135 = vector.load %arg5[%c3_133, %c0_134, %c0_135] : memref<9x128x128xbf16, #tpu.memory_space<vmem>>, vector<1x128x128xbf16>
    %136 = vector.shape_cast %135 : vector<1x128x128xbf16> to vector<128x128xbf16>
    %cst_136 = arith.constant dense<0.000000e+00> : vector<512x128xf32>
    %137 = tpu.matmul %134, %136, %cst_136 {dimension_numbers = #tpu.dot_dimension_numbers<[1], [0], [0], [1], [0, 0, 1, 1], [], []>} : vector<512x128xbf16>, vector<128x128xbf16>, vector<512x128xf32> -> vector<512x128xf32>
    %138 = arith.addf %131, %137 : vector<512x128xf32>
    %c0_137 = arith.constant 0 : index
    %c2_138 = arith.constant 2 : index
    %c0_139 = arith.constant 0 : index
    %c0_140 = arith.constant 0 : index
    %139 = vector.load %arg9[%c0_137, %c2_138, %c0_139, %c0_140] : memref<3x18x32x128xbf16, #tpu.memory_space<vmem>>, vector<1x16x32x128xbf16>
    %140 = vector.shape_cast %139 : vector<1x16x32x128xbf16> to vector<16x32x128xbf16>
    %141 = vector.shape_cast %140 : vector<16x32x128xbf16> to vector<512x128xbf16>
    %c6_141 = arith.constant 6 : index
    %c0_142 = arith.constant 0 : index
    %c0_143 = arith.constant 0 : index
    %142 = vector.load %arg5[%c6_141, %c0_142, %c0_143] : memref<9x128x128xbf16, #tpu.memory_space<vmem>>, vector<1x128x128xbf16>
    %143 = vector.shape_cast %142 : vector<1x128x128xbf16> to vector<128x128xbf16>
    %cst_144 = arith.constant dense<0.000000e+00> : vector<512x128xf32>
    %144 = tpu.matmul %141, %143, %cst_144 {dimension_numbers = #tpu.dot_dimension_numbers<[1], [0], [0], [1], [0, 0, 1, 1], [], []>} : vector<512x128xbf16>, vector<128x128xbf16>, vector<512x128xf32> -> vector<512x128xf32>
    %145 = arith.addf %138, %144 : vector<512x128xf32>
    %c1_145 = arith.constant 1 : index
    %c0_146 = arith.constant 0 : index
    %c0_147 = arith.constant 0 : index
    %c0_148 = arith.constant 0 : index
    %146 = vector.load %arg9[%c1_145, %c0_146, %c0_147, %c0_148] : memref<3x18x32x128xbf16, #tpu.memory_space<vmem>>, vector<1x16x32x128xbf16>
    %147 = vector.shape_cast %146 : vector<1x16x32x128xbf16> to vector<16x32x128xbf16>
    %148 = vector.shape_cast %147 : vector<16x32x128xbf16> to vector<512x128xbf16>
    %c1_149 = arith.constant 1 : index
    %c0_150 = arith.constant 0 : index
    %c0_151 = arith.constant 0 : index
    %149 = vector.load %arg5[%c1_149, %c0_150, %c0_151] : memref<9x128x128xbf16, #tpu.memory_space<vmem>>, vector<1x128x128xbf16>
    %150 = vector.shape_cast %149 : vector<1x128x128xbf16> to vector<128x128xbf16>
    %cst_152 = arith.constant dense<0.000000e+00> : vector<512x128xf32>
    %151 = tpu.matmul %148, %150, %cst_152 {dimension_numbers = #tpu.dot_dimension_numbers<[1], [0], [0], [1], [0, 0, 1, 1], [], []>} : vector<512x128xbf16>, vector<128x128xbf16>, vector<512x128xf32> -> vector<512x128xf32>
    %152 = arith.addf %145, %151 : vector<512x128xf32>
    %c1_153 = arith.constant 1 : index
    %c1_154 = arith.constant 1 : index
    %c0_155 = arith.constant 0 : index
    %c0_156 = arith.constant 0 : index
    %153 = vector.load %arg9[%c1_153, %c1_154, %c0_155, %c0_156] : memref<3x18x32x128xbf16, #tpu.memory_space<vmem>>, vector<1x16x32x128xbf16>
    %154 = vector.shape_cast %153 : vector<1x16x32x128xbf16> to vector<16x32x128xbf16>
    %155 = vector.shape_cast %154 : vector<16x32x128xbf16> to vector<512x128xbf16>
    %c4_157 = arith.constant 4 : index
    %c0_158 = arith.constant 0 : index
    %c0_159 = arith.constant 0 : index
    %156 = vector.load %arg5[%c4_157, %c0_158, %c0_159] : memref<9x128x128xbf16, #tpu.memory_space<vmem>>, vector<1x128x128xbf16>
    %157 = vector.shape_cast %156 : vector<1x128x128xbf16> to vector<128x128xbf16>
    %cst_160 = arith.constant dense<0.000000e+00> : vector<512x128xf32>
    %158 = tpu.matmul %155, %157, %cst_160 {dimension_numbers = #tpu.dot_dimension_numbers<[1], [0], [0], [1], [0, 0, 1, 1], [], []>} : vector<512x128xbf16>, vector<128x128xbf16>, vector<512x128xf32> -> vector<512x128xf32>
    %159 = arith.addf %152, %158 : vector<512x128xf32>
    %c1_161 = arith.constant 1 : index
    %c2_162 = arith.constant 2 : index
    %c0_163 = arith.constant 0 : index
    %c0_164 = arith.constant 0 : index
    %160 = vector.load %arg9[%c1_161, %c2_162, %c0_163, %c0_164] : memref<3x18x32x128xbf16, #tpu.memory_space<vmem>>, vector<1x16x32x128xbf16>
    %161 = vector.shape_cast %160 : vector<1x16x32x128xbf16> to vector<16x32x128xbf16>
    %162 = vector.shape_cast %161 : vector<16x32x128xbf16> to vector<512x128xbf16>
    %c7_165 = arith.constant 7 : index
    %c0_166 = arith.constant 0 : index
    %c0_167 = arith.constant 0 : index
    %163 = vector.load %arg5[%c7_165, %c0_166, %c0_167] : memref<9x128x128xbf16, #tpu.memory_space<vmem>>, vector<1x128x128xbf16>
    %164 = vector.shape_cast %163 : vector<1x128x128xbf16> to vector<128x128xbf16>
    %cst_168 = arith.constant dense<0.000000e+00> : vector<512x128xf32>
    %165 = tpu.matmul %162, %164, %cst_168 {dimension_numbers = #tpu.dot_dimension_numbers<[1], [0], [0], [1], [0, 0, 1, 1], [], []>} : vector<512x128xbf16>, vector<128x128xbf16>, vector<512x128xf32> -> vector<512x128xf32>
    %166 = arith.addf %159, %165 : vector<512x128xf32>
    %c2_169 = arith.constant 2 : index
    %c0_170 = arith.constant 0 : index
    %c0_171 = arith.constant 0 : index
    %c0_172 = arith.constant 0 : index
    %167 = vector.load %arg9[%c2_169, %c0_170, %c0_171, %c0_172] : memref<3x18x32x128xbf16, #tpu.memory_space<vmem>>, vector<1x16x32x128xbf16>
    %168 = vector.shape_cast %167 : vector<1x16x32x128xbf16> to vector<16x32x128xbf16>
    %169 = vector.shape_cast %168 : vector<16x32x128xbf16> to vector<512x128xbf16>
    %c2_173 = arith.constant 2 : index
    %c0_174 = arith.constant 0 : index
    %c0_175 = arith.constant 0 : index
    %170 = vector.load %arg5[%c2_173, %c0_174, %c0_175] : memref<9x128x128xbf16, #tpu.memory_space<vmem>>, vector<1x128x128xbf16>
    %171 = vector.shape_cast %170 : vector<1x128x128xbf16> to vector<128x128xbf16>
    %cst_176 = arith.constant dense<0.000000e+00> : vector<512x128xf32>
    %172 = tpu.matmul %169, %171, %cst_176 {dimension_numbers = #tpu.dot_dimension_numbers<[1], [0], [0], [1], [0, 0, 1, 1], [], []>} : vector<512x128xbf16>, vector<128x128xbf16>, vector<512x128xf32> -> vector<512x128xf32>
    %173 = arith.addf %166, %172 : vector<512x128xf32>
    %c2_177 = arith.constant 2 : index
    %c1_178 = arith.constant 1 : index
    %c0_179 = arith.constant 0 : index
    %c0_180 = arith.constant 0 : index
    %174 = vector.load %arg9[%c2_177, %c1_178, %c0_179, %c0_180] : memref<3x18x32x128xbf16, #tpu.memory_space<vmem>>, vector<1x16x32x128xbf16>
    %175 = vector.shape_cast %174 : vector<1x16x32x128xbf16> to vector<16x32x128xbf16>
    %176 = vector.shape_cast %175 : vector<16x32x128xbf16> to vector<512x128xbf16>
    %c5_181 = arith.constant 5 : index
    %c0_182 = arith.constant 0 : index
    %c0_183 = arith.constant 0 : index
    %177 = vector.load %arg5[%c5_181, %c0_182, %c0_183] : memref<9x128x128xbf16, #tpu.memory_space<vmem>>, vector<1x128x128xbf16>
    %178 = vector.shape_cast %177 : vector<1x128x128xbf16> to vector<128x128xbf16>
    %cst_184 = arith.constant dense<0.000000e+00> : vector<512x128xf32>
    %179 = tpu.matmul %176, %178, %cst_184 {dimension_numbers = #tpu.dot_dimension_numbers<[1], [0], [0], [1], [0, 0, 1, 1], [], []>} : vector<512x128xbf16>, vector<128x128xbf16>, vector<512x128xf32> -> vector<512x128xf32>
    %180 = arith.addf %173, %179 : vector<512x128xf32>
    %c2_185 = arith.constant 2 : index
    %c2_186 = arith.constant 2 : index
    %c0_187 = arith.constant 0 : index
    %c0_188 = arith.constant 0 : index
    %181 = vector.load %arg9[%c2_185, %c2_186, %c0_187, %c0_188] : memref<3x18x32x128xbf16, #tpu.memory_space<vmem>>, vector<1x16x32x128xbf16>
    %182 = vector.shape_cast %181 : vector<1x16x32x128xbf16> to vector<16x32x128xbf16>
    %183 = vector.shape_cast %182 : vector<16x32x128xbf16> to vector<512x128xbf16>
    %c8_189 = arith.constant 8 : index
    %c0_190 = arith.constant 0 : index
    %c0_191 = arith.constant 0 : index
    %184 = vector.load %arg5[%c8_189, %c0_190, %c0_191] : memref<9x128x128xbf16, #tpu.memory_space<vmem>>, vector<1x128x128xbf16>
    %185 = vector.shape_cast %184 : vector<1x128x128xbf16> to vector<128x128xbf16>
    %cst_192 = arith.constant dense<0.000000e+00> : vector<512x128xf32>
    %186 = tpu.matmul %183, %185, %cst_192 {dimension_numbers = #tpu.dot_dimension_numbers<[1], [0], [0], [1], [0, 0, 1, 1], [], []>} : vector<512x128xbf16>, vector<128x128xbf16>, vector<512x128xf32> -> vector<512x128xf32>
    %187 = arith.addf %180, %186 : vector<512x128xf32>
    %188 = vector.shape_cast %187 : vector<512x128xf32> to vector<16x2x16x128xf32>
    %cst_193 = arith.constant dense<0.000000e+00> : vector<2x16x128xf32>
    %189 = vector.multi_reduction <add>, %188, %cst_193 [0] : vector<16x2x16x128xf32> to vector<2x16x128xf32>
    %190 = vector.shape_cast %189 : vector<2x16x128xf32> to vector<1x2x16x128xf32>
    %cst_194 = arith.constant dense<0.000000e+00> : vector<1x2x128xf32>
    %191 = vector.multi_reduction <add>, %190, %cst_194 [2] : vector<1x2x16x128xf32> to vector<1x2x128xf32>
    %192 = vector.shape_cast %191 : vector<1x2x128xf32> to vector<1x2x1x128xf32>
    %193 = arith.mulf %188, %188 : vector<16x2x16x128xf32>
    %cst_195 = arith.constant dense<0.000000e+00> : vector<2x16x128xf32>
    %194 = vector.multi_reduction <add>, %193, %cst_195 [0] : vector<16x2x16x128xf32> to vector<2x16x128xf32>
    %195 = vector.shape_cast %194 : vector<2x16x128xf32> to vector<1x2x16x128xf32>
    %cst_196 = arith.constant dense<0.000000e+00> : vector<1x2x128xf32>
    %196 = vector.multi_reduction <add>, %195, %cst_196 [2] : vector<1x2x16x128xf32> to vector<1x2x128xf32>
    %197 = vector.shape_cast %196 : vector<1x2x128xf32> to vector<1x2x1x128xf32>
    %cst_197 = arith.constant 3.906250e-03 : f32
    %198 = vector.broadcast %cst_197 : f32 to vector<1x2x1x128xf32>
    %199 = arith.mulf %192, %198 : vector<1x2x1x128xf32>
    %cst_198 = arith.constant 2.560000e+02 : f32
    %200 = vector.broadcast %cst_198 : f32 to vector<1x2x1x128xf32>
    %201 = arith.mulf %200, %199 : vector<1x2x1x128xf32>
    %202 = arith.mulf %201, %199 : vector<1x2x1x128xf32>
    %203 = arith.subf %197, %202 : vector<1x2x1x128xf32>
    %cst_199 = arith.constant 0.000000e+00 : f32
    %204 = vector.broadcast %cst_199 : f32 to vector<1x2x1x128xf32>
    %205 = arith.maximumf %203, %204 : vector<1x2x1x128xf32>
    %cst_200 = arith.constant 0.00392156886 : f32
    %206 = vector.broadcast %cst_200 : f32 to vector<1x2x1x128xf32>
    %207 = arith.mulf %205, %206 : vector<1x2x1x128xf32>
    %cst_201 = arith.constant 9.99999974E-5 : f32
    %208 = vector.broadcast %cst_201 : f32 to vector<1x2x1x128xf32>
    %209 = arith.addf %207, %208 : vector<1x2x1x128xf32>
    %cst_202 = arith.constant 4.000000e+00 : f32
    %210 = vector.broadcast %cst_202 : f32 to vector<1x2x1x128xf32>
    %211 = arith.mulf %210, %209 : vector<1x2x1x128xf32>
    %212 = tpu.reciprocal %211 {approx = true} : vector<1x2x1x128xf32> -> vector<1x2x1x128xf32>
    %213 = arith.mulf %211, %212 : vector<1x2x1x128xf32>
    %cst_203 = arith.constant 2.000000e+00 : f32
    %214 = vector.broadcast %cst_203 : f32 to vector<1x2x1x128xf32>
    %215 = arith.subf %214, %213 : vector<1x2x1x128xf32>
    %216 = arith.mulf %212, %215 : vector<1x2x1x128xf32>
    %217 = vector.broadcast %199 : vector<1x2x1x128xf32> to vector<16x2x16x128xf32>
    %218 = arith.subf %188, %217 : vector<16x2x16x128xf32>
    %219 = arith.mulf %218, %218 : vector<16x2x16x128xf32>
    %220 = vector.broadcast %216 : vector<1x2x1x128xf32> to vector<16x2x16x128xf32>
    %221 = arith.mulf %219, %220 : vector<16x2x16x128xf32>
    %cst_204 = arith.constant 5.000000e-01 : f32
    %222 = vector.broadcast %cst_204 : f32 to vector<16x2x16x128xf32>
    %223 = arith.addf %221, %222 : vector<16x2x16x128xf32>
    %224 = arith.negf %223 : vector<16x2x16x128xf32>
    %225 = math.exp %224 : vector<16x2x16x128xf32>
    %cst_205 = arith.constant 1.000000e+00 : f32
    %226 = vector.broadcast %cst_205 : f32 to vector<16x2x16x128xf32>
    %227 = arith.addf %226, %225 : vector<16x2x16x128xf32>
    %228 = arith.divf %226, %227 : vector<16x2x16x128xf32>
    %229 = arith.mulf %188, %228 : vector<16x2x16x128xf32>
    %c0_206 = arith.constant 0 : index
    %c0_207 = arith.constant 0 : index
    %230 = vector.load %arg6[%c0_206, %c0_207] : memref<1x128xf32, #tpu.memory_space<vmem>>, vector<1x128xf32>
    %231 = vector.shape_cast %230 : vector<1x128xf32> to vector<1x1x1x128xf32>
    %232 = vector.broadcast %231 : vector<1x1x1x128xf32> to vector<16x2x16x128xf32>
    %233 = arith.mulf %229, %232 : vector<16x2x16x128xf32>
    %c0_208 = arith.constant 0 : index
    %c0_209 = arith.constant 0 : index
    %234 = vector.load %arg7[%c0_208, %c0_209] : memref<1x128xf32, #tpu.memory_space<vmem>>, vector<1x128xf32>
    %235 = vector.shape_cast %234 : vector<1x128xf32> to vector<1x1x1x128xf32>
    %236 = vector.broadcast %235 : vector<1x1x1x128xf32> to vector<16x2x16x128xf32>
    %237 = arith.addf %233, %236 : vector<16x2x16x128xf32>
    %238 = arith.extf %19 : vector<16x2x16x128xbf16> to vector<16x2x16x128xf32>
    %239 = arith.addf %237, %238 : vector<16x2x16x128xf32>
    %cst_210 = arith.constant 0.000000e+00 : f32
    %240 = vector.broadcast %cst_210 : f32 to vector<16x2x16x128xf32>
    %241 = arith.maximumf %239, %240 : vector<16x2x16x128xf32>
    %242 = arith.truncf %241 : vector<16x2x16x128xf32> to vector<16x2x16x128xbf16>
    %c0_211 = arith.constant 0 : index
    %c0_212 = arith.constant 0 : index
    %c0_213 = arith.constant 0 : index
    %c0_214 = arith.constant 0 : index
    %243 = vector.load %arg8[%c0_211, %c0_212, %c0_213, %c0_214] : memref<16x2x16x128xbf16, #tpu.memory_space<vmem>>, vector<16x2x16x128xbf16>
    tpu.vector_store %arg8[%c0_211, %c0_212, %c0_213, %c0_214], %242 {strides = array<i32>} : memref<16x2x16x128xbf16, #tpu.memory_space<vmem>>, vector<16x2x16x128xbf16>,
    return
  }
  func.func @transform_0(%arg0: i32) -> (i32, i32, i32, i32) {
    %c0_i32 = arith.constant 0 : i32
    %c0_i32_0 = arith.constant 0 : i32
    %c0_i32_1 = arith.constant 0 : i32
    %c0_i32_2 = arith.constant 0 : i32
    return %c0_i32, %arg0, %c0_i32_0, %c0_i32_1 : i32, i32, i32, i32
  }
  func.func @transform_1(%arg0: i32) -> (i32, i32, i32) {
    %c0_i32 = arith.constant 0 : i32
    %c0_i32_0 = arith.constant 0 : i32
    %c0_i32_1 = arith.constant 0 : i32
    %c0_i32_2 = arith.constant 0 : i32
    return %c0_i32, %c0_i32_0, %c0_i32_1 : i32, i32, i32
  }
  func.func @transform_2(%arg0: i32) -> (i32, i32) {
    %c0_i32 = arith.constant 0 : i32
    %c0_i32_0 = arith.constant 0 : i32
    %c0_i32_1 = arith.constant 0 : i32
    return %c0_i32, %c0_i32_0 : i32, i32
  }
  func.func @transform_3(%arg0: i32) -> (i32, i32) {
    %c0_i32 = arith.constant 0 : i32
    %c0_i32_0 = arith.constant 0 : i32
    %c0_i32_1 = arith.constant 0 : i32
    return %c0_i32, %c0_i32_0 : i32, i32
  }
  func.func @transform_4(%arg0: i32) -> (i32, i32, i32) {
    %c0_i32 = arith.constant 0 : i32
    %c0_i32_0 = arith.constant 0 : i32
    %c0_i32_1 = arith.constant 0 : i32
    %c0_i32_2 = arith.constant 0 : i32
    return %c0_i32, %c0_i32_0, %c0_i32_1 : i32, i32, i32
  }
  func.func @transform_5(%arg0: i32) -> (i32, i32) {
    %c0_i32 = arith.constant 0 : i32
    %c0_i32_0 = arith.constant 0 : i32
    %c0_i32_1 = arith.constant 0 : i32
    return %c0_i32, %c0_i32_0 : i32, i32
  }
  func.func @transform_6(%arg0: i32) -> (i32, i32) {
    %c0_i32 = arith.constant 0 : i32
    %c0_i32_0 = arith.constant 0 : i32
    %c0_i32_1 = arith.constant 0 : i32
    return %c0_i32, %c0_i32_0 : i32, i32
  }
  func.func @transform_7(%arg0: i32) -> (i32, i32, i32, i32) {
    %c0_i32 = arith.constant 0 : i32
    %c0_i32_0 = arith.constant 0 : i32
    %c0_i32_1 = arith.constant 0 : i32
    %c0_i32_2 = arith.constant 0 : i32
    return %c0_i32, %arg0, %c0_i32_0, %c0_i32_1 : i32, i32, i32, i32
  }
}

</mosaic_0001>

<bundles_post_ra>
// kernel: tpu_custom_call.1
= control target key start
LH: loop header
LB: loop body
LE: loop exit
PB: predicated region body
PF: predicated region fallthrough
CT: control target
= control target key end

     0   :  { %12 = vsyncpa [#allocation4], 0  ;;  %s19513_s0 = inlined_call_operand.hbm [shape: bf16[16,2,16,128], index: 0, kind: input, shape index: {}]   ;;  %s19514_s1 = inlined_call_operand.hbm [shape: bf16[9,128,128], index: 1, kind: input, shape index: {}]   ;;  %s19515_s2 = inlined_call_operand.vmem [shape: f32[1,128], index: 2, kind: input, shape index: {}]   ;;  %s19516_s3 = inlined_call_operand.vmem [shape: f32[1,128], index: 3, kind: input, shape index: {}]   ;;  %s19517_s4 = inlined_call_operand.hbm [shape: bf16[9,128,128], index: 4, kind: input, shape index: {}]   ;;  %s19518_s5 = inlined_call_operand.vmem [shape: f32[1,128], index: 5, kind: input, shape index: {}]   ;;  %s19519_s6 = inlined_call_operand.vmem [shape: f32[1,128], index: 6, kind: input, shape index: {}]   ;;  %s19520_s7 = inlined_call_operand.hbm [shape: bf16[16,2,16,128], index: 7, kind: output, shape index: {}]  }
   0x1   :  { %13 = vsyncpa [#allocation7], 0 }
   0x2   :  { %14 = vsyncpa [#allocation5], 0  ;;  %s15422_s24 = smov [#allocation6]   ;;  %s15423_s26 = smov [#allocation3]  }
   0x3   :  { %s32_s25 = sshll.u32 %s15422_s24, 4  ;;  %s20_s27 = sshll.u32 %s15423_s26, 4  ;;  %s33_s25 = int_to_ptr.vmem [resolvable:$true] %s32_s25  ;;  %s15469_s27 = int_to_ptr.vmem [resolvable:$true] %s20_s27 }
   0x4   :  { %s15328_s30 = scalar_lea.hbm %s19514_s1, 9216 }
   0x5   :  { %p15329_p0 = scmp.ne.s32.totalorder %s19514_s1, %s15328_s30  ;;  %p15332_p1 = scmp.lt.u32.totalorder %s15328_s30, %s19514_s1 }
   0x7   :  { %p15334_p2 = pnand %p15332_p1, %p15329_p0 }
   0x9   :  { %15337 = shalt.err (!%p15334_p2)
}
   0xa   :  { %s15338_s12 = scalar_lea.vmem %s33_s25, 9216  ;;  %p15343_p4 = scmp.lt.s32.totalorder %s33_s25, %s33_s25 }
   0xb   :  { %p15339_p3 = scmp.ne.s32.totalorder %s33_s25, %s15338_s12  ;;  %p15344_p5 = scmp.lt.s32.totalorder %s15338_s12, %s15338_s12 }
   0xd   :  { %p15345_p6 = por %p15344_p5, %p15343_p4 }
   0xf   :  { %p15346_p7 = pnand %p15345_p6, %p15339_p3 }
  0x11   :  { %15349 = shalt.err (!%p15346_p7)
}
  0x12   :  { %s15424_s13 = smov 64   ;;  %s15425_s14 = smov 4  }
  0x13   :  { %38 = dma.hbm_to_vmem [thread:$0]  %s19514_s1, 9216, %s33_s25, [#allocation7], %s15424_s13, %s15424_s13, %s15425_s14  }
  0x14   :  { %s15350_s19 = scalar_lea.hbm %s19513_s0, 4096 }
  0x15   :  { %p15351_p8 = scmp.ne.s32.totalorder %s19513_s0, %s15350_s19  ;;  %p15354_p9 = scmp.lt.u32.totalorder %s15350_s19, %s19513_s0 }
  0x17   :  { %p15356_p10 = pnand %p15354_p9, %p15351_p8 }
  0x19   :  { %15359 = shalt.err (!%p15356_p10)
}
  0x1a   :  { %s15360_s24 = scalar_lea.vmem %s15469_s27, 4096  ;;  %p15365_p12 = scmp.lt.s32.totalorder %s15469_s27, %s15469_s27 }
  0x1b   :  { %p15361_p11 = scmp.ne.s32.totalorder %s15469_s27, %s15360_s24  ;;  %p15366_p13 = scmp.lt.s32.totalorder %s15360_s24, %s15360_s24 }
  0x1d   :  { %p15367_p0 = por %p15366_p13, %p15365_p12 }
  0x1f   :  { %p15368_p1 = pnand %p15367_p0, %p15361_p11 }
  0x21   :  { %15371 = shalt.err (!%p15368_p1)
}
  0x22   :  { %26 = dma.hbm_to_vmem [thread:$0]  %s19513_s0, 4096, %s15469_s27, [#allocation4], %s15424_s13, %s15424_s13, %s15425_s14  }
  0x23   :  { %s15426_s26 = smov [#allocation8]   ;;  %s15372_s8 = scalar_lea.hbm %s19517_s4, 9216 }
  0x24   :  { %s48_s28 = sshll.u32 %s15426_s26, 4  ;;  %p15373_p2 = scmp.ne.s32.totalorder %s19517_s4, %s15372_s8  ;;  %s49_s28 = int_to_ptr.vmem [resolvable:$true] %s48_s28 }
  0x25   :  { %p15376_p3 = scmp.lt.u32.totalorder %s15372_s8, %s19517_s4 }
  0x27   :  { %p15378_p4 = pnand %p15376_p3, %p15373_p2 }
  0x29   :  { %15381 = shalt.err (!%p15378_p4)
}
  0x2a   :  { %s15382_s15 = scalar_lea.vmem %s49_s28, 9216  ;;  %p15387_p6 = scmp.lt.s32.totalorder %s49_s28, %s49_s28 }
  0x2b   :  { %p15383_p5 = scmp.ne.s32.totalorder %s49_s28, %s15382_s15  ;;  %p15388_p7 = scmp.lt.s32.totalorder %s15382_s15, %s15382_s15 }
  0x2d   :  { %p15389_p8 = por %p15388_p7, %p15387_p6 }
  0x2f   :  { %p15390_p9 = pnand %p15389_p8, %p15383_p5 }
  0x31   :  { %15393 = shalt.err (!%p15390_p9)
}
  0x32   :  { %54 = dma.hbm_to_vmem [thread:$0]  %s19517_s4, 9216, %s49_s28, [#allocation7], %s15424_s13, %s15424_s13, %s15425_s14  }
  0x33   :  { %15416 = dma.done.wait [#allocation4], 4096  }
  0x34   :  { %15417 = vsyncadd [#allocation4], 4294963200 }
  0x35   :  { %15418 = dma.done.wait [#allocation7], 18432  }
  0x36   :  { %15419 = vsyncadd [#allocation7], 4294948864  ;;  %v14824_v0 = vld [vmem:[#allocation6 + $0xc0] sm:$0xff]   ;;  %v14825_v1 = vld [vmem:[#allocation6 + $0xc8] sm:$0xff]   ;;  %vm566_vm0 = vcmask 1040384   ;;  %vm697_vm3 = vcmask 1047552  }
  0x37   :  { %12353 = vmatprep.subr.bf16.mxu0 %v14824_v0  ;;  %v14826_v2 = vld [vmem:[#allocation6 + $0xd0] sm:$0xff]   ;;  %v14827_v3 = vld [vmem:[#allocation6 + $0xd8] sm:$0xff]   ;;  %v15521_v4 = vld [vmem:[#allocation3] sm:$0xff]   ;;  %vm567_vm1 = vsmask.f32 256 }
  0x38   :  { %12354 = vmatpush3.bf16.msra.mxu0 %v14824_v0  ;;  %v19554_v5 = vshrl.u32 %v15521_v4, 16  ;;  %v19558_v6 = vshll.u32 %v15521_v4, 16  ;;  %v15525_v7 = vld [vmem:[#allocation3 + $0x8] sm:$0xff]   ;;  %v15527_v8 = vld [vmem:[#allocation3 + $0x10] sm:$0xff]   ;;  %v14828_v9 = vld [vmem:[#allocation6 + $0xe0] sm:$0xff]  }
  0x39   :  { %12355 = vmatprep.subr.bf16.mxu0 %v14825_v1  ;;  %v15529_v10 = vld [vmem:[#allocation3 + $0x18] sm:$0xff]   ;;  %v15533_v12 = vld [vmem:[#allocation3 + $0x20] sm:$0xff]   ;;  %v15535_v13 = vld [vmem:[#allocation3 + $0x28] sm:$0xff]   ;;  %v19547_v21 = vshrl.u32 %v15525_v7, 16  ;;  %v19546_v22 = vshrl.u32 %v15527_v8, 16  ;;  %v19553_v29 = vshll.u32 %v15525_v7, 16 }
  0x3a   :  { %v313_v11 = vrot.slane %v19554_v5, 7  ;;  %vm15537_vm2 = vmand %vm566_vm0, %vm567_vm1  ;;  %v15541_v15 = vld [vmem:[#allocation3 + $0x30] sm:$0xff]   ;;  %v14829_v17 = vld [vmem:[#allocation6 + $0xe8] sm:$0xff]   ;;  %v19540_v26 = vshrl.u32 %v15529_v10, 16  ;;  %v19539_v27 = vshrl.u32 %v15533_v12, 16  ;;  %v19534_v28 = vshrl.u32 %v15535_v13, 16 }
  0x3b   :  { %v15545_v18 = vld [vmem:[#allocation3 + $0x38] sm:$0xff]   ;;  %v15547_v19 = vld [vmem:[#allocation3 + $0x40] sm:$0xff]   ;;  %v15556_v23 = vld [vmem:[#allocation3 + $0x48] sm:$0xff]   ;;  %v19531_v30 = vshrl.u32 %v15541_v15, 16  ;;  %v320_v32 = vrot.slane %v19547_v21, 7  ;;  %v327_v33 = vrot.slane %v19546_v22, 7 }
  0x3c   :  { %12356 = vmatpush3.bf16.msra.mxu0 %v14825_v1  ;;  %v316_v16 = vor.u32 %v19558_v6, %v313_v11  ;;  %v15558_v24 = vld [vmem:[#allocation3 + $0x50] sm:$0xff]   ;;  %v15565_v31 = vld [vmem:[#allocation3 + $0x58] sm:$0xff]   ;;  %v19551_v34 = vshll.u32 %v15527_v8, 16  ;;  %v19528_v35 = vshrl.u32 %v15545_v18, 16  ;;  %v334_v36 = vrot.slane %v19540_v26, 7  ;;  %v15588_v48 = vld [vmem:[#allocation3 + $0x60] sm:$0xff]  }
  0x3d   :  { %12357 = vmatprep.subr.bf16.mxu0 %v14826_v2  ;;  %v14830_v25 = vld [vmem:[#allocation6 + $0xf0] sm:$0xff]   ;;  %v19542_v37 = vshll.u32 %v15529_v10, 16  ;;  %v19541_v38 = vshll.u32 %v15533_v12, 16  ;;  %v19526_v39 = vshrl.u32 %v15547_v19, 16  ;;  %v14831_v40 = vld [vmem:[#allocation6 + $0xf8] sm:$0xff]   ;;  %v341_v41 = vrot.slane %v19539_v27, 7 }
  0x3e   :  { %v15551_v20 = vsel %vm15537_vm2, 0, %v316_v16  ;;  %v348_v42 = vrot.slane %v19534_v28, 7  ;;  %v19537_v43 = vshll.u32 %v15535_v13, 16  ;;  %v355_v44 = vrot.slane %v19531_v30, 7  ;;  %v15601_v56 = vld [vmem:[#allocation3 + $0x68] sm:$0xff]   ;;  %v14834_v57 = vld [vmem:[#allocation6] sm:$0xff]  }
  0x3f   :  { %12369 = vmatprep.mubr.bf16.mxu0 %v15551_v20  ;;  %v19535_v45 = vshll.u32 %v15541_v15, 16  ;;  %v19523_v46 = vshrl.u32 %v15556_v23, 16  ;;  %v19522_v47 = vshrl.u32 %v15558_v24, 16  ;;  %v323_v49 = vor.u32 %v19553_v29, %v320_v32  ;;  %v15610_v62 = vld [vmem:[#allocation3 + $0x70] sm:$0xff]   ;;  %v15740_v21 = vld [vmem:[#allocation3 + $0xc8] sm:$0xff]   ;;  %v14948_v14 = vld [vmem:[#allocation8 + $0x1a0] sm:$0xff]  }
  0x40   :  { %12358 = vmatpush3.bf16.msra.mxu0 %v14826_v2  ;;  %v362_v50 = vrot.slane %v19528_v35, 7  ;;  %v19530_v51 = vshll.u32 %v15545_v18, 16  ;;  %v330_v52 = vor.u32 %v19551_v34, %v327_v33  ;;  %v369_v53 = vrot.slane %v19526_v39, 7  ;;  %v15617_v2 = vld [vmem:[#allocation3 + $0x78] sm:$0xff]   ;;  %v15706_v30 = vld [vmem:[#allocation3 + $0xb0] sm:$0xff]   ;;  %19810 = vst [vmem:[#allocation20_spill] sm:$0xff] %v15740_v21 }
  0x41   :  { %12359 = vmatprep.subr.bf16.mxu0 %v14827_v3  ;;  %v19529_v54 = vshll.u32 %v15547_v19, 16  ;;  %v19521_v55 = vshrl.u32 %v15565_v31, 16  ;;  %v337_v58 = vor.u32 %v19542_v37, %v334_v36  ;;  %v344_v59 = vor.u32 %v19541_v38, %v341_v41  ;;  %v15644_v41 = vld [vmem:[#allocation3 + $0x80] sm:$0xff]   ;;  %v14849_v35 = vld [vmem:[#allocation6 + $0x18] sm:$0xff]   ;;  %19807 = vst [vmem:[#allocation17_spill] sm:$0xff] %v15706_v30  ;;  %v14859_v34 = vld [vmem:[#allocation6 + $0x28] sm:$0xff]  }
  0x42   :  { %v351_v60 = vor.u32 %v19537_v43, %v348_v42  ;;  %v19525_v61 = vshll.u32 %v15556_v23, 16  ;;  %v376_v63 = vrot.slane %v19523_v46, 7  ;;  %v383_v0 = vrot.slane %v19522_v47, 7  ;;  %v15672_v47 = vld [vmem:[#allocation3 + $0xa0] sm:$0xff]   ;;  %v15777_v29 = vld [vmem:[#allocation3 + $0xd0] sm:$0xff]  }
  0x43   :  { %v19524_v1 = vshll.u32 %v15558_v24, 16  ;;  %v358_v11 = vor.u32 %v19535_v45, %v355_v44  ;;  %v365_v16 = vor.u32 %v19530_v51, %v362_v50  ;;  %v19527_v32 = vshll.u32 %v15565_v31, 16  ;;  %19805 = vst [vmem:[#allocation15_spill] sm:$0xff] %v15672_v47  ;;  %v15713_v45 = vld [vmem:[#allocation3 + $0xb8] sm:$0xff]   ;;  %v14854_v38 = vld [vmem:[#allocation6 + $0x20] sm:$0xff]   ;;  %19811 = vst [vmem:[#allocation21_spill] sm:$0xff] %v15777_v29 }
  0x44   :  { %12360 = vmatpush3.bf16.msra.mxu0 %v14827_v3  ;;  %v15621_v3 = vsel %vm15537_vm2, 0, %v323_v49  ;;  %v15634_v33 = vsel %vm15537_vm2, 0, %v330_v52  ;;  %v15638_v36 = vsel %vm15537_vm2, 0, %v337_v58  ;;  %v15648_v42 = vsel %vm15537_vm2, 0, %v351_v60  ;;  %v15655_v52 = vld [vmem:[#allocation3 + $0x88] sm:$0xff]   ;;  %v14844_v60 = vld [vmem:[#allocation6 + $0x10] sm:$0xff]  }
  0x45   :  { %12361 = vmatprep.subr.bf16.mxu0 %v14828_v9  ;;  %v379_v44 = vor.u32 %v19525_v61, %v376_v63  ;;  %v386_v49 = vor.u32 %v19524_v1, %v383_v0  ;;  %v19532_v50 = vshrl.u32 %v15588_v48, 16  ;;  %v15662_v58 = vsel %vm15537_vm2, 0, %v358_v11  ;;  %v15683_v61 = vld [vmem:[#allocation3 + $0xa8] sm:$0xff]   ;;  %19808 = vst [vmem:[#allocation18_spill] sm:$0xff] %v15713_v45 }
  0x46   :  { %v19544_v63 = vshll.u32 %v15588_v48, 16  ;;  %v19533_v0 = vshrl.u32 %v15601_v56, 16  ;;  %v19536_v46 = vshrl.u32 %v15610_v62, 16  ;;  %v19538_v1 = vshrl.u32 %v15617_v2, 16  ;;  %19806 = vst [vmem:[#allocation16_spill] sm:$0xff] %v15683_v61 }
  0x47   :  { %v15687_v39 = vsel %vm15537_vm2, 0, %v379_v44  ;;  %v19550_v51 = vshll.u32 %v15617_v2, 16  ;;  %v19549_v28 = vshrl.u32 %v15655_v52, 16  ;;  %v19559_v26 = vshll.u32 %v15644_v41, 16 }
  0x48   :  { %12362 = vmatpush3.bf16.msra.mxu0 %v14828_v9  ;;  %v14839_v9 = vld [vmem:[#allocation6 + $0x8] sm:$0xff]   ;;  %v19557_v37 = vshrl.u32 %v15683_v61, 16  ;;  %vm698_vm4 = vsmask.f32 7424 }
  0x49   :  { %12363 = vmatprep.subr.bf16.mxu0 %v14829_v17  ;;  %vm16110_vm5 = vmand %vm697_vm3, %vm698_vm4 }
  0x4c   :  { %12364 = vmatpush3.bf16.msra.mxu0 %v14829_v17  ;;  %v372_v17 = vor.u32 %v19529_v54, %v369_v53  ;;  %v15657_v53 = vld [vmem:[#allocation3 + $0x90] sm:$0xff]   ;;  %v19545_v54 = vshll.u32 %v15610_v62, 16 }
  0x4d   :  { %12365 = vmatprep.subr.bf16.mxu0 %v14830_v25  ;;  %19803 = vst [vmem:[#allocation13_spill] sm:$0xff] %v15657_v53 }
  0x4e   :  { %v15677_v11 = vsel %vm15537_vm2, 0, %v372_v17  ;;  %v397_v17 = vrot.slane %v19532_v50, 7  ;;  %v418_v50 = vrot.slane %v19538_v1, 7  ;;  %v19556_v1 = vshrl.u32 %v15672_v47, 16 }
  0x50   :  { %12366 = vmatpush3.bf16.msra.mxu0 %v14830_v25  ;;  %v390_v25 = vrot.slane %v19521_v55, 7  ;;  %v15670_v55 = vld [vmem:[#allocation3 + $0x98] sm:$0xff]  }
  0x51   :  { %12367 = vmatprep.subr.bf16.mxu0 %v14831_v40  ;;  %19804 = vst [vmem:[#allocation14_spill] sm:$0xff] %v15670_v55  ;;  %v19555_v43 = vshrl.u32 %v15670_v55, 16  ;;  %v19562_v22 = vshll.u32 %v15670_v55, 16  ;;  %v15830_v55 = vld [vmem:[#allocation3 + $0xe0] sm:$0xff]  }
  0x54   :  { %12368 = vmatpush3.bf16.msra.mxu0 %v14831_v40  ;;  %v15642_v40 = vsel %vm15537_vm2, 0, %v344_v59  ;;  %v15666_v59 = vsel %vm15537_vm2, 0, %v365_v16  ;;  %v393_v16 = vor.u32 %v19527_v32, %v390_v25  ;;  %v19543_v25 = vshll.u32 %v15601_v56, 16 }
  0x55   :  { %12433 = vmatprep.subr.bf16.mxu0 %v14834_v57  ;;  %v404_v32 = vrot.slane %v19533_v0, 7  ;;  %v19548_v0 = vshrl.u32 %v15644_v41, 16 }
  0x56   :  { %v15701_v44 = vsel %vm15537_vm2, 0, %v393_v16  ;;  %v400_v16 = vor.u32 %v19544_v63, %v397_v17  ;;  %v421_v17 = vor.u32 %v19550_v51, %v418_v50  ;;  %v15734_v63 = vld [vmem:[#allocation3 + $0xc0] sm:$0xff]   ;;  %v446_v50 = vrot.slane %v19555_v43, 7 }
  0x57   :  { %12370 = vmatmul.mubr.bf16.vlgmr.msra.gmra.mrb[0].mxu0 %v15621_v3  ;;  %19809 = vst [vmem:[#allocation19_spill] sm:$0xff] %v15734_v63  ;;  %v19563_v51 = vshll.u32 %v15683_v61, 16 }
  0x58   :  { %12434 = vmatpush3.bf16.msra.mxu0 %v14834_v57  ;;  %12373 = vmatprep.mubr.bf16.mxu0 %v15634_v33  ;;  %v15691_v57 = vsel %vm15537_vm2, 0, %v386_v49  ;;  %v411_v49 = vrot.slane %v19536_v46, 7  ;;  %v407_v46 = vor.u32 %v19543_v25, %v404_v32  ;;  %v425_v32 = vrot.slane %v19548_v0, 7 }
  0x59   :  { %12435 = vmatprep.subr.bf16.mxu0 %v14839_v9  ;;  %v432_v25 = vrot.slane %v19549_v28, 7  ;;  %v453_v0 = vrot.slane %v19556_v1, 7  ;;  %v19564_v28 = vshll.u32 %v15672_v47, 16  ;;  %v15753_v5 = vsel %vm15537_vm2, 0, %v400_v16 }
  0x5a   :  { %v414_v27 = vor.u32 %v19545_v54, %v411_v49  ;;  %v19561_v54 = vshll.u32 %v15657_v53, 16  ;;  %v15757_v43 = vsel %vm15537_vm2, 0, %v407_v46  ;;  %v15769_v16 = vsel %vm15537_vm2, 0, %v421_v17 }
  0x5b   :  { %v19814_v47 = vshll.u32 %v15713_v45, 16 }
  0x5c   :  { %12436 = vmatpush3.bf16.msra.mxu0 %v14839_v9  ;;  %v19552_v9 = vshrl.u32 %v15657_v53, 16  ;;  %v15761_v1 = vsel %vm15537_vm2, 0, %v414_v27  ;;  %v449_v27 = vor.u32 %v19562_v22, %v446_v50  ;;  %v19573_v50 = vshrl.u32 %v15734_v63, 16 }
  0x5d   :  { %12437 = vmatprep.subr.bf16.mxu0 %v14844_v60  ;;  %v19572_v22 = vshrl.u32 %v15740_v21, 16 }
  0x5e   :  { %v439_v49 = vrot.slane %v19552_v9, 7  ;;  %v460_v9 = vrot.slane %v19557_v37, 7  ;;  %v19565_v37 = vshrl.u32 %v15713_v45, 16 }
  0x5f   :  { %12374 = vmatmul.mubr.bf16.gmra.mrb[4].mxu0 %v15638_v36  ;;  %v488_v61 = vrot.slane %v19572_v22, 7 }
  0x60   :  { %12377 = vmatprep.mubr.bf16.mxu0 %v15642_v40  ;;  %12438 = vmatpush3.bf16.msra.mxu0 %v14844_v60  ;;  %v19560_v60 = vshll.u32 %v15655_v52, 16  ;;  %v442_v6 = vor.u32 %v19561_v54, %v439_v49  ;;  %v463_v17 = vor.u32 %v19563_v51, %v460_v9  ;;  %v14864_v49 = vld [vmem:[#allocation6 + $0x30] sm:$0xff]   ;;  %v15787_v54 = vld [vmem:[#allocation3 + $0xd8] sm:$0xff]  }
  0x61   :  { %12439 = vmatprep.subr.bf16.mxu0 %v14849_v35  ;;  %19813 = vst [vmem:[#allocation22_spill] sm:$0xff] %v15787_v54 }
  0x62   :  { %v435_v46 = vor.u32 %v19560_v60, %v432_v25  ;;  %v19574_v60 = vshll.u32 %v15706_v30, 16  ;;  %v15804_v51 = vsel %vm15537_vm2, 0, %v442_v6 }
  0x64   :  { %12440 = vmatpush3.bf16.msra.mxu0 %v14849_v35  ;;  %v428_v35 = vor.u32 %v19559_v26, %v425_v32  ;;  %v456_v32 = vor.u32 %v19564_v28, %v453_v0  ;;  %v19812_v26 = vshrl.u32 %v15706_v30, 16  ;;  %v15808_v28 = vsel %vm15537_vm2, 0, %v449_v27 }
  0x65   :  { %12441 = vmatprep.subr.bf16.mxu0 %v14854_v38  ;;  %v19577_v0 = vshll.u32 %v15740_v21, 16  ;;  %v481_v27 = vrot.slane %v19573_v50, 7  ;;  %v19576_v50 = vshrl.u32 %v15787_v54, 16 }
  0x66   :  { %v467_v25 = vrot.slane %v19812_v26, 7  ;;  %v15796_v9 = vsel %vm15537_vm2, 0, %v428_v35  ;;  %v15800_v26 = vsel %vm15537_vm2, 0, %v435_v46  ;;  %v15816_v35 = vsel %vm15537_vm2, 0, %v463_v17 }
  0x67   :  { %12378 = vmatmul.mubr.bf16.gmra.mrb[8].mxu0 %v15648_v42  ;;  %v19578_v46 = vshll.u32 %v15777_v29, 16 }
  0x68   :  { %12381 = vmatprep.mubr.bf16.mxu0 %v15662_v58  ;;  %12442 = vmatpush3.bf16.msra.mxu0 %v14854_v38  ;;  %v474_v38 = vrot.slane %v19565_v37, 7  ;;  %v15812_v37 = vsel %vm15537_vm2, 0, %v456_v32  ;;  %v470_v6 = vor.u32 %v19574_v60, %v467_v25  ;;  %v14869_v32 = vld [vmem:[#allocation6 + $0x38] sm:$0xff]   ;;  %v15833_v25 = vld [vmem:[#allocation6 + $0x180] sm:$0xff]  }
  0x69   :  { %12443 = vmatprep.subr.bf16.mxu0 %v14859_v34 }
  0x6a   :  { %v477_v17 = vor.u32 %v19814_v47, %v474_v38  ;;  %v15838_v22 = vsel %vm15537_vm2, 0, %v470_v6  ;;  %v19579_v6 = vshrl.u32 %v15830_v55, 16 }
  0x6c   :  { %12444 = vmatpush3.bf16.msra.mxu0 %v14859_v34  ;;  %v19575_v34 = vshrl.u32 %v15777_v29, 16  ;;  %v15843_v47 = vsel %vm15537_vm2, 0, %v477_v17  ;;  %v19815_v17 = vshll.u32 %v15734_v63, 16  ;;  %v19817_v29 = vshll.u32 %v15830_v55, 16 }
  0x6d   :  { %12445 = vmatprep.subr.bf16.mxu0 %v14864_v49 }
  0x6e   :  { %v495_v38 = vrot.slane %v19575_v34, 7  ;;  %v484_v60 = vor.u32 %v19815_v17, %v481_v27 }
  0x6f   :  { %12382 = vmatmul.mubr.bf16.gmra.mrb[12].mxu0 %v15666_v59 }
  0x70   :  { %12385 = vmatprep.mubr.bf16.mxu0 %v15677_v11  ;;  %12446 = vmatpush3.bf16.msra.mxu0 %v14864_v49  ;;  %v15861_v34 = vsel %vm15537_vm2, 0, %v484_v60  ;;  %v498_v60 = vor.u32 %v19578_v46, %v495_v38  ;;  %v15896_v46 = vld [vmem:[#allocation3 + $0xf8] sm:$0xff]  }
  0x71   :  { %12447 = vmatprep.subr.bf16.mxu0 %v14869_v32 }
  0x72   :  { %v15882_v17 = vsel %vm15537_vm2, 0, %v498_v60 }
  0x74   :  { %12448 = vmatpush3.bf16.msra.mxu0 %v14869_v32  ;;  %v491_v32 = vor.u32 %v19577_v0, %v488_v61  ;;  %v502_v61 = vrot.slane %v19576_v50, 7  ;;  %v15887_v50 = vld [vmem:[#allocation3 + $0xe8] sm:$0xff]   ;;  %v15889_v0 = vld [vmem:[#allocation3 + $0xf0] sm:$0xff]  }
  0x75   :  { %12513 = vmatprep.subr.bf16.mxu0 %v15833_v25  ;;  %v19594_v38 = vshrl.u32 %v15887_v50, 16  ;;  %v517_v30 = vshll.u32 %v15887_v50, 16  ;;  %v19818_v53 = vshrl.u32 %v15889_v0, 16 }
  0x76   :  { %v15865_v49 = vsel %vm15537_vm2, 0, %v491_v32  ;;  %v509_v32 = vrot.slane %v19579_v6, 7  ;;  %v19816_v6 = vshll.u32 %v15787_v54, 16 }
  0x77   :  { %12386 = vmatmul.mubr.bf16.gmra.mrb[16].mxu0 %v15687_v39  ;;  %v516_v45 = vrot.slane %v19594_v38, 7  ;;  %v523_v54 = vrot.slane %v19818_v53, 7 }
  0x78   :  { %12389 = vmatprep.mubr.bf16.mxu0 %v15691_v57  ;;  %v505_v27 = vor.u32 %v19816_v6, %v502_v61  ;;  %v512_v21 = vor.u32 %v19817_v29, %v509_v32  ;;  %v524_v6 = vshll.u32 %v15889_v0, 16  ;;  %v19595_v61 = vshrl.u32 %v15896_v46, 16 }
  0x79   :  { %v519_v29 = vor.u32 %v517_v30, %v516_v45  ;;  %v19596_v32 = vshll.u32 %v15896_v46, 16 }
  0x7a   :  { %v15905_v63 = vsel %vm15537_vm2, 0, %v505_v27  ;;  %v15912_v60 = vsel %vm15537_vm2, 0, %v512_v21  ;;  %v526_v27 = vor.u32 %v524_v6, %v523_v54  ;;  %v530_v53 = vrot.slane %v19595_v61, 7  ;;  %v14873_v61 = vld [vmem:[#allocation6 + $0x188] sm:$0xff]  }
  0x7b   :  { %v15926_v21 = vsel %vm15537_vm2, 0, %v519_v29  ;;  %v19597_v29 = vmov 0  }
  0x7c   :  { %v15933_v38 = vsel %vm15537_vm2, 0, %v526_v27  ;;  %v533_v45 = vor.u32 %v19596_v32, %v530_v53  ;;  %v14874_v27 = vld [vmem:[#allocation6 + $0x190] sm:$0xff]   ;;  %v14875_v53 = vld [vmem:[#allocation6 + $0x198] sm:$0xff]   ;;  %v14877_v32 = vld [vmem:[#allocation6 + $0x1a8] sm:$0xff]  }
  0x7e   :  { %v15941_v54 = vsel %vm15537_vm2, 0, %v533_v45  ;;  %v14876_v45 = vld [vmem:[#allocation6 + $0x1a0] sm:$0xff]  }
  0x7f   :  { %12390 = vmatmul.mubr.bf16.gmra.mrb[20].mxu0 %v15701_v44 }
  0x80   :  { %12393 = vmatprep.mubr.bf16.mxu0 %v15753_v5 }
  0x87   :  { %12394 = vmatmul.mubr.bf16.gmra.mrb[24].mxu0 %v15757_v43 }
  0x88   :  { %12397 = vmatprep.mubr.bf16.mxu0 %v15761_v1 }
  0x8f   :  { %12398 = vmatmul.mubr.bf16.gmra.mrb[28].mxu0 %v15769_v16 }
  0x90   :  { %12401 = vmatprep.mubr.bf16.mxu0 %v15796_v9 }
  0x97   :  { %12402 = vmatmul.mubr.bf16.gmra.mrb[32].mxu0 %v15800_v26 }
  0x98   :  { %12405 = vmatprep.mubr.bf16.mxu0 %v15804_v51 }
  0x9f   :  { %12406 = vmatmul.mubr.bf16.gmra.mrb[36].mxu0 %v15808_v28 }
  0xa0   :  { %12409 = vmatprep.mubr.bf16.mxu0 %v15812_v37 }
  0xa7   :  { %12410 = vmatmul.mubr.bf16.gmra.mrb[40].mxu0 %v15816_v35 }
  0xa8   :  { %12413 = vmatprep.mubr.bf16.mxu0 %v15838_v22 }
  0xaf   :  { %12414 = vmatmul.mubr.bf16.gmra.mrb[44].mxu0 %v15843_v47 }
  0xb0   :  { %12417 = vmatprep.mubr.bf16.mxu0 %v15861_v34 }
  0xb7   :  { %12418 = vmatmul.mubr.bf16.gmra.mrb[48].mxu0 %v15865_v49 }
  0xb8   :  { %12421 = vmatprep.mubr.bf16.mxu0 %v15882_v17 }
  0xbf   :  { %12422 = vmatmul.mubr.bf16.gmra.mrb[52].mxu0 %v15905_v63 }
  0xc0   :  { %12425 = vmatprep.mubr.bf16.mxu0 %v15912_v60 }
  0xc7   :  { %12426 = vmatmul.mubr.bf16.gmra.mrb[56].mxu0 %v15926_v21 }
  0xc8   :  { %12429 = vmatprep.mubr.bf16.mxu0 %v15933_v38 }
  0xcf   :  { %12430 = vmatmul.mubr.bf16.gmra.mrb[60].mxu0 %v15941_v54 }
  0xd0   :  { %12449 = vmatprep.mubr.bf16.mxu0 %v19597_v29 }
  0xd7   :  { %12450 = vmatmul.mubr.bf16.vlgmr.msra.gmra.mrb[0].mxu0 %v19597_v29 }
  0xd8   :  { %12514 = vmatpush3.bf16.msra.mxu0 %v15833_v25  ;;  %12453 = vmatprep.mubr.bf16.mxu0 %v15551_v20  ;;  %v14878_v20 = vld [vmem:[#allocation6 + $0x1b0] sm:$0xff]   ;;  %v14879_v25 = vld [vmem:[#allocation6 + $0x1b8] sm:$0xff]  }
  0xd9   :  { %12515 = vmatprep.subr.bf16.mxu0 %v14873_v61 }
  0xdc   :  { %12516 = vmatpush3.bf16.msra.mxu0 %v14873_v61  ;;  %v14881_v61 = vld [vmem:[#allocation6 + $0x48] sm:$0xff]  }
  0xdd   :  { %12517 = vmatprep.subr.bf16.mxu0 %v14874_v27 }
  0xdf   :  { %12454 = vmatmul.mubr.bf16.gmra.mrb[4].mxu0 %v15621_v3  ;;  %v14880_v3 = vld [vmem:[#allocation6 + $0x40] sm:$0xff]  }
  0xe0   :  { %12457 = vmatprep.mubr.bf16.mxu0 %v15634_v33  ;;  %12518 = vmatpush3.bf16.msra.mxu0 %v14874_v27  ;;  %v14883_v27 = vld [vmem:[#allocation6 + $0x58] sm:$0xff]  }
  0xe1   :  { %12519 = vmatprep.subr.bf16.mxu0 %v14875_v53 }
  0xe4   :  { %12520 = vmatpush3.bf16.msra.mxu0 %v14875_v53  ;;  %v14884_v53 = vld [vmem:[#allocation6 + $0x60] sm:$0xff]  }
  0xe5   :  { %12521 = vmatprep.subr.bf16.mxu0 %v14876_v45 }
  0xe7   :  { %12458 = vmatmul.mubr.bf16.gmra.mrb[8].mxu0 %v15638_v36 }
  0xe8   :  { %12461 = vmatprep.mubr.bf16.mxu0 %v15642_v40  ;;  %12522 = vmatpush3.bf16.msra.mxu0 %v14876_v45  ;;  %v14905_v45 = vld [vmem:[#allocation6 + $0x88] sm:$0xff]  }
  0xe9   :  { %12523 = vmatprep.subr.bf16.mxu0 %v14877_v32 }
  0xec   :  { %12524 = vmatpush3.bf16.msra.mxu0 %v14877_v32  ;;  %v14882_v32 = vld [vmem:[#allocation6 + $0x50] sm:$0xff]  }
  0xed   :  { %12525 = vmatprep.subr.bf16.mxu0 %v14878_v20 }
  0xef   :  { %12462 = vmatmul.mubr.bf16.gmra.mrb[12].mxu0 %v15648_v42 }
  0xf0   :  { %12465 = vmatprep.mubr.bf16.mxu0 %v15662_v58  ;;  %12526 = vmatpush3.bf16.msra.mxu0 %v14878_v20  ;;  %v14906_v20 = vld [vmem:[#allocation6 + $0x90] sm:$0xff]  }
  0xf1   :  { %12527 = vmatprep.subr.bf16.mxu0 %v14879_v25 }
  0xf4   :  { %12528 = vmatpush3.bf16.msra.mxu0 %v14879_v25  ;;  %v14907_v25 = vld [vmem:[#allocation6 + $0x98] sm:$0xff]  }
  0xf5   :  { %12593 = vmatprep.subr.bf16.mxu0 %v14880_v3 }
  0xf7   :  { %12466 = vmatmul.mubr.bf16.gmra.mrb[16].mxu0 %v15666_v59 }
  0xf8   :  { %12469 = vmatprep.mubr.bf16.mxu0 %v15677_v11 }
  0xff   :  { %12470 = vmatmul.mubr.bf16.gmra.mrb[20].mxu0 %v15687_v39 }
 0x100   :  { %12473 = vmatprep.mubr.bf16.mxu0 %v15691_v57 }
 0x107   :  { %12474 = vmatmul.mubr.bf16.gmra.mrb[24].mxu0 %v15701_v44 }
 0x108   :  { %12477 = vmatprep.mubr.bf16.mxu0 %v15753_v5 }
 0x10f   :  { %12478 = vmatmul.mubr.bf16.gmra.mrb[28].mxu0 %v15757_v43 }
 0x110   :  { %12481 = vmatprep.mubr.bf16.mxu0 %v15761_v1 }
 0x117   :  { %12482 = vmatmul.mubr.bf16.gmra.mrb[32].mxu0 %v15769_v16 }
 0x118   :  { %12485 = vmatprep.mubr.bf16.mxu0 %v15796_v9 }
 0x11f   :  { %12486 = vmatmul.mubr.bf16.gmra.mrb[36].mxu0 %v15800_v26 }
 0x120   :  { %12489 = vmatprep.mubr.bf16.mxu0 %v15804_v51 }
 0x127   :  { %12490 = vmatmul.mubr.bf16.gmra.mrb[40].mxu0 %v15808_v28 }
 0x128   :  { %12493 = vmatprep.mubr.bf16.mxu0 %v15812_v37 }
 0x12f   :  { %12494 = vmatmul.mubr.bf16.gmra.mrb[44].mxu0 %v15816_v35 }
 0x130   :  { %12497 = vmatprep.mubr.bf16.mxu0 %v15838_v22 }
 0x137   :  { %12498 = vmatmul.mubr.bf16.gmra.mrb[48].mxu0 %v15843_v47 }
 0x138   :  { %12501 = vmatprep.mubr.bf16.mxu0 %v15861_v34 }
 0x13f   :  { %12502 = vmatmul.mubr.bf16.gmra.mrb[52].mxu0 %v15865_v49 }
 0x140   :  { %12505 = vmatprep.mubr.bf16.mxu0 %v15882_v17 }
 0x147   :  { %12506 = vmatmul.mubr.bf16.gmra.mrb[56].mxu0 %v15905_v63 }
 0x148   :  { %12509 = vmatprep.mubr.bf16.mxu0 %v15912_v60 }
 0x14f   :  { %12510 = vmatmul.mubr.bf16.gmra.mrb[60].mxu0 %v15926_v21 }
 0x150   :  { %12529 = vmatprep.mubr.bf16.mxu0 %v15634_v33  ;;  %v14885_v33 = vld [vmem:[#allocation6 + $0x68] sm:$0xff]  }
 0x157   :  { %12530 = vmatmul.mubr.bf16.vlgmr.msra.gmra.mrb[0].mxu0 %v15638_v36  ;;  %v14886_v36 = vld [vmem:[#allocation6 + $0x70] sm:$0xff]  }
 0x158   :  { %12594 = vmatpush3.bf16.msra.mxu0 %v14880_v3  ;;  %12533 = vmatprep.mubr.bf16.mxu0 %v15642_v40  ;;  %v14887_v40 = vld [vmem:[#allocation6 + $0x78] sm:$0xff]   ;;  %v14908_v3 = vld [vmem:[#allocation6 + $0xa0] sm:$0xff]  }
 0x159   :  { %12595 = vmatprep.subr.bf16.mxu0 %v14881_v61 }
 0x15c   :  { %12596 = vmatpush3.bf16.msra.mxu0 %v14881_v61  ;;  %v14909_v61 = vld [vmem:[#allocation6 + $0xa8] sm:$0xff]  }
 0x15d   :  { %12597 = vmatprep.subr.bf16.mxu0 %v14882_v32 }
 0x15f   :  { %12534 = vmatmul.mubr.bf16.gmra.mrb[4].mxu0 %v15648_v42  ;;  %v14888_v42 = vld [vmem:[#allocation6 + $0x100] sm:$0xff]  }
 0x160   :  { %12537 = vmatprep.mubr.bf16.mxu0 %v15662_v58  ;;  %12598 = vmatpush3.bf16.msra.mxu0 %v14882_v32  ;;  %v19819_v58 = vld [vmem:[#allocation13_spill] sm:$0xff]  ;;  %v14910_v32 = vld [vmem:[#allocation6 + $0xb0] sm:$0xff]  }
 0x161   :  { %12599 = vmatprep.subr.bf16.mxu0 %v14883_v27 }
 0x164   :  { %12600 = vmatpush3.bf16.msra.mxu0 %v14883_v27  ;;  %v14911_v27 = vld [vmem:[#allocation6 + $0xb8] sm:$0xff]  }
 0x165   :  { %12601 = vmatprep.subr.bf16.mxu0 %v14884_v53 }
 0x167   :  { %12538 = vmatmul.mubr.bf16.gmra.mrb[8].mxu0 %v15666_v59  ;;  %v19820_v59 = vld [vmem:[#allocation14_spill] sm:$0xff] }
 0x168   :  { %12541 = vmatprep.mubr.bf16.mxu0 %v15677_v11  ;;  %12602 = vmatpush3.bf16.msra.mxu0 %v14884_v53  ;;  %v19822_v11 = vld [vmem:[#allocation16_spill] sm:$0xff]  ;;  %v14912_v53 = vld [vmem:[#allocation6 + $0x140] sm:$0xff]  }
 0x169   :  { %12603 = vmatprep.subr.bf16.mxu0 %v14885_v33 }
 0x16c   :  { %12604 = vmatpush3.bf16.msra.mxu0 %v14885_v33  ;;  %v19829_v33 = vshll.u32 %v15521_v4, 16 }
 0x16d   :  { %12605 = vmatprep.subr.bf16.mxu0 %v14886_v36 }
 0x16f   :  { %12542 = vmatmul.mubr.bf16.gmra.mrb[12].mxu0 %v15687_v39  ;;  %v14893_v39 = vld [vmem:[#allocation6 + $0x128] sm:$0xff]  }
 0x170   :  { %12545 = vmatprep.mubr.bf16.mxu0 %v15691_v57  ;;  %12606 = vmatpush3.bf16.msra.mxu0 %v14886_v36  ;;  %v19823_v57 = vld [vmem:[#allocation17_spill] sm:$0xff]  ;;  %v601_v36 = vrot.slane %v19829_v33, 1 }
 0x171   :  { %12607 = vmatprep.subr.bf16.mxu0 %v14887_v40 }
 0x174   :  { %12608 = vmatpush3.bf16.msra.mxu0 %v14887_v40  ;;  %v19830_v40 = vshrl.u32 %v15521_v4, 16 }
 0x175   :  { %12673 = vmatprep.subr.bf16.mxu0 %v14888_v42 }
 0x177   :  { %12546 = vmatmul.mubr.bf16.gmra.mrb[16].mxu0 %v15701_v44  ;;  %v19824_v44 = vld [vmem:[#allocation18_spill] sm:$0xff] }
 0x178   :  { %12549 = vmatprep.mubr.bf16.mxu0 %v15753_v5  ;;  %v14889_v5 = vld [vmem:[#allocation6 + $0x108] sm:$0xff]  }
 0x17f   :  { %12550 = vmatmul.mubr.bf16.gmra.mrb[20].mxu0 %v15757_v43  ;;  %v14894_v43 = vld [vmem:[#allocation6 + $0x130] sm:$0xff]  }
 0x180   :  { %12553 = vmatprep.mubr.bf16.mxu0 %v15761_v1  ;;  %v14896_v1 = vld [vmem:[#allocation6 + $0x1c0] sm:$0xff]  }
 0x187   :  { %12554 = vmatmul.mubr.bf16.gmra.mrb[24].mxu0 %v15769_v16  ;;  %v19825_v16 = vld [vmem:[#allocation19_spill] sm:$0xff] }
 0x188   :  { %12557 = vmatprep.mubr.bf16.mxu0 %v15796_v9  ;;  %v19826_v9 = vld [vmem:[#allocation20_spill] sm:$0xff] }
 0x18f   :  { %12558 = vmatmul.mubr.bf16.gmra.mrb[28].mxu0 %v15800_v26  ;;  %v19827_v26 = vld [vmem:[#allocation21_spill] sm:$0xff] }
 0x190   :  { %12561 = vmatprep.mubr.bf16.mxu0 %v15804_v51  ;;  %v14895_v51 = vld [vmem:[#allocation6 + $0x138] sm:$0xff]  }
 0x197   :  { %12562 = vmatmul.mubr.bf16.gmra.mrb[32].mxu0 %v15808_v28  ;;  %v14891_v28 = vld [vmem:[#allocation6 + $0x118] sm:$0xff]  }
 0x198   :  { %12565 = vmatprep.mubr.bf16.mxu0 %v15812_v37  ;;  %v14892_v37 = vld [vmem:[#allocation6 + $0x120] sm:$0xff]  }
 0x19f   :  { %12566 = vmatmul.mubr.bf16.gmra.mrb[36].mxu0 %v15816_v35  ;;  %v19828_v35 = vld [vmem:[#allocation22_spill] sm:$0xff] }
 0x1a0   :  { %12569 = vmatprep.mubr.bf16.mxu0 %v15838_v22  ;;  %v14890_v22 = vld [vmem:[#allocation6 + $0x110] sm:$0xff]  }
 0x1a7   :  { %12570 = vmatmul.mubr.bf16.gmra.mrb[40].mxu0 %v15843_v47  ;;  %v14898_v47 = vld [vmem:[#allocation6 + $0x1d0] sm:$0xff]  }
 0x1a8   :  { %12573 = vmatprep.mubr.bf16.mxu0 %v15861_v34  ;;  %v14897_v34 = vld [vmem:[#allocation6 + $0x1c8] sm:$0xff]  }
 0x1af   :  { %12574 = vmatmul.mubr.bf16.gmra.mrb[44].mxu0 %v15865_v49  ;;  %v14899_v49 = vld [vmem:[#allocation6 + $0x1d8] sm:$0xff]  }
 0x1b0   :  { %12577 = vmatprep.mubr.bf16.mxu0 %v15882_v17  ;;  %v14900_v17 = vld [vmem:[#allocation6 + $0x1e0] sm:$0xff]  }
 0x1b7   :  { %12578 = vmatmul.mubr.bf16.gmra.mrb[48].mxu0 %v15905_v63  ;;  %v19821_v63 = vld [vmem:[#allocation15_spill] sm:$0xff] }
 0x1b8   :  { %12581 = vmatprep.mubr.bf16.mxu0 %v15912_v60  ;;  %v14902_v60 = vld [vmem:[#allocation6 + $0x1f0] sm:$0xff]  }
 0x1bf   :  { %12582 = vmatmul.mubr.bf16.gmra.mrb[52].mxu0 %v15926_v21  ;;  %v14903_v21 = vld [vmem:[#allocation6 + $0x1f8] sm:$0xff]  }
 0x1c0   :  { %12585 = vmatprep.mubr.bf16.mxu0 %v15933_v38  ;;  %v14901_v38 = vld [vmem:[#allocation6 + $0x1e8] sm:$0xff]  }
 0x1c7   :  { %12586 = vmatmul.mubr.bf16.gmra.mrb[56].mxu0 %v15941_v54  ;;  %v14904_v54 = vld [vmem:[#allocation6 + $0x80] sm:$0xff]  }
 0x1c8   :  { %12589 = vmatprep.mubr.bf16.mxu0 %v19597_v29 }
 0x1cf   :  { %12590 = vmatmul.mubr.bf16.gmra.mrb[60].mxu0 %v19597_v29 }
 0x1d0   :  { %12609 = vmatprep.mubr.bf16.mxu0 %v19597_v29 }
 0x1d7   :  { %12610 = vmatmul.mubr.bf16.vlgmr.msra.gmra.mrb[0].mxu0 %v19597_v29 }
 0x1d8   :  { %12674 = vmatpush3.bf16.msra.mxu0 %v14888_v42  ;;  %12613 = vmatprep.mubr.bf16.mxu0 %v15521_v4  ;;  %v602_v42 = vor.u32 %v601_v36, %v19830_v40  ;;  %v19844_v40 = vshrl.u32 %v15535_v13, 16 }
 0x1d9   :  { %12675 = vmatprep.subr.bf16.mxu0 %v14889_v5 }
 0x1dc   :  { %12676 = vmatpush3.bf16.msra.mxu0 %v14889_v5  ;;  %v19831_v5 = vmov 0 }
 0x1dd   :  { %12677 = vmatprep.subr.bf16.mxu0 %v14890_v22  ;;  %v19832_v5 = vsel %vm16110_vm5, 4294967295, %v19831_v5 }
 0x1de   :  { %19833 = vst [vmem:[#allocation13_spill] sm:$0xff] %v19832_v5 }
 0x1df   :  { %12614 = vmatmul.mubr.bf16.gmra.mrb[4].mxu0 %v15525_v7 }
 0x1e0   :  { %12617 = vmatprep.mubr.bf16.mxu0 %v15527_v8  ;;  %12678 = vmatpush3.bf16.msra.mxu0 %v14890_v22  ;;  %v19834_v22 = vshll.u32 %v15525_v7, 16 }
 0x1e1   :  { %12679 = vmatprep.subr.bf16.mxu0 %v14891_v28 }
 0x1e4   :  { %12680 = vmatpush3.bf16.msra.mxu0 %v14891_v28  ;;  %v603_v28 = vrot.slane %v19834_v22, 1  ;;  %v19845_v22 = vshrl.u32 %v15541_v15, 16 }
 0x1e5   :  { %12681 = vmatprep.subr.bf16.mxu0 %v14892_v37 }
 0x1e7   :  { %12618 = vmatmul.mubr.bf16.gmra.mrb[8].mxu0 %v15529_v10 }
 0x1e8   :  { %12621 = vmatprep.mubr.bf16.mxu0 %v15533_v12  ;;  %12682 = vmatpush3.bf16.msra.mxu0 %v14892_v37  ;;  %v16118_v37 = vsel %vm16110_vm5, %v602_v42, 0 }
 0x1e9   :  { %12683 = vmatprep.subr.bf16.mxu0 %v14893_v39 }
 0x1ec   :  { %12684 = vmatpush3.bf16.msra.mxu0 %v14893_v39  ;;  %v19835_v39 = vshll.u32 %v15527_v8, 16 }
 0x1ed   :  { %12685 = vmatprep.subr.bf16.mxu0 %v14894_v43 }
 0x1ef   :  { %12622 = vmatmul.mubr.bf16.gmra.mrb[12].mxu0 %v15535_v13 }
 0x1f0   :  { %12625 = vmatprep.mubr.bf16.mxu0 %v15541_v15  ;;  %12686 = vmatpush3.bf16.msra.mxu0 %v14894_v43  ;;  %v605_v43 = vrot.slane %v19835_v39, 1  ;;  %v14918_v39 = vld [vmem:[#allocation6 + $0x170] sm:$0xff]  }
 0x1f1   :  { %12687 = vmatprep.subr.bf16.mxu0 %v14895_v51 }
 0x1f4   :  { %12688 = vmatpush3.bf16.msra.mxu0 %v14895_v51  ;;  %v14913_v51 = vld [vmem:[#allocation6 + $0x148] sm:$0xff]  }
 0x1f5   :  { %12753 = vmatprep.subr.bf16.mxu0 %v14896_v1 }
 0x1f7   :  { %12626 = vmatmul.mubr.bf16.gmra.mrb[16].mxu0 %v15545_v18 }
 0x1f8   :  { %12629 = vmatprep.mubr.bf16.mxu0 %v15547_v19 }
 0x1ff   :  { %12630 = vmatmul.mubr.bf16.gmra.mrb[20].mxu0 %v15556_v23 }
 0x200   :  { %12633 = vmatprep.mubr.bf16.mxu0 %v15558_v24 }
 0x207   :  { %12634 = vmatmul.mubr.bf16.gmra.mrb[24].mxu0 %v15565_v31 }
 0x208   :  { %12637 = vmatprep.mubr.bf16.mxu0 %v15588_v48 }
 0x20f   :  { %12638 = vmatmul.mubr.bf16.gmra.mrb[28].mxu0 %v15601_v56 }
 0x210   :  { %12641 = vmatprep.mubr.bf16.mxu0 %v15610_v62 }
 0x217   :  { %12642 = vmatmul.mubr.bf16.gmra.mrb[32].mxu0 %v15617_v2 }
 0x218   :  { %12645 = vmatprep.mubr.bf16.mxu0 %v15644_v41 }
 0x21f   :  { %12646 = vmatmul.mubr.bf16.gmra.mrb[36].mxu0 %v15655_v52 }
 0x220   :  { %12649 = vmatprep.mubr.bf16.mxu0 %v19819_v58 }
 0x227   :  { %12650 = vmatmul.mubr.bf16.gmra.mrb[40].mxu0 %v19820_v59 }
 0x228   :  { %12653 = vmatprep.mubr.bf16.mxu0 %v19821_v63 }
 0x22f   :  { %12654 = vmatmul.mubr.bf16.gmra.mrb[44].mxu0 %v19822_v11 }
 0x230   :  { %12657 = vmatprep.mubr.bf16.mxu0 %v19823_v57 }
 0x237   :  { %12658 = vmatmul.mubr.bf16.gmra.mrb[48].mxu0 %v19824_v44 }
 0x238   :  { %12661 = vmatprep.mubr.bf16.mxu0 %v19825_v16 }
 0x23f   :  { %12662 = vmatmul.mubr.bf16.gmra.mrb[52].mxu0 %v19826_v9 }
 0x240   :  { %12665 = vmatprep.mubr.bf16.mxu0 %v19827_v26 }
 0x247   :  { %12666 = vmatmul.mubr.bf16.gmra.mrb[56].mxu0 %v19828_v35 }
 0x248   :  { %12669 = vmatprep.mubr.bf16.mxu0 %v15830_v55 }
 0x24f   :  { %12670 = vmatmul.mubr.bf16.gmra.mrb[60].mxu0 %v15887_v50 }
 0x250   :  { %12689 = vmatprep.mubr.bf16.mxu0 %v15521_v4  ;;  %v19836_v4 = vshrl.u32 %v15525_v7, 16 }
 0x257   :  { %12690 = vmatmul.mubr.bf16.vlgmr.msra.gmra.mrb[0].mxu0 %v15525_v7  ;;  %v19839_v7 = vshll.u32 %v15533_v12, 16 }
 0x258   :  { %12754 = vmatpush3.bf16.msra.mxu0 %v14896_v1  ;;  %12693 = vmatprep.mubr.bf16.mxu0 %v15527_v8  ;;  %v604_v1 = vor.u32 %v603_v28, %v19836_v4 }
 0x259   :  { %12755 = vmatprep.subr.bf16.mxu0 %v14897_v34 }
 0x25c   :  { %12756 = vmatpush3.bf16.msra.mxu0 %v14897_v34  ;;  %v19837_v34 = vshrl.u32 %v15527_v8, 16 }
 0x25d   :  { %12757 = vmatprep.subr.bf16.mxu0 %v14898_v47 }
 0x25f   :  { %12694 = vmatmul.mubr.bf16.gmra.mrb[4].mxu0 %v15529_v10 }
 0x260   :  { %12697 = vmatprep.mubr.bf16.mxu0 %v15533_v12  ;;  %12758 = vmatpush3.bf16.msra.mxu0 %v14898_v47  ;;  %v606_v47 = vor.u32 %v605_v43, %v19837_v34 }
 0x261   :  { %12759 = vmatprep.subr.bf16.mxu0 %v14899_v49 }
 0x264   :  { %12760 = vmatpush3.bf16.msra.mxu0 %v14899_v49  ;;  %v14914_v49 = vld [vmem:[#allocation6 + $0x150] sm:$0xff]  }
 0x265   :  { %12761 = vmatprep.subr.bf16.mxu0 %v14900_v17 }
 0x267   :  { %12698 = vmatmul.mubr.bf16.gmra.mrb[8].mxu0 %v15535_v13 }
 0x268   :  { %12701 = vmatprep.mubr.bf16.mxu0 %v15541_v15  ;;  %12762 = vmatpush3.bf16.msra.mxu0 %v14900_v17  ;;  %v16130_v17 = vsel %vm16110_vm5, %v604_v1, 0 }
 0x269   :  { %12763 = vmatprep.subr.bf16.mxu0 %v14901_v38 }
 0x26c   :  { %12764 = vmatpush3.bf16.msra.mxu0 %v14901_v38  ;;  %v19838_v38 = vshll.u32 %v15529_v10, 16 }
 0x26d   :  { %12765 = vmatprep.subr.bf16.mxu0 %v14902_v60 }
 0x26f   :  { %12702 = vmatmul.mubr.bf16.gmra.mrb[12].mxu0 %v15545_v18 }
 0x270   :  { %12705 = vmatprep.mubr.bf16.mxu0 %v15547_v19  ;;  %12766 = vmatpush3.bf16.msra.mxu0 %v14902_v60  ;;  %v607_v60 = vrot.slane %v19838_v38, 1  ;;  %v19849_v38 = vshrl.u32 %v15547_v19, 16 }
 0x271   :  { %12767 = vmatprep.subr.bf16.mxu0 %v14903_v21 }
 0x274   :  { %12768 = vmatpush3.bf16.msra.mxu0 %v14903_v21  ;;  %v16136_v21 = vsel %vm16110_vm5, %v606_v47, 0  ;;  %v19848_v47 = vshrl.u32 %v15545_v18, 16 }
 0x275   :  { %12833 = vmatprep.subr.bf16.mxu0 %v14904_v54 }
 0x277   :  { %12706 = vmatmul.mubr.bf16.gmra.mrb[16].mxu0 %v15556_v23 }
 0x278   :  { %12709 = vmatprep.mubr.bf16.mxu0 %v15558_v24 }
 0x27f   :  { %12710 = vmatmul.mubr.bf16.gmra.mrb[20].mxu0 %v15565_v31 }
 0x280   :  { %12713 = vmatprep.mubr.bf16.mxu0 %v15588_v48 }
 0x287   :  { %12714 = vmatmul.mubr.bf16.gmra.mrb[24].mxu0 %v15601_v56 }
 0x288   :  { %12717 = vmatprep.mubr.bf16.mxu0 %v15610_v62 }
 0x28f   :  { %12718 = vmatmul.mubr.bf16.gmra.mrb[28].mxu0 %v15617_v2 }
 0x290   :  { %12721 = vmatprep.mubr.bf16.mxu0 %v15644_v41 }
 0x297   :  { %12722 = vmatmul.mubr.bf16.gmra.mrb[32].mxu0 %v15655_v52 }
 0x298   :  { %12725 = vmatprep.mubr.bf16.mxu0 %v19819_v58 }
 0x29f   :  { %12726 = vmatmul.mubr.bf16.gmra.mrb[36].mxu0 %v19820_v59 }
 0x2a0   :  { %12729 = vmatprep.mubr.bf16.mxu0 %v19821_v63 }
 0x2a7   :  { %12730 = vmatmul.mubr.bf16.gmra.mrb[40].mxu0 %v19822_v11 }
 0x2a8   :  { %12733 = vmatprep.mubr.bf16.mxu0 %v19823_v57 }
 0x2af   :  { %12734 = vmatmul.mubr.bf16.gmra.mrb[44].mxu0 %v19824_v44 }
 0x2b0   :  { %12737 = vmatprep.mubr.bf16.mxu0 %v19825_v16 }
 0x2b7   :  { %12738 = vmatmul.mubr.bf16.gmra.mrb[48].mxu0 %v19826_v9 }
 0x2b8   :  { %12741 = vmatprep.mubr.bf16.mxu0 %v19827_v26 }
 0x2bf   :  { %12742 = vmatmul.mubr.bf16.gmra.mrb[52].mxu0 %v19828_v35 }
 0x2c0   :  { %12745 = vmatprep.mubr.bf16.mxu0 %v15830_v55 }
 0x2c7   :  { %12746 = vmatmul.mubr.bf16.gmra.mrb[56].mxu0 %v15887_v50 }
 0x2c8   :  { %12749 = vmatprep.mubr.bf16.mxu0 %v15889_v0 }
 0x2cf   :  { %12750 = vmatmul.mubr.bf16.gmra.mrb[60].mxu0 %v15896_v46 }
 0x2d0   :  { %12769 = vmatprep.mubr.bf16.mxu0 %v15527_v8  ;;  %v14915_v8 = vld [vmem:[#allocation6 + $0x158] sm:$0xff]  }
 0x2d7   :  { %12770 = vmatmul.mubr.bf16.vlgmr.msra.gmra.mrb[0].mxu0 %v15529_v10 }
 0x2d8   :  { %12834 = vmatpush3.bf16.msra.mxu0 %v14904_v54  ;;  %12773 = vmatprep.mubr.bf16.mxu0 %v15533_v12  ;;  %v609_v54 = vrot.slane %v19839_v7, 1  ;;  %v16182_v7 = vld [vmem:[#allocation6 + $0x200] sm:$0xff]  }
 0x2d9   :  { %12835 = vmatprep.subr.bf16.mxu0 %v14905_v45 }
 0x2dc   :  { %12836 = vmatpush3.bf16.msra.mxu0 %v14905_v45  ;;  %v19840_v45 = vshrl.u32 %v15529_v10, 16  ;;  %v19843_v10 = vshll.u32 %v15541_v15, 16 }
 0x2dd   :  { %12837 = vmatprep.subr.bf16.mxu0 %v14906_v20 }
 0x2de   :  { %v613_v36 = vrot.slane %v19843_v10, 1  ;;  %v19854_v10 = vshll.u32 %v15565_v31, 16 }
 0x2df   :  { %12774 = vmatmul.mubr.bf16.gmra.mrb[4].mxu0 %v15535_v13 }
 0x2e0   :  { %12777 = vmatprep.mubr.bf16.mxu0 %v15541_v15  ;;  %12838 = vmatpush3.bf16.msra.mxu0 %v14906_v20  ;;  %v608_v20 = vor.u32 %v607_v60, %v19840_v45  ;;  %v614_v28 = vor.u32 %v613_v36, %v19845_v22  ;;  %v14919_v15 = vld [vmem:[#allocation6 + $0x178] sm:$0xff]   ;;  %v623_v36 = vrot.slane %v19854_v10, 1  ;;  %v19857_v22 = vshrl.u32 %v15588_v48, 16 }
 0x2e1   :  { %12839 = vmatprep.subr.bf16.mxu0 %v14907_v25 }
 0x2e2   :  { %v16172_v1 = vsel %vm16110_vm5, %v614_v28, 0 }
 0x2e4   :  { %12840 = vmatpush3.bf16.msra.mxu0 %v14907_v25  ;;  %v19841_v25 = vshrl.u32 %v15533_v12, 16  ;;  %v14917_v12 = vld [vmem:[#allocation6 + $0x168] sm:$0xff]  }
 0x2e5   :  { %12841 = vmatprep.subr.bf16.mxu0 %v14908_v3 }
 0x2e7   :  { %12778 = vmatmul.mubr.bf16.gmra.mrb[8].mxu0 %v15545_v18 }
 0x2e8   :  { %12781 = vmatprep.mubr.bf16.mxu0 %v15547_v19  ;;  %12842 = vmatpush3.bf16.msra.mxu0 %v14908_v3  ;;  %v610_v3 = vor.u32 %v609_v54, %v19841_v25 }
 0x2e9   :  { %12843 = vmatprep.subr.bf16.mxu0 %v14909_v61 }
 0x2ea   :  { %v16154_v33 = vsel %vm16110_vm5, %v610_v3, 0 }
 0x2ec   :  { %12844 = vmatpush3.bf16.msra.mxu0 %v14909_v61  ;;  %v14916_v61 = vld [vmem:[#allocation6 + $0x160] sm:$0xff]  }
 0x2ed   :  { %12845 = vmatprep.subr.bf16.mxu0 %v14910_v32 }
 0x2ef   :  { %12782 = vmatmul.mubr.bf16.gmra.mrb[12].mxu0 %v15556_v23 }
 0x2f0   :  { %12785 = vmatprep.mubr.bf16.mxu0 %v15558_v24  ;;  %12846 = vmatpush3.bf16.msra.mxu0 %v14910_v32  ;;  %v16148_v32 = vsel %vm16110_vm5, %v608_v20, 0 }
 0x2f1   :  { %12847 = vmatprep.subr.bf16.mxu0 %v14911_v27 }
 0x2f4   :  { %12848 = vmatpush3.bf16.msra.mxu0 %v14911_v27  ;;  %v19842_v27 = vshll.u32 %v15535_v13, 16  ;;  %v19847_v13 = vshll.u32 %v15547_v19, 16  ;;  %v19852_v19 = vshrl.u32 %v15556_v23, 16 }
 0x2f5   :  { %12913 = vmatprep.subr.bf16.mxu0 %v14912_v53 }
 0x2f6   :  { %v617_v34 = vrot.slane %v19847_v13, 1 }
 0x2f7   :  { %12786 = vmatmul.mubr.bf16.gmra.mrb[16].mxu0 %v15565_v31 }
 0x2f8   :  { %12789 = vmatprep.mubr.bf16.mxu0 %v15588_v48  ;;  %v618_v60 = vor.u32 %v617_v34, %v19849_v38  ;;  %v19859_v34 = vshll.u32 %v15610_v62, 16 }
 0x2fa   :  { %v16192_v20 = vsel %vm16110_vm5, %v618_v60, 0  ;;  %v19862_v60 = vshll.u32 %v15617_v2, 16 }
 0x2ff   :  { %12790 = vmatmul.mubr.bf16.gmra.mrb[20].mxu0 %v15601_v56 }
 0x300   :  { %12793 = vmatprep.mubr.bf16.mxu0 %v15610_v62 }
 0x307   :  { %12794 = vmatmul.mubr.bf16.gmra.mrb[24].mxu0 %v15617_v2 }
 0x308   :  { %12797 = vmatprep.mubr.bf16.mxu0 %v15644_v41 }
 0x30f   :  { %12798 = vmatmul.mubr.bf16.gmra.mrb[28].mxu0 %v15655_v52 }
 0x310   :  { %12801 = vmatprep.mubr.bf16.mxu0 %v19819_v58 }
 0x317   :  { %12802 = vmatmul.mubr.bf16.gmra.mrb[32].mxu0 %v19820_v59 }
 0x318   :  { %12805 = vmatprep.mubr.bf16.mxu0 %v19821_v63 }
 0x31f   :  { %12806 = vmatmul.mubr.bf16.gmra.mrb[36].mxu0 %v19822_v11 }
 0x320   :  { %12809 = vmatprep.mubr.bf16.mxu0 %v19823_v57 }
 0x327   :  { %12810 = vmatmul.mubr.bf16.gmra.mrb[40].mxu0 %v19824_v44 }
 0x328   :  { %12813 = vmatprep.mubr.bf16.mxu0 %v19825_v16 }
 0x32f   :  { %12814 = vmatmul.mubr.bf16.gmra.mrb[44].mxu0 %v19826_v9 }
 0x330   :  { %12817 = vmatprep.mubr.bf16.mxu0 %v19827_v26 }
 0x337   :  { %12818 = vmatmul.mubr.bf16.gmra.mrb[48].mxu0 %v19828_v35 }
 0x338   :  { %12821 = vmatprep.mubr.bf16.mxu0 %v15830_v55 }
 0x33f   :  { %12822 = vmatmul.mubr.bf16.gmra.mrb[52].mxu0 %v15887_v50 }
 0x340   :  { %12825 = vmatprep.mubr.bf16.mxu0 %v15889_v0 }
 0x347   :  { %12826 = vmatmul.mubr.bf16.gmra.mrb[56].mxu0 %v15896_v46 }
 0x348   :  { %12829 = vmatprep.mubr.bf16.mxu0 %v19597_v29 }
 0x34f   :  { %12830 = vmatmul.mubr.bf16.gmra.mrb[60].mxu0 %v19597_v29 }
 0x350   :  { %12849 = vmatprep.mubr.bf16.mxu0 %v19597_v29 }
 0x357   :  { %12850 = vmatmul.mubr.bf16.vlgmr.msra.gmra.mrb[0].mxu0 %v19597_v29 }
 0x358   :  { %12914 = vmatpush3.bf16.msra.mxu0 %v14912_v53  ;;  %12853 = vmatprep.mubr.bf16.mxu0 %v16118_v37  ;;  %v611_v53 = vrot.slane %v19842_v27, 1 }
 0x359   :  { %12915 = vmatprep.subr.bf16.mxu0 %v14913_v51 }
 0x35a   :  { %v612_v42 = vor.u32 %v611_v53, %v19844_v40  ;;  %v19855_v40 = vshll.u32 %v15588_v48, 16 }
 0x35c   :  { %12916 = vmatpush3.bf16.msra.mxu0 %v14913_v51  ;;  %v16166_v43 = vsel %vm16110_vm5, %v612_v42, 0  ;;  %v19846_v51 = vshll.u32 %v15545_v18, 16  ;;  %v19851_v18 = vshll.u32 %v15558_v24, 16  ;;  %v625_v42 = vrot.slane %v19855_v40, 1 }
 0x35d   :  { %12917 = vmatprep.subr.bf16.mxu0 %v14914_v49  ;;  %v19867_v40 = vshll.u32 %v19819_v58, 16 }
 0x35e   :  { %v615_v4 = vrot.slane %v19846_v51, 1  ;;  %v621_v25 = vrot.slane %v19851_v18, 1  ;;  %v626_v28 = vor.u32 %v625_v42, %v19857_v22  ;;  %v19858_v51 = vshll.u32 %v15601_v56, 16 }
 0x35f   :  { %12854 = vmatmul.mubr.bf16.gmra.mrb[4].mxu0 %v16130_v17  ;;  %v19863_v18 = vshll.u32 %v15644_v41, 16  ;;  %v637_v42 = vrot.slane %v19867_v40, 1  ;;  %v19879_v40 = vshll.u32 %v19825_v16, 16 }
 0x360   :  { %12857 = vmatprep.mubr.bf16.mxu0 %v16136_v21  ;;  %12918 = vmatpush3.bf16.msra.mxu0 %v14914_v49  ;;  %v616_v49 = vor.u32 %v615_v4, %v19848_v47  ;;  %v627_v4 = vrot.slane %v19858_v51, 1  ;;  %v16229_v13 = vsel %vm16110_vm5, %v626_v28, 0  ;;  %v19861_v47 = vshrl.u32 %v15610_v62, 16 }
 0x361   :  { %12919 = vmatprep.subr.bf16.mxu0 %v14915_v8  ;;  %v19870_v28 = vshll.u32 %v19820_v59, 16 }
 0x362   :  { %v16186_v54 = vsel %vm16110_vm5, %v616_v49, 0 }
 0x363   :  { %v639_v51 = vrot.slane %v19870_v28, 1 }
 0x364   :  { %12920 = vmatpush3.bf16.msra.mxu0 %v14915_v8  ;;  %v19850_v8 = vshll.u32 %v15556_v23, 16  ;;  %v19856_v23 = vshrl.u32 %v15565_v31, 16  ;;  %v19860_v31 = vshrl.u32 %v15601_v56, 16  ;;  %v19864_v56 = vshrl.u32 %v15617_v2, 16 }
 0x365   :  { %12921 = vmatprep.subr.bf16.mxu0 %v14916_v61  ;;  %v19868_v2 = vshrl.u32 %v15655_v52, 16 }
 0x366   :  { %v619_v45 = vrot.slane %v19850_v8, 1  ;;  %v628_v48 = vor.u32 %v627_v4, %v19860_v31  ;;  %v631_v8 = vrot.slane %v19862_v60, 1  ;;  %v19873_v31 = vshrl.u32 %v19821_v63, 16 }
 0x367   :  { %12858 = vmatmul.mubr.bf16.gmra.mrb[8].mxu0 %v16148_v32 }
 0x368   :  { %12861 = vmatprep.mubr.bf16.mxu0 %v16154_v33  ;;  %12922 = vmatpush3.bf16.msra.mxu0 %v14916_v61  ;;  %v620_v3 = vor.u32 %v619_v45, %v19852_v19  ;;  %v19853_v61 = vshrl.u32 %v15558_v24, 16  ;;  %v624_v24 = vor.u32 %v623_v36, %v19856_v23  ;;  %v16241_v38 = vsel %vm16110_vm5, %v628_v48, 0 }
 0x369   :  { %12923 = vmatprep.subr.bf16.mxu0 %v14917_v12  ;;  %v632_v62 = vor.u32 %v631_v8, %v19864_v56  ;;  %v19865_v19 = vshrl.u32 %v15644_v41, 16  ;;  %v19869_v23 = vshrl.u32 %v19819_v58, 16  ;;  %v19877_v56 = vshrl.u32 %v19823_v57, 16 }
 0x36a   :  { %v622_v27 = vor.u32 %v621_v25, %v19853_v61  ;;  %v16205_v53 = vsel %vm16110_vm5, %v620_v3, 0  ;;  %v633_v25 = vrot.slane %v19863_v18, 1  ;;  %v19875_v18 = vshll.u32 %v19823_v57, 16 }
 0x36b   :  { %v16259_v61 = vsel %vm16110_vm5, %v632_v62, 0 }
 0x36c   :  { %12924 = vmatpush3.bf16.msra.mxu0 %v14917_v12  ;;  %v16211_v12 = vsel %vm16110_vm5, %v622_v27, 0  ;;  %v634_v3 = vor.u32 %v633_v25, %v19865_v19  ;;  %v19866_v27 = vshll.u32 %v15655_v52, 16  ;;  %v19872_v52 = vshrl.u32 %v19820_v59, 16 }
 0x36d   :  { %12925 = vmatprep.subr.bf16.mxu0 %v14918_v39  ;;  %v645_v25 = vrot.slane %v19875_v18, 1  ;;  %v19876_v59 = vshrl.u32 %v19822_v11, 16  ;;  %v19887_v18 = vshll.u32 %v15830_v55, 16 }
 0x36e   :  { %v635_v10 = vrot.slane %v19866_v27, 1  ;;  %v16265_v36 = vsel %vm16110_vm5, %v634_v3, 0  ;;  %v640_v58 = vor.u32 %v639_v51, %v19872_v52  ;;  %v19878_v3 = vshll.u32 %v19824_v44, 16 }
 0x36f   :  { %12862 = vmatmul.mubr.bf16.gmra.mrb[12].mxu0 %v16166_v43  ;;  %v646_v62 = vor.u32 %v645_v25, %v19877_v56  ;;  %v19885_v52 = vshrl.u32 %v19827_v26, 16  ;;  %v657_v25 = vrot.slane %v19887_v18, 1 }
 0x370   :  { %12865 = vmatprep.mubr.bf16.mxu0 %v16172_v1  ;;  %12926 = vmatpush3.bf16.msra.mxu0 %v14918_v39  ;;  %v16223_v39 = vsel %vm16110_vm5, %v624_v24, 0  ;;  %v636_v41 = vor.u32 %v635_v10, %v19868_v2  ;;  %v638_v24 = vor.u32 %v637_v42, %v19869_v23  ;;  %v647_v27 = vrot.slane %v19878_v3, 1 }
 0x371   :  { %12927 = vmatprep.subr.bf16.mxu0 %v14919_v15  ;;  %v16319_v10 = vsel %vm16110_vm5, %v646_v62, 0  ;;  %v649_v42 = vrot.slane %v19879_v40, 1  ;;  %v19881_v2 = vshrl.u32 %v19825_v16, 16  ;;  %v659_v62 = vrot.slane %v517_v30, 1  ;;  %v14921_v30 = vld [vmem:[#allocation6 + $0x208] sm:$0xff]   ;;  %v14922_v40 = vld [vmem:[#allocation6 + $0x210] sm:$0xff]  }
 0x372   :  { %v16277_v22 = vsel %vm16110_vm5, %v636_v41, 0  ;;  %v16283_v4 = vsel %vm16110_vm5, %v638_v24, 0  ;;  %v19882_v24 = vshll.u32 %v19826_v9, 16 }
 0x373   :  { %v650_v41 = vor.u32 %v649_v42, %v19881_v2  ;;  %v14924_v42 = vld [vmem:[#allocation6 + $0x220] sm:$0xff]  }
 0x374   :  { %12928 = vmatpush3.bf16.msra.mxu0 %v14919_v15  ;;  %v629_v15 = vrot.slane %v19859_v34, 1  ;;  %v19871_v34 = vshll.u32 %v19821_v63, 16  ;;  %v651_v28 = vrot.slane %v19882_v24, 1 }
 0x375   :  { %12993 = vmatprep.subr.bf16.mxu0 %v16182_v7  ;;  %v16337_v51 = vsel %vm16110_vm5, %v650_v41, 0  ;;  %v19892_v41 = vshll.u32 %v15896_v46, 16 }
 0x376   :  { %v630_v49 = vor.u32 %v629_v15, %v19861_v47  ;;  %v641_v15 = vrot.slane %v19871_v34, 1  ;;  %v16295_v47 = vsel %vm16110_vm5, %v640_v58, 0  ;;  %v19883_v34 = vshll.u32 %v19827_v26, 16 }
 0x377   :  { %12866 = vmatmul.mubr.bf16.gmra.mrb[16].mxu0 %v16186_v54  ;;  %v663_v24 = vrot.slane %v19892_v41, 1 }
 0x378   :  { %12869 = vmatprep.mubr.bf16.mxu0 %v16192_v20  ;;  %v16247_v45 = vsel %vm16110_vm5, %v630_v49, 0  ;;  %v642_v48 = vor.u32 %v641_v15, %v19873_v31  ;;  %v19874_v49 = vshll.u32 %v19822_v11, 16  ;;  %v19880_v11 = vshrl.u32 %v19824_v44, 16 }
 0x379   :  { %v653_v15 = vrot.slane %v19883_v34, 1  ;;  %v19884_v44 = vshrl.u32 %v19826_v9, 16  ;;  %v19888_v9 = vshrl.u32 %v19828_v35, 16  ;;  %v19893_v34 = vshrl.u32 %v15896_v46, 16  ;;  %v14931_v46 = vld [vmem:[#allocation8 + $0xd8] sm:$0xff]  }
 0x37a   :  { %v643_v60 = vrot.slane %v19874_v49, 1  ;;  %v16301_v8 = vsel %vm16110_vm5, %v642_v48, 0  ;;  %v648_v57 = vor.u32 %v647_v27, %v19880_v11  ;;  %v19886_v48 = vshll.u32 %v19828_v35, 16 }
 0x37b   :  { %v652_v16 = vor.u32 %v651_v28, %v19884_v44  ;;  %v654_v58 = vor.u32 %v653_v15, %v19885_v52  ;;  %v19890_v35 = vshrl.u32 %v15887_v50, 16  ;;  %v14923_v50 = vld [vmem:[#allocation6 + $0x218] sm:$0xff]   ;;  %v661_v11 = vrot.slane %v524_v6, 1  ;;  %v14928_v44 = vld [vmem:[#allocation8 + $0xc0] sm:$0xff]  }
 0x37c   :  { %v644_v63 = vor.u32 %v643_v60, %v19876_v59  ;;  %v16331_v23 = vsel %vm16110_vm5, %v648_v57, 0  ;;  %v655_v49 = vrot.slane %v19886_v48, 1  ;;  %v19889_v59 = vshrl.u32 %v15830_v55, 16  ;;  %13073 = vmatprep.subr.bf16.mxu1 %v14928_v44 }
 0x37d   :  { %v16349_v31 = vsel %vm16110_vm5, %v652_v16, 0  ;;  %v16355_v60 = vsel %vm16110_vm5, %v654_v58, 0  ;;  %v660_v27 = vor.u32 %v659_v62, %v19890_v35  ;;  %v19891_v57 = vshrl.u32 %v15889_v0, 16  ;;  %v14929_v16 = vld [vmem:[#allocation8 + $0xc8] sm:$0xff]   ;;  %13074 = vmatpush3.bf16.msra.mxu1 %v14928_v44  ;;  %v14930_v0 = vld [vmem:[#allocation8 + $0xd0] sm:$0xff]  }
 0x37e   :  { %v16313_v19 = vsel %vm16110_vm5, %v644_v63, 0  ;;  %v656_v26 = vor.u32 %v655_v49, %v19888_v9  ;;  %v658_v63 = vor.u32 %v657_v25, %v19889_v59  ;;  %v664_v15 = vor.u32 %v663_v24, %v19893_v34  ;;  %13075 = vmatprep.subr.bf16.mxu1 %v14929_v16 }
 0x37f   :  { %12870 = vmatmul.mubr.bf16.gmra.mrb[20].mxu0 %v16205_v53  ;;  %v16381_v55 = vsel %vm16110_vm5, %v660_v27, 0  ;;  %v662_v2 = vor.u32 %v661_v11, %v19891_v57 }
 0x380   :  { %12873 = vmatprep.mubr.bf16.mxu0 %v16211_v12  ;;  %v16367_v56 = vsel %vm16110_vm5, %v656_v26, 0  ;;  %v16373_v3 = vsel %vm16110_vm5, %v658_v63, 0  ;;  %v731_v6 = vsel %vm16110_vm5, %v664_v15, 0 }
 0x381   :  { %v730_v28 = vsel %vm16110_vm5, %v662_v2, 0  ;;  %13076 = vmatpush3.bf16.msra.mxu1 %v14929_v16 }
 0x382   :  { %13077 = vmatprep.subr.bf16.mxu1 %v14930_v0 }
 0x385   :  { %13078 = vmatpush3.bf16.msra.mxu1 %v14930_v0 }
 0x386   :  { %13079 = vmatprep.subr.bf16.mxu1 %v14931_v46 }
 0x387   :  { %12874 = vmatmul.mubr.bf16.gmra.mrb[24].mxu0 %v16223_v39 }
 0x388   :  { %12877 = vmatprep.mubr.bf16.mxu0 %v16229_v13 }
 0x389   :  { %13080 = vmatpush3.bf16.msra.mxu1 %v14931_v46 }
 0x38f   :  { %12878 = vmatmul.mubr.bf16.gmra.mrb[28].mxu0 %v16241_v38 }
 0x390   :  { %12881 = vmatprep.mubr.bf16.mxu0 %v16247_v45 }
 0x397   :  { %12882 = vmatmul.mubr.bf16.gmra.mrb[32].mxu0 %v16259_v61 }
 0x398   :  { %12885 = vmatprep.mubr.bf16.mxu0 %v16265_v36 }
 0x39f   :  { %12886 = vmatmul.mubr.bf16.gmra.mrb[36].mxu0 %v16277_v22 }
 0x3a0   :  { %12889 = vmatprep.mubr.bf16.mxu0 %v16283_v4 }
 0x3a7   :  { %12890 = vmatmul.mubr.bf16.gmra.mrb[40].mxu0 %v16295_v47 }
 0x3a8   :  { %12893 = vmatprep.mubr.bf16.mxu0 %v16301_v8 }
 0x3af   :  { %12894 = vmatmul.mubr.bf16.gmra.mrb[44].mxu0 %v16313_v19 }
 0x3b0   :  { %12897 = vmatprep.mubr.bf16.mxu0 %v16319_v10 }
 0x3b7   :  { %12898 = vmatmul.mubr.bf16.gmra.mrb[48].mxu0 %v16331_v23 }
 0x3b8   :  { %12901 = vmatprep.mubr.bf16.mxu0 %v16337_v51 }
 0x3bf   :  { %12902 = vmatmul.mubr.bf16.gmra.mrb[52].mxu0 %v16349_v31 }
 0x3c0   :  { %12905 = vmatprep.mubr.bf16.mxu0 %v16355_v60 }
 0x3c7   :  { %12906 = vmatmul.mubr.bf16.gmra.mrb[56].mxu0 %v16367_v56 }
 0x3c8   :  { %12909 = vmatprep.mubr.bf16.mxu0 %v16373_v3 }
 0x3cf   :  { %12910 = vmatmul.mubr.bf16.gmra.mrb[60].mxu0 %v16381_v55 }
 0x3d0   :  { %12929 = vmatprep.mubr.bf16.mxu0 %v16118_v37  ;;  %v14925_v37 = vld [vmem:[#allocation6 + $0x228] sm:$0xff]  }
 0x3d7   :  { %12930 = vmatmul.mubr.bf16.vlgmr.msra.gmra.mrb[0].mxu0 %v16130_v17  ;;  %v14926_v17 = vld [vmem:[#allocation6 + $0x230] sm:$0xff]  }
 0x3d8   :  { %12994 = vmatpush3.bf16.msra.mxu0 %v16182_v7  ;;  %12933 = vmatprep.mubr.bf16.mxu0 %v16136_v21  ;;  %v14927_v7 = vld [vmem:[#allocation6 + $0x238] sm:$0xff]  }
 0x3d9   :  { %12995 = vmatprep.subr.bf16.mxu0 %v14921_v30 }
 0x3dc   :  { %12996 = vmatpush3.bf16.msra.mxu0 %v14921_v30 }
 0x3dd   :  { %12997 = vmatprep.subr.bf16.mxu0 %v14922_v40 }
 0x3df   :  { %12934 = vmatmul.mubr.bf16.gmra.mrb[4].mxu0 %v16148_v32 }
 0x3e0   :  { %12937 = vmatprep.mubr.bf16.mxu0 %v16154_v33  ;;  %12998 = vmatpush3.bf16.msra.mxu0 %v14922_v40 }
 0x3e1   :  { %12999 = vmatprep.subr.bf16.mxu0 %v14923_v50 }
 0x3e4   :  { %13000 = vmatpush3.bf16.msra.mxu0 %v14923_v50 }
 0x3e5   :  { %13001 = vmatprep.subr.bf16.mxu0 %v14924_v42 }
 0x3e7   :  { %12938 = vmatmul.mubr.bf16.gmra.mrb[8].mxu0 %v16166_v43 }
 0x3e8   :  { %12941 = vmatprep.mubr.bf16.mxu0 %v16172_v1  ;;  %13002 = vmatpush3.bf16.msra.mxu0 %v14924_v42 }
 0x3e9   :  { %13003 = vmatprep.subr.bf16.mxu0 %v14925_v37 }
 0x3ec   :  { %13004 = vmatpush3.bf16.msra.mxu0 %v14925_v37 }
 0x3ed   :  { %13005 = vmatprep.subr.bf16.mxu0 %v14926_v17 }
 0x3ef   :  { %12942 = vmatmul.mubr.bf16.gmra.mrb[12].mxu0 %v16186_v54 }
 0x3f0   :  { %12945 = vmatprep.mubr.bf16.mxu0 %v16192_v20  ;;  %13006 = vmatpush3.bf16.msra.mxu0 %v14926_v17 }
 0x3f1   :  { %13007 = vmatprep.subr.bf16.mxu0 %v14927_v7 }
 0x3f4   :  { %13008 = vmatpush3.bf16.msra.mxu0 %v14927_v7 }
 0x3f7   :  { %12946 = vmatmul.mubr.bf16.gmra.mrb[16].mxu0 %v16205_v53 }
 0x3f8   :  { %12949 = vmatprep.mubr.bf16.mxu0 %v16211_v12 }
 0x3ff   :  { %12950 = vmatmul.mubr.bf16.gmra.mrb[20].mxu0 %v16223_v39 }
 0x400   :  { %12953 = vmatprep.mubr.bf16.mxu0 %v16229_v13 }
 0x407   :  { %12954 = vmatmul.mubr.bf16.gmra.mrb[24].mxu0 %v16241_v38 }
 0x408   :  { %12957 = vmatprep.mubr.bf16.mxu0 %v16247_v45 }
 0x40f   :  { %12958 = vmatmul.mubr.bf16.gmra.mrb[28].mxu0 %v16259_v61 }
 0x410   :  { %12961 = vmatprep.mubr.bf16.mxu0 %v16265_v36 }
 0x417   :  { %12962 = vmatmul.mubr.bf16.gmra.mrb[32].mxu0 %v16277_v22 }
 0x418   :  { %12965 = vmatprep.mubr.bf16.mxu0 %v16283_v4 }
 0x41f   :  { %12966 = vmatmul.mubr.bf16.gmra.mrb[36].mxu0 %v16295_v47 }
 0x420   :  { %12969 = vmatprep.mubr.bf16.mxu0 %v16301_v8 }
 0x427   :  { %12970 = vmatmul.mubr.bf16.gmra.mrb[40].mxu0 %v16313_v19 }
 0x428   :  { %12973 = vmatprep.mubr.bf16.mxu0 %v16319_v10 }
 0x42f   :  { %12974 = vmatmul.mubr.bf16.gmra.mrb[44].mxu0 %v16331_v23 }
 0x430   :  { %12977 = vmatprep.mubr.bf16.mxu0 %v16337_v51 }
 0x437   :  { %12978 = vmatmul.mubr.bf16.gmra.mrb[48].mxu0 %v16349_v31 }
 0x438   :  { %12981 = vmatprep.mubr.bf16.mxu0 %v16355_v60 }
 0x43f   :  { %12982 = vmatmul.mubr.bf16.gmra.mrb[52].mxu0 %v16367_v56 }
 0x440   :  { %12985 = vmatprep.mubr.bf16.mxu0 %v16373_v3 }
 0x447   :  { %12986 = vmatmul.mubr.bf16.gmra.mrb[56].mxu0 %v16381_v55 }
 0x448   :  { %12989 = vmatprep.mubr.bf16.mxu0 %v730_v28 }
 0x44f   :  { %12990 = vmatmul.mubr.bf16.gmra.mrb[60].mxu0 %v731_v6 }
 0x450   :  { %13009 = vmatprep.mubr.bf16.mxu0 %v16136_v21  ;;  %v14932_v21 = vld [vmem:[#allocation8 + $0xe0] sm:$0xff]  }
 0x451   :  { %13081 = vmatprep.subr.bf16.mxu1 %v14932_v21 }
 0x452   :  { %13082 = vmatpush3.bf16.msra.mxu1 %v14932_v21 }
 0x457   :  { %13010 = vmatmul.mubr.bf16.vlgmr.msra.gmra.mrb[0].mxu0 %v16148_v32  ;;  %v14933_v32 = vld [vmem:[#allocation8 + $0xe8] sm:$0xff]  }
 0x458   :  { %13013 = vmatprep.mubr.bf16.mxu0 %v16154_v33  ;;  %13083 = vmatprep.subr.bf16.mxu1 %v14933_v32  ;;  %v14934_v33 = vld [vmem:[#allocation8 + $0xf0] sm:$0xff]  }
 0x459   :  { %13084 = vmatpush3.bf16.msra.mxu1 %v14933_v32  ;;  %v14937_v32 = vld [vmem:[#allocation8 + $0x8] sm:$0xff]  }
 0x45a   :  { %13085 = vmatprep.subr.bf16.mxu1 %v14934_v33 }
 0x45d   :  { %13086 = vmatpush3.bf16.msra.mxu1 %v14934_v33 }
 0x45f   :  { %13014 = vmatmul.mubr.bf16.gmra.mrb[4].mxu0 %v16166_v43  ;;  %v14935_v43 = vld [vmem:[#allocation8 + $0xf8] sm:$0xff]  }
 0x460   :  { %13017 = vmatprep.mubr.bf16.mxu0 %v16172_v1  ;;  %13087 = vmatprep.subr.bf16.mxu1 %v14935_v43  ;;  %v16455_v1 = vld [vmem:[#allocation8] sm:$0xff]  }
 0x461   :  { %13088 = vmatpush3.bf16.msra.mxu1 %v14935_v43 }
 0x462   :  { %13153 = vmatprep.subr.bf16.mxu1 %v16455_v1 }
 0x467   :  { %13018 = vmatmul.mubr.bf16.gmra.mrb[8].mxu0 %v16186_v54  ;;  %v16463_v54 = vld [vmem:[%s19515_s2] ss:$0 sm:$0xff] }
 0x468   :  { %13021 = vmatprep.mubr.bf16.mxu0 %v16192_v20 }
 0x46f   :  { %13022 = vmatmul.mubr.bf16.gmra.mrb[12].mxu0 %v16205_v53  ;;  %v16468_v53 = vld [vmem:[%s19516_s3] ss:$0 sm:$0xff] }
 0x470   :  { %13025 = vmatprep.mubr.bf16.mxu0 %v16211_v12 }
 0x477   :  { %13026 = vmatmul.mubr.bf16.gmra.mrb[16].mxu0 %v16223_v39 }
 0x478   :  { %13029 = vmatprep.mubr.bf16.mxu0 %v16229_v13 }
 0x47f   :  { %13030 = vmatmul.mubr.bf16.gmra.mrb[20].mxu0 %v16241_v38 }
 0x480   :  { %13033 = vmatprep.mubr.bf16.mxu0 %v16247_v45 }
 0x487   :  { %13034 = vmatmul.mubr.bf16.gmra.mrb[24].mxu0 %v16259_v61 }
 0x488   :  { %13037 = vmatprep.mubr.bf16.mxu0 %v16265_v36 }
 0x48f   :  { %13038 = vmatmul.mubr.bf16.gmra.mrb[28].mxu0 %v16277_v22 }
 0x490   :  { %13041 = vmatprep.mubr.bf16.mxu0 %v16283_v4 }
 0x497   :  { %13042 = vmatmul.mubr.bf16.gmra.mrb[32].mxu0 %v16295_v47 }
 0x498   :  { %13045 = vmatprep.mubr.bf16.mxu0 %v16301_v8 }
 0x49f   :  { %13046 = vmatmul.mubr.bf16.gmra.mrb[36].mxu0 %v16313_v19 }
 0x4a0   :  { %13049 = vmatprep.mubr.bf16.mxu0 %v16319_v10 }
 0x4a7   :  { %13050 = vmatmul.mubr.bf16.gmra.mrb[40].mxu0 %v16331_v23 }
 0x4a8   :  { %13053 = vmatprep.mubr.bf16.mxu0 %v16337_v51 }
 0x4af   :  { %13054 = vmatmul.mubr.bf16.gmra.mrb[44].mxu0 %v16349_v31 }
 0x4b0   :  { %13057 = vmatprep.mubr.bf16.mxu0 %v16355_v60 }
 0x4b7   :  { %13058 = vmatmul.mubr.bf16.gmra.mrb[48].mxu0 %v16367_v56 }
 0x4b8   :  { %13061 = vmatprep.mubr.bf16.mxu0 %v16373_v3 }
 0x4bf   :  { %13062 = vmatmul.mubr.bf16.gmra.mrb[52].mxu0 %v16381_v55 }
 0x4c0   :  { %13065 = vmatprep.mubr.bf16.mxu0 %v730_v28 }
 0x4c7   :  { %13066 = vmatmul.mubr.bf16.gmra.mrb[56].mxu0 %v731_v6 }
 0x4c8   :  { %13069 = vmatprep.mubr.bf16.mxu0 %v19597_v29 }
 0x4cf   :  { %13070 = vmatmul.mubr.bf16.gmra.mrb[60].mxu0 %v19597_v29 }
 0x52a   :  { %v13011_v20 = vpop.f32.mrb[0].mxu0 }
 0x52b   :  { %v4796_v12 = vmul.f32 %v13011_v20, %v16463_v54  ;;  %v4468_v39 = vpop.f32.mrb[1].mxu0 }
 0x52c   :  { %v4794_v13 = vmul.f32 %v16463_v54, %v4468_v39  ;;  %v13012_v38 = vpop.f32.mrb[2].mxu0 }
 0x52d   :  { %v4867_v45 = vadd.f32 %v16468_v53, %v4796_v12  ;;  %v4797_v61 = vmul.f32 %v13012_v38, %v16463_v54  ;;  %v4471_v36 = vpop.f32.mrb[3].mxu0 }
 0x52e   :  { %v4865_v22 = vadd.f32 %v16468_v53, %v4794_v13  ;;  %v4795_v4 = vmul.f32 %v16463_v54, %v4471_v36 }
 0x52f   :  { %v4868_v47 = vadd.f32 %v16468_v53, %v4797_v61  ;;  %v4931_v19 = vmax.f32 %v4867_v45, 0.0 }
 0x530   :  { %v4866_v8 = vadd.f32 %v16468_v53, %v4795_v4  ;;  %v4929_v23 = vmax.f32 %v4865_v22, 0.0 }
 0x531   :  { %v4932_v10 = vmax.f32 %v4868_v47, 0.0 }
 0x532   :  { %v4930_v51 = vmax.f32 %v4866_v8, 0.0  ;;  %v13015_v52 = vpop.f32.mrb[4].mxu0 }
 0x533   :  { %v16478_v58 = vpack.c.bf16 %v4932_v10, %v4931_v19  ;;  %v4800_v31 = vmul.f32 %v13015_v52, %v16463_v54  ;;  %v4484_v48 = vpop.f32.mrb[5].mxu0  ;;  %v14938_v19 = vld [vmem:[#allocation8 + $0x10] sm:$0xff]  }
 0x534   :  { %v16481_v49 = vpack.c.bf16 %v4930_v51, %v4929_v23  ;;  %v4798_v60 = vmul.f32 %v16463_v54, %v4484_v48  ;;  %v13016_v18 = vpop.f32.mrb[6].mxu0 }
 0x535   :  { %v4871_v25 = vadd.f32 %v16468_v53, %v4800_v31  ;;  %v4801_v9 = vmul.f32 %v13016_v18, %v16463_v54  ;;  %v4487_v26 = vpop.f32.mrb[7].mxu0  ;;  %v5033_v59 = vshrl.u32 %v16478_v58, 16  ;;  %v5036_v63 = vshll.u32 %v16478_v58, 16 }
 0x536   :  { %v4869_v56 = vadd.f32 %v16468_v53, %v4798_v60  ;;  %v4799_v62 = vmul.f32 %v16463_v54, %v4487_v26  ;;  %v5026_v3 = vshrl.u32 %v16481_v49, 16  ;;  %v5029_v35 = vshll.u32 %v16481_v49, 16 }
 0x537   :  { %v4872_v27 = vadd.f32 %v16468_v53, %v4801_v9  ;;  %v5035_v55 = vrot.slane %v5033_v59, 7  ;;  %v5315_v30 = vrot.slane %v5036_v63, 1  ;;  %v4935_v37 = vmax.f32 %v4871_v25, 0.0 }
 0x538   :  { %v4870_v40 = vadd.f32 %v16468_v53, %v4799_v62  ;;  %v5028_v50 = vrot.slane %v5026_v3, 7  ;;  %v5313_v42 = vrot.slane %v5029_v35, 1  ;;  %v4933_v57 = vmax.f32 %v4869_v56, 0.0 }
 0x539   :  { %v4936_v17 = vmax.f32 %v4872_v27, 0.0  ;;  %v5038_v7 = vor.u32 %v5036_v63, %v5035_v55  ;;  %v16494_v11 = vor.u32 %v5315_v30, %v5033_v59  ;;  %v14939_v27 = vld [vmem:[#allocation8 + $0x18] sm:$0xff]  }
 0x53a   :  { %v4934_v2 = vmax.f32 %v4870_v40, 0.0  ;;  %v13019_v41 = vpop.f32.mrb[8].mxu0  ;;  %v5031_v24 = vor.u32 %v5029_v35, %v5028_v50  ;;  %v16496_v28 = vor.u32 %v5313_v42, %v5026_v3 }
 0x53b   :  { %19894 = vst [vmem:[#allocation14_spill] sm:$0xff] %v16494_v11  ;;  %v16498_v34 = vpack.c.bf16 %v4936_v17, %v4935_v37  ;;  %v4804_v15 = vmul.f32 %v13019_v41, %v16463_v54  ;;  %v4500_v6 = vpop.f32.mrb[9].mxu0  ;;  %v16510_v21 = vsel %vm15537_vm2, 0, %v5038_v7 }
 0x53c   :  { %19895 = vst [vmem:[#allocation15_spill] sm:$0xff] %v16496_v28  ;;  %v16501_v44 = vpack.c.bf16 %v4934_v2, %v4933_v57  ;;  %v4802_v16 = vmul.f32 %v16463_v54, %v4500_v6  ;;  %v13020_v0 = vpop.f32.mrb[10].mxu0  ;;  %v16506_v46 = vsel %vm15537_vm2, 0, %v5031_v24 }
 0x53d   :  { %v4875_v33 = vadd.f32 %v16468_v53, %v4804_v15  ;;  %v4805_v43 = vmul.f32 %v13020_v0, %v16463_v54  ;;  %v4503_v20 = vpop.f32.mrb[11].mxu0  ;;  %13089 = vmatprep.mubr.bf16.mxu1 %v16506_v46  ;;  %v5047_v12 = vshrl.u32 %v16498_v34, 16  ;;  %v5050_v39 = vshll.u32 %v16498_v34, 16 }
 0x53e   :  { %v4873_v13 = vadd.f32 %v16468_v53, %v4802_v16  ;;  %v4803_v38 = vmul.f32 %v16463_v54, %v4503_v20  ;;  %13090 = vmatmul.mubr.bf16.vlgmr.msra.gmra.mrb[0].mxu1 %v16510_v21  ;;  %v5040_v45 = vshrl.u32 %v16501_v44, 16  ;;  %v5043_v61 = vshll.u32 %v16501_v44, 16  ;;  %v14940_v16 = vld [vmem:[#allocation8 + $0x20] sm:$0xff]  }
 0x53f   :  { %v4876_v36 = vadd.f32 %v16468_v53, %v4805_v43  ;;  %13154 = vmatpush3.bf16.msra.mxu1 %v16455_v1  ;;  %v5049_v22 = vrot.slane %v5047_v12, 7  ;;  %v5319_v4 = vrot.slane %v5050_v39, 1  ;;  %v4939_v23 = vmax.f32 %v4875_v33, 0.0 }
 0x540   :  { %v4874_v47 = vadd.f32 %v16468_v53, %v4803_v38  ;;  %v5042_v8 = vrot.slane %v5040_v45, 7  ;;  %13155 = vmatprep.subr.bf16.mxu1 %v14937_v32  ;;  %v5317_v10 = vrot.slane %v5043_v61, 1  ;;  %v4937_v48 = vmax.f32 %v4873_v13, 0.0 }
 0x541   :  { %v4940_v51 = vmax.f32 %v4876_v36, 0.0  ;;  %v5052_v52 = vor.u32 %v5050_v39, %v5049_v22  ;;  %v16525_v31 = vor.u32 %v5319_v4, %v5047_v12 }
 0x542   :  { %v4938_v60 = vmax.f32 %v4874_v47, 0.0  ;;  %v13023_v18 = vpop.f32.mrb[12].mxu0  ;;  %v5045_v25 = vor.u32 %v5043_v61, %v5042_v8  ;;  %v16527_v9 = vor.u32 %v5317_v10, %v5040_v45 }
 0x543   :  { %19896 = vst [vmem:[#allocation16_spill] sm:$0xff] %v16525_v31  ;;  %v16529_v1 = vpack.c.bf16 %v4940_v51, %v4939_v23  ;;  %v4808_v26 = vmul.f32 %v13023_v18, %v16463_v54  ;;  %v4516_v59 = vpop.f32.mrb[13].mxu0  ;;  %13156 = vmatpush3.bf16.msra.mxu1 %v14937_v32  ;;  %v16541_v35 = vsel %vm15537_vm2, 0, %v5052_v52  ;;  %v14941_v23 = vld [vmem:[#allocation8 + $0x28] sm:$0xff]  }
 0x544   :  { %19897 = vst [vmem:[#allocation17_spill] sm:$0xff] %v16527_v9  ;;  %v16532_v63 = vpack.c.bf16 %v4938_v60, %v4937_v48  ;;  %v4806_v56 = vmul.f32 %v16463_v54, %v4516_v59  ;;  %v13024_v62 = vpop.f32.mrb[14].mxu0  ;;  %v16537_v3 = vsel %vm15537_vm2, 0, %v5045_v25  ;;  %13157 = vmatprep.subr.bf16.mxu1 %v14938_v19 }
 0x545   :  { %v4879_v55 = vadd.f32 %v16468_v53, %v4808_v26  ;;  %v4809_v30 = vmul.f32 %v13024_v62, %v16463_v54  ;;  %v4519_v40 = vpop.f32.mrb[15].mxu0  ;;  %13093 = vmatprep.mubr.bf16.mxu1 %v16537_v3  ;;  %v5061_v50 = vshrl.u32 %v16529_v1, 16  ;;  %v5064_v42 = vshll.u32 %v16529_v1, 16 }
 0x546   :  { %v4877_v37 = vadd.f32 %v16468_v53, %v4806_v56  ;;  %v4807_v17 = vmul.f32 %v16463_v54, %v4519_v40  ;;  %13094 = vmatmul.mubr.bf16.gmra.mrb[4].mxu1 %v16541_v35  ;;  %v5054_v7 = vshrl.u32 %v16532_v63, 16  ;;  %v5057_v57 = vshll.u32 %v16532_v63, 16 }
 0x547   :  { %v4880_v2 = vadd.f32 %v16468_v53, %v4809_v30  ;;  %v5063_v41 = vrot.slane %v5061_v50, 7  ;;  %13158 = vmatpush3.bf16.msra.mxu1 %v14938_v19  ;;  %v5323_v24 = vrot.slane %v5064_v42, 1  ;;  %v4943_v32 = vmax.f32 %v4879_v55, 0.0 }
 0x548   :  { %v4878_v15 = vadd.f32 %v16468_v53, %v4807_v17  ;;  %v5056_v6 = vrot.slane %v5054_v7, 7  ;;  %13159 = vmatprep.subr.bf16.mxu1 %v14939_v27  ;;  %v5321_v0 = vrot.slane %v5057_v57, 1  ;;  %v4941_v12 = vmax.f32 %v4877_v37, 0.0 }
 0x549   :  { %v4944_v33 = vmax.f32 %v4880_v2, 0.0  ;;  %v5066_v43 = vor.u32 %v5064_v42, %v5063_v41  ;;  %v16555_v20 = vor.u32 %v5323_v24, %v5061_v50  ;;  %v14942_v50 = vld [vmem:[#allocation8 + $0x30] sm:$0xff]  }
 0x54a   :  { %v4942_v39 = vmax.f32 %v4878_v15, 0.0  ;;  %v13027_v13 = vpop.f32.mrb[16].mxu0  ;;  %v5059_v38 = vor.u32 %v5057_v57, %v5056_v6  ;;  %v16557_v45 = vor.u32 %v5321_v0, %v5054_v7 }
 0x54b   :  { %19898 = vst [vmem:[#allocation18_spill] sm:$0xff] %v16555_v20  ;;  %v16559_v61 = vpack.c.bf16 %v4944_v33, %v4943_v32  ;;  %v4812_v36 = vmul.f32 %v13027_v13, %v16463_v54  ;;  %v4532_v22 = vpop.f32.mrb[17].mxu0  ;;  %13160 = vmatpush3.bf16.msra.mxu1 %v14939_v27  ;;  %v16571_v10 = vsel %vm15537_vm2, 0, %v5066_v43 }
 0x54c   :  { %19899 = vst [vmem:[#allocation19_spill] sm:$0xff] %v16557_v45  ;;  %v16562_v4 = vpack.c.bf16 %v4942_v39, %v4941_v12  ;;  %v4810_v47 = vmul.f32 %v16463_v54, %v4532_v22  ;;  %v13028_v8 = vpop.f32.mrb[18].mxu0  ;;  %v16567_v19 = vsel %vm15537_vm2, 0, %v5059_v38  ;;  %13161 = vmatprep.subr.bf16.mxu1 %v14940_v16  ;;  %v14943_v38 = vld [vmem:[#allocation8 + $0x38] sm:$0xff]  }
 0x54d   :  { %v4883_v51 = vadd.f32 %v16468_v53, %v4812_v36  ;;  %v4813_v52 = vmul.f32 %v13028_v8, %v16463_v54  ;;  %v4535_v48 = vpop.f32.mrb[19].mxu0  ;;  %13097 = vmatprep.mubr.bf16.mxu1 %v16567_v19  ;;  %v5075_v60 = vshrl.u32 %v16559_v61, 16  ;;  %v5078_v18 = vshll.u32 %v16559_v61, 16 }
 0x54e   :  { %v4881_v25 = vadd.f32 %v16468_v53, %v4810_v47  ;;  %v4811_v26 = vmul.f32 %v16463_v54, %v4535_v48  ;;  %13098 = vmatmul.mubr.bf16.gmra.mrb[8].mxu1 %v16571_v10  ;;  %v5068_v59 = vshrl.u32 %v16562_v4, 16  ;;  %v5071_v56 = vshll.u32 %v16562_v4, 16 }
 0x54f   :  { %v4884_v62 = vadd.f32 %v16468_v53, %v4813_v52  ;;  %v5077_v27 = vrot.slane %v5075_v60, 7  ;;  %13162 = vmatpush3.bf16.msra.mxu1 %v14940_v16  ;;  %v5327_v55 = vrot.slane %v5078_v18, 1  ;;  %v4947_v37 = vmax.f32 %v4883_v51, 0.0 }
 0x550   :  { %v4882_v30 = vadd.f32 %v16468_v53, %v4811_v26  ;;  %v5070_v40 = vrot.slane %v5068_v59, 7  ;;  %13163 = vmatprep.subr.bf16.mxu1 %v14941_v23  ;;  %v5325_v42 = vrot.slane %v5071_v56, 1  ;;  %v4945_v2 = vmax.f32 %v4881_v25, 0.0 }
 0x551   :  { %v4948_v17 = vmax.f32 %v4884_v62, 0.0  ;;  %v5080_v7 = vor.u32 %v5078_v18, %v5077_v27  ;;  %v16585_v57 = vor.u32 %v5327_v55, %v5075_v60  ;;  %v16615_v62 = vld [vmem:[#allocation8 + $0x180] sm:$0xff]  }
 0x552   :  { %v4946_v41 = vmax.f32 %v4882_v30, 0.0  ;;  %v13031_v24 = vpop.f32.mrb[20].mxu0  ;;  %v5073_v15 = vor.u32 %v5071_v56, %v5070_v40  ;;  %v16587_v6 = vor.u32 %v5325_v42, %v5068_v59 }
 0x553   :  { %19900 = vst [vmem:[#allocation20_spill] sm:$0xff] %v16585_v57  ;;  %v16589_v0 = vpack.c.bf16 %v4948_v17, %v4947_v37  ;;  %v4816_v16 = vmul.f32 %v13031_v24, %v16463_v54  ;;  %v4548_v32 = vpop.f32.mrb[21].mxu0  ;;  %13164 = vmatpush3.bf16.msra.mxu1 %v14941_v23  ;;  %v16601_v13 = vsel %vm15537_vm2, 0, %v5080_v7 }
 0x554   :  { %19901 = vst [vmem:[#allocation21_spill] sm:$0xff] %v16587_v6  ;;  %v16592_v33 = vpack.c.bf16 %v4946_v41, %v4945_v2  ;;  %v4814_v43 = vmul.f32 %v16463_v54, %v4548_v32  ;;  %v13032_v12 = vpop.f32.mrb[22].mxu0  ;;  %v16597_v39 = vsel %vm15537_vm2, 0, %v5073_v15  ;;  %13165 = vmatprep.subr.bf16.mxu1 %v14942_v50 }
 0x555   :  { %19902 = vst [vmem:[#allocation22_spill] sm:$0xff] %v16589_v0  ;;  %v4887_v36 = vadd.f32 %v16468_v53, %v4816_v16  ;;  %v4817_v22 = vmul.f32 %v13032_v12, %v16463_v54  ;;  %v4551_v47 = vpop.f32.mrb[23].mxu0  ;;  %13101 = vmatprep.mubr.bf16.mxu1 %v16597_v39  ;;  %v5089_v8 = vshrl.u32 %v16589_v0, 16  ;;  %v5092_v23 = vshll.u32 %v16589_v0, 16 }
 0x556   :  { %19903 = vst [vmem:[#allocation23_spill] sm:$0xff] %v16592_v33  ;;  %v4885_v51 = vadd.f32 %v16468_v53, %v4814_v43  ;;  %v4815_v52 = vmul.f32 %v16463_v54, %v4551_v47  ;;  %13102 = vmatmul.mubr.bf16.gmra.mrb[12].mxu1 %v16601_v13  ;;  %v5082_v48 = vshrl.u32 %v16592_v33, 16  ;;  %v5085_v60 = vshll.u32 %v16592_v33, 16 }
 0x557   :  { %v4888_v18 = vadd.f32 %v16468_v53, %v4817_v22  ;;  %v5091_v25 = vrot.slane %v5089_v8, 7  ;;  %13166 = vmatpush3.bf16.msra.mxu1 %v14942_v50  ;;  %v5331_v26 = vrot.slane %v5092_v23, 1  ;;  %v4951_v55 = vmax.f32 %v4887_v36, 0.0 }
 0x558   :  { %v4886_v59 = vadd.f32 %v16468_v53, %v4815_v52  ;;  %v5084_v56 = vrot.slane %v5082_v48, 7  ;;  %13167 = vmatprep.subr.bf16.mxu1 %v14943_v38  ;;  %v5329_v27 = vrot.slane %v5085_v60, 1  ;;  %v4949_v37 = vmax.f32 %v4885_v51, 0.0 }
 0x559   :  { %v4952_v30 = vmax.f32 %v4888_v18, 0.0  ;;  %v5094_v40 = vor.u32 %v5092_v23, %v5091_v25  ;;  %v16617_v42 = vor.u32 %v5331_v26, %v5089_v8 }
 0x55a   :  { %v4950_v17 = vmax.f32 %v4886_v59, 0.0  ;;  %v13035_v7 = vpop.f32.mrb[24].mxu0  ;;  %v5087_v2 = vor.u32 %v5085_v60, %v5084_v56  ;;  %v16619_v41 = vor.u32 %v5329_v27, %v5082_v48 }
 0x55b   :  { %19904 = vst [vmem:[#allocation24_spill] sm:$0xff] %v16617_v42  ;;  %v16621_v50 = vpack.c.bf16 %v4952_v30, %v4951_v55  ;;  %v4820_v24 = vmul.f32 %v13035_v7, %v16463_v54  ;;  %v4564_v15 = vpop.f32.mrb[25].mxu0  ;;  %13168 = vmatpush3.bf16.msra.mxu1 %v14943_v38  ;;  %v16633_v36 = vsel %vm15537_vm2, 0, %v5094_v40 }
 0x55c   :  { %19905 = vst [vmem:[#allocation25_spill] sm:$0xff] %v16619_v41  ;;  %v16624_v16 = vpack.c.bf16 %v4950_v17, %v4949_v37  ;;  %v4818_v32 = vmul.f32 %v16463_v54, %v4564_v15  ;;  %v13036_v43 = vpop.f32.mrb[26].mxu0  ;;  %v16629_v12 = vsel %vm15537_vm2, 0, %v5087_v2  ;;  %13233 = vmatprep.subr.bf16.mxu1 %v16615_v62 }
 0x55d   :  { %19906 = vst [vmem:[#allocation26_spill] sm:$0xff] %v16621_v50  ;;  %v4891_v22 = vadd.f32 %v16468_v53, %v4820_v24  ;;  %v4821_v47 = vmul.f32 %v13036_v43, %v16463_v54  ;;  %v4567_v38 = vpop.f32.mrb[27].mxu0  ;;  %13105 = vmatprep.mubr.bf16.mxu1 %v16629_v12  ;;  %v5103_v8 = vshrl.u32 %v16621_v50, 16  ;;  %v5106_v23 = vshll.u32 %v16621_v50, 16 }
 0x55e   :  { %19907 = vst [vmem:[#allocation27_spill] sm:$0xff] %v16624_v16  ;;  %v4889_v51 = vadd.f32 %v16468_v53, %v4818_v32  ;;  %v4819_v52 = vmul.f32 %v16463_v54, %v4567_v38  ;;  %13106 = vmatmul.mubr.bf16.gmra.mrb[16].mxu1 %v16633_v36  ;;  %v5096_v48 = vshrl.u32 %v16624_v16, 16  ;;  %v5099_v60 = vshll.u32 %v16624_v16, 16 }
 0x55f   :  { %v4892_v18 = vadd.f32 %v16468_v53, %v4821_v47  ;;  %v5105_v25 = vrot.slane %v5103_v8, 7  ;;  %v5335_v26 = vrot.slane %v5106_v23, 1  ;;  %v4955_v55 = vmax.f32 %v4891_v22, 0.0 }
 0x560   :  { %v4890_v59 = vadd.f32 %v16468_v53, %v4819_v52  ;;  %v5098_v56 = vrot.slane %v5096_v48, 7  ;;  %v5333_v27 = vrot.slane %v5099_v60, 1  ;;  %v4953_v17 = vmax.f32 %v4889_v51, 0.0 }
 0x561   :  { %v4956_v30 = vmax.f32 %v4892_v18, 0.0  ;;  %v5108_v40 = vor.u32 %v5106_v23, %v5105_v25  ;;  %v16648_v37 = vor.u32 %v5335_v26, %v5103_v8 }
 0x562   :  { %v4954_v7 = vmax.f32 %v4890_v59, 0.0  ;;  %v13039_v2 = vpop.f32.mrb[28].mxu0  ;;  %v5101_v24 = vor.u32 %v5099_v60, %v5098_v56  ;;  %v16650_v15 = vor.u32 %v5333_v27, %v5096_v48 }
 0x563   :  { %19908 = vst [vmem:[#allocation28_spill] sm:$0xff] %v16648_v37  ;;  %v16652_v32 = vpack.c.bf16 %v4956_v30, %v4955_v55  ;;  %v4824_v43 = vmul.f32 %v13039_v2, %v16463_v54  ;;  %v4580_v47 = vpop.f32.mrb[29].mxu0  ;;  %v16664_v23 = vsel %vm15537_vm2, 0, %v5108_v40 }
 0x564   :  { %19909 = vst [vmem:[#allocation29_spill] sm:$0xff] %v16650_v15  ;;  %v16655_v38 = vpack.c.bf16 %v4954_v7, %v4953_v17  ;;  %v4822_v52 = vmul.f32 %v16463_v54, %v4580_v47  ;;  %v13040_v22 = vpop.f32.mrb[30].mxu0  ;;  %v16660_v8 = vsel %vm15537_vm2, 0, %v5101_v24 }
 0x565   :  { %19910 = vst [vmem:[#allocation30_spill] sm:$0xff] %v16652_v32  ;;  %v4895_v51 = vadd.f32 %v16468_v53, %v4824_v43  ;;  %v4825_v48 = vmul.f32 %v13040_v22, %v16463_v54  ;;  %v4583_v60 = vpop.f32.mrb[31].mxu0  ;;  %13109 = vmatprep.mubr.bf16.mxu1 %v16660_v8  ;;  %v5117_v18 = vshrl.u32 %v16652_v32, 16  ;;  %v5120_v25 = vshll.u32 %v16652_v32, 16 }
 0x566   :  { %19911 = vst [vmem:[#allocation31_spill] sm:$0xff] %v16655_v38  ;;  %v4893_v26 = vadd.f32 %v16468_v53, %v4822_v52  ;;  %v4823_v59 = vmul.f32 %v16463_v54, %v4583_v60  ;;  %13110 = vmatmul.mubr.bf16.gmra.mrb[20].mxu1 %v16664_v23  ;;  %v5110_v56 = vshrl.u32 %v16655_v38, 16  ;;  %v5113_v27 = vshll.u32 %v16655_v38, 16 }
 0x567   :  { %v4896_v55 = vadd.f32 %v16468_v53, %v4825_v48  ;;  %v5119_v30 = vrot.slane %v5117_v18, 7  ;;  %v5339_v40 = vrot.slane %v5120_v25, 1  ;;  %v4959_v24 = vmax.f32 %v4895_v51, 0.0 }
 0x568   :  { %v4894_v17 = vadd.f32 %v16468_v53, %v4823_v59  ;;  %v5112_v7 = vrot.slane %v5110_v56, 7  ;;  %v5337_v2 = vrot.slane %v5113_v27, 1  ;;  %v4957_v22 = vmax.f32 %v4893_v26, 0.0 }
 0x569   :  { %v4960_v43 = vmax.f32 %v4896_v55, 0.0  ;;  %v5122_v47 = vor.u32 %v5120_v25, %v5119_v30  ;;  %v16678_v52 = vor.u32 %v5339_v40, %v5117_v18 }
 0x56a   :  { %v4958_v60 = vmax.f32 %v4894_v17, 0.0  ;;  %v13043_v29 = vpop.f32.mrb[32].mxu0  ;;  %v5115_v37 = vor.u32 %v5113_v27, %v5112_v7  ;;  %v16680_v15 = vor.u32 %v5337_v2, %v5110_v56 }
 0x56b   :  { %19912 = vst [vmem:[#allocation32_spill] sm:$0xff] %v16678_v52  ;;  %v16682_v42 = vpack.c.bf16 %v4960_v43, %v4959_v24  ;;  %v4828_v48 = vmul.f32 %v13043_v29, %v16463_v54  ;;  %v4596_v41 = vpop.f32.mrb[33].mxu0  ;;  %v16694_v25 = vsel %vm15537_vm2, 0, %v5122_v47 }
 0x56c   :  { %19913 = vst [vmem:[#allocation33_spill] sm:$0xff] %v16680_v15  ;;  %v16685_v57 = vpack.c.bf16 %v4958_v60, %v4957_v22  ;;  %v4826_v59 = vmul.f32 %v16463_v54, %v4596_v41  ;;  %v13044_v51 = vpop.f32.mrb[34].mxu0  ;;  %v16690_v18 = vsel %vm15537_vm2, 0, %v5115_v37 }
 0x56d   :  { %19914 = vst [vmem:[#allocation34_spill] sm:$0xff] %v16682_v42  ;;  %v4899_v26 = vadd.f32 %v16468_v53, %v4828_v48  ;;  %v4829_v56 = vmul.f32 %v13044_v51, %v16463_v54  ;;  %v4599_v27 = vpop.f32.mrb[35].mxu0  ;;  %13113 = vmatprep.mubr.bf16.mxu1 %v16690_v18  ;;  %v5131_v29 = vshrl.u32 %v16682_v42, 16  ;;  %v5134_v41 = vshll.u32 %v16682_v42, 16 }
 0x56e   :  { %19915 = vst [vmem:[#allocation35_spill] sm:$0xff] %v16685_v57  ;;  %v4897_v55 = vadd.f32 %v16468_v53, %v4826_v59  ;;  %v4827_v37 = vmul.f32 %v16463_v54, %v4599_v27  ;;  %13114 = vmatmul.mubr.bf16.gmra.mrb[24].mxu1 %v16694_v25  ;;  %v5124_v30 = vshrl.u32 %v16685_v57, 16  ;;  %v5127_v40 = vshll.u32 %v16685_v57, 16 }
 0x56f   :  { %v4900_v17 = vadd.f32 %v16468_v53, %v4829_v56  ;;  %v5133_v7 = vrot.slane %v5131_v29, 7  ;;  %v5343_v2 = vrot.slane %v5134_v41, 1  ;;  %v4963_v22 = vmax.f32 %v4899_v26, 0.0 }
 0x570   :  { %v4898_v24 = vadd.f32 %v16468_v53, %v4827_v37  ;;  %v5126_v43 = vrot.slane %v5124_v30, 7  ;;  %v5341_v47 = vrot.slane %v5127_v40, 1  ;;  %v4961_v51 = vmax.f32 %v4897_v55, 0.0 }
 0x571   :  { %v4964_v60 = vmax.f32 %v4900_v17, 0.0  ;;  %v5136_v48 = vor.u32 %v5134_v41, %v5133_v7  ;;  %v16708_v59 = vor.u32 %v5343_v2, %v5131_v29 }
 0x572   :  { %v4962_v27 = vmax.f32 %v4898_v24, 0.0  ;;  %v13047_v52 = vpop.f32.mrb[36].mxu0  ;;  %v5129_v15 = vor.u32 %v5127_v40, %v5126_v43  ;;  %v16710_v6 = vor.u32 %v5341_v47, %v5124_v30 }
 0x573   :  { %19916 = vst [vmem:[#allocation36_spill] sm:$0xff] %v16708_v59  ;;  %v16712_v20 = vpack.c.bf16 %v4964_v60, %v4963_v22  ;;  %v4832_v56 = vmul.f32 %v13047_v52, %v16463_v54  ;;  %v4612_v45 = vpop.f32.mrb[37].mxu0  ;;  %v16724_v41 = vsel %vm15537_vm2, 0, %v5136_v48 }
 0x574   :  { %19917 = vst [vmem:[#allocation37_spill] sm:$0xff] %v16710_v6  ;;  %v16715_v31 = vpack.c.bf16 %v4962_v27, %v4961_v51  ;;  %v4830_v37 = vmul.f32 %v16463_v54, %v4612_v45  ;;  %v13048_v26 = vpop.f32.mrb[38].mxu0  ;;  %v16720_v29 = vsel %vm15537_vm2, 0, %v5129_v15 }
 0x575   :  { %19918 = vst [vmem:[#allocation38_spill] sm:$0xff] %v16712_v20  ;;  %v4903_v55 = vadd.f32 %v16468_v53, %v4832_v56  ;;  %v4833_v30 = vmul.f32 %v13048_v26, %v16463_v54  ;;  %v4615_v40 = vpop.f32.mrb[39].mxu0  ;;  %13117 = vmatprep.mubr.bf16.mxu1 %v16720_v29  ;;  %v5145_v52 = vshrl.u32 %v16712_v20, 16  ;;  %v5148_v45 = vshll.u32 %v16712_v20, 16 }
 0x576   :  { %19919 = vst [vmem:[#allocation39_spill] sm:$0xff] %v16715_v31  ;;  %v4901_v17 = vadd.f32 %v16468_v53, %v4830_v37  ;;  %v4831_v15 = vmul.f32 %v16463_v54, %v4615_v40  ;;  %13118 = vmatmul.mubr.bf16.gmra.mrb[28].mxu1 %v16724_v41  ;;  %v5138_v7 = vshrl.u32 %v16715_v31, 16  ;;  %v5141_v2 = vshll.u32 %v16715_v31, 16 }
 0x577   :  { %v4904_v24 = vadd.f32 %v16468_v53, %v4833_v30  ;;  %v5147_v43 = vrot.slane %v5145_v52, 7  ;;  %v5347_v47 = vrot.slane %v5148_v45, 1  ;;  %v4967_v51 = vmax.f32 %v4903_v55, 0.0 }
 0x578   :  { %v4902_v22 = vadd.f32 %v16468_v53, %v4831_v15  ;;  %v5140_v60 = vrot.slane %v5138_v7, 7  ;;  %v5345_v48 = vrot.slane %v5141_v2, 1  ;;  %v4965_v26 = vmax.f32 %v4901_v17, 0.0 }
 0x579   :  { %v4968_v27 = vmax.f32 %v4904_v24, 0.0  ;;  %v5150_v56 = vor.u32 %v5148_v45, %v5147_v43  ;;  %v16738_v37 = vor.u32 %v5347_v47, %v5145_v52 }
 0x57a   :  { %v4966_v40 = vmax.f32 %v4902_v22, 0.0  ;;  %v13051_v59 = vpop.f32.mrb[40].mxu0  ;;  %v5143_v6 = vor.u32 %v5141_v2, %v5140_v60  ;;  %v16740_v9 = vor.u32 %v5345_v48, %v5138_v7 }
 0x57b   :  { %19920 = vst [vmem:[#allocation40_spill] sm:$0xff] %v16738_v37  ;;  %v16742_v11 = vpack.c.bf16 %v4968_v27, %v4967_v51  ;;  %v4836_v30 = vmul.f32 %v13051_v59, %v16463_v54  ;;  %v4628_v5 = vpop.f32.mrb[41].mxu0  ;;  %v16754_v45 = vsel %vm15537_vm2, 0, %v5150_v56 }
 0x57c   :  { %19921 = vst [vmem:[#allocation41_spill] sm:$0xff] %v16740_v9  ;;  %v16745_v28 = vpack.c.bf16 %v4966_v40, %v4965_v26  ;;  %v4834_v15 = vmul.f32 %v16463_v54, %v4628_v5  ;;  %v13052_v55 = vpop.f32.mrb[42].mxu0  ;;  %v16750_v52 = vsel %vm15537_vm2, 0, %v5143_v6 }
 0x57d   :  { %19922 = vst [vmem:[#allocation42_spill] sm:$0xff] %v16742_v11  ;;  %v4907_v17 = vadd.f32 %v16468_v53, %v4836_v30  ;;  %v4837_v7 = vmul.f32 %v13052_v55, %v16463_v54  ;;  %v4631_v2 = vpop.f32.mrb[43].mxu0  ;;  %13121 = vmatprep.mubr.bf16.mxu1 %v16750_v52  ;;  %v5159_v59 = vshrl.u32 %v16742_v11, 16  ;;  %v5162_v5 = vshll.u32 %v16742_v11, 16 }
 0x57e   :  { %19923 = vst [vmem:[#allocation43_spill] sm:$0xff] %v16745_v28  ;;  %v4905_v24 = vadd.f32 %v16468_v53, %v4834_v15  ;;  %v4835_v6 = vmul.f32 %v16463_v54, %v4631_v2  ;;  %13122 = vmatmul.mubr.bf16.gmra.mrb[32].mxu1 %v16754_v45  ;;  %v5152_v43 = vshrl.u32 %v16745_v28, 16  ;;  %v5155_v47 = vshll.u32 %v16745_v28, 16 }
 0x57f   :  { %v4908_v22 = vadd.f32 %v16468_v53, %v4837_v7  ;;  %v5161_v60 = vrot.slane %v5159_v59, 7  ;;  %v5351_v48 = vrot.slane %v5162_v5, 1  ;;  %v4971_v26 = vmax.f32 %v4907_v17, 0.0 }
 0x580   :  { %v4906_v51 = vadd.f32 %v16468_v53, %v4835_v6  ;;  %v5154_v27 = vrot.slane %v5152_v43, 7  ;;  %v5349_v56 = vrot.slane %v5155_v47, 1  ;;  %v4969_v55 = vmax.f32 %v4905_v24, 0.0 }
 0x581   :  { %v4972_v40 = vmax.f32 %v4908_v22, 0.0  ;;  %v5164_v30 = vor.u32 %v5162_v5, %v5161_v60  ;;  %v16768_v15 = vor.u32 %v5351_v48, %v5159_v59 }
 0x582   :  { %v4970_v2 = vmax.f32 %v4906_v51, 0.0  ;;  %v13055_v37 = vpop.f32.mrb[44].mxu0  ;;  %v5157_v9 = vor.u32 %v5155_v47, %v5154_v27  ;;  %v16770_v11 = vor.u32 %v5349_v56, %v5152_v43 }
 0x583   :  { %19924 = vst [vmem:[#allocation44_spill] sm:$0xff] %v16768_v15  ;;  %v16772_v28 = vpack.c.bf16 %v4972_v40, %v4971_v26  ;;  %v4840_v7 = vmul.f32 %v13055_v37, %v16463_v54  ;;  %v4644_v20 = vpop.f32.mrb[45].mxu0  ;;  %v16784_v5 = vsel %vm15537_vm2, 0, %v5164_v30 }
 0x584   :  { %19925 = vst [vmem:[#allocation45_spill] sm:$0xff] %v16770_v11  ;;  %v16775_v31 = vpack.c.bf16 %v4970_v2, %v4969_v55  ;;  %v4838_v6 = vmul.f32 %v16463_v54, %v4644_v20  ;;  %v13056_v17 = vpop.f32.mrb[46].mxu0  ;;  %v16780_v59 = vsel %vm15537_vm2, 0, %v5157_v9 }
 0x585   :  { %19926 = vst [vmem:[#allocation46_spill] sm:$0xff] %v16772_v28  ;;  %v4911_v24 = vadd.f32 %v16468_v53, %v4840_v7  ;;  %v4841_v43 = vmul.f32 %v13056_v17, %v16463_v54  ;;  %v4647_v47 = vpop.f32.mrb[47].mxu0  ;;  %13125 = vmatprep.mubr.bf16.mxu1 %v16780_v59  ;;  %v5173_v37 = vshrl.u32 %v16772_v28, 16  ;;  %v5176_v20 = vshll.u32 %v16772_v28, 16 }
 0x586   :  { %19927 = vst [vmem:[#allocation47_spill] sm:$0xff] %v16775_v31  ;;  %v4909_v22 = vadd.f32 %v16468_v53, %v4838_v6  ;;  %v4839_v9 = vmul.f32 %v16463_v54, %v4647_v47  ;;  %13126 = vmatmul.mubr.bf16.gmra.mrb[36].mxu1 %v16784_v5  ;;  %v5166_v60 = vshrl.u32 %v16775_v31, 16  ;;  %v5169_v48 = vshll.u32 %v16775_v31, 16 }
 0x587   :  { %v4912_v51 = vadd.f32 %v16468_v53, %v4841_v43  ;;  %v5175_v27 = vrot.slane %v5173_v37, 7  ;;  %v5355_v56 = vrot.slane %v5176_v20, 1  ;;  %v4975_v55 = vmax.f32 %v4911_v24, 0.0 }
 0x588   :  { %v4910_v26 = vadd.f32 %v16468_v53, %v4839_v9  ;;  %v5168_v40 = vrot.slane %v5166_v60, 7  ;;  %v5353_v30 = vrot.slane %v5169_v48, 1  ;;  %v4973_v17 = vmax.f32 %v4909_v22, 0.0 }
 0x589   :  { %v4976_v2 = vmax.f32 %v4912_v51, 0.0  ;;  %v5178_v7 = vor.u32 %v5176_v20, %v5175_v27  ;;  %v16798_v6 = vor.u32 %v5355_v56, %v5173_v37 }
 0x58a   :  { %v4974_v47 = vmax.f32 %v4910_v26, 0.0  ;;  %v13059_v15 = vpop.f32.mrb[48].mxu0  ;;  %v5171_v11 = vor.u32 %v5169_v48, %v5168_v40  ;;  %v16800_v28 = vor.u32 %v5353_v30, %v5166_v60 }
 0x58b   :  { %19928 = vst [vmem:[#allocation48_spill] sm:$0xff] %v16798_v6  ;;  %v16802_v31 = vpack.c.bf16 %v4976_v2, %v4975_v55  ;;  %v4844_v43 = vmul.f32 %v13059_v15, %v16463_v54  ;;  %v4660_v42 = vpop.f32.mrb[49].mxu0  ;;  %v16814_v20 = vsel %vm15537_vm2, 0, %v5178_v7 }
 0x58c   :  { %19929 = vst [vmem:[#allocation49_spill] sm:$0xff] %v16800_v28  ;;  %v16805_v57 = vpack.c.bf16 %v4974_v47, %v4973_v17  ;;  %v4842_v9 = vmul.f32 %v16463_v54, %v4660_v42  ;;  %v13060_v24 = vpop.f32.mrb[50].mxu0  ;;  %v16810_v37 = vsel %vm15537_vm2, 0, %v5171_v11 }
 0x58d   :  { %19930 = vst [vmem:[#allocation50_spill] sm:$0xff] %v16802_v31  ;;  %v4915_v22 = vadd.f32 %v16468_v53, %v4844_v43  ;;  %v4845_v60 = vmul.f32 %v13060_v24, %v16463_v54  ;;  %v4663_v48 = vpop.f32.mrb[51].mxu0  ;;  %13129 = vmatprep.mubr.bf16.mxu1 %v16810_v37  ;;  %v5187_v15 = vshrl.u32 %v16802_v31, 16  ;;  %v5190_v42 = vshll.u32 %v16802_v31, 16 }
 0x58e   :  { %19931 = vst [vmem:[#allocation51_spill] sm:$0xff] %v16805_v57  ;;  %v4913_v51 = vadd.f32 %v16468_v53, %v4842_v9  ;;  %v4843_v11 = vmul.f32 %v16463_v54, %v4663_v48  ;;  %13130 = vmatmul.mubr.bf16.gmra.mrb[40].mxu1 %v16814_v20  ;;  %v5180_v27 = vshrl.u32 %v16805_v57, 16  ;;  %v5183_v56 = vshll.u32 %v16805_v57, 16 }
 0x58f   :  { %v4916_v26 = vadd.f32 %v16468_v53, %v4845_v60  ;;  %v5189_v40 = vrot.slane %v5187_v15, 7  ;;  %v5359_v30 = vrot.slane %v5190_v42, 1  ;;  %v4979_v17 = vmax.f32 %v4915_v22, 0.0 }
 0x590   :  { %v4914_v55 = vadd.f32 %v16468_v53, %v4843_v11  ;;  %v5182_v2 = vrot.slane %v5180_v27, 7  ;;  %v5357_v7 = vrot.slane %v5183_v56, 1  ;;  %v4977_v24 = vmax.f32 %v4913_v51, 0.0 }
 0x591   :  { %v4980_v47 = vmax.f32 %v4916_v26, 0.0  ;;  %v5192_v43 = vor.u32 %v5190_v42, %v5189_v40  ;;  %v16828_v9 = vor.u32 %v5359_v30, %v5187_v15 }
 0x592   :  { %v4978_v48 = vmax.f32 %v4914_v55, 0.0  ;;  %v13063_v6 = vpop.f32.mrb[52].mxu0  ;;  %v5185_v28 = vor.u32 %v5183_v56, %v5182_v2  ;;  %v16830_v31 = vor.u32 %v5357_v7, %v5180_v27 }
 0x593   :  { %19932 = vst [vmem:[#allocation52_spill] sm:$0xff] %v16828_v9  ;;  %v16832_v57 = vpack.c.bf16 %v4980_v47, %v4979_v17  ;;  %v4848_v60 = vmul.f32 %v13063_v6, %v16463_v54  ;;  %v4676_v32 = vpop.f32.mrb[53].mxu0  ;;  %v16844_v42 = vsel %vm15537_vm2, 0, %v5192_v43 }
 0x594   :  { %19933 = vst [vmem:[#allocation53_spill] sm:$0xff] %v16830_v31  ;;  %v16835_v38 = vpack.c.bf16 %v4978_v48, %v4977_v24  ;;  %v4846_v11 = vmul.f32 %v16463_v54, %v4676_v32  ;;  %v13064_v22 = vpop.f32.mrb[54].mxu0  ;;  %v16840_v15 = vsel %vm15537_vm2, 0, %v5185_v28 }
 0x595   :  { %19934 = vst [vmem:[#allocation54_spill] sm:$0xff] %v16832_v57  ;;  %v4919_v51 = vadd.f32 %v16468_v53, %v4848_v60  ;;  %v4849_v27 = vmul.f32 %v13064_v22, %v16463_v54  ;;  %v4679_v56 = vpop.f32.mrb[55].mxu0  ;;  %13133 = vmatprep.mubr.bf16.mxu1 %v16840_v15  ;;  %v5201_v6 = vshrl.u32 %v16832_v57, 16  ;;  %v5204_v32 = vshll.u32 %v16832_v57, 16 }
 0x596   :  { %19935 = vst [vmem:[#allocation55_spill] sm:$0xff] %v16835_v38  ;;  %v4917_v26 = vadd.f32 %v16468_v53, %v4846_v11  ;;  %v4847_v28 = vmul.f32 %v16463_v54, %v4679_v56  ;;  %13134 = vmatmul.mubr.bf16.gmra.mrb[44].mxu1 %v16844_v42  ;;  %v5194_v40 = vshrl.u32 %v16835_v38, 16  ;;  %v5197_v30 = vshll.u32 %v16835_v38, 16 }
 0x597   :  { %v4920_v55 = vadd.f32 %v16468_v53, %v4849_v27  ;;  %v5203_v2 = vrot.slane %v5201_v6, 7  ;;  %v5363_v7 = vrot.slane %v5204_v32, 1  ;;  %v4983_v24 = vmax.f32 %v4919_v51, 0.0 }
 0x598   :  { %v4918_v17 = vadd.f32 %v16468_v53, %v4847_v28  ;;  %v5196_v47 = vrot.slane %v5194_v40, 7  ;;  %v5361_v43 = vrot.slane %v5197_v30, 1  ;;  %v4981_v22 = vmax.f32 %v4917_v26, 0.0 }
 0x599   :  { %v4984_v48 = vmax.f32 %v4920_v55, 0.0  ;;  %v5206_v60 = vor.u32 %v5204_v32, %v5203_v2  ;;  %v16858_v11 = vor.u32 %v5363_v7, %v5201_v6 }
 0x59a   :  { %v4982_v56 = vmax.f32 %v4918_v17, 0.0  ;;  %v13067_v9 = vpop.f32.mrb[56].mxu0  ;;  %v5199_v31 = vor.u32 %v5197_v30, %v5196_v47  ;;  %v16860_v57 = vor.u32 %v5361_v43, %v5194_v40 }
 0x59b   :  { %19936 = vst [vmem:[#allocation56_spill] sm:$0xff] %v16858_v11  ;;  %v16862_v38 = vpack.c.bf16 %v4984_v48, %v4983_v24  ;;  %v4852_v27 = vmul.f32 %v13067_v9, %v16463_v54  ;;  %v4692_v50 = vpop.f32.mrb[57].mxu0  ;;  %v16874_v32 = vsel %vm15537_vm2, 0, %v5206_v60 }
 0x59c   :  { %19937 = vst [vmem:[#allocation57_spill] sm:$0xff] %v16860_v57  ;;  %v16865_v16 = vpack.c.bf16 %v4982_v56, %v4981_v22  ;;  %v4850_v28 = vmul.f32 %v16463_v54, %v4692_v50  ;;  %v13068_v51 = vpop.f32.mrb[58].mxu0  ;;  %v16870_v6 = vsel %vm15537_vm2, 0, %v5199_v31 }
 0x59d   :  { %19938 = vst [vmem:[#allocation58_spill] sm:$0xff] %v16862_v38  ;;  %v4923_v26 = vadd.f32 %v16468_v53, %v4852_v27  ;;  %v4853_v40 = vmul.f32 %v13068_v51, %v16463_v54  ;;  %v4695_v30 = vpop.f32.mrb[59].mxu0  ;;  %13137 = vmatprep.mubr.bf16.mxu1 %v16870_v6  ;;  %v5215_v9 = vshrl.u32 %v16862_v38, 16  ;;  %v5218_v50 = vshll.u32 %v16862_v38, 16 }
 0x59e   :  { %19939 = vst [vmem:[#allocation59_spill] sm:$0xff] %v16865_v16  ;;  %v4921_v55 = vadd.f32 %v16468_v53, %v4850_v28  ;;  %v4851_v31 = vmul.f32 %v16463_v54, %v4695_v30  ;;  %13138 = vmatmul.mubr.bf16.gmra.mrb[48].mxu1 %v16874_v32  ;;  %v5208_v2 = vshrl.u32 %v16865_v16, 16  ;;  %v5211_v7 = vshll.u32 %v16865_v16, 16 }
 0x59f   :  { %v4924_v17 = vadd.f32 %v16468_v53, %v4853_v40  ;;  %v5217_v47 = vrot.slane %v5215_v9, 7  ;;  %v5367_v43 = vrot.slane %v5218_v50, 1  ;;  %v4987_v22 = vmax.f32 %v4923_v26, 0.0  ;;  %v15292_v40 = vld [vmem:[%s19515_s2] ss:$0 sm:$0xff] }
 0x5a0   :  { %v4922_v24 = vadd.f32 %v16468_v53, %v4851_v31  ;;  %v5210_v48 = vrot.slane %v5208_v2, 7  ;;  %v5365_v60 = vrot.slane %v5211_v7, 1  ;;  %v4985_v54 = vmax.f32 %v4921_v55, 0.0 }
 0x5a1   :  { %v4988_v56 = vmax.f32 %v4924_v17, 0.0  ;;  %v5220_v27 = vor.u32 %v5218_v50, %v5217_v47  ;;  %v16888_v28 = vor.u32 %v5367_v43, %v5215_v9 }
 0x5a2   :  { %v4986_v51 = vmax.f32 %v4922_v24, 0.0  ;;  %v13071_v30 = vpop.f32.mrb[60].mxu0  ;;  %v5213_v11 = vor.u32 %v5211_v7, %v5210_v48  ;;  %v16890_v57 = vor.u32 %v5365_v60, %v5208_v2  ;;  %v15293_v2 = vld [vmem:[%s19516_s3] ss:$0 sm:$0xff] }
 0x5a3   :  { %19940 = vst [vmem:[#allocation60_spill] sm:$0xff] %v16888_v28  ;;  %v16892_v38 = vpack.c.bf16 %v4988_v56, %v4987_v22  ;;  %v4856_v53 = vmul.f32 %v15292_v40, %v13071_v30  ;;  %v4708_v31 = vpop.f32.mrb[61].mxu0  ;;  %v16905_v55 = vsel %vm15537_vm2, 0, %v5220_v27 }
 0x5a4   :  { %19941 = vst [vmem:[#allocation61_spill] sm:$0xff] %v16890_v57  ;;  %v16897_v16 = vpack.c.bf16 %v4986_v51, %v4985_v54  ;;  %v4854_v26 = vmul.f32 %v15292_v40, %v4708_v31  ;;  %v13072_v50 = vpop.f32.mrb[62].mxu0  ;;  %v16901_v9 = vsel %vm15537_vm2, 0, %v5213_v11 }
 0x5a5   :  { %19942 = vst [vmem:[#allocation62_spill] sm:$0xff] %v16892_v38  ;;  %v4927_v7 = vadd.f32 %v15293_v2, %v4856_v53  ;;  %v4857_v17 = vmul.f32 %v15292_v40, %v13072_v50  ;;  %v4711_v47 = vpop.f32.mrb[63].mxu0  ;;  %13141 = vmatprep.mubr.bf16.mxu1 %v16901_v9  ;;  %v5229_v43 = vshrl.u32 %v16892_v38, 16  ;;  %v5232_v24 = vshll.u32 %v16892_v38, 16 }
 0x5a6   :  { %v4925_v48 = vadd.f32 %v15293_v2, %v4854_v26  ;;  %v4855_v11 = vmul.f32 %v15292_v40, %v4711_v47  ;;  %13142 = vmatmul.mubr.bf16.gmra.mrb[52].mxu1 %v16905_v55  ;;  %v5222_v60 = vshrl.u32 %v16897_v16, 16  ;;  %v5225_v22 = vshll.u32 %v16897_v16, 16 }
 0x5a7   :  { %v4928_v56 = vadd.f32 %v15293_v2, %v4857_v17  ;;  %v5231_v27 = vrot.slane %v5229_v43, 7  ;;  %v5371_v54 = vrot.slane %v5232_v24, 1  ;;  %v4991_v31 = vmax.f32 %v4927_v7, 0.0 }
 0x5a8   :  { %v4926_v51 = vadd.f32 %v15293_v2, %v4855_v11  ;;  %v5224_v30 = vrot.slane %v5222_v60, 7  ;;  %v5369_v53 = vrot.slane %v5225_v22, 1  ;;  %v4989_v38 = vmax.f32 %v4925_v48, 0.0 }
 0x5a9   :  { %v4992_v50 = vmax.f32 %v4928_v56, 0.0  ;;  %v5234_v28 = vor.u32 %v5232_v24, %v5231_v27  ;;  %v16916_v57 = vor.u32 %v5371_v54, %v5229_v43 }
 0x5aa   :  { %v4990_v26 = vmax.f32 %v4926_v51, 0.0  ;;  %v5227_v40 = vor.u32 %v5225_v22, %v5224_v30  ;;  %v16918_v47 = vor.u32 %v5369_v53, %v5222_v60  ;;  %v19943_v53 = vmov 0  }
 0x5ab   :  { %v16920_v0 = vpack.c.bf16 %v4992_v50, %v4991_v31  ;;  %v16931_v2 = vsel %vm15537_vm2, 0, %v5234_v28  ;;  %v14945_v31 = vld [vmem:[#allocation8 + $0x188] sm:$0xff]   ;;  %v14946_v50 = vld [vmem:[#allocation8 + $0x190] sm:$0xff]  }
 0x5ac   :  { %v16922_v33 = vpack.c.bf16 %v4990_v26, %v4989_v38  ;;  %v16926_v17 = vsel %vm15537_vm2, 0, %v5227_v40  ;;  %v14947_v26 = vld [vmem:[#allocation8 + $0x198] sm:$0xff]   ;;  %v14949_v40 = vld [vmem:[#allocation8 + $0x1a8] sm:$0xff]  }
 0x5ad   :  { %13145 = vmatprep.mubr.bf16.mxu1 %v16926_v17  ;;  %v5243_v7 = vshrl.u32 %v16920_v0, 16  ;;  %v5246_v43 = vshll.u32 %v16920_v0, 16 }
 0x5ae   :  { %13146 = vmatmul.mubr.bf16.gmra.mrb[56].mxu1 %v16931_v2  ;;  %v5236_v24 = vshrl.u32 %v16922_v33, 16  ;;  %v5239_v38 = vshll.u32 %v16922_v33, 16 }
 0x5af   :  { %v5245_v48 = vrot.slane %v5243_v7, 7  ;;  %v5375_v11 = vrot.slane %v5246_v43, 1 }
 0x5b0   :  { %v5238_v60 = vrot.slane %v5236_v24, 7  ;;  %v5373_v22 = vrot.slane %v5239_v38, 1 }
 0x5b1   :  { %v5248_v56 = vor.u32 %v5246_v43, %v5245_v48  ;;  %v16938_v27 = vor.u32 %v5375_v11, %v5243_v7  ;;  %v14953_v7 = vld [vmem:[#allocation8 + $0x48] sm:$0xff]   ;;  %v14954_v43 = vld [vmem:[#allocation8 + $0x50] sm:$0xff]  }
 0x5b2   :  { %v5241_v54 = vor.u32 %v5239_v38, %v5238_v60  ;;  %v16940_v28 = vor.u32 %v5373_v22, %v5236_v24  ;;  %v14955_v24 = vld [vmem:[#allocation8 + $0x58] sm:$0xff]   ;;  %v14956_v38 = vld [vmem:[#allocation8 + $0x60] sm:$0xff]   ;;  %v19960_v48 = vld [vmem:[#allocation55_spill] sm:$0xff] }
 0x5b3   :  { %v16949_v30 = vsel %vm15537_vm2, 0, %v5248_v56  ;;  %v19961_v11 = vld [vmem:[#allocation54_spill] sm:$0xff]  ;;  %v19962_v60 = vld [vmem:[#allocation59_spill] sm:$0xff] }
 0x5b4   :  { %v16944_v51 = vsel %vm15537_vm2, 0, %v5241_v54  ;;  %v19963_v22 = vld [vmem:[#allocation58_spill] sm:$0xff] }
 0x5b5   :  { %13149 = vmatprep.mubr.bf16.mxu1 %v16944_v51  ;;  %v19964_v56 = vld [vmem:[#allocation62_spill] sm:$0xff] }
 0x5b6   :  { %13150 = vmatmul.mubr.bf16.gmra.mrb[60].mxu1 %v16949_v30  ;;  %v14969_v54 = vld [vmem:[#allocation8 + $0x1c8] sm:$0xff]  }
 0x5b7   :  { %13169 = vmatprep.mubr.bf16.mxu1 %v19943_v53 }
 0x5be   :  { %13170 = vmatmul.mubr.bf16.vlgmr.msra.gmra.mrb[0].mxu1 %v19943_v53 }
 0x5bf   :  { %13173 = vmatprep.mubr.bf16.mxu1 %v16506_v46  ;;  %13234 = vmatpush3.bf16.msra.mxu1 %v16615_v62  ;;  %v14950_v46 = vld [vmem:[#allocation8 + $0x1b0] sm:$0xff]   ;;  %v14951_v62 = vld [vmem:[#allocation8 + $0x1b8] sm:$0xff]  }
 0x5c0   :  { %13235 = vmatprep.subr.bf16.mxu1 %v14945_v31 }
 0x5c3   :  { %13236 = vmatpush3.bf16.msra.mxu1 %v14945_v31  ;;  %v14972_v31 = vld [vmem:[#allocation8 + $0x1e0] sm:$0xff]  }
 0x5c4   :  { %13237 = vmatprep.subr.bf16.mxu1 %v14946_v50 }
 0x5c6   :  { %13174 = vmatmul.mubr.bf16.gmra.mrb[4].mxu1 %v16510_v21  ;;  %v14952_v21 = vld [vmem:[#allocation8 + $0x40] sm:$0xff]  }
 0x5c7   :  { %13177 = vmatprep.mubr.bf16.mxu1 %v16537_v3  ;;  %13238 = vmatpush3.bf16.msra.mxu1 %v14946_v50  ;;  %v14975_v50 = vld [vmem:[#allocation8 + $0x1f8] sm:$0xff]  }
 0x5c8   :  { %13239 = vmatprep.subr.bf16.mxu1 %v14947_v26 }
 0x5cb   :  { %13240 = vmatpush3.bf16.msra.mxu1 %v14947_v26  ;;  %v14976_v26 = vld [vmem:[#allocation8 + $0x80] sm:$0xff]  }
 0x5cc   :  { %13241 = vmatprep.subr.bf16.mxu1 %v14948_v14 }
 0x5ce   :  { %13178 = vmatmul.mubr.bf16.gmra.mrb[8].mxu1 %v16541_v35 }
 0x5cf   :  { %13181 = vmatprep.mubr.bf16.mxu1 %v16567_v19  ;;  %13242 = vmatpush3.bf16.msra.mxu1 %v14948_v14  ;;  %v14977_v14 = vld [vmem:[#allocation8 + $0x88] sm:$0xff]  }
 0x5d0   :  { %13243 = vmatprep.subr.bf16.mxu1 %v14949_v40 }
 0x5d3   :  { %13244 = vmatpush3.bf16.msra.mxu1 %v14949_v40  ;;  %v14978_v40 = vld [vmem:[#allocation8 + $0x90] sm:$0xff]  }
 0x5d4   :  { %13245 = vmatprep.subr.bf16.mxu1 %v14950_v46 }
 0x5d6   :  { %13182 = vmatmul.mubr.bf16.gmra.mrb[12].mxu1 %v16571_v10 }
 0x5d7   :  { %13185 = vmatprep.mubr.bf16.mxu1 %v16597_v39  ;;  %13246 = vmatpush3.bf16.msra.mxu1 %v14950_v46  ;;  %v14979_v46 = vld [vmem:[#allocation8 + $0x98] sm:$0xff]  }
 0x5d8   :  { %13247 = vmatprep.subr.bf16.mxu1 %v14951_v62 }
 0x5db   :  { %13248 = vmatpush3.bf16.msra.mxu1 %v14951_v62  ;;  %v14980_v62 = vld [vmem:[#allocation8 + $0xa0] sm:$0xff]  }
 0x5dc   :  { %13313 = vmatprep.subr.bf16.mxu1 %v14952_v21 }
 0x5de   :  { %13186 = vmatmul.mubr.bf16.gmra.mrb[16].mxu1 %v16601_v13 }
 0x5df   :  { %13189 = vmatprep.mubr.bf16.mxu1 %v16629_v12 }
 0x5e6   :  { %13190 = vmatmul.mubr.bf16.gmra.mrb[20].mxu1 %v16633_v36 }
 0x5e7   :  { %13193 = vmatprep.mubr.bf16.mxu1 %v16660_v8 }
 0x5ee   :  { %13194 = vmatmul.mubr.bf16.gmra.mrb[24].mxu1 %v16664_v23 }
 0x5ef   :  { %13197 = vmatprep.mubr.bf16.mxu1 %v16690_v18 }
 0x5f6   :  { %13198 = vmatmul.mubr.bf16.gmra.mrb[28].mxu1 %v16694_v25 }
 0x5f7   :  { %13201 = vmatprep.mubr.bf16.mxu1 %v16720_v29 }
 0x5fe   :  { %13202 = vmatmul.mubr.bf16.gmra.mrb[32].mxu1 %v16724_v41 }
 0x5ff   :  { %13205 = vmatprep.mubr.bf16.mxu1 %v16750_v52 }
 0x606   :  { %13206 = vmatmul.mubr.bf16.gmra.mrb[36].mxu1 %v16754_v45 }
 0x607   :  { %13209 = vmatprep.mubr.bf16.mxu1 %v16780_v59 }
 0x60e   :  { %13210 = vmatmul.mubr.bf16.gmra.mrb[40].mxu1 %v16784_v5 }
 0x60f   :  { %13213 = vmatprep.mubr.bf16.mxu1 %v16810_v37 }
 0x616   :  { %13214 = vmatmul.mubr.bf16.gmra.mrb[44].mxu1 %v16814_v20 }
 0x617   :  { %13217 = vmatprep.mubr.bf16.mxu1 %v16840_v15 }
 0x61e   :  { %13218 = vmatmul.mubr.bf16.gmra.mrb[48].mxu1 %v16844_v42 }
 0x61f   :  { %13221 = vmatprep.mubr.bf16.mxu1 %v16870_v6 }
 0x626   :  { %13222 = vmatmul.mubr.bf16.gmra.mrb[52].mxu1 %v16874_v32 }
 0x627   :  { %13225 = vmatprep.mubr.bf16.mxu1 %v16901_v9 }
 0x62e   :  { %13226 = vmatmul.mubr.bf16.gmra.mrb[56].mxu1 %v16905_v55 }
 0x62f   :  { %13229 = vmatprep.mubr.bf16.mxu1 %v16926_v17 }
 0x636   :  { %13230 = vmatmul.mubr.bf16.gmra.mrb[60].mxu1 %v16931_v2 }
 0x637   :  { %13249 = vmatprep.mubr.bf16.mxu1 %v16537_v3  ;;  %v14957_v3 = vld [vmem:[#allocation8 + $0x68] sm:$0xff]  }
 0x63e   :  { %13250 = vmatmul.mubr.bf16.vlgmr.msra.gmra.mrb[0].mxu1 %v16541_v35  ;;  %v14958_v35 = vld [vmem:[#allocation8 + $0x70] sm:$0xff]  }
 0x63f   :  { %13253 = vmatprep.mubr.bf16.mxu1 %v16567_v19  ;;  %13314 = vmatpush3.bf16.msra.mxu1 %v14952_v21  ;;  %v14959_v19 = vld [vmem:[#allocation8 + $0x78] sm:$0xff]  }
 0x640   :  { %13315 = vmatprep.subr.bf16.mxu1 %v14953_v7 }
 0x643   :  { %13316 = vmatpush3.bf16.msra.mxu1 %v14953_v7 }
 0x644   :  { %13317 = vmatprep.subr.bf16.mxu1 %v14954_v43 }
 0x646   :  { %13254 = vmatmul.mubr.bf16.gmra.mrb[4].mxu1 %v16571_v10  ;;  %v14960_v10 = vld [vmem:[#allocation8 + $0x100] sm:$0xff]  }
 0x647   :  { %13257 = vmatprep.mubr.bf16.mxu1 %v16597_v39  ;;  %13318 = vmatpush3.bf16.msra.mxu1 %v14954_v43  ;;  %v14961_v39 = vld [vmem:[#allocation8 + $0x108] sm:$0xff]  }
 0x648   :  { %13319 = vmatprep.subr.bf16.mxu1 %v14955_v24 }
 0x64b   :  { %13320 = vmatpush3.bf16.msra.mxu1 %v14955_v24  ;;  %v19968_v24 = vld [vmem:[#allocation17_spill] sm:$0xff] }
 0x64c   :  { %13321 = vmatprep.subr.bf16.mxu1 %v14956_v38 }
 0x64e   :  { %13258 = vmatmul.mubr.bf16.gmra.mrb[8].mxu1 %v16601_v13  ;;  %v14962_v13 = vld [vmem:[#allocation8 + $0x110] sm:$0xff]  }
 0x64f   :  { %13261 = vmatprep.mubr.bf16.mxu1 %v16629_v12  ;;  %13322 = vmatpush3.bf16.msra.mxu1 %v14956_v38  ;;  %v14963_v12 = vld [vmem:[#allocation8 + $0x118] sm:$0xff]   ;;  %v17130_v38 = vsel %vm16110_vm5, %v19968_v24, 0 }
 0x650   :  { %13323 = vmatprep.subr.bf16.mxu1 %v14957_v3 }
 0x653   :  { %13324 = vmatpush3.bf16.msra.mxu1 %v14957_v3  ;;  %v14988_v3 = vld [vmem:[#allocation8 + $0x160] sm:$0xff]  }
 0x654   :  { %13325 = vmatprep.subr.bf16.mxu1 %v14958_v35 }
 0x656   :  { %13262 = vmatmul.mubr.bf16.gmra.mrb[12].mxu1 %v16633_v36  ;;  %v14964_v36 = vld [vmem:[#allocation8 + $0x120] sm:$0xff]  }
 0x657   :  { %13265 = vmatprep.mubr.bf16.mxu1 %v16660_v8  ;;  %13326 = vmatpush3.bf16.msra.mxu1 %v14958_v35  ;;  %v14965_v8 = vld [vmem:[#allocation8 + $0x128] sm:$0xff]  }
 0x658   :  { %13327 = vmatprep.subr.bf16.mxu1 %v14959_v19  ;;  %v14989_v35 = vld [vmem:[#allocation8 + $0x168] sm:$0xff]  }
 0x65b   :  { %13328 = vmatpush3.bf16.msra.mxu1 %v14959_v19  ;;  %v19969_v19 = vld [vmem:[#allocation16_spill] sm:$0xff] }
 0x65c   :  { %13393 = vmatprep.subr.bf16.mxu1 %v14960_v10 }
 0x65e   :  { %13266 = vmatmul.mubr.bf16.gmra.mrb[16].mxu1 %v16664_v23  ;;  %v14966_v23 = vld [vmem:[#allocation8 + $0x130] sm:$0xff]  }
 0x65f   :  { %13269 = vmatprep.mubr.bf16.mxu1 %v16690_v18  ;;  %v14967_v18 = vld [vmem:[#allocation8 + $0x138] sm:$0xff]  }
 0x666   :  { %13270 = vmatmul.mubr.bf16.gmra.mrb[20].mxu1 %v16694_v25  ;;  %v14968_v25 = vld [vmem:[#allocation8 + $0x1c0] sm:$0xff]  }
 0x667   :  { %13273 = vmatprep.mubr.bf16.mxu1 %v16720_v29  ;;  %v19944_v29 = vld [vmem:[#allocation23_spill] sm:$0xff] }
 0x66e   :  { %13274 = vmatmul.mubr.bf16.gmra.mrb[24].mxu1 %v16724_v41  ;;  %v19945_v41 = vld [vmem:[#allocation22_spill] sm:$0xff] }
 0x66f   :  { %13277 = vmatprep.mubr.bf16.mxu1 %v16750_v52  ;;  %v19946_v52 = vld [vmem:[#allocation27_spill] sm:$0xff] }
 0x676   :  { %13278 = vmatmul.mubr.bf16.gmra.mrb[28].mxu1 %v16754_v45  ;;  %v19947_v45 = vld [vmem:[#allocation26_spill] sm:$0xff] }
 0x677   :  { %13281 = vmatprep.mubr.bf16.mxu1 %v16780_v59  ;;  %v19948_v59 = vld [vmem:[#allocation31_spill] sm:$0xff] }
 0x67e   :  { %13282 = vmatmul.mubr.bf16.gmra.mrb[32].mxu1 %v16784_v5  ;;  %v19949_v5 = vld [vmem:[#allocation30_spill] sm:$0xff] }
 0x67f   :  { %13285 = vmatprep.mubr.bf16.mxu1 %v16810_v37  ;;  %v19950_v37 = vld [vmem:[#allocation35_spill] sm:$0xff] }
 0x686   :  { %13286 = vmatmul.mubr.bf16.gmra.mrb[36].mxu1 %v16814_v20  ;;  %v19951_v20 = vld [vmem:[#allocation34_spill] sm:$0xff] }
 0x687   :  { %13289 = vmatprep.mubr.bf16.mxu1 %v16840_v15  ;;  %v19952_v15 = vld [vmem:[#allocation39_spill] sm:$0xff] }
 0x68e   :  { %13290 = vmatmul.mubr.bf16.gmra.mrb[40].mxu1 %v16844_v42  ;;  %v19953_v42 = vld [vmem:[#allocation38_spill] sm:$0xff] }
 0x68f   :  { %13293 = vmatprep.mubr.bf16.mxu1 %v16870_v6  ;;  %v19954_v6 = vld [vmem:[#allocation43_spill] sm:$0xff] }
 0x696   :  { %13294 = vmatmul.mubr.bf16.gmra.mrb[44].mxu1 %v16874_v32  ;;  %v19955_v32 = vld [vmem:[#allocation42_spill] sm:$0xff] }
 0x697   :  { %13297 = vmatprep.mubr.bf16.mxu1 %v16901_v9  ;;  %v19956_v9 = vld [vmem:[#allocation47_spill] sm:$0xff] }
 0x69e   :  { %13298 = vmatmul.mubr.bf16.gmra.mrb[48].mxu1 %v16905_v55  ;;  %v19957_v55 = vld [vmem:[#allocation46_spill] sm:$0xff] }
 0x69f   :  { %13301 = vmatprep.mubr.bf16.mxu1 %v16926_v17  ;;  %v19958_v17 = vld [vmem:[#allocation51_spill] sm:$0xff] }
 0x6a6   :  { %13302 = vmatmul.mubr.bf16.gmra.mrb[52].mxu1 %v16931_v2  ;;  %v19959_v2 = vld [vmem:[#allocation50_spill] sm:$0xff] }
 0x6a7   :  { %13305 = vmatprep.mubr.bf16.mxu1 %v16944_v51  ;;  %v14970_v51 = vld [vmem:[#allocation8 + $0x1d0] sm:$0xff]  }
 0x6ae   :  { %13306 = vmatmul.mubr.bf16.gmra.mrb[56].mxu1 %v16949_v30  ;;  %v14971_v30 = vld [vmem:[#allocation8 + $0x1d8] sm:$0xff]  }
 0x6af   :  { %13309 = vmatprep.mubr.bf16.mxu1 %v19943_v53 }
 0x6b6   :  { %13310 = vmatmul.mubr.bf16.gmra.mrb[60].mxu1 %v19943_v53 }
 0x6b7   :  { %13329 = vmatprep.mubr.bf16.mxu1 %v19943_v53 }
 0x6be   :  { %13330 = vmatmul.mubr.bf16.vlgmr.msra.gmra.mrb[0].mxu1 %v19943_v53 }
 0x6bf   :  { %13333 = vmatprep.mubr.bf16.mxu1 %v16481_v49  ;;  %13394 = vmatpush3.bf16.msra.mxu1 %v14960_v10  ;;  %v17136_v10 = vsel %vm16110_vm5, %v19969_v19, 0  ;;  %v14993_v19 = vld [vmem:[#allocation8 + $0x208] sm:$0xff]  }
 0x6c0   :  { %13395 = vmatprep.subr.bf16.mxu1 %v14961_v39 }
 0x6c3   :  { %13396 = vmatpush3.bf16.msra.mxu1 %v14961_v39  ;;  %v19970_v39 = vld [vmem:[#allocation19_spill] sm:$0xff] }
 0x6c4   :  { %13397 = vmatprep.subr.bf16.mxu1 %v14962_v13 }
 0x6c6   :  { %13334 = vmatmul.mubr.bf16.gmra.mrb[4].mxu1 %v16478_v58 }
 0x6c7   :  { %13337 = vmatprep.mubr.bf16.mxu1 %v16501_v44  ;;  %13398 = vmatpush3.bf16.msra.mxu1 %v14962_v13  ;;  %v17142_v13 = vsel %vm16110_vm5, %v19970_v39, 0  ;;  %v14995_v39 = vld [vmem:[#allocation8 + $0x218] sm:$0xff]  }
 0x6c8   :  { %13399 = vmatprep.subr.bf16.mxu1 %v14963_v12 }
 0x6cb   :  { %13400 = vmatpush3.bf16.msra.mxu1 %v14963_v12  ;;  %v14990_v12 = vld [vmem:[#allocation8 + $0x170] sm:$0xff]  }
 0x6cc   :  { %13401 = vmatprep.subr.bf16.mxu1 %v14964_v36 }
 0x6ce   :  { %13338 = vmatmul.mubr.bf16.gmra.mrb[8].mxu1 %v16498_v34 }
 0x6cf   :  { %13341 = vmatprep.mubr.bf16.mxu1 %v16532_v63  ;;  %13402 = vmatpush3.bf16.msra.mxu1 %v14964_v36  ;;  %v14991_v36 = vld [vmem:[#allocation8 + $0x178] sm:$0xff]  }
 0x6d0   :  { %13403 = vmatprep.subr.bf16.mxu1 %v14965_v8 }
 0x6d3   :  { %13404 = vmatpush3.bf16.msra.mxu1 %v14965_v8  ;;  %v19971_v8 = vld [vmem:[#allocation18_spill] sm:$0xff] }
 0x6d4   :  { %13405 = vmatprep.subr.bf16.mxu1 %v14966_v23 }
 0x6d6   :  { %13342 = vmatmul.mubr.bf16.gmra.mrb[12].mxu1 %v16529_v1 }
 0x6d7   :  { %13345 = vmatprep.mubr.bf16.mxu1 %v16562_v4  ;;  %13406 = vmatpush3.bf16.msra.mxu1 %v14966_v23  ;;  %v17148_v23 = vsel %vm16110_vm5, %v19971_v8, 0  ;;  %v5440_v8 = vsel %vm16110_vm5, %v16938_v27, 0 }
 0x6d8   :  { %13407 = vmatprep.subr.bf16.mxu1 %v14967_v18 }
 0x6db   :  { %13408 = vmatpush3.bf16.msra.mxu1 %v14967_v18  ;;  %v19972_v18 = vld [vmem:[#allocation21_spill] sm:$0xff] }
 0x6dc   :  { %13473 = vmatprep.subr.bf16.mxu1 %v14968_v25 }
 0x6de   :  { %13346 = vmatmul.mubr.bf16.gmra.mrb[16].mxu1 %v16559_v61 }
 0x6df   :  { %13349 = vmatprep.mubr.bf16.mxu1 %v19944_v29 }
 0x6e6   :  { %13350 = vmatmul.mubr.bf16.gmra.mrb[20].mxu1 %v19945_v41 }
 0x6e7   :  { %13353 = vmatprep.mubr.bf16.mxu1 %v19946_v52 }
 0x6ee   :  { %13354 = vmatmul.mubr.bf16.gmra.mrb[24].mxu1 %v19947_v45 }
 0x6ef   :  { %13357 = vmatprep.mubr.bf16.mxu1 %v19948_v59 }
 0x6f6   :  { %13358 = vmatmul.mubr.bf16.gmra.mrb[28].mxu1 %v19949_v5 }
 0x6f7   :  { %13361 = vmatprep.mubr.bf16.mxu1 %v19950_v37 }
 0x6fe   :  { %13362 = vmatmul.mubr.bf16.gmra.mrb[32].mxu1 %v19951_v20 }
 0x6ff   :  { %13365 = vmatprep.mubr.bf16.mxu1 %v19952_v15 }
 0x706   :  { %13366 = vmatmul.mubr.bf16.gmra.mrb[36].mxu1 %v19953_v42 }
 0x707   :  { %13369 = vmatprep.mubr.bf16.mxu1 %v19954_v6 }
 0x70e   :  { %13370 = vmatmul.mubr.bf16.gmra.mrb[40].mxu1 %v19955_v32 }
 0x70f   :  { %13373 = vmatprep.mubr.bf16.mxu1 %v19956_v9 }
 0x716   :  { %13374 = vmatmul.mubr.bf16.gmra.mrb[44].mxu1 %v19957_v55 }
 0x717   :  { %13377 = vmatprep.mubr.bf16.mxu1 %v19958_v17 }
 0x71e   :  { %13378 = vmatmul.mubr.bf16.gmra.mrb[48].mxu1 %v19959_v2 }
 0x71f   :  { %13381 = vmatprep.mubr.bf16.mxu1 %v19960_v48 }
 0x726   :  { %13382 = vmatmul.mubr.bf16.gmra.mrb[52].mxu1 %v19961_v11 }
 0x727   :  { %13385 = vmatprep.mubr.bf16.mxu1 %v19962_v60 }
 0x72e   :  { %13386 = vmatmul.mubr.bf16.gmra.mrb[56].mxu1 %v19963_v22 }
 0x72f   :  { %13389 = vmatprep.mubr.bf16.mxu1 %v16897_v16 }
 0x736   :  { %13390 = vmatmul.mubr.bf16.gmra.mrb[60].mxu1 %v19964_v56 }
 0x737   :  { %13409 = vmatprep.mubr.bf16.mxu1 %v16481_v49  ;;  %v14973_v49 = vld [vmem:[#allocation8 + $0x1e8] sm:$0xff]  }
 0x73e   :  { %13410 = vmatmul.mubr.bf16.vlgmr.msra.gmra.mrb[0].mxu1 %v16478_v58  ;;  %v14974_v58 = vld [vmem:[#allocation8 + $0x1f0] sm:$0xff]  }
 0x73f   :  { %13413 = vmatprep.mubr.bf16.mxu1 %v16501_v44  ;;  %13474 = vmatpush3.bf16.msra.mxu1 %v14968_v25  ;;  %v17154_v25 = vsel %vm16110_vm5, %v19972_v18, 0 }
 0x740   :  { %13475 = vmatprep.subr.bf16.mxu1 %v14969_v54 }
 0x743   :  { %13476 = vmatpush3.bf16.msra.mxu1 %v14969_v54  ;;  %v19983_v54 = vld [vmem:[#allocation40_spill] sm:$0xff] }
 0x744   :  { %13477 = vmatprep.subr.bf16.mxu1 %v14970_v51 }
 0x746   :  { %13414 = vmatmul.mubr.bf16.gmra.mrb[4].mxu1 %v16498_v34 }
 0x747   :  { %13417 = vmatprep.mubr.bf16.mxu1 %v16532_v63  ;;  %13478 = vmatpush3.bf16.msra.mxu1 %v14970_v51  ;;  %v17220_v51 = vsel %vm16110_vm5, %v19983_v54, 0 }
 0x748   :  { %13479 = vmatprep.subr.bf16.mxu1 %v14971_v30 }
 0x74b   :  { %13480 = vmatpush3.bf16.msra.mxu1 %v14971_v30  ;;  %v19984_v30 = vld [vmem:[#allocation45_spill] sm:$0xff] }
 0x74c   :  { %13481 = vmatprep.subr.bf16.mxu1 %v14972_v31 }
 0x74e   :  { %13418 = vmatmul.mubr.bf16.gmra.mrb[8].mxu1 %v16529_v1 }
 0x74f   :  { %13421 = vmatprep.mubr.bf16.mxu1 %v16562_v4  ;;  %13482 = vmatpush3.bf16.msra.mxu1 %v14972_v31  ;;  %v17226_v31 = vsel %vm16110_vm5, %v19984_v30, 0 }
 0x750   :  { %13483 = vmatprep.subr.bf16.mxu1 %v14973_v49 }
 0x753   :  { %13484 = vmatpush3.bf16.msra.mxu1 %v14973_v49  ;;  %v19985_v49 = vld [vmem:[#allocation44_spill] sm:$0xff] }
 0x754   :  { %13485 = vmatprep.subr.bf16.mxu1 %v14974_v58 }
 0x756   :  { %13422 = vmatmul.mubr.bf16.gmra.mrb[12].mxu1 %v16559_v61 }
 0x757   :  { %13425 = vmatprep.mubr.bf16.mxu1 %v19944_v29  ;;  %13486 = vmatpush3.bf16.msra.mxu1 %v14974_v58  ;;  %v17232_v58 = vsel %vm16110_vm5, %v19985_v49, 0 }
 0x758   :  { %13487 = vmatprep.subr.bf16.mxu1 %v14975_v50 }
 0x75b   :  { %13488 = vmatpush3.bf16.msra.mxu1 %v14975_v50  ;;  %v19986_v50 = vld [vmem:[#allocation49_spill] sm:$0xff] }
 0x75c   :  { %13553 = vmatprep.subr.bf16.mxu1 %v14976_v26 }
 0x75e   :  { %13426 = vmatmul.mubr.bf16.gmra.mrb[16].mxu1 %v19945_v41 }
 0x75f   :  { %13429 = vmatprep.mubr.bf16.mxu1 %v19946_v52 }
 0x766   :  { %13430 = vmatmul.mubr.bf16.gmra.mrb[20].mxu1 %v19947_v45 }
 0x767   :  { %13433 = vmatprep.mubr.bf16.mxu1 %v19948_v59 }
 0x76e   :  { %13434 = vmatmul.mubr.bf16.gmra.mrb[24].mxu1 %v19949_v5 }
 0x76f   :  { %13437 = vmatprep.mubr.bf16.mxu1 %v19950_v37 }
 0x776   :  { %13438 = vmatmul.mubr.bf16.gmra.mrb[28].mxu1 %v19951_v20 }
 0x777   :  { %13441 = vmatprep.mubr.bf16.mxu1 %v19952_v15 }
 0x77e   :  { %13442 = vmatmul.mubr.bf16.gmra.mrb[32].mxu1 %v19953_v42 }
 0x77f   :  { %13445 = vmatprep.mubr.bf16.mxu1 %v19954_v6 }
 0x786   :  { %13446 = vmatmul.mubr.bf16.gmra.mrb[36].mxu1 %v19955_v32 }
 0x787   :  { %13449 = vmatprep.mubr.bf16.mxu1 %v19956_v9 }
 0x78e   :  { %13450 = vmatmul.mubr.bf16.gmra.mrb[40].mxu1 %v19957_v55 }
 0x78f   :  { %13453 = vmatprep.mubr.bf16.mxu1 %v19958_v17 }
 0x796   :  { %13454 = vmatmul.mubr.bf16.gmra.mrb[44].mxu1 %v19959_v2 }
 0x797   :  { %13457 = vmatprep.mubr.bf16.mxu1 %v19960_v48 }
 0x79e   :  { %13458 = vmatmul.mubr.bf16.gmra.mrb[48].mxu1 %v19961_v11 }
 0x79f   :  { %13461 = vmatprep.mubr.bf16.mxu1 %v19962_v60 }
 0x7a6   :  { %13462 = vmatmul.mubr.bf16.gmra.mrb[52].mxu1 %v19963_v22 }
 0x7a7   :  { %13465 = vmatprep.mubr.bf16.mxu1 %v16897_v16 }
 0x7ae   :  { %13466 = vmatmul.mubr.bf16.gmra.mrb[56].mxu1 %v19964_v56 }
 0x7af   :  { %13469 = vmatprep.mubr.bf16.mxu1 %v16922_v33 }
 0x7b6   :  { %13470 = vmatmul.mubr.bf16.gmra.mrb[60].mxu1 %v16920_v0 }
 0x7b7   :  { %13489 = vmatprep.mubr.bf16.mxu1 %v16501_v44  ;;  %v14981_v44 = vld [vmem:[#allocation8 + $0xa8] sm:$0xff]  }
 0x7be   :  { %13490 = vmatmul.mubr.bf16.vlgmr.msra.gmra.mrb[0].mxu1 %v16498_v34  ;;  %v14982_v34 = vld [vmem:[#allocation8 + $0xb0] sm:$0xff]  }
 0x7bf   :  { %13493 = vmatprep.mubr.bf16.mxu1 %v16532_v63  ;;  %13554 = vmatpush3.bf16.msra.mxu1 %v14976_v26  ;;  %v14983_v63 = vld [vmem:[#allocation8 + $0xb8] sm:$0xff]   ;;  %v17238_v26 = vsel %vm16110_vm5, %v19986_v50, 0 }
 0x7c0   :  { %13555 = vmatprep.subr.bf16.mxu1 %v14977_v14 }
 0x7c3   :  { %13556 = vmatpush3.bf16.msra.mxu1 %v14977_v14  ;;  %v19987_v14 = vld [vmem:[#allocation48_spill] sm:$0xff] }
 0x7c4   :  { %13557 = vmatprep.subr.bf16.mxu1 %v14978_v40 }
 0x7c6   :  { %13494 = vmatmul.mubr.bf16.gmra.mrb[4].mxu1 %v16529_v1  ;;  %v14984_v1 = vld [vmem:[#allocation8 + $0x140] sm:$0xff]  }
 0x7c7   :  { %13497 = vmatprep.mubr.bf16.mxu1 %v16562_v4  ;;  %13558 = vmatpush3.bf16.msra.mxu1 %v14978_v40  ;;  %v19965_v4 = vld [vmem:[#allocation15_spill] sm:$0xff]  ;;  %v17244_v40 = vsel %vm16110_vm5, %v19987_v14, 0 }
 0x7c8   :  { %13559 = vmatprep.subr.bf16.mxu1 %v14979_v46  ;;  %v17118_v7 = vsel %vm16110_vm5, %v19965_v4, 0 }
 0x7cb   :  { %13560 = vmatpush3.bf16.msra.mxu1 %v14979_v46  ;;  %v19988_v46 = vld [vmem:[#allocation53_spill] sm:$0xff] }
 0x7cc   :  { %13561 = vmatprep.subr.bf16.mxu1 %v14980_v62 }
 0x7ce   :  { %13498 = vmatmul.mubr.bf16.gmra.mrb[8].mxu1 %v16559_v61  ;;  %v14985_v61 = vld [vmem:[#allocation8 + $0x148] sm:$0xff]  }
 0x7cf   :  { %13501 = vmatprep.mubr.bf16.mxu1 %v19944_v29  ;;  %13562 = vmatpush3.bf16.msra.mxu1 %v14980_v62  ;;  %v14992_v29 = vld [vmem:[#allocation8 + $0x200] sm:$0xff]   ;;  %v17250_v62 = vsel %vm16110_vm5, %v19988_v46, 0 }
 0x7d0   :  { %13563 = vmatprep.subr.bf16.mxu1 %v14981_v44 }
 0x7d3   :  { %13564 = vmatpush3.bf16.msra.mxu1 %v14981_v44  ;;  %v19989_v44 = vld [vmem:[#allocation52_spill] sm:$0xff] }
 0x7d4   :  { %13565 = vmatprep.subr.bf16.mxu1 %v14982_v34 }
 0x7d6   :  { %13502 = vmatmul.mubr.bf16.gmra.mrb[12].mxu1 %v19945_v41  ;;  %v19973_v41 = vld [vmem:[#allocation20_spill] sm:$0xff] }
 0x7d7   :  { %13505 = vmatprep.mubr.bf16.mxu1 %v19946_v52  ;;  %13566 = vmatpush3.bf16.msra.mxu1 %v14982_v34  ;;  %v17160_v52 = vsel %vm16110_vm5, %v19973_v41, 0  ;;  %v17256_v34 = vsel %vm16110_vm5, %v19989_v44, 0 }
 0x7d8   :  { %13567 = vmatprep.subr.bf16.mxu1 %v14983_v63 }
 0x7db   :  { %13568 = vmatpush3.bf16.msra.mxu1 %v14983_v63  ;;  %v19990_v63 = vld [vmem:[#allocation57_spill] sm:$0xff] }
 0x7dc   :  { %13633 = vmatprep.subr.bf16.mxu1 %v14984_v1 }
 0x7de   :  { %13506 = vmatmul.mubr.bf16.gmra.mrb[16].mxu1 %v19947_v45  ;;  %v19974_v45 = vld [vmem:[#allocation25_spill] sm:$0xff] }
 0x7df   :  { %13509 = vmatprep.mubr.bf16.mxu1 %v19948_v59  ;;  %v17166_v59 = vsel %vm16110_vm5, %v19974_v45, 0 }
 0x7e6   :  { %13510 = vmatmul.mubr.bf16.gmra.mrb[20].mxu1 %v19949_v5  ;;  %v19975_v5 = vld [vmem:[#allocation24_spill] sm:$0xff] }
 0x7e7   :  { %13513 = vmatprep.mubr.bf16.mxu1 %v19950_v37  ;;  %v17172_v37 = vsel %vm16110_vm5, %v19975_v5, 0 }
 0x7ee   :  { %13514 = vmatmul.mubr.bf16.gmra.mrb[24].mxu1 %v19951_v20  ;;  %v19976_v20 = vld [vmem:[#allocation29_spill] sm:$0xff] }
 0x7ef   :  { %13517 = vmatprep.mubr.bf16.mxu1 %v19952_v15  ;;  %v17178_v15 = vsel %vm16110_vm5, %v19976_v20, 0 }
 0x7f6   :  { %13518 = vmatmul.mubr.bf16.gmra.mrb[28].mxu1 %v19953_v42  ;;  %v19977_v42 = vld [vmem:[#allocation28_spill] sm:$0xff] }
 0x7f7   :  { %13521 = vmatprep.mubr.bf16.mxu1 %v19954_v6  ;;  %v17184_v6 = vsel %vm16110_vm5, %v19977_v42, 0 }
 0x7fe   :  { %13522 = vmatmul.mubr.bf16.gmra.mrb[32].mxu1 %v19955_v32  ;;  %v19978_v32 = vld [vmem:[#allocation33_spill] sm:$0xff] }
 0x7ff   :  { %13525 = vmatprep.mubr.bf16.mxu1 %v19956_v9  ;;  %v17190_v9 = vsel %vm16110_vm5, %v19978_v32, 0 }
 0x806   :  { %13526 = vmatmul.mubr.bf16.gmra.mrb[36].mxu1 %v19957_v55  ;;  %v19979_v55 = vld [vmem:[#allocation32_spill] sm:$0xff] }
 0x807   :  { %13529 = vmatprep.mubr.bf16.mxu1 %v19958_v17  ;;  %v17196_v17 = vsel %vm16110_vm5, %v19979_v55, 0 }
 0x80e   :  { %13530 = vmatmul.mubr.bf16.gmra.mrb[40].mxu1 %v19959_v2  ;;  %v19980_v2 = vld [vmem:[#allocation37_spill] sm:$0xff] }
 0x80f   :  { %13533 = vmatprep.mubr.bf16.mxu1 %v19960_v48  ;;  %v17202_v48 = vsel %vm16110_vm5, %v19980_v2, 0 }
 0x816   :  { %13534 = vmatmul.mubr.bf16.gmra.mrb[44].mxu1 %v19961_v11  ;;  %v19981_v11 = vld [vmem:[#allocation36_spill] sm:$0xff] }
 0x817   :  { %13537 = vmatprep.mubr.bf16.mxu1 %v19962_v60  ;;  %v17208_v60 = vsel %vm16110_vm5, %v19981_v11, 0 }
 0x81e   :  { %13538 = vmatmul.mubr.bf16.gmra.mrb[48].mxu1 %v19963_v22  ;;  %v19982_v22 = vld [vmem:[#allocation41_spill] sm:$0xff] }
 0x81f   :  { %13541 = vmatprep.mubr.bf16.mxu1 %v16897_v16  ;;  %v19967_v16 = vld [vmem:[#allocation14_spill] sm:$0xff] }
 0x820   :  { %v17124_v43 = vsel %vm16110_vm5, %v19967_v16, 0  ;;  %v19993_v16 = vld [vmem:[#allocation60_spill] sm:$0xff] }
 0x821   :  { %v17280_v24 = vsel %vm16110_vm5, %v19993_v16, 0 }
 0x826   :  { %13542 = vmatmul.mubr.bf16.gmra.mrb[52].mxu1 %v19964_v56  ;;  %v17214_v56 = vsel %vm16110_vm5, %v19982_v22, 0 }
 0x827   :  { %13545 = vmatprep.mubr.bf16.mxu1 %v16922_v33  ;;  %v14986_v33 = vld [vmem:[#allocation8 + $0x150] sm:$0xff]  }
 0x82e   :  { %13546 = vmatmul.mubr.bf16.gmra.mrb[56].mxu1 %v16920_v0  ;;  %v14987_v0 = vld [vmem:[#allocation8 + $0x158] sm:$0xff]  }
 0x82f   :  { %13549 = vmatprep.mubr.bf16.mxu1 %v19943_v53 }
 0x836   :  { %13550 = vmatmul.mubr.bf16.gmra.mrb[60].mxu1 %v19943_v53 }
 0x837   :  { %13569 = vmatprep.mubr.bf16.mxu1 %v19943_v53 }
 0x83e   :  { %13570 = vmatmul.mubr.bf16.vlgmr.msra.gmra.mrb[0].mxu1 %v19943_v53 }
 0x83f   :  { %13573 = vmatprep.mubr.bf16.mxu1 %v17118_v7  ;;  %13634 = vmatpush3.bf16.msra.mxu1 %v14984_v1  ;;  %v17262_v1 = vsel %vm16110_vm5, %v19990_v63, 0 }
 0x840   :  { %13635 = vmatprep.subr.bf16.mxu1 %v14985_v61 }
 0x843   :  { %13636 = vmatpush3.bf16.msra.mxu1 %v14985_v61  ;;  %v19991_v61 = vld [vmem:[#allocation56_spill] sm:$0xff] }
 0x844   :  { %13637 = vmatprep.subr.bf16.mxu1 %v14986_v33  ;;  %v17268_v4 = vsel %vm16110_vm5, %v19991_v61, 0 }
 0x846   :  { %13574 = vmatmul.mubr.bf16.gmra.mrb[4].mxu1 %v17124_v43 }
 0x847   :  { %13577 = vmatprep.mubr.bf16.mxu1 %v17130_v38  ;;  %13638 = vmatpush3.bf16.msra.mxu1 %v14986_v33  ;;  %v19992_v33 = vld [vmem:[#allocation61_spill] sm:$0xff] }
 0x848   :  { %13639 = vmatprep.subr.bf16.mxu1 %v14987_v0 }
 0x84b   :  { %13640 = vmatpush3.bf16.msra.mxu1 %v14987_v0  ;;  %v17274_v0 = vsel %vm16110_vm5, %v19992_v33, 0 }
 0x84c   :  { %13641 = vmatprep.subr.bf16.mxu1 %v14988_v3 }
 0x84e   :  { %13578 = vmatmul.mubr.bf16.gmra.mrb[8].mxu1 %v17136_v10 }
 0x84f   :  { %13581 = vmatprep.mubr.bf16.mxu1 %v17142_v13  ;;  %13642 = vmatpush3.bf16.msra.mxu1 %v14988_v3  ;;  %v17286_v3 = vsel %vm16110_vm5, %v16918_v47, 0  ;;  %v14994_v47 = vld [vmem:[#allocation8 + $0x210] sm:$0xff]  }
 0x850   :  { %13643 = vmatprep.subr.bf16.mxu1 %v14989_v35 }
 0x853   :  { %13644 = vmatpush3.bf16.msra.mxu1 %v14989_v35  ;;  %v17292_v35 = vsel %vm16110_vm5, %v16916_v57, 0  ;;  %v14996_v57 = vld [vmem:[#allocation8 + $0x220] sm:$0xff]  }
 0x854   :  { %13645 = vmatprep.subr.bf16.mxu1 %v14990_v12 }
 0x856   :  { %13582 = vmatmul.mubr.bf16.gmra.mrb[12].mxu1 %v17148_v23 }
 0x857   :  { %13585 = vmatprep.mubr.bf16.mxu1 %v17154_v25  ;;  %13646 = vmatpush3.bf16.msra.mxu1 %v14990_v12  ;;  %v14999_v12 = vld [vmem:[#allocation8 + $0x238] sm:$0xff]  }
 0x858   :  { %13647 = vmatprep.subr.bf16.mxu1 %v14991_v36 }
 0x85b   :  { %13648 = vmatpush3.bf16.msra.mxu1 %v14991_v36  ;;  %v5439_v36 = vsel %vm16110_vm5, %v16940_v28, 0 }
 0x85c   :  { %13713 = vmatprep.subr.bf16.mxu1 %v14992_v29 }
 0x85e   :  { %13586 = vmatmul.mubr.bf16.gmra.mrb[16].mxu1 %v17160_v52 }
 0x85f   :  { %13589 = vmatprep.mubr.bf16.mxu1 %v17166_v59 }
 0x866   :  { %13590 = vmatmul.mubr.bf16.gmra.mrb[20].mxu1 %v17172_v37 }
 0x867   :  { %13593 = vmatprep.mubr.bf16.mxu1 %v17178_v15 }
 0x86e   :  { %13594 = vmatmul.mubr.bf16.gmra.mrb[24].mxu1 %v17184_v6 }
 0x86f   :  { %13597 = vmatprep.mubr.bf16.mxu1 %v17190_v9 }
 0x876   :  { %13598 = vmatmul.mubr.bf16.gmra.mrb[28].mxu1 %v17196_v17 }
 0x877   :  { %13601 = vmatprep.mubr.bf16.mxu1 %v17202_v48 }
 0x87e   :  { %13602 = vmatmul.mubr.bf16.gmra.mrb[32].mxu1 %v17208_v60 }
 0x87f   :  { %13605 = vmatprep.mubr.bf16.mxu1 %v17214_v56 }
 0x886   :  { %13606 = vmatmul.mubr.bf16.gmra.mrb[36].mxu1 %v17220_v51 }
 0x887   :  { %13609 = vmatprep.mubr.bf16.mxu1 %v17226_v31 }
 0x88e   :  { %13610 = vmatmul.mubr.bf16.gmra.mrb[40].mxu1 %v17232_v58 }
 0x88f   :  { %13613 = vmatprep.mubr.bf16.mxu1 %v17238_v26 }
 0x896   :  { %13614 = vmatmul.mubr.bf16.gmra.mrb[44].mxu1 %v17244_v40 }
 0x897   :  { %13617 = vmatprep.mubr.bf16.mxu1 %v17250_v62 }
 0x89e   :  { %13618 = vmatmul.mubr.bf16.gmra.mrb[48].mxu1 %v17256_v34 }
 0x89f   :  { %13621 = vmatprep.mubr.bf16.mxu1 %v17262_v1 }
 0x8a6   :  { %13622 = vmatmul.mubr.bf16.gmra.mrb[52].mxu1 %v17268_v4 }
 0x8a7   :  { %13625 = vmatprep.mubr.bf16.mxu1 %v17274_v0 }
 0x8ae   :  { %13626 = vmatmul.mubr.bf16.gmra.mrb[56].mxu1 %v17280_v24 }
 0x8af   :  { %13629 = vmatprep.mubr.bf16.mxu1 %v17286_v3 }
 0x8b6   :  { %13630 = vmatmul.mubr.bf16.gmra.mrb[60].mxu1 %v17292_v35 }
 0x8b7   :  { %13649 = vmatprep.mubr.bf16.mxu1 %v17118_v7  ;;  %v14997_v7 = vld [vmem:[#allocation8 + $0x228] sm:$0xff]  }
 0x8be   :  { %13650 = vmatmul.mubr.bf16.vlgmr.msra.gmra.mrb[0].mxu1 %v17124_v43  ;;  %v14998_v43 = vld [vmem:[#allocation8 + $0x230] sm:$0xff]  }
 0x8bf   :  { %13653 = vmatprep.mubr.bf16.mxu1 %v17130_v38  ;;  %13714 = vmatpush3.bf16.msra.mxu1 %v14992_v29 }
 0x8c0   :  { %13715 = vmatprep.subr.bf16.mxu1 %v14993_v19 }
 0x8c3   :  { %13716 = vmatpush3.bf16.msra.mxu1 %v14993_v19 }
 0x8c4   :  { %13717 = vmatprep.subr.bf16.mxu1 %v14994_v47 }
 0x8c6   :  { %13654 = vmatmul.mubr.bf16.gmra.mrb[4].mxu1 %v17136_v10 }
 0x8c7   :  { %13657 = vmatprep.mubr.bf16.mxu1 %v17142_v13  ;;  %13718 = vmatpush3.bf16.msra.mxu1 %v14994_v47 }
 0x8c8   :  { %13719 = vmatprep.subr.bf16.mxu1 %v14995_v39 }
 0x8cb   :  { %13720 = vmatpush3.bf16.msra.mxu1 %v14995_v39 }
 0x8cc   :  { %13721 = vmatprep.subr.bf16.mxu1 %v14996_v57 }
 0x8ce   :  { %13658 = vmatmul.mubr.bf16.gmra.mrb[8].mxu1 %v17148_v23 }
 0x8cf   :  { %13661 = vmatprep.mubr.bf16.mxu1 %v17154_v25  ;;  %13722 = vmatpush3.bf16.msra.mxu1 %v14996_v57 }
 0x8d0   :  { %13723 = vmatprep.subr.bf16.mxu1 %v14997_v7 }
 0x8d3   :  { %13724 = vmatpush3.bf16.msra.mxu1 %v14997_v7 }
 0x8d4   :  { %13725 = vmatprep.subr.bf16.mxu1 %v14998_v43 }
 0x8d6   :  { %13662 = vmatmul.mubr.bf16.gmra.mrb[12].mxu1 %v17160_v52 }
 0x8d7   :  { %13665 = vmatprep.mubr.bf16.mxu1 %v17166_v59  ;;  %13726 = vmatpush3.bf16.msra.mxu1 %v14998_v43 }
 0x8d8   :  { %13727 = vmatprep.subr.bf16.mxu1 %v14999_v12 }
 0x8db   :  { %13728 = vmatpush3.bf16.msra.mxu1 %v14999_v12 }
 0x8de   :  { %13666 = vmatmul.mubr.bf16.gmra.mrb[16].mxu1 %v17172_v37 }
 0x8df   :  { %13669 = vmatprep.mubr.bf16.mxu1 %v17178_v15 }
 0x8e6   :  { %13670 = vmatmul.mubr.bf16.gmra.mrb[20].mxu1 %v17184_v6 }
 0x8e7   :  { %13673 = vmatprep.mubr.bf16.mxu1 %v17190_v9 }
 0x8ee   :  { %13674 = vmatmul.mubr.bf16.gmra.mrb[24].mxu1 %v17196_v17 }
 0x8ef   :  { %13677 = vmatprep.mubr.bf16.mxu1 %v17202_v48 }
 0x8f6   :  { %13678 = vmatmul.mubr.bf16.gmra.mrb[28].mxu1 %v17208_v60 }
 0x8f7   :  { %13681 = vmatprep.mubr.bf16.mxu1 %v17214_v56 }
 0x8fe   :  { %13682 = vmatmul.mubr.bf16.gmra.mrb[32].mxu1 %v17220_v51 }
 0x8ff   :  { %13685 = vmatprep.mubr.bf16.mxu1 %v17226_v31 }
 0x906   :  { %13686 = vmatmul.mubr.bf16.gmra.mrb[36].mxu1 %v17232_v58 }
 0x907   :  { %13689 = vmatprep.mubr.bf16.mxu1 %v17238_v26 }
 0x90e   :  { %13690 = vmatmul.mubr.bf16.gmra.mrb[40].mxu1 %v17244_v40 }
 0x90f   :  { %13693 = vmatprep.mubr.bf16.mxu1 %v17250_v62 }
 0x916   :  { %13694 = vmatmul.mubr.bf16.gmra.mrb[44].mxu1 %v17256_v34 }
 0x917   :  { %13697 = vmatprep.mubr.bf16.mxu1 %v17262_v1 }
 0x91e   :  { %13698 = vmatmul.mubr.bf16.gmra.mrb[48].mxu1 %v17268_v4 }
 0x91f   :  { %13701 = vmatprep.mubr.bf16.mxu1 %v17274_v0 }
 0x926   :  { %13702 = vmatmul.mubr.bf16.gmra.mrb[52].mxu1 %v17280_v24 }
 0x927   :  { %13705 = vmatprep.mubr.bf16.mxu1 %v17286_v3 }
 0x92e   :  { %13706 = vmatmul.mubr.bf16.gmra.mrb[56].mxu1 %v17292_v35 }
 0x92f   :  { %13709 = vmatprep.mubr.bf16.mxu1 %v5439_v36 }
 0x936   :  { %13710 = vmatmul.mubr.bf16.gmra.mrb[60].mxu1 %v5440_v8 }
 0x937   :  { %13729 = vmatprep.mubr.bf16.mxu1 %v17130_v38 }
 0x93e   :  { %13730 = vmatmul.mubr.bf16.vlgmr.msra.gmra.mrb[0].mxu1 %v17136_v10 }
 0x93f   :  { %13733 = vmatprep.mubr.bf16.mxu1 %v17142_v13 }
 0x946   :  { %13734 = vmatmul.mubr.bf16.gmra.mrb[4].mxu1 %v17148_v23 }
 0x947   :  { %13737 = vmatprep.mubr.bf16.mxu1 %v17154_v25 }
 0x94e   :  { %13738 = vmatmul.mubr.bf16.gmra.mrb[8].mxu1 %v17160_v52 }
 0x94f   :  { %13741 = vmatprep.mubr.bf16.mxu1 %v17166_v59 }
 0x956   :  { %13742 = vmatmul.mubr.bf16.gmra.mrb[12].mxu1 %v17172_v37 }
 0x957   :  { %13745 = vmatprep.mubr.bf16.mxu1 %v17178_v15 }
 0x95e   :  { %13746 = vmatmul.mubr.bf16.gmra.mrb[16].mxu1 %v17184_v6 }
 0x95f   :  { %13749 = vmatprep.mubr.bf16.mxu1 %v17190_v9 }
 0x966   :  { %13750 = vmatmul.mubr.bf16.gmra.mrb[20].mxu1 %v17196_v17 }
 0x967   :  { %13753 = vmatprep.mubr.bf16.mxu1 %v17202_v48 }
 0x96e   :  { %13754 = vmatmul.mubr.bf16.gmra.mrb[24].mxu1 %v17208_v60 }
 0x96f   :  { %13757 = vmatprep.mubr.bf16.mxu1 %v17214_v56 }
 0x976   :  { %13758 = vmatmul.mubr.bf16.gmra.mrb[28].mxu1 %v17220_v51 }
 0x977   :  { %13761 = vmatprep.mubr.bf16.mxu1 %v17226_v31 }
 0x97e   :  { %13762 = vmatmul.mubr.bf16.gmra.mrb[32].mxu1 %v17232_v58 }
 0x97f   :  { %13765 = vmatprep.mubr.bf16.mxu1 %v17238_v26 }
 0x986   :  { %13766 = vmatmul.mubr.bf16.gmra.mrb[36].mxu1 %v17244_v40 }
 0x987   :  { %13769 = vmatprep.mubr.bf16.mxu1 %v17250_v62 }
 0x98e   :  { %13770 = vmatmul.mubr.bf16.gmra.mrb[40].mxu1 %v17256_v34 }
 0x98f   :  { %13773 = vmatprep.mubr.bf16.mxu1 %v17262_v1 }
 0x996   :  { %13774 = vmatmul.mubr.bf16.gmra.mrb[44].mxu1 %v17268_v4 }
 0x997   :  { %13777 = vmatprep.mubr.bf16.mxu1 %v17274_v0 }
 0x99e   :  { %13778 = vmatmul.mubr.bf16.gmra.mrb[48].mxu1 %v17280_v24 }
 0x99f   :  { %13781 = vmatprep.mubr.bf16.mxu1 %v17286_v3 }
 0x9a6   :  { %13782 = vmatmul.mubr.bf16.gmra.mrb[52].mxu1 %v17292_v35 }
 0x9a7   :  { %13785 = vmatprep.mubr.bf16.mxu1 %v5439_v36 }
 0x9ae   :  { %13786 = vmatmul.mubr.bf16.gmra.mrb[56].mxu1 %v5440_v8 }
 0x9af   :  { %13789 = vmatprep.mubr.bf16.mxu1 %v19943_v53 }
 0x9b6   :  { %13790 = vmatmul.mubr.bf16.gmra.mrb[60].mxu1 %v19943_v53 }
 0xa11   :  { %v17361_v27 = vpop.f32.mrb[0].mxu1 }
 0xa12   :  { %19994 = vst [vmem:[#allocation23_spill] sm:$0xff] %v17361_v27  ;;  %v17363_v28 = vpop.f32.mrb[1].mxu1  ;;  %v9534_v13 = vmul.f32 %v17361_v27, %v17361_v27 }
 0xa13   :  { %19995 = vst [vmem:[#allocation22_spill] sm:$0xff] %v17363_v28  ;;  %v17365_v21 = vpop.f32.mrb[2].mxu1  ;;  %v9532_v25 = vmul.f32 %v17363_v28, %v17363_v28 }
 0xa14   :  { %19996 = vst [vmem:[#allocation27_spill] sm:$0xff] %v17365_v21  ;;  %v17367_v38 = vpop.f32.mrb[3].mxu1  ;;  %v9535_v45 = vmul.f32 %v17365_v21, %v17365_v21 }
 0xa15   :  { %19997 = vst [vmem:[#allocation26_spill] sm:$0xff] %v17367_v38  ;;  %v9533_v15 = vmul.f32 %v17367_v38, %v17367_v38 }
 0xa19   :  { %v17369_v10 = vpop.f32.mrb[4].mxu1 }
 0xa1a   :  { %19998 = vst [vmem:[#allocation31_spill] sm:$0xff] %v17369_v10  ;;  %v9488_v23 = vadd.f32 %v17369_v10, %v17361_v27  ;;  %v9538_v18 = vmul.f32 %v17369_v10, %v17369_v10  ;;  %v17377_v53 = vpop.f32.mrb[5].mxu1 }
 0xa1b   :  { %19999 = vst [vmem:[#allocation30_spill] sm:$0xff] %v17377_v53  ;;  %v9458_v29 = vadd.f32 %v17377_v53, %v17363_v28  ;;  %v9536_v41 = vmul.f32 %v17377_v53, %v17377_v53  ;;  %v17385_v52 = vpop.f32.mrb[6].mxu1 }
 0xa1c   :  { %20000 = vst [vmem:[#allocation35_spill] sm:$0xff] %v17385_v52  ;;  %v9626_v59 = vadd.f32 %v9538_v18, %v9534_v13  ;;  %v9503_v5 = vadd.f32 %v17385_v52, %v17365_v21  ;;  %v9539_v37 = vmul.f32 %v17385_v52, %v17385_v52  ;;  %v17393_v20 = vpop.f32.mrb[7].mxu1 }
 0xa1d   :  { %20001 = vst [vmem:[#allocation34_spill] sm:$0xff] %v17393_v20  ;;  %v9596_v42 = vadd.f32 %v9536_v41, %v9532_v25  ;;  %v9473_v6 = vadd.f32 %v17393_v20, %v17367_v38  ;;  %v9537_v32 = vmul.f32 %v17393_v20, %v17393_v20 }
 0xa1e   :  { %v9641_v9 = vadd.f32 %v9539_v37, %v9535_v45 }
 0xa1f   :  { %v9611_v55 = vadd.f32 %v9537_v32, %v9533_v15 }
 0xa21   :  { %v17401_v17 = vpop.f32.mrb[8].mxu1 }
 0xa22   :  { %20002 = vst [vmem:[#allocation39_spill] sm:$0xff] %v17401_v17  ;;  %v9489_v2 = vadd.f32 %v17401_v17, %v9488_v23  ;;  %v9542_v48 = vmul.f32 %v17401_v17, %v17401_v17  ;;  %v17406_v11 = vpop.f32.mrb[9].mxu1 }
 0xa23   :  { %20003 = vst [vmem:[#allocation38_spill] sm:$0xff] %v17406_v11  ;;  %v9459_v60 = vadd.f32 %v9458_v29, %v17406_v11  ;;  %v9540_v22 = vmul.f32 %v17406_v11, %v17406_v11  ;;  %v17411_v56 = vpop.f32.mrb[10].mxu1 }
 0xa24   :  { %20004 = vst [vmem:[#allocation43_spill] sm:$0xff] %v17411_v56  ;;  %v9627_v54 = vadd.f32 %v9626_v59, %v9542_v48  ;;  %v9504_v51 = vadd.f32 %v17411_v56, %v9503_v5  ;;  %v9543_v30 = vmul.f32 %v17411_v56, %v17411_v56  ;;  %v17416_v31 = vpop.f32.mrb[11].mxu1 }
 0xa25   :  { %20005 = vst [vmem:[#allocation42_spill] sm:$0xff] %v17416_v31  ;;  %v9597_v49 = vadd.f32 %v9596_v42, %v9540_v22  ;;  %v9474_v58 = vadd.f32 %v9473_v6, %v17416_v31  ;;  %v9541_v50 = vmul.f32 %v17416_v31, %v17416_v31 }
 0xa26   :  { %v9642_v26 = vadd.f32 %v9641_v9, %v9543_v30 }
 0xa27   :  { %v9612_v14 = vadd.f32 %v9611_v55, %v9541_v50 }
 0xa29   :  { %v17421_v40 = vpop.f32.mrb[12].mxu1 }
 0xa2a   :  { %20006 = vst [vmem:[#allocation47_spill] sm:$0xff] %v17421_v40  ;;  %v9490_v46 = vadd.f32 %v17421_v40, %v9489_v2  ;;  %v9546_v62 = vmul.f32 %v17421_v40, %v17421_v40  ;;  %v17426_v44 = vpop.f32.mrb[13].mxu1 }
 0xa2b   :  { %20007 = vst [vmem:[#allocation46_spill] sm:$0xff] %v17426_v44  ;;  %v9460_v34 = vadd.f32 %v9459_v60, %v17426_v44  ;;  %v9544_v63 = vmul.f32 %v17426_v44, %v17426_v44  ;;  %v17431_v1 = vpop.f32.mrb[14].mxu1 }
 0xa2c   :  { %20008 = vst [vmem:[#allocation51_spill] sm:$0xff] %v17431_v1  ;;  %v9628_v61 = vadd.f32 %v9627_v54, %v9546_v62  ;;  %v9505_v4 = vadd.f32 %v17431_v1, %v9504_v51  ;;  %v9547_v33 = vmul.f32 %v17431_v1, %v17431_v1  ;;  %v17436_v0 = vpop.f32.mrb[15].mxu1 }
 0xa2d   :  { %20009 = vst [vmem:[#allocation50_spill] sm:$0xff] %v17436_v0  ;;  %v9598_v16 = vadd.f32 %v9597_v49, %v9544_v63  ;;  %v9475_v24 = vadd.f32 %v9474_v58, %v17436_v0  ;;  %v9545_v3 = vmul.f32 %v17436_v0, %v17436_v0 }
 0xa2e   :  { %v9643_v35 = vadd.f32 %v9642_v26, %v9547_v33 }
 0xa2f   :  { %v9613_v19 = vadd.f32 %v9612_v14, %v9545_v3 }
 0xa31   :  { %v17441_v47 = vpop.f32.mrb[16].mxu1 }
 0xa32   :  { %20010 = vst [vmem:[#allocation55_spill] sm:$0xff] %v17441_v47  ;;  %v9491_v39 = vadd.f32 %v17441_v47, %v9490_v46  ;;  %v9550_v57 = vmul.f32 %v17441_v47, %v17441_v47  ;;  %v17446_v7 = vpop.f32.mrb[17].mxu1 }
 0xa33   :  { %20011 = vst [vmem:[#allocation54_spill] sm:$0xff] %v17446_v7  ;;  %v9461_v43 = vadd.f32 %v9460_v34, %v17446_v7  ;;  %v9548_v12 = vmul.f32 %v17446_v7, %v17446_v7  ;;  %v17451_v36 = vpop.f32.mrb[18].mxu1 }
 0xa34   :  { %20012 = vst [vmem:[#allocation59_spill] sm:$0xff] %v17451_v36  ;;  %v9629_v8 = vadd.f32 %v9628_v61, %v9550_v57  ;;  %v9506_v13 = vadd.f32 %v17451_v36, %v9505_v4  ;;  %v9551_v23 = vmul.f32 %v17451_v36, %v17451_v36  ;;  %v17456_v18 = vpop.f32.mrb[19].mxu1 }
 0xa35   :  { %20013 = vst [vmem:[#allocation58_spill] sm:$0xff] %v17456_v18  ;;  %v9599_v25 = vadd.f32 %v9598_v16, %v9548_v12  ;;  %v9476_v29 = vadd.f32 %v9475_v24, %v17456_v18  ;;  %v9549_v41 = vmul.f32 %v17456_v18, %v17456_v18 }
 0xa36   :  { %v9644_v45 = vadd.f32 %v9643_v35, %v9551_v23 }
 0xa37   :  { %v9614_v59 = vadd.f32 %v9613_v19, %v9549_v41 }
 0xa39   :  { %v17461_v5 = vpop.f32.mrb[20].mxu1 }
 0xa3a   :  { %20014 = vst [vmem:[#allocation62_spill] sm:$0xff] %v17461_v5  ;;  %v9492_v37 = vadd.f32 %v17461_v5, %v9491_v39  ;;  %v9554_v15 = vmul.f32 %v17461_v5, %v17461_v5  ;;  %v17466_v42 = vpop.f32.mrb[21].mxu1 }
 0xa3b   :  { %20015 = vst [vmem:[#allocation15_spill] sm:$0xff] %v17466_v42  ;;  %v9462_v6 = vadd.f32 %v9461_v43, %v17466_v42  ;;  %v9552_v32 = vmul.f32 %v17466_v42, %v17466_v42  ;;  %v17471_v9 = vpop.f32.mrb[22].mxu1 }
 0xa3c   :  { %20016 = vst [vmem:[#allocation13_spill] sm:$0xff] %v17471_v9  ;;  %v9630_v55 = vadd.f32 %v9629_v8, %v9554_v15  ;;  %v9507_v2 = vadd.f32 %v17471_v9, %v9506_v13  ;;  %v9555_v48 = vmul.f32 %v17471_v9, %v17471_v9  ;;  %v17476_v60 = vpop.f32.mrb[23].mxu1 }
 0xa3d   :  { %20017 = vst [vmem:[#allocation14_spill] sm:$0xff] %v17476_v60  ;;  %v9600_v22 = vadd.f32 %v9599_v25, %v9552_v32  ;;  %v9477_v54 = vadd.f32 %v9476_v29, %v17476_v60  ;;  %v9553_v51 = vmul.f32 %v17476_v60, %v17476_v60 }
 0xa3e   :  { %v9645_v30 = vadd.f32 %v9644_v45, %v9555_v48 }
 0xa3f   :  { %v9615_v49 = vadd.f32 %v9614_v59, %v9553_v51 }
 0xa41   :  { %v17481_v58 = vpop.f32.mrb[24].mxu1 }
 0xa42   :  { %20018 = vst [vmem:[#allocation17_spill] sm:$0xff] %v17481_v58  ;;  %v9493_v50 = vadd.f32 %v17481_v58, %v9492_v37  ;;  %v9558_v26 = vmul.f32 %v17481_v58, %v17481_v58  ;;  %v17486_v14 = vpop.f32.mrb[25].mxu1 }
 0xa43   :  { %20019 = vst [vmem:[#allocation16_spill] sm:$0xff] %v17486_v14  ;;  %v9463_v46 = vadd.f32 %v9462_v6, %v17486_v14  ;;  %v9556_v62 = vmul.f32 %v17486_v14, %v17486_v14  ;;  %v17491_v34 = vpop.f32.mrb[26].mxu1 }
 0xa44   :  { %20020 = vst [vmem:[#allocation19_spill] sm:$0xff] %v17491_v34  ;;  %v9631_v63 = vadd.f32 %v9630_v55, %v9558_v26  ;;  %v9508_v61 = vadd.f32 %v17491_v34, %v9507_v2  ;;  %v9559_v4 = vmul.f32 %v17491_v34, %v17491_v34  ;;  %v17496_v33 = vpop.f32.mrb[27].mxu1 }
 0xa45   :  { %20021 = vst [vmem:[#allocation18_spill] sm:$0xff] %v17496_v33  ;;  %v9601_v16 = vadd.f32 %v9600_v22, %v9556_v62  ;;  %v9478_v24 = vadd.f32 %v9477_v54, %v17496_v33  ;;  %v9557_v3 = vmul.f32 %v17496_v33, %v17496_v33 }
 0xa46   :  { %v9646_v35 = vadd.f32 %v9645_v30, %v9559_v4 }
 0xa47   :  { %v9616_v19 = vadd.f32 %v9615_v49, %v9557_v3 }
 0xa49   :  { %v17501_v39 = vpop.f32.mrb[28].mxu1 }
 0xa4a   :  { %20022 = vst [vmem:[#allocation21_spill] sm:$0xff] %v17501_v39  ;;  %v9494_v57 = vadd.f32 %v17501_v39, %v9493_v50  ;;  %v9562_v43 = vmul.f32 %v17501_v39, %v17501_v39  ;;  %v17506_v12 = vpop.f32.mrb[29].mxu1 }
 0xa4b   :  { %20023 = vst [vmem:[#allocation20_spill] sm:$0xff] %v17506_v12  ;;  %v9464_v8 = vadd.f32 %v9463_v46, %v17506_v12  ;;  %v9560_v13 = vmul.f32 %v17506_v12, %v17506_v12  ;;  %v17511_v23 = vpop.f32.mrb[30].mxu1 }
 0xa4c   :  { %20024 = vst [vmem:[#allocation25_spill] sm:$0xff] %v17511_v23  ;;  %v9632_v25 = vadd.f32 %v9631_v63, %v9562_v43  ;;  %v9509_v29 = vadd.f32 %v17511_v23, %v9508_v61  ;;  %v9563_v41 = vmul.f32 %v17511_v23, %v17511_v23  ;;  %v17516_v45 = vpop.f32.mrb[31].mxu1 }
 0xa4d   :  { %20025 = vst [vmem:[#allocation24_spill] sm:$0xff] %v17516_v45  ;;  %v9602_v59 = vadd.f32 %v9601_v16, %v9560_v13  ;;  %v9479_v37 = vadd.f32 %v9478_v24, %v17516_v45  ;;  %v9561_v15 = vmul.f32 %v17516_v45, %v17516_v45 }
 0xa4e   :  { %v9647_v6 = vadd.f32 %v9646_v35, %v9563_v41 }
 0xa4f   :  { %v9617_v32 = vadd.f32 %v9616_v19, %v9561_v15 }
 0xa51   :  { %v17521_v55 = vpop.f32.mrb[32].mxu1 }
 0xa52   :  { %20026 = vst [vmem:[#allocation29_spill] sm:$0xff] %v17521_v55  ;;  %v9495_v2 = vadd.f32 %v17521_v55, %v9494_v57  ;;  %v9566_v48 = vmul.f32 %v17521_v55, %v17521_v55  ;;  %v17526_v22 = vpop.f32.mrb[33].mxu1 }
 0xa53   :  { %20027 = vst [vmem:[#allocation28_spill] sm:$0xff] %v17526_v22  ;;  %v9465_v54 = vadd.f32 %v9464_v8, %v17526_v22  ;;  %v9564_v51 = vmul.f32 %v17526_v22, %v17526_v22  ;;  %v17531_v30 = vpop.f32.mrb[34].mxu1 }
 0xa54   :  { %20028 = vst [vmem:[#allocation33_spill] sm:$0xff] %v17531_v30  ;;  %v9633_v49 = vadd.f32 %v9632_v25, %v9566_v48  ;;  %v9510_v50 = vadd.f32 %v17531_v30, %v9509_v29  ;;  %v9567_v26 = vmul.f32 %v17531_v30, %v17531_v30  ;;  %v17536_v46 = vpop.f32.mrb[35].mxu1 }
 0xa55   :  { %20029 = vst [vmem:[#allocation32_spill] sm:$0xff] %v17536_v46  ;;  %v9603_v62 = vadd.f32 %v9602_v59, %v9564_v51  ;;  %v9480_v63 = vadd.f32 %v9479_v37, %v17536_v46  ;;  %v9565_v61 = vmul.f32 %v17536_v46, %v17536_v46 }
 0xa56   :  { %v9648_v4 = vadd.f32 %v9647_v6, %v9567_v26 }
 0xa57   :  { %v9618_v16 = vadd.f32 %v9617_v32, %v9565_v61 }
 0xa59   :  { %v17541_v24 = vpop.f32.mrb[36].mxu1 }
 0xa5a   :  { %20030 = vst [vmem:[#allocation37_spill] sm:$0xff] %v17541_v24  ;;  %v9496_v3 = vadd.f32 %v17541_v24, %v9495_v2  ;;  %v9570_v35 = vmul.f32 %v17541_v24, %v17541_v24  ;;  %v17546_v19 = vpop.f32.mrb[37].mxu1 }
 0xa5b   :  { %20031 = vst [vmem:[#allocation36_spill] sm:$0xff] %v17546_v19  ;;  %v9466_v57 = vadd.f32 %v9465_v54, %v17546_v19  ;;  %v9568_v43 = vmul.f32 %v17546_v19, %v17546_v19  ;;  %v17551_v8 = vpop.f32.mrb[38].mxu1 }
 0xa5c   :  { %20032 = vst [vmem:[#allocation41_spill] sm:$0xff] %v17551_v8  ;;  %v9634_v13 = vadd.f32 %v9633_v49, %v9570_v35  ;;  %v9511_v25 = vadd.f32 %v17551_v8, %v9510_v50  ;;  %v9571_v29 = vmul.f32 %v17551_v8, %v17551_v8  ;;  %v17556_v41 = vpop.f32.mrb[39].mxu1 }
 0xa5d   :  { %20033 = vst [vmem:[#allocation40_spill] sm:$0xff] %v17556_v41  ;;  %v9604_v59 = vadd.f32 %v9603_v62, %v9568_v43  ;;  %v9481_v37 = vadd.f32 %v9480_v63, %v17556_v41  ;;  %v9569_v15 = vmul.f32 %v17556_v41, %v17556_v41 }
 0xa5e   :  { %v9649_v6 = vadd.f32 %v9648_v4, %v9571_v29 }
 0xa5f   :  { %v9619_v32 = vadd.f32 %v9618_v16, %v9569_v15 }
 0xa61   :  { %v17561_v2 = vpop.f32.mrb[40].mxu1 }
 0xa62   :  { %20034 = vst [vmem:[#allocation45_spill] sm:$0xff] %v17561_v2  ;;  %v9497_v48 = vadd.f32 %v17561_v2, %v9496_v3  ;;  %v9574_v54 = vmul.f32 %v17561_v2, %v17561_v2  ;;  %v17566_v51 = vpop.f32.mrb[41].mxu1 }
 0xa63   :  { %20035 = vst [vmem:[#allocation44_spill] sm:$0xff] %v17566_v51  ;;  %v9467_v49 = vadd.f32 %v9466_v57, %v17566_v51  ;;  %v9572_v50 = vmul.f32 %v17566_v51, %v17566_v51  ;;  %v17571_v26 = vpop.f32.mrb[42].mxu1 }
 0xa64   :  { %20036 = vst [vmem:[#allocation49_spill] sm:$0xff] %v17571_v26  ;;  %v9635_v62 = vadd.f32 %v9634_v13, %v9574_v54  ;;  %v9512_v63 = vadd.f32 %v17571_v26, %v9511_v25  ;;  %v9575_v61 = vmul.f32 %v17571_v26, %v17571_v26  ;;  %v17576_v4 = vpop.f32.mrb[43].mxu1 }
 0xa65   :  { %20037 = vst [vmem:[#allocation48_spill] sm:$0xff] %v17576_v4  ;;  %v9605_v16 = vadd.f32 %v9604_v59, %v9572_v50  ;;  %v9482_v3 = vadd.f32 %v9481_v37, %v17576_v4  ;;  %v9573_v35 = vmul.f32 %v17576_v4, %v17576_v4 }
 0xa66   :  { %v9650_v57 = vadd.f32 %v9649_v6, %v9575_v61 }
 0xa67   :  { %v9620_v43 = vadd.f32 %v9619_v32, %v9573_v35 }
 0xa69   :  { %v17581_v29 = vpop.f32.mrb[44].mxu1 }
 0xa6a   :  { %20038 = vst [vmem:[#allocation53_spill] sm:$0xff] %v17581_v29  ;;  %v9498_v15 = vadd.f32 %v17581_v29, %v9497_v48  ;;  %v9578_v13 = vmul.f32 %v17581_v29, %v17581_v29  ;;  %v17586_v25 = vpop.f32.mrb[45].mxu1 }
 0xa6b   :  { %20039 = vst [vmem:[#allocation52_spill] sm:$0xff] %v17586_v25  ;;  %v9468_v54 = vadd.f32 %v9467_v49, %v17586_v25  ;;  %v9576_v59 = vmul.f32 %v17586_v25, %v17586_v25  ;;  %v17591_v37 = vpop.f32.mrb[46].mxu1 }
 0xa6c   :  { %20040 = vst [vmem:[#allocation57_spill] sm:$0xff] %v17591_v37  ;;  %v9636_v50 = vadd.f32 %v9635_v62, %v9578_v13  ;;  %v9513_v6 = vadd.f32 %v17591_v37, %v9512_v63  ;;  %v9579_v32 = vmul.f32 %v17591_v37, %v17591_v37  ;;  %v17596_v61 = vpop.f32.mrb[47].mxu1 }
 0xa6d   :  { %20041 = vst [vmem:[#allocation56_spill] sm:$0xff] %v17596_v61  ;;  %v9606_v48 = vadd.f32 %v9605_v16, %v9576_v59  ;;  %v9483_v35 = vadd.f32 %v9482_v3, %v17596_v61  ;;  %v9577_v4 = vmul.f32 %v17596_v61, %v17596_v61 }
 0xa6e   :  { %v9651_v49 = vadd.f32 %v9650_v57, %v9579_v32 }
 0xa6f   :  { %v9621_v51 = vadd.f32 %v9620_v43, %v9577_v4 }
 0xa71   :  { %v17601_v41 = vpop.f32.mrb[48].mxu1 }
 0xa72   :  { %20042 = vst [vmem:[#allocation61_spill] sm:$0xff] %v17601_v41  ;;  %v9499_v25 = vadd.f32 %v17601_v41, %v9498_v15  ;;  %v9582_v62 = vmul.f32 %v17601_v41, %v17601_v41  ;;  %v17606_v63 = vpop.f32.mrb[49].mxu1 }
 0xa73   :  { %20043 = vst [vmem:[#allocation60_spill] sm:$0xff] %v17606_v63  ;;  %v9469_v13 = vadd.f32 %v9468_v54, %v17606_v63  ;;  %v9580_v16 = vmul.f32 %v17606_v63, %v17606_v63  ;;  %v17611_v3 = vpop.f32.mrb[50].mxu1 }
 0xa74   :  { %20044 = vst [vmem:[#allocation63_spill] sm:$0xff] %v17611_v3  ;;  %v9637_v59 = vadd.f32 %v9636_v50, %v9582_v62  ;;  %v9514_v57 = vadd.f32 %v17611_v3, %v9513_v6  ;;  %v9583_v4 = vmul.f32 %v17611_v3, %v17611_v3  ;;  %v17616_v43 = vpop.f32.mrb[51].mxu1 }
 0xa75   :  { %20045 = vst [vmem:[#allocation64_spill] sm:$0xff] %v17616_v43  ;;  %v9607_v15 = vadd.f32 %v9606_v48, %v9580_v16  ;;  %v9484_v32 = vadd.f32 %v9483_v35, %v17616_v43  ;;  %v9581_v61 = vmul.f32 %v17616_v43, %v17616_v43 }
 0xa76   :  { %v9652_v54 = vadd.f32 %v9651_v49, %v9583_v4 }
 0xa77   :  { %v9622_v19 = vadd.f32 %v9621_v51, %v9581_v61 }
 0xa79   :  { %v17621_v46 = vpop.f32.mrb[52].mxu1 }
 0xa7a   :  { %20046 = vst [vmem:[#allocation65_spill] sm:$0xff] %v17621_v46  ;;  %v9500_v63 = vadd.f32 %v17621_v46, %v9499_v25  ;;  %v9586_v50 = vmul.f32 %v17621_v46, %v17621_v46  ;;  %v17626_v6 = vpop.f32.mrb[53].mxu1 }
 0xa7b   :  { %20047 = vst [vmem:[#allocation66_spill] sm:$0xff] %v17626_v6  ;;  %v9470_v62 = vadd.f32 %v9469_v13, %v17626_v6  ;;  %v9584_v48 = vmul.f32 %v17626_v6, %v17626_v6  ;;  %v17631_v35 = vpop.f32.mrb[54].mxu1 }
 0xa7c   :  { %20048 = vst [vmem:[#allocation67_spill] sm:$0xff] %v17631_v35  ;;  %v9638_v16 = vadd.f32 %v9637_v59, %v9586_v50  ;;  %v9515_v49 = vadd.f32 %v17631_v35, %v9514_v57  ;;  %v9587_v51 = vmul.f32 %v17631_v35, %v17631_v35  ;;  %v17636_v61 = vpop.f32.mrb[55].mxu1 }
 0xa7d   :  { %20049 = vst [vmem:[#allocation68_spill] sm:$0xff] %v17636_v61  ;;  %v9608_v25 = vadd.f32 %v9607_v15, %v9584_v48  ;;  %v9485_v4 = vadd.f32 %v9484_v32, %v17636_v61  ;;  %v9585_v43 = vmul.f32 %v17636_v61, %v17636_v61 }
 0xa7e   :  { %v9653_v13 = vadd.f32 %v9652_v54, %v9587_v51 }
 0xa7f   :  { %v9623_v22 = vadd.f32 %v9622_v19, %v9585_v43 }
 0xa81   :  { %v17641_v45 = vpop.f32.mrb[56].mxu1 }
 0xa82   :  { %20050 = vst [vmem:[#allocation69_spill] sm:$0xff] %v17641_v45  ;;  %v9501_v6 = vadd.f32 %v17641_v45, %v9500_v63  ;;  %v9590_v59 = vmul.f32 %v17641_v45, %v17641_v45  ;;  %v17646_v57 = vpop.f32.mrb[57].mxu1 }
 0xa83   :  { %20051 = vst [vmem:[#allocation70_spill] sm:$0xff] %v17646_v57  ;;  %v9471_v50 = vadd.f32 %v9470_v62, %v17646_v57  ;;  %v9588_v15 = vmul.f32 %v17646_v57, %v17646_v57  ;;  %v17651_v32 = vpop.f32.mrb[58].mxu1 }
 0xa84   :  { %20052 = vst [vmem:[#allocation71_spill] sm:$0xff] %v17651_v32  ;;  %v9639_v48 = vadd.f32 %v9638_v16, %v9590_v59  ;;  %v9516_v54 = vadd.f32 %v17651_v32, %v9515_v49  ;;  %v9591_v19 = vmul.f32 %v17651_v32, %v17651_v32  ;;  %v17656_v43 = vpop.f32.mrb[59].mxu1 }
 0xa85   :  { %20053 = vst [vmem:[#allocation72_spill] sm:$0xff] %v17656_v43  ;;  %v9609_v63 = vadd.f32 %v9608_v25, %v9588_v15  ;;  %v9589_v51 = vmul.f32 %v17656_v43, %v17656_v43  ;;  %v9486_v61 = vadd.f32 %v9485_v4, %v17656_v43 }
 0xa86   :  { %v9654_v62 = vadd.f32 %v9653_v13, %v9591_v19 }
 0xa87   :  { %v9624_v12 = vadd.f32 %v9623_v22, %v9589_v51 }
 0xa89   :  { %v17661_v33 = vpop.f32.mrb[60].mxu1 }
 0xa8a   :  { %20054 = vst [vmem:[#allocation73_spill] sm:$0xff] %v17661_v33  ;;  %v9502_v57 = vadd.f32 %v17661_v33, %v9501_v6  ;;  %v9594_v16 = vmul.f32 %v17661_v33, %v17661_v33  ;;  %v17666_v49 = vpop.f32.mrb[61].mxu1 }
 0xa8b   :  { %20055 = vst [vmem:[#allocation74_spill] sm:$0xff] %v17666_v49  ;;  %v9472_v59 = vadd.f32 %v9471_v50, %v17666_v49  ;;  %v9592_v25 = vmul.f32 %v17666_v49, %v17666_v49  ;;  %v17671_v15 = vpop.f32.mrb[62].mxu1 }
 0xa8c   :  { %20056 = vst [vmem:[#allocation75_spill] sm:$0xff] %v17671_v15  ;;  %v9640_v14 = vadd.f32 %v9639_v48, %v9594_v16  ;;  %v9517_v4 = vadd.f32 %v17671_v15, %v9516_v54  ;;  %v9595_v22 = vmul.f32 %v17671_v15, %v17671_v15  ;;  %v17676_v13 = vpop.f32.mrb[63].mxu1 }
 0xa8d   :  { %20057 = vst [vmem:[#allocation76_spill] sm:$0xff] %v17676_v13  ;;  %v9610_v6 = vadd.f32 %v9609_v63, %v9592_v25  ;;  %v9487_v19 = vadd.f32 %v9486_v61, %v17676_v13  ;;  %v9593_v51 = vmul.f32 %v17676_v13, %v17676_v13 }
 0xa8e   :  { %v9525_v50 = vadd.f32 %v9517_v4, %v9502_v57  ;;  %v9655_v43 = vadd.f32 %v9654_v62, %v9595_v22 }
 0xa8f   :  { %v9518_v60 = vadd.f32 %v9487_v19, %v9472_v59  ;;  %v9625_v42 = vadd.f32 %v9624_v12, %v9593_v51 }
 0xa90   :  { %v9526_v18 = vrot.slane %v9525_v50, 4  ;;  %v9663_v7 = vadd.f32 %v9655_v43, %v9640_v14 }
 0xa91   :  { %v9519_v48 = vrot.slane %v9518_v60, 4  ;;  %v9656_v16 = vadd.f32 %v9625_v42, %v9610_v6 }
 0xa92   :  { %v9527_v54 = vadd.f32 %v9526_v18, %v9525_v50  ;;  %v9664_v0 = vrot.slane %v9663_v7, 4 }
 0xa93   :  { %v9520_v44 = vadd.f32 %v9519_v48, %v9518_v60  ;;  %v9657_v31 = vrot.slane %v9656_v16, 4 }
 0xa94   :  { %v9528_v11 = vrot.slane %v9527_v54, 2  ;;  %v9665_v20 = vadd.f32 %v9664_v0, %v9663_v7 }
 0xa95   :  { %v9521_v63 = vrot.slane %v9520_v44, 2  ;;  %v9658_v25 = vadd.f32 %v9657_v31, %v9656_v16 }
 0xa96   :  { %v9529_v61 = vadd.f32 %v9528_v11, %v9527_v54  ;;  %v9666_v53 = vrot.slane %v9665_v20, 2 }
 0xa97   :  { %v9522_v38 = vadd.f32 %v9521_v63, %v9520_v44  ;;  %v9659_v28 = vrot.slane %v9658_v25, 2 }
 0xa98   :  { %v9530_v57 = vrot.slane %v9529_v61, 1  ;;  %v9667_v62 = vadd.f32 %v9666_v53, %v9665_v20 }
 0xa99   :  { %v9523_v59 = vrot.slane %v9522_v38, 1  ;;  %v9660_v12 = vadd.f32 %v9659_v28, %v9658_v25 }
 0xa9a   :  { %v9531_v4 = vadd.f32 %v9530_v57, %v9529_v61  ;;  %v9668_v14 = vrot.slane %v9667_v62, 1 }
 0xa9b   :  { %v9524_v43 = vadd.f32 %v9523_v59, %v9522_v38  ;;  %v9661_v42 = vrot.slane %v9660_v12, 1 }
 0xa9c   :  { %v9671_v18 = vmul.f32 0.00390625, %v9531_v4  ;;  %v9669_v22 = vadd.f32 %v9668_v14, %v9667_v62 }
 0xa9d   :  { %v9662_v60 = vadd.f32 %v9661_v42, %v9660_v12  ;;  %v17681_v6 = vmul.f32 0.00390625, %v9524_v43 }
 0xa9e   :  { %v9673_v0 = vmul.f32 256.0, %v9671_v18  ;;  %v9756_v31 = vsub.f32 %v17661_v33, %v9671_v18  ;;  %v9757_v11 = vsub.f32 %v17671_v15, %v9671_v18  ;;  %v17686_v44 = vsub.f32 %v17361_v27, %v9671_v18 }
 0xa9f   :  { %v17689_v53 = vsub.f32 %v17365_v21, %v9671_v18  ;;  %v17692_v28 = vsub.f32 %v17369_v10, %v9671_v18  ;;  %v17695_v38 = vsub.f32 %v17385_v52, %v9671_v18  ;;  %v17698_v20 = vsub.f32 %v17401_v17, %v9671_v18  ;;  %v20067_v52 = vld [vmem:[#allocation50_spill] sm:$0xff] }
 0xaa0   :  { %v9675_v7 = vmul.f32 %v9673_v0, %v9671_v18  ;;  %v17700_v19 = vmul.f32 %v9756_v31, %v9756_v31  ;;  %v17702_v51 = vmul.f32 %v9757_v11, %v9757_v11  ;;  %v17705_v50 = vsub.f32 %v17411_v56, %v9671_v18  ;;  %v20066_v56 = vld [vmem:[#allocation46_spill] sm:$0xff] }
 0xaa1   :  { %v17708_v48 = vsub.f32 %v17421_v40, %v9671_v18  ;;  %v17711_v16 = vsub.f32 %v17431_v1, %v9671_v18  ;;  %v17714_v54 = vsub.f32 %v17441_v47, %v9671_v18  ;;  %v17717_v63 = vsub.f32 %v17451_v36, %v9671_v18  ;;  %v20064_v36 = vld [vmem:[#allocation38_spill] sm:$0xff] }
 0xaa2   :  { %v9677_v25 = vsub.f32 %v9669_v22, %v9675_v7  ;;  %v17720_v61 = vsub.f32 %v17461_v5, %v9671_v18  ;;  %v17723_v57 = vsub.f32 %v17471_v9, %v9671_v18  ;;  %v17726_v62 = vsub.f32 %v17481_v58, %v9671_v18  ;;  %v20065_v1 = vld [vmem:[#allocation42_spill] sm:$0xff] }
 0xaa3   :  { %v17729_v59 = vsub.f32 %v17491_v34, %v9671_v18  ;;  %v17732_v12 = vsub.f32 %v17501_v39, %v9671_v18  ;;  %v17735_v4 = vsub.f32 %v17511_v23, %v9671_v18  ;;  %v17738_v14 = vsub.f32 %v17521_v55, %v9671_v18 }
 0xaa4   :  { %v9679_v43 = vmax.f32 %v9677_v25, 0.0  ;;  %v17741_v42 = vsub.f32 %v17531_v30, %v9671_v18  ;;  %v17744_v22 = vsub.f32 %v17541_v24, %v9671_v18  ;;  %v17747_v0 = vsub.f32 %v17551_v8, %v9671_v18 }
 0xaa5   :  { %v17750_v31 = vsub.f32 %v17561_v2, %v9671_v18  ;;  %v17753_v11 = vsub.f32 %v17571_v26, %v9671_v18  ;;  %v17756_v7 = vsub.f32 %v17581_v29, %v9671_v18  ;;  %v17759_v25 = vsub.f32 %v17591_v37, %v9671_v18 }
 0xaa6   :  { %v9681_v30 = vmul.f32 0.003921569, %v9679_v43  ;;  %v17762_v55 = vsub.f32 %v17601_v41, %v9671_v18  ;;  %v17765_v24 = vsub.f32 %v17611_v3, %v9671_v18  ;;  %v17768_v8 = vsub.f32 %v17621_v46, %v9671_v18  ;;  %v20058_v46 = vld [vmem:[#allocation22_spill] sm:$0xff] }
 0xaa7   :  { %v17771_v2 = vsub.f32 %v17631_v35, %v9671_v18  ;;  %v17774_v26 = vsub.f32 %v17641_v45, %v9671_v18  ;;  %v17777_v29 = vsub.f32 %v17651_v32, %v9671_v18  ;;  %v9672_v43 = vmul.f32 256.0, %v17681_v6  ;;  %v20059_v45 = vld [vmem:[#allocation26_spill] sm:$0xff] }
 0xaa8   :  { %v9683_v37 = vadd.f32 0.0001, %v9681_v30  ;;  %v9754_v41 = vsub.f32 %v17666_v49, %v17681_v6  ;;  %v9755_v3 = vsub.f32 %v17676_v13, %v17681_v6  ;;  %v17786_v23 = vsub.f32 %v20058_v46, %v17681_v6  ;;  %v20060_v18 = vld [vmem:[#allocation30_spill] sm:$0xff]  ;;  %v20077_v46 = vld [vmem:[#allocation32_spill] sm:$0xff] }
 0xaa9   :  { %v9674_v35 = vmul.f32 %v9672_v43, %v17681_v6  ;;  %v17791_v39 = vsub.f32 %v20059_v45, %v17681_v6  ;;  %v17795_v32 = vsub.f32 %v20060_v18, %v17681_v6  ;;  %v20061_v30 = vld [vmem:[#allocation34_spill] sm:$0xff]  ;;  %v17807_v43 = vsub.f32 %v20064_v36, %v17681_v6 }
 0xaaa   :  { %v17799_v34 = vsub.f32 %v20061_v30, %v17681_v6  ;;  %v9685_v58 = vmul.f32 4.0, %v9683_v37  ;;  %v17801_v9 = vmul.f32 %v9754_v41, %v9754_v41  ;;  %v17803_v5 = vmul.f32 %v9755_v3, %v9755_v3  ;;  %v20068_v41 = vld [vmem:[#allocation54_spill] sm:$0xff] }
 0xaab   :  { %v9676_v47 = vsub.f32 %v9662_v60, %v9674_v35  ;;  %v17811_v40 = vsub.f32 %v20065_v1, %v17681_v6  ;;  %v17815_v17 = vsub.f32 %v20066_v56, %v17681_v6  ;;  %v17819_v37 = vsub.f32 %v20067_v52, %v17681_v6  ;;  %v20069_v36 = vld [vmem:[#allocation58_spill] sm:$0xff]  ;;  %v20070_v60 = vld [vmem:[#allocation15_spill] sm:$0xff]  ;;  %v20072_v52 = vld [vmem:[#allocation16_spill] sm:$0xff] }
 0xaac   :  { %20062 = vst [vmem:[#allocation77_spill] sm:$0xff] %v17801_v9  ;;  %20063 = vst [vmem:[#allocation78_spill] sm:$0xff] %v17803_v5  ;;  %15032 = vrcp.f32 %v9685_v58  ;;  %v17823_v3 = vsub.f32 %v20068_v41, %v17681_v6  ;;  %v17827_v35 = vsub.f32 %v20069_v36, %v17681_v6  ;;  %v17831_v1 = vsub.f32 %v20070_v60, %v17681_v6  ;;  %v20071_v56 = vld [vmem:[#allocation14_spill] sm:$0xff]  ;;  %v20074_v36 = vld [vmem:[#allocation20_spill] sm:$0xff] }
 0xaad   :  { %v9678_v10 = vmax.f32 %v9676_v47, 0.0  ;;  %v17835_v30 = vsub.f32 %v20071_v56, %v17681_v6  ;;  %v17839_v18 = vsub.f32 %v20072_v52, %v17681_v6  ;;  %v20073_v41 = vld [vmem:[#allocation18_spill] sm:$0xff]  ;;  %v17847_v27 = vsub.f32 %v20074_v36, %v17681_v6  ;;  %v20075_v60 = vld [vmem:[#allocation24_spill] sm:$0xff] }
 0xaae   :  { %v17843_v21 = vsub.f32 %v20073_v41, %v17681_v6  ;;  %v17851_v45 = vsub.f32 %v20075_v60, %v17681_v6  ;;  %v20076_v47 = vld [vmem:[#allocation28_spill] sm:$0xff]  ;;  %v17859_v52 = vsub.f32 %v20077_v46, %v17681_v6 }
 0xaaf   :  { %v17855_v56 = vsub.f32 %v20076_v47, %v17681_v6  ;;  %v9680_v13 = vmul.f32 0.003921569, %v9678_v10  ;;  %v20078_v41 = vld [vmem:[#allocation36_spill] sm:$0xff] }
 0xab0   :  { %v17863_v49 = vsub.f32 %v20078_v41, %v17681_v6  ;;  %v20080_v36 = vld [vmem:[#allocation40_spill] sm:$0xff] }
 0xab1   :  { %v17867_v15 = vsub.f32 %v20080_v36, %v17681_v6  ;;  %v20082_v60 = vld [vmem:[#allocation44_spill] sm:$0xff] }
 0xab2   :  { %20079 = vst [vmem:[#allocation79_spill] sm:$0xff] %v17863_v49  ;;  %v17871_v33 = vsub.f32 %v20082_v60, %v17681_v6  ;;  %v20084_v47 = vld [vmem:[#allocation48_spill] sm:$0xff] }
 0xab3   :  { %20081 = vst [vmem:[#allocation80_spill] sm:$0xff] %v17867_v15  ;;  %v17875_v5 = vsub.f32 %v20084_v47, %v17681_v6  ;;  %v20086_v46 = vld [vmem:[#allocation52_spill] sm:$0xff]  ;;  %v9682_v15 = vadd.f32 0.0001, %v9680_v13  ;;  %v20093_v47 = vld [vmem:[#allocation66_spill] sm:$0xff]  ;;  %v17911_v13 = vmul.f32 %v17686_v44, %v17686_v44  ;;  %v17931_v44 = vmul.f32 %v17705_v50, %v17705_v50 }
 0xab4   :  { %20083 = vst [vmem:[#allocation81_spill] sm:$0xff] %v17871_v33  ;;  %v17879_v9 = vsub.f32 %v20086_v46, %v17681_v6  ;;  %v20088_v10 = vld [vmem:[#allocation56_spill] sm:$0xff]  ;;  %v17955_v50 = vmul.f32 %v17723_v57, %v17723_v57  ;;  %v17975_v57 = vmul.f32 %v17738_v14, %v17738_v14  ;;  %v17999_v14 = vmul.f32 %v17756_v7, %v17756_v7 }
 0xab5   :  { %20085 = vst [vmem:[#allocation82_spill] sm:$0xff] %v17875_v5  ;;  %v17883_v41 = vsub.f32 %v20088_v10, %v17681_v6  ;;  %v20090_v49 = vld [vmem:[#allocation60_spill] sm:$0xff]  ;;  %v17895_v5 = vsub.f32 %v20093_v47, %v17681_v6  ;;  %v20095_v10 = vld [vmem:[#allocation70_spill] sm:$0xff]  ;;  %v17915_v47 = vmul.f32 %v17689_v53, %v17689_v53  ;;  %v17935_v53 = vmul.f32 %v17708_v48, %v17708_v48 }
 0xab6   :  { %20087 = vst [vmem:[#allocation83_spill] sm:$0xff] %v17879_v9  ;;  %v17887_v36 = vsub.f32 %v20090_v49, %v17681_v6  ;;  %v20092_v60 = vld [vmem:[#allocation64_spill] sm:$0xff]  ;;  %v15033_v48 = vpop.eup %15032  ;;  %v18019_v7 = vmul.f32 %v17771_v2, %v17771_v2  ;;  %v9762_v2 = vmul.f32 %v17795_v32, %v17795_v32  ;;  %v9771_v32 = vmul.f32 %v17819_v37, %v17819_v37 }
 0xab7   :  { %20089 = vst [vmem:[#allocation84_spill] sm:$0xff] %v17883_v41  ;;  %v17891_v33 = vsub.f32 %v20092_v60, %v17681_v6  ;;  %v20094_v46 = vld [vmem:[#allocation68_spill] sm:$0xff]  ;;  %v17903_v41 = vsub.f32 %v20095_v10, %v17681_v6  ;;  %v9684_v60 = vmul.f32 4.0, %v9682_v15  ;;  %v17923_v10 = vmul.f32 %v17695_v38, %v17695_v38 }
 0xab8   :  { %20091 = vst [vmem:[#allocation85_spill] sm:$0xff] %v17887_v36  ;;  %v17899_v9 = vsub.f32 %v20094_v46, %v17681_v6  ;;  %v20096_v49 = vld [vmem:[#allocation72_spill] sm:$0xff]  ;;  %v17919_v46 = vmul.f32 %v17692_v28, %v17692_v28  ;;  %v17939_v15 = vmul.f32 %v17711_v16, %v17711_v16  ;;  %v17943_v28 = vmul.f32 %v17714_v54, %v17714_v54 }
 0xab9   :  { %v17907_v36 = vsub.f32 %v20096_v49, %v17681_v6  ;;  %v17927_v6 = vmul.f32 %v17698_v20, %v17698_v20  ;;  %15034 = vrcp.f32 %v9684_v60  ;;  %v17947_v38 = vmul.f32 %v17717_v63, %v17717_v63  ;;  %20100 = vst [vmem:[#allocation89_spill] sm:$0xff] %v18019_v7 }
 0xaba   :  { %v17951_v20 = vmul.f32 %v17720_v61, %v17720_v61  ;;  %v17959_v16 = vmul.f32 %v17726_v62, %v17726_v62  ;;  %v17963_v54 = vmul.f32 %v17729_v59, %v17729_v59  ;;  %v17967_v63 = vmul.f32 %v17732_v12, %v17732_v12 }
 0xabb   :  { %v17971_v61 = vmul.f32 %v17735_v4, %v17735_v4  ;;  %v9689_v49 = vmul.f32 %v15033_v48, %v9685_v58  ;;  %v17979_v62 = vmul.f32 %v17741_v42, %v17741_v42  ;;  %v17983_v59 = vmul.f32 %v17744_v22, %v17744_v22 }
 0xabc   :  { %v17987_v12 = vmul.f32 %v17747_v0, %v17747_v0  ;;  %v17991_v4 = vmul.f32 %v17750_v31, %v17750_v31  ;;  %v17995_v58 = vmul.f32 %v17753_v11, %v17753_v11  ;;  %v18003_v22 = vmul.f32 %v17759_v25, %v17759_v25 }
 0xabd   :  { %v9691_v42 = vsub.f32 2.0, %v9689_v49  ;;  %v18007_v0 = vmul.f32 %v17762_v55, %v17762_v55  ;;  %v18011_v31 = vmul.f32 %v17765_v24, %v17765_v24  ;;  %v18015_v11 = vmul.f32 %v17768_v8, %v17768_v8 }
 0xabe   :  { %v18023_v49 = vmul.f32 %v17774_v26, %v17774_v26  ;;  %v18027_v55 = vmul.f32 %v17777_v29, %v17777_v29  ;;  %v9758_v24 = vmul.f32 %v17786_v23, %v17786_v23  ;;  %v9759_v8 = vmul.f32 %v17791_v39, %v17791_v39 }
 0xabf   :  { %20097 = vst [vmem:[#allocation86_spill] sm:$0xff] %v18007_v0  ;;  %20098 = vst [vmem:[#allocation87_spill] sm:$0xff] %v18011_v31  ;;  %v18029_v25 = vmul.f32 %v15033_v48, %v9691_v42  ;;  %v9763_v7 = vmul.f32 %v17799_v34, %v17799_v34  ;;  %v9766_v26 = vmul.f32 %v17807_v43, %v17807_v43 }
 0xac0   :  { %20099 = vst [vmem:[#allocation88_spill] sm:$0xff] %v18015_v11  ;;  %20101 = vst [vmem:[#allocation90_spill] sm:$0xff] %v18023_v49  ;;  %v9767_v29 = vmul.f32 %v17811_v40, %v17811_v40  ;;  %v9770_v48 = vmul.f32 %v17815_v17, %v17815_v17  ;;  %v9774_v34 = vmul.f32 %v17823_v3, %v17823_v3  ;;  %v20104_v11 = vld [vmem:[#allocation80_spill] sm:$0xff] }
 0xac1   :  { %20102 = vst [vmem:[#allocation91_spill] sm:$0xff] %v18027_v55  ;;  %v9884_v23 = vmul.f32 %v17700_v19, %v18029_v25  ;;  %v9885_v39 = vmul.f32 %v17702_v51, %v18029_v25  ;;  %v9775_v43 = vmul.f32 %v17827_v35, %v17827_v35  ;;  %v9778_v40 = vmul.f32 %v17831_v1, %v17831_v1 }
 0xac2   :  { %v9779_v17 = vmul.f32 %v17835_v30, %v17835_v30  ;;  %v9782_v19 = vmul.f32 %v17839_v18, %v17839_v18  ;;  %v9783_v37 = vmul.f32 %v17843_v21, %v17843_v21  ;;  %v9786_v3 = vmul.f32 %v17847_v27, %v17847_v27 }
 0xac3   :  { %v15035_v42 = vpop.eup %15034  ;;  %v9948_v51 = vadd.f32 0.5, %v9884_v23  ;;  %v9949_v55 = vadd.f32 0.5, %v9885_v39  ;;  %v9787_v35 = vmul.f32 %v17851_v45, %v17851_v45  ;;  %v18069_v1 = vmul.f32 %v17855_v56, %v17855_v56  ;;  %v20103_v39 = vld [vmem:[#allocation79_spill] sm:$0xff]  ;;  %v20105_v45 = vld [vmem:[#allocation81_spill] sm:$0xff]  ;;  %v20106_v56 = vld [vmem:[#allocation82_spill] sm:$0xff] }
 0xac4   :  { %v9688_v49 = vmul.f32 %v15035_v42, %v9684_v60  ;;  %v18073_v18 = vmul.f32 %v17859_v52, %v17859_v52  ;;  %v18077_v21 = vmul.f32 %v20103_v39, %v20103_v39  ;;  %v18081_v27 = vmul.f32 %v20104_v11, %v20104_v11  ;;  %v20107_v52 = vld [vmem:[#allocation83_spill] sm:$0xff]  ;;  %v20109_v11 = vld [vmem:[#allocation85_spill] sm:$0xff] }
 0xac5   :  { %v11310_v30 = vmul.f32 -1.442695, %v9948_v51  ;;  %v11311_v23 = vmul.f32 -1.442695, %v9949_v55  ;;  %v18085_v31 = vmul.f32 %v20105_v45, %v20105_v45  ;;  %v18089_v0 = vmul.f32 %v20106_v56, %v20106_v56  ;;  %v20108_v51 = vld [vmem:[#allocation84_spill] sm:$0xff] }
 0xac6   :  { %v9690_v60 = vsub.f32 2.0, %v9688_v49  ;;  %v18093_v55 = vmul.f32 %v20107_v52, %v20107_v52  ;;  %v18097_v39 = vmul.f32 %v20108_v51, %v20108_v51  ;;  %v18101_v49 = vmul.f32 %v20109_v11, %v20109_v11 }
 0xac7   :  { %15036 = vpow2.f32 %v11310_v30  ;;  %v18105_v45 = vmul.f32 %v17891_v33, %v17891_v33  ;;  %v18111_v52 = vmul.f32 %v17895_v5, %v17895_v5  ;;  %v18115_v30 = vmul.f32 %v17899_v9, %v17899_v9 }
 0xac8   :  { %15038 = vpow2.f32 %v11311_v23  ;;  %v18107_v56 = vmul.f32 %v15035_v42, %v9690_v60  ;;  %v18119_v51 = vmul.f32 %v17903_v41, %v17903_v41  ;;  %v18123_v11 = vmul.f32 %v17907_v36, %v17907_v36  ;;  %v20112_v42 = vld [vmem:[#allocation77_spill] sm:$0xff]  ;;  %v20113_v23 = vld [vmem:[#allocation78_spill] sm:$0xff] }
 0xac9   :  { %v18127_v33 = vmul.f32 %v17911_v13, %v18029_v25  ;;  %v18131_v5 = vmul.f32 %v17915_v47, %v18029_v25  ;;  %v18151_v47 = vmul.f32 %v17919_v46, %v18029_v25  ;;  %v18169_v46 = vmul.f32 %v17931_v44, %v18029_v25 }
 0xaca   :  { %20110 = vst [vmem:[#allocation79_spill] sm:$0xff] %v18123_v11  ;;  %v9882_v9 = vmul.f32 %v20112_v42, %v18107_v56  ;;  %v9883_v60 = vmul.f32 %v20113_v23, %v18107_v56  ;;  %v18138_v41 = vmul.f32 %v9758_v24, %v18107_v56  ;;  %v18141_v36 = vmul.f32 %v9759_v8, %v18107_v56 }
 0xacb   :  { %20111 = vst [vmem:[#allocation80_spill] sm:$0xff] %v18131_v5  ;;  %v18144_v11 = vmul.f32 %v9762_v2, %v18107_v56  ;;  %v18147_v13 = vmul.f32 %v9763_v7, %v18107_v56  ;;  %v18155_v42 = vmul.f32 %v17923_v10, %v18029_v25  ;;  %v18158_v5 = vmul.f32 %v9766_v26, %v18107_v56 }
 0xacc   :  { %v9946_v23 = vadd.f32 0.5, %v9882_v9  ;;  %v9947_v24 = vadd.f32 0.5, %v9883_v60  ;;  %v18161_v8 = vmul.f32 %v9767_v29, %v18107_v56  ;;  %v18165_v7 = vmul.f32 %v17927_v6, %v18029_v25 }
 0xacd   :  { %v18172_v2 = vmul.f32 %v9770_v48, %v18107_v56  ;;  %v18175_v10 = vmul.f32 %v9771_v32, %v18107_v56  ;;  %v18179_v29 = vmul.f32 %v17935_v53, %v18029_v25  ;;  %v18183_v6 = vmul.f32 %v17939_v15, %v18029_v25 }
 0xace   :  { %v11308_v9 = vmul.f32 -1.442695, %v9946_v23  ;;  %v11309_v26 = vmul.f32 -1.442695, %v9947_v24  ;;  %v18186_v60 = vmul.f32 %v9774_v34, %v18107_v56  ;;  %v18189_v44 = vmul.f32 %v9775_v43, %v18107_v56 }
 0xacf   :  { %v18193_v48 = vmul.f32 %v17943_v28, %v18029_v25  ;;  %v18197_v32 = vmul.f32 %v17947_v38, %v18029_v25  ;;  %v18200_v53 = vmul.f32 %v9778_v40, %v18107_v56  ;;  %v18203_v15 = vmul.f32 %v9779_v17, %v18107_v56 }
 0xad0   :  { %15040 = vpow2.f32 %v11308_v9  ;;  %v18207_v34 = vmul.f32 %v17951_v20, %v18029_v25  ;;  %v18211_v28 = vmul.f32 %v17955_v50, %v18029_v25  ;;  %v18214_v38 = vmul.f32 %v9782_v19, %v18107_v56 }
 0xad1   :  { %v15037_v43 = vpop.eup %15036  ;;  %15042 = vpow2.f32 %v11309_v26  ;;  %v18217_v23 = vmul.f32 %v9783_v37, %v18107_v56  ;;  %v18221_v17 = vmul.f32 %v17959_v16, %v18029_v25  ;;  %v18225_v20 = vmul.f32 %v17963_v54, %v18029_v25 }
 0xad2   :  { %v15039_v40 = vpop.eup %15038  ;;  %v10204_v24 = vadd.f32 1.0, %v15037_v43  ;;  %v18228_v9 = vmul.f32 %v9786_v3, %v18107_v56  ;;  %v18231_v19 = vmul.f32 %v9787_v35, %v18107_v56  ;;  %v18235_v37 = vmul.f32 %v17967_v63, %v18029_v25  ;;  %v20123_v43 = vld [vmem:[#allocation87_spill] sm:$0xff] }
 0xad3   :  { %v10205_v50 = vadd.f32 1.0, %v15039_v40  ;;  %v18239_v26 = vmul.f32 %v17971_v61, %v18029_v25  ;;  %v18243_v16 = vmul.f32 %v18069_v1, %v18107_v56  ;;  %v18247_v54 = vmul.f32 %v18073_v18, %v18107_v56 }
 0xad4   :  { %15044 = vrcp.f32 %v10204_v24  ;;  %v18251_v3 = vmul.f32 %v17975_v57, %v18029_v25  ;;  %v18255_v63 = vmul.f32 %v17979_v62, %v18029_v25  ;;  %v18259_v61 = vmul.f32 %v18077_v21, %v18107_v56 }
 0xad5   :  { %15046 = vrcp.f32 %v10205_v50  ;;  %v18263_v35 = vmul.f32 %v18081_v27, %v18107_v56  ;;  %v18267_v1 = vmul.f32 %v17983_v59, %v18029_v25  ;;  %v18271_v57 = vmul.f32 %v17987_v12, %v18029_v25  ;;  %v20129_v50 = vld [vmem:[#allocation89_spill] sm:$0xff] }
 0xad6   :  { %v18275_v62 = vmul.f32 %v18085_v31, %v18107_v56  ;;  %v18279_v18 = vmul.f32 %v18089_v0, %v18107_v56  ;;  %v18283_v21 = vmul.f32 %v17991_v4, %v18029_v25  ;;  %v18287_v59 = vmul.f32 %v17995_v58, %v18029_v25 }
 0xad7   :  { %v18291_v12 = vmul.f32 %v18093_v55, %v18107_v56  ;;  %v18295_v31 = vmul.f32 %v18097_v39, %v18107_v56  ;;  %v18299_v0 = vmul.f32 %v17999_v14, %v18029_v25  ;;  %v18303_v4 = vmul.f32 %v18003_v22, %v18029_v25  ;;  %v20121_v55 = vld [vmem:[#allocation86_spill] sm:$0xff] }
 0xad8   :  { %20114 = vst [vmem:[#allocation81_spill] sm:$0xff] %v18287_v59  ;;  %v18307_v58 = vmul.f32 %v18101_v49, %v18107_v56  ;;  %v18311_v27 = vmul.f32 %v18105_v45, %v18107_v56  ;;  %v18315_v39 = vmul.f32 %v20121_v55, %v18029_v25  ;;  %v18319_v14 = vmul.f32 %v20123_v43, %v18029_v25  ;;  %v20127_v45 = vld [vmem:[#allocation88_spill] sm:$0xff] }
 0xad9   :  { %20115 = vst [vmem:[#allocation82_spill] sm:$0xff] %v18291_v12  ;;  %20116 = vst [vmem:[#allocation83_spill] sm:$0xff] %v18295_v31  ;;  %v18323_v22 = vmul.f32 %v18111_v52, %v18107_v56  ;;  %v18327_v49 = vmul.f32 %v18115_v30, %v18107_v56  ;;  %v18331_v24 = vmul.f32 %v20127_v45, %v18029_v25  ;;  %v20132_v52 = vld [vmem:[#allocation79_spill] sm:$0xff]  ;;  %v20142_v31 = vld [vmem:[#allocation74_spill] sm:$0xff] }
 0xada   :  { %20117 = vst [vmem:[#allocation84_spill] sm:$0xff] %v18299_v0  ;;  %20118 = vst [vmem:[#allocation85_spill] sm:$0xff] %v18303_v4  ;;  %v15041_v40 = vpop.eup %15040  ;;  %v18335_v55 = vmul.f32 %v20129_v50, %v18029_v25  ;;  %v18339_v43 = vmul.f32 %v18119_v51, %v18107_v56  ;;  %v20136_v45 = vld [vmem:[#allocation91_spill] sm:$0xff]  ;;  %v18356_v51 = vld [vmem:[%s19518_s5] ss:$0 sm:$0xff] }
 0xadb   :  { %20119 = vst [vmem:[#allocation77_spill] sm:$0xff] %v18307_v58  ;;  %20120 = vst [vmem:[#allocation78_spill] sm:$0xff] %v18311_v27  ;;  %v10202_v30 = vadd.f32 1.0, %v15041_v40 }
 0xadc   :  { %20122 = vst [vmem:[#allocation86_spill] sm:$0xff] %v18315_v39  ;;  %20124 = vst [vmem:[#allocation87_spill] sm:$0xff] %v18319_v14  ;;  %v15043_v14 = vpop.eup %15042 }
 0xadd   :  { %20125 = vst [vmem:[#allocation92_spill] sm:$0xff] %v18323_v22  ;;  %20126 = vst [vmem:[#allocation93_spill] sm:$0xff] %v18327_v49  ;;  %v18343_v22 = vmul.f32 %v20132_v52, %v18107_v56  ;;  %v20134_v49 = vld [vmem:[#allocation90_spill] sm:$0xff]  ;;  %v10203_v50 = vadd.f32 1.0, %v15043_v14  ;;  %15048 = vrcp.f32 %v10202_v30  ;;  %v20139_v52 = vld [vmem:[#allocation73_spill] sm:$0xff] }
 0xade   :  { %20128 = vst [vmem:[#allocation88_spill] sm:$0xff] %v18331_v24  ;;  %20130 = vst [vmem:[#allocation89_spill] sm:$0xff] %v18335_v55  ;;  %v18347_v39 = vmul.f32 %v20134_v49, %v18029_v25  ;;  %v18351_v24 = vmul.f32 %v20136_v45, %v18029_v25  ;;  %v15045_v55 = vpop.eup %15044  ;;  %v18362_v49 = vld [vmem:[%s19519_s6] ss:$0 sm:$0xff]  ;;  %v15294_v45 = vld [vmem:[#allocation3 + $0xf8] sm:$0xff]  }
 0xadf   :  { %20131 = vst [vmem:[#allocation94_spill] sm:$0xff] %v18339_v43  ;;  %20133 = vst [vmem:[#allocation79_spill] sm:$0xff] %v18343_v22  ;;  %15050 = vrcp.f32 %v10203_v50  ;;  %v15047_v56 = vpop.eup %15046  ;;  %v10396_v40 = vmul.f32 %v15045_v55, %v20139_v52  ;;  %v10602_v14 = vunpack.c.l.bf16 %v15294_v45  ;;  %v10603_v22 = vunpack.c.h.bf16 %v15294_v45  ;;  %v18399_v45 = vld [vmem:[#allocation3 + $0x20] sm:$0xff]  }
 0xae0   :  { %20135 = vst [vmem:[#allocation90_spill] sm:$0xff] %v18347_v39  ;;  %20137 = vst [vmem:[#allocation91_spill] sm:$0xff] %v18351_v24  ;;  %v20141_v39 = vld [vmem:[#allocation75_spill] sm:$0xff] }
 0xae1   :  { %20138 = vst [vmem:[#allocation95_spill] sm:$0xff] %v18356_v51  ;;  %20140 = vst [vmem:[#allocation73_spill] sm:$0xff] %v18362_v49  ;;  %v10397_v25 = vmul.f32 %v15047_v56, %v20141_v39  ;;  %v10467_v30 = vmul.f32 %v18356_v51, %v10396_v40  ;;  %v18370_v39 = vld [vmem:[#allocation3 + $0x8] sm:$0xff]   ;;  %v20144_v40 = vld [vmem:[#allocation76_spill] sm:$0xff] }
 0xae2   :  { %20143 = vst [vmem:[#allocation75_spill] sm:$0xff] %v18370_v39  ;;  %20150 = vst [vmem:[#allocation97_spill] sm:$0xff] %v18399_v45 }
 0xae3   :  { %v10468_v24 = vmul.f32 %v18356_v51, %v10397_v25  ;;  %v10538_v43 = vadd.f32 %v18362_v49, %v10467_v30  ;;  %v18374_v25 = vld [vmem:[#allocation3] sm:$0xff]   ;;  %v15297_v30 = vld [vmem:[#allocation3 + $0xf0] sm:$0xff]  }
 0xae4   :  { %20145 = vst [vmem:[#allocation74_spill] sm:$0xff] %v18374_v25 }
 0xae5   :  { %v10539_v50 = vadd.f32 %v18362_v49, %v10468_v24  ;;  %v10666_v27 = vadd.f32 %v10602_v14, %v10538_v43  ;;  %v10600_v24 = vunpack.c.l.bf16 %v15297_v30 }
 0xae7   :  { %v10667_v55 = vadd.f32 %v10603_v22, %v10539_v50  ;;  %v15049_v52 = vpop.eup %15048  ;;  %v10730_v58 = vmax.f32 %v10666_v27, 0.0  ;;  %v10601_v50 = vunpack.c.h.bf16 %v15297_v30  ;;  %v20148_v30 = vld [vmem:[#allocation80_spill] sm:$0xff] }
 0xae8   :  { %v10394_v12 = vmul.f32 %v15049_v52, %v20142_v31  ;;  %v9889_v56 = vadd.f32 0.5, %v20148_v30  ;;  %v9892_v30 = vadd.f32 0.5, %v18151_v47  ;;  %v9928_v47 = vadd.f32 0.5, %v18283_v21 }
 0xae9   :  { %v15051_v4 = vpop.eup %15050  ;;  %v10731_v0 = vmax.f32 %v10667_v55, 0.0  ;;  %v18381_v55 = vld [vmem:[#allocation3 + $0x18] sm:$0xff]  }
 0xaea   :  { %v10395_v59 = vmul.f32 %v15051_v4, %v20144_v40  ;;  %v10465_v22 = vmul.f32 %v18356_v51, %v10394_v12  ;;  %20146 = vst [vmem:[#allocation76_spill] sm:$0xff] %v18381_v55  ;;  %v9886_v40 = vadd.f32 0.5, %v18138_v41  ;;  %v18396_v41 = vld [vmem:[#allocation3 + $0x28] sm:$0xff]  }
 0xaeb   :  { %v11600_v43 = vpack.c.bf16 %v10731_v0, %v10730_v58  ;;  %v9887_v0 = vadd.f32 0.5, %v18141_v36  ;;  %v18387_v58 = vld [vmem:[#allocation3 + $0x10] sm:$0xff]   ;;  %20149 = vst [vmem:[#allocation80_spill] sm:$0xff] %v18396_v41  ;;  %v9894_v36 = vadd.f32 0.5, %v18158_v5  ;;  %v9897_v5 = vadd.f32 0.5, %v18169_v46 }
 0xaec   :  { %v10466_v31 = vmul.f32 %v18356_v51, %v10395_v59  ;;  %v10536_v52 = vadd.f32 %v18362_v49, %v10465_v22  ;;  %20147 = vst [vmem:[#allocation96_spill] sm:$0xff] %v18387_v58  ;;  %v9888_v59 = vadd.f32 0.5, %v18127_v33  ;;  %v9890_v22 = vadd.f32 0.5, %v18144_v11 }
 0xaed   :  { %11632 = vst [vmem:[#allocation9 + $0xf8] sm:$0xff] %v11600_v43   ;;  %v9891_v33 = vadd.f32 0.5, %v18147_v13  ;;  %v11248_v14 = vmul.f32 -1.442695, %v9886_v40  ;;  %v11249_v55 = vmul.f32 -1.442695, %v9887_v0 }
 0xaee   :  { %v10537_v27 = vadd.f32 %v18362_v49, %v10466_v31  ;;  %v10664_v4 = vadd.f32 %v10600_v24, %v10536_v52  ;;  %v9893_v24 = vadd.f32 0.5, %v18155_v42  ;;  %v11250_v11 = vmul.f32 -1.442695, %v9888_v59  ;;  %v18410_v42 = vld [vmem:[#allocation3 + $0x38] sm:$0xff]  }
 0xaef   :  { %v11251_v52 = vmul.f32 -1.442695, %v9889_v56  ;;  %15052 = vpow2.f32 %v11248_v14  ;;  %v11252_v25 = vmul.f32 -1.442695, %v9890_v22  ;;  %v11253_v13 = vmul.f32 -1.442695, %v9891_v33 }
 0xaf0   :  { %v10665_v31 = vadd.f32 %v10601_v50, %v10537_v27  ;;  %v10728_v39 = vmax.f32 %v10664_v4, 0.0  ;;  %v9895_v27 = vadd.f32 0.5, %v18161_v8  ;;  %15054 = vpow2.f32 %v11249_v55  ;;  %20151 = vst [vmem:[#allocation98_spill] sm:$0xff] %v18410_v42  ;;  %v18422_v22 = vld [vmem:[#allocation3 + $0x48] sm:$0xff]  }
 0xaf1   :  { %v9896_v50 = vadd.f32 0.5, %v18165_v7  ;;  %15056 = vpow2.f32 %v11250_v11  ;;  %v11254_v4 = vmul.f32 -1.442695, %v9892_v30  ;;  %v11255_v14 = vmul.f32 -1.442695, %v9893_v24  ;;  %20153 = vst [vmem:[#allocation100_spill] sm:$0xff] %v18422_v22 }
 0xaf2   :  { %v10729_v43 = vmax.f32 %v10665_v31, 0.0  ;;  %15058 = vpow2.f32 %v11251_v52  ;;  %v9898_v55 = vadd.f32 0.5, %v18172_v2  ;;  %v11256_v40 = vmul.f32 -1.442695, %v9894_v36  ;;  %v18426_v36 = vld [vmem:[#allocation3 + $0x40] sm:$0xff]  }
 0xaf3   :  { %15060 = vpow2.f32 %v11252_v25  ;;  %v9899_v0 = vadd.f32 0.5, %v18175_v10  ;;  %v11257_v59 = vmul.f32 -1.442695, %v9895_v27  ;;  %v9900_v46 = vadd.f32 0.5, %v18179_v29  ;;  %20154 = vst [vmem:[#allocation101_spill] sm:$0xff] %v18426_v36  ;;  %v20185_v36 = vld [vmem:[#allocation89_spill] sm:$0xff] }
 0xaf4   :  { %v11595_v12 = vpack.c.bf16 %v10729_v43, %v10728_v39  ;;  %v18414_v39 = vld [vmem:[#allocation3 + $0x30] sm:$0xff]   ;;  %15062 = vpow2.f32 %v11253_v13  ;;  %v11258_v43 = vmul.f32 -1.442695, %v9896_v50  ;;  %v9901_v2 = vadd.f32 0.5, %v18183_v6 }
 0xaf5   :  { %20152 = vst [vmem:[#allocation99_spill] sm:$0xff] %v18414_v39  ;;  %15064 = vpow2.f32 %v11254_v4  ;;  %v11259_v25 = vmul.f32 -1.442695, %v9897_v5  ;;  %v9902_v33 = vadd.f32 0.5, %v18186_v60  ;;  %v11260_v30 = vmul.f32 -1.442695, %v9898_v55 }
 0xaf6   :  { %11631 = vst [vmem:[#allocation9 + $0xf0] sm:$0xff] %v11595_v12   ;;  %15066 = vpow2.f32 %v11255_v14  ;;  %v9903_v24 = vadd.f32 0.5, %v18189_v44  ;;  %v11261_v11 = vmul.f32 -1.442695, %v9899_v0  ;;  %v9904_v27 = vadd.f32 0.5, %v18193_v48  ;;  %v18438_v4 = vld [vmem:[#allocation3 + $0x58] sm:$0xff]  }
 0xaf7   :  { %15068 = vpow2.f32 %v11256_v40  ;;  %v11262_v13 = vmul.f32 -1.442695, %v9900_v46  ;;  %20155 = vst [vmem:[#allocation102_spill] sm:$0xff] %v18438_v4  ;;  %v9905_v5 = vadd.f32 0.5, %v18197_v32  ;;  %v11263_v44 = vmul.f32 -1.442695, %v9901_v2 }
 0xaf8   :  { %15070 = vpow2.f32 %v11257_v59  ;;  %v18444_v55 = vld [vmem:[#allocation3 + $0x50] sm:$0xff]   ;;  %v9906_v48 = vadd.f32 0.5, %v18200_v53  ;;  %v11264_v0 = vmul.f32 -1.442695, %v9902_v33  ;;  %v11265_v32 = vmul.f32 -1.442695, %v9903_v24 }
 0xaf9   :  { %v18432_v52 = vpop.eup %15052  ;;  %15072 = vpow2.f32 %v11258_v43  ;;  %20156 = vst [vmem:[#allocation103_spill] sm:$0xff] %v18444_v55  ;;  %v9907_v43 = vadd.f32 0.5, %v18203_v15  ;;  %v9908_v60 = vadd.f32 0.5, %v18207_v34  ;;  %v11266_v40 = vmul.f32 -1.442695, %v9904_v27  ;;  %v18458_v53 = vld [vmem:[#allocation3 + $0x68] sm:$0xff]  }
 0xafa   :  { %v18436_v50 = vpop.eup %15054  ;;  %15074 = vpow2.f32 %v11259_v25  ;;  %20157 = vst [vmem:[#allocation104_spill] sm:$0xff] %v18458_v53  ;;  %v11267_v15 = vmul.f32 -1.442695, %v9905_v5  ;;  %v18464_v24 = vld [vmem:[#allocation3 + $0x60] sm:$0xff]   ;;  %v9910_v34 = vadd.f32 0.5, %v18214_v38  ;;  %v9911_v33 = vadd.f32 0.5, %v18217_v23 }
 0xafb   :  { %v18442_v14 = vpop.eup %15056  ;;  %15076 = vpow2.f32 %v11260_v30  ;;  %v9909_v30 = vadd.f32 0.5, %v18211_v28  ;;  %20158 = vst [vmem:[#allocation105_spill] sm:$0xff] %v18464_v24  ;;  %v11268_v27 = vmul.f32 -1.442695, %v9906_v48  ;;  %v11269_v28 = vmul.f32 -1.442695, %v9907_v43 }
 0xafc   :  { %v18448_v59 = vpop.eup %15058  ;;  %15078 = vpow2.f32 %v11261_v11  ;;  %v9912_v31 = vadd.f32 0.5, %v18221_v17  ;;  %v11270_v46 = vmul.f32 -1.442695, %v9908_v60  ;;  %v18478_v38 = vld [vmem:[#allocation3 + $0x78] sm:$0xff]   ;;  %v18484_v43 = vld [vmem:[#allocation3 + $0x70] sm:$0xff]   ;;  %v9914_v17 = vadd.f32 0.5, %v18228_v9 }
 0xafd   :  { %v18452_v25 = vpop.eup %15060  ;;  %15080 = vpow2.f32 %v11262_v13  ;;  %20159 = vst [vmem:[#allocation106_spill] sm:$0xff] %v18478_v38  ;;  %v11271_v23 = vmul.f32 -1.442695, %v9909_v30  ;;  %20160 = vst [vmem:[#allocation107_spill] sm:$0xff] %v18484_v43  ;;  %v11272_v60 = vmul.f32 -1.442695, %v9910_v34 }
 0xafe   :  { %v18456_v29 = vpop.eup %15062  ;;  %15082 = vpow2.f32 %v11263_v44  ;;  %v9915_v48 = vadd.f32 0.5, %v18231_v19  ;;  %v9916_v10 = vadd.f32 0.5, %v18235_v37  ;;  %v11274_v2 = vmul.f32 -1.442695, %v9912_v31  ;;  %v18498_v9 = vld [vmem:[#allocation3 + $0x88] sm:$0xff]   ;;  %v20183_v55 = vld [vmem:[#allocation93_spill] sm:$0xff] }
 0xaff   :  { %v18462_v11 = vpop.eup %15064  ;;  %15084 = vpow2.f32 %v11264_v0  ;;  %v9913_v0 = vadd.f32 0.5, %v18225_v20  ;;  %v11273_v20 = vmul.f32 -1.442695, %v9911_v33  ;;  %20161 = vst [vmem:[#allocation108_spill] sm:$0xff] %v18498_v9  ;;  %v18504_v33 = vld [vmem:[#allocation3 + $0x80] sm:$0xff]   ;;  %v9918_v37 = vadd.f32 0.5, %v18243_v16 }
 0xb00   :  { %v18468_v13 = vpop.eup %15066  ;;  %15086 = vpow2.f32 %v11265_v32  ;;  %20162 = vst [vmem:[#allocation109_spill] sm:$0xff] %v18504_v33  ;;  %v11276_v31 = vmul.f32 -1.442695, %v9914_v17  ;;  %v9919_v34 = vadd.f32 0.5, %v18247_v54  ;;  %v9920_v56 = vadd.f32 0.5, %v18251_v3  ;;  %v18518_v16 = vld [vmem:[#allocation3 + $0x98] sm:$0xff]  }
 0xb01   :  { %v18472_v44 = vpop.eup %15068  ;;  %15088 = vpow2.f32 %v11266_v40  ;;  %v11275_v19 = vmul.f32 -1.442695, %v9913_v0  ;;  %v11278_v5 = vmul.f32 -1.442695, %v9916_v10  ;;  %20163 = vst [vmem:[#allocation110_spill] sm:$0xff] %v18518_v16  ;;  %v9922_v3 = vadd.f32 0.5, %v18259_v61 }
 0xb02   :  { %v18476_v6 = vpop.eup %15070  ;;  %15090 = vpow2.f32 %v11267_v15  ;;  %v11280_v10 = vmul.f32 -1.442695, %v9918_v37  ;;  %v9923_v17 = vadd.f32 0.5, %v18263_v35  ;;  %v9924_v8 = vadd.f32 0.5, %v18267_v1  ;;  %v18538_v61 = vld [vmem:[#allocation3 + $0xa8] sm:$0xff]   ;;  %v20172_v9 = vld [vmem:[#allocation84_spill] sm:$0xff] }
 0xb03   :  { %v18482_v32 = vpop.eup %15072  ;;  %15092 = vpow2.f32 %v11268_v27  ;;  %v9917_v27 = vadd.f32 0.5, %v18239_v26  ;;  %v11277_v26 = vmul.f32 -1.442695, %v9915_v48  ;;  %v18524_v48 = vld [vmem:[#allocation3 + $0x90] sm:$0xff]   ;;  %v11282_v30 = vmul.f32 -1.442695, %v9920_v56 }
 0xb04   :  { %v18488_v40 = vpop.eup %15074  ;;  %15094 = vpow2.f32 %v11269_v28  ;;  %20164 = vst [vmem:[#allocation111_spill] sm:$0xff] %v18524_v48  ;;  %20165 = vst [vmem:[#allocation112_spill] sm:$0xff] %v18538_v61  ;;  %v9926_v1 = vadd.f32 0.5, %v18275_v62  ;;  %v11284_v56 = vmul.f32 -1.442695, %v9922_v3  ;;  %v9927_v37 = vadd.f32 0.5, %v18279_v18 }
 0xb05   :  { %v18492_v15 = vpop.eup %15076  ;;  %15096 = vpow2.f32 %v11270_v46  ;;  %v11279_v54 = vmul.f32 -1.442695, %v9917_v27  ;;  %v11286_v0 = vmul.f32 -1.442695, %v9924_v8  ;;  %v18558_v62 = vld [vmem:[#allocation3 + $0xb8] sm:$0xff]   ;;  %v20170_v61 = vld [vmem:[#allocation82_spill] sm:$0xff] }
 0xb06   :  { %v18496_v7 = vpop.eup %15078  ;;  %15098 = vpow2.f32 %v11271_v23  ;;  %20167 = vst [vmem:[#allocation114_spill] sm:$0xff] %v18558_v62  ;;  %v9930_v21 = vadd.f32 0.5, %v20170_v61  ;;  %v11288_v8 = vmul.f32 -1.442695, %v9926_v1  ;;  %v20171_v48 = vld [vmem:[#allocation83_spill] sm:$0xff]  ;;  %v9932_v33 = vadd.f32 0.5, %v20172_v9 }
 0xb07   :  { %v18502_v28 = vpop.eup %15080  ;;  %15100 = vpow2.f32 %v11272_v60  ;;  %v9921_v60 = vadd.f32 0.5, %v18255_v63  ;;  %v11281_v63 = vmul.f32 -1.442695, %v9919_v34  ;;  %v18544_v34 = vld [vmem:[#allocation3 + $0xa0] sm:$0xff]   ;;  %v9931_v3 = vadd.f32 0.5, %v20171_v48  ;;  %v18578_v61 = vld [vmem:[#allocation3 + $0xc8] sm:$0xff]  }
 0xb08   :  { %v18508_v46 = vpop.eup %15082  ;;  %15102 = vpow2.f32 %v11273_v20  ;;  %20166 = vst [vmem:[#allocation113_spill] sm:$0xff] %v18544_v34  ;;  %20173 = vst [vmem:[#allocation82_spill] sm:$0xff] %v18578_v61  ;;  %v20176_v62 = vld [vmem:[#allocation77_spill] sm:$0xff]  ;;  %v20177_v43 = vld [vmem:[#allocation78_spill] sm:$0xff]  ;;  %v9941_v42 = vadd.f32 0.5, %v20185_v36 }
 0xb09   :  { %v18512_v23 = vpop.eup %15084  ;;  %15104 = vpow2.f32 %v11274_v2  ;;  %v11283_v35 = vmul.f32 -1.442695, %v9921_v60  ;;  %v11290_v60 = vmul.f32 -1.442695, %v9928_v47  ;;  %v9934_v9 = vadd.f32 0.5, %v20176_v62  ;;  %v20178_v53 = vld [vmem:[#allocation86_spill] sm:$0xff] }
 0xb0a   :  { %v18516_v12 = vpop.eup %15086  ;;  %15106 = vpow2.f32 %v11275_v19  ;;  %v11292_v47 = vmul.f32 -1.442695, %v9930_v21  ;;  %v9935_v1 = vadd.f32 0.5, %v20177_v43  ;;  %v9936_v24 = vadd.f32 0.5, %v20178_v53  ;;  %v18598_v62 = vld [vmem:[#allocation3 + $0xd8] sm:$0xff]  }
 0xb0b   :  { %v18522_v20 = vpop.eup %15088  ;;  %15108 = vpow2.f32 %v11276_v31  ;;  %v9925_v31 = vadd.f32 0.5, %v18271_v57  ;;  %v11285_v57 = vmul.f32 -1.442695, %v9923_v17  ;;  %v18564_v17 = vld [vmem:[#allocation3 + $0xb0] sm:$0xff]   ;;  %20179 = vst [vmem:[#allocation84_spill] sm:$0xff] %v18598_v62  ;;  %v20182_v61 = vld [vmem:[#allocation92_spill] sm:$0xff] }
 0xb0c   :  { %v18528_v2 = vpop.eup %15090  ;;  %15110 = vpow2.f32 %v11277_v26  ;;  %v9938_v53 = vadd.f32 0.5, %v20182_v61  ;;  %v9939_v21 = vadd.f32 0.5, %v20183_v55  ;;  %v20186_v61 = vld [vmem:[#allocation94_spill] sm:$0xff]  ;;  %v11303_v36 = vmul.f32 -1.442695, %v9941_v42 }
 0xb0d   :  { %v18532_v19 = vpop.eup %15092  ;;  %15112 = vpow2.f32 %v11278_v5  ;;  %v11287_v18 = vmul.f32 -1.442695, %v9925_v31  ;;  %v11294_v31 = vmul.f32 -1.442695, %v9932_v33  ;;  %v11296_v33 = vmul.f32 -1.442695, %v9934_v9 }
 0xb0e   :  { %v18536_v58 = vpop.eup %15094  ;;  %15114 = vpow2.f32 %v11279_v54  ;;  %v9942_v9 = vadd.f32 0.5, %v20186_v61  ;;  %v20188_v55 = vld [vmem:[#allocation90_spill] sm:$0xff]  ;;  %v11301_v61 = vmul.f32 -1.442695, %v9939_v21  ;;  %v10145_v42 = vadd.f32 1.0, %v18448_v59 }
 0xb0f   :  { %v18542_v26 = vpop.eup %15096  ;;  %15116 = vpow2.f32 %v11280_v10  ;;  %v20168_v10 = vld [vmem:[#allocation81_spill] sm:$0xff]  ;;  %v18662_v59 = vadd.f32 1.0, %v18482_v32  ;;  %v18680_v32 = vadd.f32 1.0, %v18512_v23 }
 0xb10   :  { %v18548_v5 = vpop.eup %15098  ;;  %15118 = vpow2.f32 %v11281_v63  ;;  %v9929_v27 = vadd.f32 0.5, %v20168_v10  ;;  %20169 = vst [vmem:[#allocation81_spill] sm:$0xff] %v18564_v17  ;;  %v11289_v10 = vmul.f32 -1.442695, %v9927_v37  ;;  %v18584_v37 = vld [vmem:[#allocation3 + $0xc0] sm:$0xff]   ;;  %v18698_v23 = vadd.f32 1.0, %v18542_v26 }
 0xb11   :  { %v18552_v54 = vpop.eup %15100  ;;  %15120 = vpow2.f32 %v11282_v30  ;;  %20175 = vst [vmem:[#allocation83_spill] sm:$0xff] %v18584_v37 }
 0xb12   :  { %v18556_v16 = vpop.eup %15102  ;;  %15122 = vpow2.f32 %v11283_v35  ;;  %v11291_v48 = vmul.f32 -1.442695, %v9929_v27  ;;  %v11298_v27 = vmul.f32 -1.442695, %v9936_v24  ;;  %v18627_v24 = vld [vmem:[#allocation3 + $0xe8] sm:$0xff]  }
 0xb13   :  { %v18562_v63 = vpop.eup %15104  ;;  %15124 = vpow2.f32 %v11284_v56  ;;  %v20174_v56 = vld [vmem:[#allocation85_spill] sm:$0xff]  ;;  %20190 = vst [vmem:[#allocation77_spill] sm:$0xff] %v18627_v24  ;;  %v20197_v24 = vld [vmem:[#allocation95_spill] sm:$0xff] }
 0xb14   :  { %v18568_v30 = vpop.eup %15106  ;;  %15126 = vpow2.f32 %v11285_v57  ;;  %v9933_v34 = vadd.f32 0.5, %v20174_v56  ;;  %v11293_v56 = vmul.f32 -1.442695, %v9931_v3  ;;  %v18604_v3 = vld [vmem:[#allocation3 + $0xd0] sm:$0xff]  }
 0xb15   :  { %v18572_v35 = vpop.eup %15108  ;;  %15128 = vpow2.f32 %v11286_v0  ;;  %20181 = vst [vmem:[#allocation85_spill] sm:$0xff] %v18604_v3  ;;  %v11304_v3 = vmul.f32 -1.442695, %v9942_v9 }
 0xb16   :  { %v18576_v38 = vpop.eup %15110  ;;  %15130 = vpow2.f32 %v11287_v18  ;;  %v11295_v43 = vmul.f32 -1.442695, %v9933_v34  ;;  %v20184_v34 = vld [vmem:[#allocation88_spill] sm:$0xff]  ;;  %v18716_v26 = vadd.f32 1.0, %v18572_v35 }
 0xb17   :  { %v18582_v57 = vpop.eup %15112  ;;  %15132 = vpow2.f32 %v11288_v8  ;;  %v20180_v8 = vld [vmem:[#allocation87_spill] sm:$0xff]  ;;  %v9940_v22 = vadd.f32 0.5, %v20184_v34  ;;  %v11300_v34 = vmul.f32 -1.442695, %v9938_v53 }
 0xb18   :  { %v18588_v0 = vpop.eup %15114  ;;  %15134 = vpow2.f32 %v11289_v10  ;;  %v9937_v17 = vadd.f32 0.5, %v20180_v8  ;;  %v11297_v8 = vmul.f32 -1.442695, %v9935_v1  ;;  %v9944_v1 = vadd.f32 0.5, %v20188_v55 }
 0xb19   :  { %v18592_v18 = vpop.eup %15116  ;;  %15136 = vpow2.f32 %v11290_v60  ;;  %v11302_v53 = vmul.f32 -1.442695, %v9940_v22  ;;  %v10142_v55 = vadd.f32 1.0, %v18432_v52  ;;  %v10143_v22 = vadd.f32 1.0, %v18436_v50 }
 0xb1a   :  { %v18596_v4 = vpop.eup %15118  ;;  %15138 = vpow2.f32 %v11291_v48  ;;  %v11299_v37 = vmul.f32 -1.442695, %v9937_v17  ;;  %v18632_v17 = vld [vmem:[#allocation3 + $0xe0] sm:$0xff]   ;;  %v10149_v52 = vadd.f32 1.0, %v18468_v13  ;;  %v18656_v50 = vadd.f32 1.0, %v18472_v44 }
 0xb1b   :  { %v18602_v10 = vpop.eup %15120  ;;  %15140 = vpow2.f32 %v11292_v47  ;;  %v20187_v47 = vld [vmem:[#allocation79_spill] sm:$0xff]  ;;  %20192 = vst [vmem:[#allocation86_spill] sm:$0xff] %v18632_v17  ;;  %v18671_v13 = vadd.f32 1.0, %v18496_v7  ;;  %v18674_v44 = vadd.f32 1.0, %v18502_v28  ;;  %v18689_v7 = vadd.f32 1.0, %v18528_v2 }
 0xb1c   :  { %v18608_v60 = vpop.eup %15122  ;;  %15142 = vpow2.f32 %v11293_v56  ;;  %v9943_v41 = vadd.f32 0.5, %v20187_v47  ;;  %v20189_v56 = vld [vmem:[#allocation91_spill] sm:$0xff]  ;;  %v18692_v28 = vadd.f32 1.0, %v18532_v19  ;;  %v18707_v2 = vadd.f32 1.0, %v18556_v16 }
 0xb1d   :  { %v18612_v48 = vpop.eup %15124  ;;  %15144 = vpow2.f32 %v11294_v31  ;;  %v9945_v45 = vadd.f32 0.5, %v20189_v56  ;;  %v18710_v19 = vadd.f32 1.0, %v18562_v63  ;;  %v18725_v16 = vadd.f32 1.0, %v18588_v0 }
 0xb1e   :  { %v18616_v39 = vpop.eup %15126  ;;  %15146 = vpow2.f32 %v11295_v43  ;;  %v11305_v21 = vmul.f32 -1.442695, %v9943_v41  ;;  %v10147_v41 = vadd.f32 1.0, %v18456_v29  ;;  %v18665_v29 = vadd.f32 1.0, %v18488_v40 }
 0xb1f   :  { %v18620_v62 = vpop.eup %15128  ;;  %15148 = vpow2.f32 %v11296_v33  ;;  %v11307_v51 = vmul.f32 -1.442695, %v9945_v45  ;;  %v10148_v45 = vadd.f32 1.0, %v18462_v11  ;;  %v18668_v11 = vadd.f32 1.0, %v18492_v15 }
 0xb20   :  { %v18624_v49 = vpop.eup %15130  ;;  %15150 = vpow2.f32 %v11297_v8  ;;  %v11306_v8 = vmul.f32 -1.442695, %v9944_v1  ;;  %v18659_v1 = vadd.f32 1.0, %v18476_v6  ;;  %v18677_v6 = vadd.f32 1.0, %v18508_v46 }
 0xb21   :  { %v18630_v43 = vpop.eup %15132  ;;  %15152 = vpow2.f32 %v11298_v27  ;;  %v10144_v27 = vadd.f32 1.0, %v18442_v14  ;;  %v18683_v40 = vadd.f32 1.0, %v18516_v12  ;;  %v18686_v15 = vadd.f32 1.0, %v18522_v20 }
 0xb22   :  { %20191 = vst [vmem:[#allocation78_spill] sm:$0xff] %v18630_v43  ;;  %v18636_v33 = vpop.eup %15134  ;;  %15154 = vpow2.f32 %v11299_v37  ;;  %v10146_v37 = vadd.f32 1.0, %v18452_v25  ;;  %v18695_v46 = vadd.f32 1.0, %v18536_v58  ;;  %v18701_v12 = vadd.f32 1.0, %v18548_v5 }
 0xb23   :  { %v18639_v31 = vpop.eup %15136  ;;  %15156 = vpow2.f32 %v11300_v34  ;;  %v18704_v20 = vadd.f32 1.0, %v18552_v54  ;;  %v18719_v5 = vadd.f32 1.0, %v18576_v38  ;;  %v18728_v63 = vadd.f32 1.0, %v18592_v18 }
 0xb24   :  { %v18641_v43 = vpop.eup %15138  ;;  %15158 = vpow2.f32 %v11301_v61  ;;  %v18713_v61 = vadd.f32 1.0, %v18568_v30  ;;  %v18734_v35 = vadd.f32 1.0, %v18602_v10  ;;  %v18737_v38 = vadd.f32 1.0, %v18608_v60 }
 0xb25   :  { %v18646_v47 = vpop.eup %15140  ;;  %15160 = vpow2.f32 %v11302_v53  ;;  %v18731_v53 = vadd.f32 1.0, %v18596_v4  ;;  %v18743_v0 = vadd.f32 1.0, %v18616_v39  ;;  %v18746_v18 = vadd.f32 1.0, %v18620_v62 }
 0xb26   :  { %v18651_v9 = vpop.eup %15142  ;;  %15162 = vpow2.f32 %v11303_v36  ;;  %v18755_v60 = vadd.f32 1.0, %v18636_v33  ;;  %v18761_v39 = vadd.f32 1.0, %v18641_v43  ;;  %v18764_v62 = vadd.f32 1.0, %v18646_v47 }
 0xb27   :  { %v15145_v14 = vpop.eup %15144  ;;  %15164 = vpow2.f32 %v11304_v3 }
 0xb28   :  { %v15147_v25 = vpop.eup %15146  ;;  %15166 = vpow2.f32 %v11305_v21  ;;  %v18740_v21 = vadd.f32 1.0, %v18612_v48 }
 0xb29   :  { %v15149_v3 = vpop.eup %15148  ;;  %15168 = vpow2.f32 %v11306_v8  ;;  %v18749_v8 = vadd.f32 1.0, %v18624_v49  ;;  %v20193_v10 = vld [vmem:[#allocation78_spill] sm:$0xff]  ;;  %v18771_v33 = vadd.f32 1.0, %v15147_v25 }
 0xb2a   :  { %v15151_v34 = vpop.eup %15150  ;;  %15170 = vpow2.f32 %v11307_v51 }
 0xb2b   :  { %v15153_v36 = vpop.eup %15152  ;;  %15172 = vrcp.f32 %v10142_v55  ;;  %v18722_v55 = vadd.f32 1.0, %v18582_v57 }
 0xb2c   :  { %v15155_v51 = vpop.eup %15154  ;;  %15174 = vrcp.f32 %v10143_v22  ;;  %v18752_v22 = vadd.f32 1.0, %v20193_v10  ;;  %v18778_v43 = vadd.f32 1.0, %v15153_v36 }
 0xb2d   :  { %v15157_v58 = vpop.eup %15156  ;;  %15176 = vrcp.f32 %v10144_v27  ;;  %v18758_v27 = vadd.f32 1.0, %v18639_v31  ;;  %v18774_v31 = vadd.f32 1.0, %v15149_v3 }
 0xb2e   :  { %v15159_v54 = vpop.eup %15158  ;;  %15178 = vrcp.f32 %v10145_v42  ;;  %v18767_v42 = vadd.f32 1.0, %v18651_v9  ;;  %v18783_v9 = vadd.f32 1.0, %v15157_v58  ;;  %v20195_v58 = vld [vmem:[#allocation26_spill] sm:$0xff] }
 0xb2f   :  { %v15161_v30 = vpop.eup %15160  ;;  %15180 = vrcp.f32 %v10146_v37  ;;  %v18769_v37 = vadd.f32 1.0, %v15145_v14  ;;  %v18785_v14 = vadd.f32 1.0, %v15159_v54 }
 0xb30   :  { %v15163_v57 = vpop.eup %15162  ;;  %15182 = vrcp.f32 %v10147_v41 }
 0xb31   :  { %v15165_v4 = vpop.eup %15164  ;;  %15184 = vrcp.f32 %v10148_v45  ;;  %v18776_v45 = vadd.f32 1.0, %v15151_v34  ;;  %v18790_v3 = vadd.f32 1.0, %v15163_v57  ;;  %v20194_v34 = vld [vmem:[#allocation22_spill] sm:$0xff] }
 0xb32   :  { %v15167_v48 = vpop.eup %15166  ;;  %15186 = vrcp.f32 %v10149_v52  ;;  %v18781_v52 = vadd.f32 1.0, %v15155_v51 }
 0xb33   :  { %v15169_v49 = vpop.eup %15168  ;;  %15188 = vrcp.f32 %v18656_v50  ;;  %v18788_v50 = vadd.f32 1.0, %v15161_v30  ;;  %v18796_v51 = vadd.f32 1.0, %v15167_v48  ;;  %v20196_v30 = vld [vmem:[#allocation23_spill] sm:$0xff] }
 0xb34   :  { %v15171_v41 = vpop.eup %15170  ;;  %15190 = vrcp.f32 %v18659_v1  ;;  %v18794_v1 = vadd.f32 1.0, %v15165_v4  ;;  %v20198_v4 = vld [vmem:[#allocation27_spill] sm:$0xff] }
 0xb35   :  { %v15173_v47 = vpop.eup %15172  ;;  %15192 = vrcp.f32 %v18662_v59  ;;  %v18800_v59 = vadd.f32 1.0, %v15169_v49  ;;  %v20199_v49 = vld [vmem:[#allocation30_spill] sm:$0xff] }
 0xb36   :  { %v15175_v25 = vpop.eup %15174  ;;  %15194 = vrcp.f32 %v18665_v29  ;;  %v10334_v36 = vmul.f32 %v15173_v47, %v20194_v34  ;;  %v18805_v47 = vadd.f32 1.0, %v15171_v41  ;;  %v20201_v41 = vld [vmem:[#allocation34_spill] sm:$0xff] }
 0xb37   :  { %v15177_v10 = vpop.eup %15176  ;;  %15196 = vrcp.f32 %v18668_v11  ;;  %v10335_v54 = vmul.f32 %v15175_v25, %v20195_v58  ;;  %v20200_v58 = vld [vmem:[#allocation73_spill] sm:$0xff] }
 0xb38   :  { %v15179_v56 = vpop.eup %15178  ;;  %15198 = vrcp.f32 %v18671_v13  ;;  %v10336_v57 = vmul.f32 %v15177_v10, %v20196_v30  ;;  %v10405_v29 = vmul.f32 %v20197_v24, %v10334_v36 }
 0xb39   :  { %v15181_v17 = vpop.eup %15180  ;;  %15200 = vrcp.f32 %v18674_v44  ;;  %v10337_v48 = vmul.f32 %v15179_v56, %v20198_v4  ;;  %v10406_v11 = vmul.f32 %v20197_v24, %v10335_v54 }
 0xb3a   :  { %v15183_v34 = vpop.eup %15182  ;;  %15202 = vrcp.f32 %v18677_v6  ;;  %v10338_v25 = vmul.f32 %v15181_v17, %v20199_v49  ;;  %v10407_v13 = vmul.f32 %v20197_v24, %v10336_v57  ;;  %v18814_v10 = vadd.f32 %v20200_v58, %v10405_v29  ;;  %v20202_v6 = vld [vmem:[#allocation31_spill] sm:$0xff] }
 0xb3b   :  { %v15185_v36 = vpop.eup %15184  ;;  %15204 = vrcp.f32 %v18680_v32  ;;  %v10339_v30 = vmul.f32 %v15183_v34, %v20201_v41  ;;  %v10408_v44 = vmul.f32 %v20197_v24, %v10337_v48  ;;  %v18820_v56 = vadd.f32 %v20200_v58, %v10406_v11  ;;  %v20203_v32 = vld [vmem:[#allocation35_spill] sm:$0xff] }
 0xb3c   :  { %v15187_v54 = vpop.eup %15186  ;;  %15206 = vrcp.f32 %v18683_v40  ;;  %v10340_v17 = vmul.f32 %v15185_v36, %v20202_v6  ;;  %v10409_v57 = vmul.f32 %v20197_v24, %v10338_v25  ;;  %v18826_v29 = vadd.f32 %v20200_v58, %v10407_v13  ;;  %v20204_v40 = vld [vmem:[#allocation38_spill] sm:$0xff] }
 0xb3d   :  { %v15189_v4 = vpop.eup %15188  ;;  %15208 = vrcp.f32 %v18686_v15  ;;  %v10341_v34 = vmul.f32 %v15187_v54, %v20203_v32  ;;  %v10410_v48 = vmul.f32 %v20197_v24, %v10339_v30  ;;  %v18832_v11 = vadd.f32 %v20200_v58, %v10408_v44  ;;  %v20205_v15 = vld [vmem:[#allocation42_spill] sm:$0xff] }
 0xb3e   :  { %v15191_v49 = vpop.eup %15190  ;;  %15210 = vrcp.f32 %v18689_v7  ;;  %v10342_v36 = vmul.f32 %v15189_v4, %v20204_v40  ;;  %v10411_v25 = vmul.f32 %v20197_v24, %v10340_v17  ;;  %v18838_v13 = vadd.f32 %v20200_v58, %v10409_v57  ;;  %v20206_v7 = vld [vmem:[#allocation39_spill] sm:$0xff] }
 0xb3f   :  { %v15193_v41 = vpop.eup %15192  ;;  %15212 = vrcp.f32 %v18692_v28  ;;  %v10343_v54 = vmul.f32 %v15191_v49, %v20205_v15  ;;  %v10412_v30 = vmul.f32 %v20197_v24, %v10341_v34  ;;  %v18844_v44 = vadd.f32 %v20200_v58, %v10410_v48  ;;  %v20207_v28 = vld [vmem:[#allocation43_spill] sm:$0xff] }
 0xb40   :  { %v15195_v6 = vpop.eup %15194  ;;  %15214 = vrcp.f32 %v18695_v46  ;;  %v10344_v4 = vmul.f32 %v15193_v41, %v20206_v7  ;;  %v10413_v17 = vmul.f32 %v20197_v24, %v10342_v36  ;;  %v18850_v57 = vadd.f32 %v20200_v58, %v10411_v25  ;;  %v20208_v46 = vld [vmem:[#allocation46_spill] sm:$0xff] }
 0xb41   :  { %v15197_v32 = vpop.eup %15196  ;;  %15216 = vrcp.f32 %v18698_v23  ;;  %v10345_v49 = vmul.f32 %v15195_v6, %v20207_v28  ;;  %v10414_v34 = vmul.f32 %v20197_v24, %v10343_v54  ;;  %v18856_v48 = vadd.f32 %v20200_v58, %v10412_v30  ;;  %v20209_v23 = vld [vmem:[#allocation50_spill] sm:$0xff] }
 0xb42   :  { %v15199_v40 = vpop.eup %15198  ;;  %15218 = vrcp.f32 %v18701_v12  ;;  %v10346_v41 = vmul.f32 %v15197_v32, %v20208_v46  ;;  %v10415_v36 = vmul.f32 %v20197_v24, %v10344_v4  ;;  %v18862_v25 = vadd.f32 %v20200_v58, %v10413_v17  ;;  %v20210_v12 = vld [vmem:[#allocation47_spill] sm:$0xff] }
 0xb43   :  { %v15201_v15 = vpop.eup %15200  ;;  %15220 = vrcp.f32 %v18704_v20  ;;  %v10347_v6 = vmul.f32 %v15199_v40, %v20209_v23  ;;  %v10416_v54 = vmul.f32 %v20197_v24, %v10345_v49  ;;  %v18868_v30 = vadd.f32 %v20200_v58, %v10414_v34  ;;  %v20211_v20 = vld [vmem:[#allocation51_spill] sm:$0xff] }
 0xb44   :  { %v15203_v7 = vpop.eup %15202  ;;  %15222 = vrcp.f32 %v18707_v2  ;;  %v10348_v32 = vmul.f32 %v15201_v15, %v20210_v12  ;;  %v10417_v4 = vmul.f32 %v20197_v24, %v10346_v41  ;;  %v18874_v17 = vadd.f32 %v20200_v58, %v10415_v36  ;;  %v20212_v2 = vld [vmem:[#allocation54_spill] sm:$0xff] }
 0xb45   :  { %v15205_v28 = vpop.eup %15204  ;;  %15224 = vrcp.f32 %v18710_v19  ;;  %v10349_v40 = vmul.f32 %v15203_v7, %v20211_v20  ;;  %v10418_v49 = vmul.f32 %v20197_v24, %v10347_v6  ;;  %v18880_v34 = vadd.f32 %v20200_v58, %v10416_v54  ;;  %v20213_v19 = vld [vmem:[#allocation58_spill] sm:$0xff] }
 0xb46   :  { %v15207_v46 = vpop.eup %15206  ;;  %15226 = vrcp.f32 %v18713_v61  ;;  %v10350_v15 = vmul.f32 %v15205_v28, %v20212_v2  ;;  %v10419_v41 = vmul.f32 %v20197_v24, %v10348_v32  ;;  %v18886_v36 = vadd.f32 %v20200_v58, %v10417_v4  ;;  %v20214_v61 = vld [vmem:[#allocation55_spill] sm:$0xff] }
 0xb47   :  { %v15209_v23 = vpop.eup %15208  ;;  %15228 = vrcp.f32 %v18716_v26  ;;  %v10351_v7 = vmul.f32 %v15207_v46, %v20213_v19  ;;  %v10420_v6 = vmul.f32 %v20197_v24, %v10349_v40  ;;  %v18892_v54 = vadd.f32 %v20200_v58, %v10418_v49  ;;  %v20215_v26 = vld [vmem:[#allocation59_spill] sm:$0xff] }
 0xb48   :  { %v15211_v12 = vpop.eup %15210  ;;  %15230 = vrcp.f32 %v18719_v5  ;;  %v10352_v28 = vmul.f32 %v15209_v23, %v20214_v61  ;;  %v10421_v32 = vmul.f32 %v20197_v24, %v10350_v15  ;;  %v18898_v4 = vadd.f32 %v20200_v58, %v10419_v41  ;;  %v20216_v5 = vld [vmem:[#allocation15_spill] sm:$0xff] }
 0xb49   :  { %v15213_v20 = vpop.eup %15212  ;;  %15232 = vrcp.f32 %v18722_v55  ;;  %v10353_v46 = vmul.f32 %v15211_v12, %v20215_v26  ;;  %v10422_v40 = vmul.f32 %v20197_v24, %v10351_v7  ;;  %v18904_v49 = vadd.f32 %v20200_v58, %v10420_v6  ;;  %v20217_v55 = vld [vmem:[#allocation14_spill] sm:$0xff] }
 0xb4a   :  { %v15215_v2 = vpop.eup %15214  ;;  %15234 = vrcp.f32 %v18725_v16  ;;  %v10354_v23 = vmul.f32 %v15213_v20, %v20216_v5  ;;  %v10423_v15 = vmul.f32 %v20197_v24, %v10352_v28  ;;  %v18910_v41 = vadd.f32 %v20200_v58, %v10421_v32  ;;  %v20218_v16 = vld [vmem:[#allocation62_spill] sm:$0xff]  ;;  %v18923_v28 = vld [vmem:[%s19518_s5] ss:$0 sm:$0xff]  ;;  %s15428_s5 = smov [#allocation9]  }
 0xb4b   :  { %v15217_v19 = vpop.eup %15216  ;;  %15236 = vrcp.f32 %v18728_v63  ;;  %v10355_v12 = vmul.f32 %v15215_v2, %v20217_v55  ;;  %v10424_v7 = vmul.f32 %v20197_v24, %v10353_v46  ;;  %v18916_v6 = vadd.f32 %v20200_v58, %v10422_v40  ;;  %v20219_v24 = vld [vmem:[#allocation13_spill] sm:$0xff]  ;;  %v20221_v55 = vld [vmem:[#allocation18_spill] sm:$0xff] }
 0xb4c   :  { %v15219_v61 = vpop.eup %15218  ;;  %15238 = vrcp.f32 %v18731_v53  ;;  %v10356_v20 = vmul.f32 %v15217_v19, %v20218_v16  ;;  %v10425_v32 = vmul.f32 %v18923_v28, %v10354_v23  ;;  %v18927_v63 = vadd.f32 %v20200_v58, %v10423_v15  ;;  %v18935_v53 = vld [vmem:[%s19519_s6] ss:$0 sm:$0xff]  ;;  %v20220_v58 = vld [vmem:[#allocation16_spill] sm:$0xff]  ;;  %s11057_s6 = sshll.u32 %s15428_s5, 4  ;;  %s11058_s6 = int_to_ptr.vmem [resolvable:$true] %s11057_s6 }
 0xb4d   :  { %v15221_v26 = vpop.eup %15220  ;;  %15240 = vrcp.f32 %v18734_v35  ;;  %v10357_v46 = vmul.f32 %v15219_v61, %v20219_v24  ;;  %v10426_v40 = vmul.f32 %v18923_v28, %v10355_v12  ;;  %v18938_v2 = vadd.f32 %v18935_v53, %v10424_v7  ;;  %s15394_s29 = scalar_lea.vmem %s11058_s6, 4096  ;;  %p15399_p11 = scmp.lt.s32.totalorder %s11058_s6, %s11058_s6 }
 0xb4e   :  { %v15223_v5 = vpop.eup %15222  ;;  %15242 = vrcp.f32 %v18737_v38  ;;  %v10358_v23 = vmul.f32 %v15221_v26, %v20220_v58  ;;  %v10427_v15 = vmul.f32 %v18923_v28, %v10356_v20  ;;  %v18944_v35 = vadd.f32 %v18935_v53, %v10425_v32  ;;  %v20222_v38 = vld [vmem:[#allocation17_spill] sm:$0xff]  ;;  %p15395_p10 = scmp.ne.s32.totalorder %s11058_s6, %s15394_s29  ;;  %p15400_p12 = scmp.lt.s32.totalorder %s15394_s29, %s15394_s29 }
 0xb4f   :  { %v15225_v19 = vpop.eup %15224  ;;  %15244 = vrcp.f32 %v18740_v21  ;;  %v10359_v12 = vmul.f32 %v15223_v5, %v20221_v55  ;;  %v10428_v61 = vmul.f32 %v18923_v28, %v10357_v46  ;;  %v18950_v7 = vadd.f32 %v18935_v53, %v10426_v40  ;;  %v20223_v21 = vld [vmem:[#allocation19_spill] sm:$0xff] }
 0xb50   :  { %v15227_v16 = vpop.eup %15226  ;;  %15246 = vrcp.f32 %v18743_v0  ;;  %v10360_v26 = vmul.f32 %v15225_v19, %v20222_v38  ;;  %v10429_v20 = vmul.f32 %v18923_v28, %v10358_v23  ;;  %v18956_v32 = vadd.f32 %v18935_v53, %v10427_v15  ;;  %v20224_v0 = vld [vmem:[#allocation20_spill] sm:$0xff]  ;;  %p15401_p13 = por %p15400_p12, %p15399_p11 }
 0xb51   :  { %v15229_v24 = vpop.eup %15228  ;;  %15248 = vrcp.f32 %v18746_v18  ;;  %v10361_v5 = vmul.f32 %v15227_v16, %v20223_v21  ;;  %v10430_v46 = vmul.f32 %v18923_v28, %v10359_v12  ;;  %v18962_v40 = vadd.f32 %v18935_v53, %v10428_v61  ;;  %v20225_v18 = vld [vmem:[#allocation24_spill] sm:$0xff] }
 0xb52   :  { %v15231_v58 = vpop.eup %15230  ;;  %15250 = vrcp.f32 %v18749_v8  ;;  %v10362_v19 = vmul.f32 %v15229_v24, %v20224_v0  ;;  %v10431_v23 = vmul.f32 %v18923_v28, %v10360_v26  ;;  %v18968_v15 = vadd.f32 %v18935_v53, %v10429_v20  ;;  %v20226_v8 = vld [vmem:[#allocation21_spill] sm:$0xff]  ;;  %p15402_p0 = pnand %p15401_p13, %p15395_p10 }
 0xb53   :  { %v15233_v55 = vpop.eup %15232  ;;  %15252 = vrcp.f32 %v18752_v22  ;;  %v10363_v16 = vmul.f32 %v15231_v58, %v20225_v18  ;;  %v10432_v12 = vmul.f32 %v18923_v28, %v10361_v5  ;;  %v18974_v61 = vadd.f32 %v18935_v53, %v10430_v46  ;;  %v20227_v22 = vld [vmem:[#allocation25_spill] sm:$0xff] }
 0xb54   :  { %v15235_v38 = vpop.eup %15234  ;;  %15254 = vrcp.f32 %v18755_v60  ;;  %v10364_v24 = vmul.f32 %v15233_v55, %v20226_v8  ;;  %v10433_v26 = vmul.f32 %v18923_v28, %v10362_v19  ;;  %v18980_v20 = vadd.f32 %v18935_v53, %v10431_v23  ;;  %v20228_v60 = vld [vmem:[#allocation28_spill] sm:$0xff] }
 0xb55   :  { %v15237_v21 = vpop.eup %15236  ;;  %15256 = vrcp.f32 %v18758_v27  ;;  %v10365_v58 = vmul.f32 %v15235_v38, %v20227_v22  ;;  %v10434_v5 = vmul.f32 %v18923_v28, %v10363_v16  ;;  %v18986_v46 = vadd.f32 %v18935_v53, %v10432_v12  ;;  %v20229_v27 = vld [vmem:[#allocation32_spill] sm:$0xff] }
 0xb56   :  { %v15239_v0 = vpop.eup %15238  ;;  %15258 = vrcp.f32 %v18761_v39  ;;  %v10366_v55 = vmul.f32 %v15237_v21, %v20228_v60  ;;  %v10435_v19 = vmul.f32 %v18923_v28, %v10364_v24  ;;  %v18992_v23 = vadd.f32 %v18935_v53, %v10433_v26  ;;  %v20230_v39 = vld [vmem:[#allocation29_spill] sm:$0xff] }
 0xb57   :  { %v15241_v18 = vpop.eup %15240  ;;  %15260 = vrcp.f32 %v18764_v62  ;;  %v10367_v38 = vmul.f32 %v15239_v0, %v20229_v27  ;;  %v10436_v16 = vmul.f32 %v18923_v28, %v10365_v58  ;;  %v18998_v12 = vadd.f32 %v18935_v53, %v10434_v5  ;;  %v20231_v62 = vld [vmem:[#allocation33_spill] sm:$0xff] }
 0xb58   :  { %v15243_v8 = vpop.eup %15242  ;;  %15262 = vrcp.f32 %v18767_v42  ;;  %v10368_v21 = vmul.f32 %v15241_v18, %v20230_v39  ;;  %v10437_v24 = vmul.f32 %v18923_v28, %v10366_v55  ;;  %v19004_v26 = vadd.f32 %v18935_v53, %v10435_v19  ;;  %v20232_v42 = vld [vmem:[#allocation36_spill] sm:$0xff] }
 0xb59   :  { %v15245_v22 = vpop.eup %15244  ;;  %15264 = vrcp.f32 %v18769_v37  ;;  %v10369_v0 = vmul.f32 %v15243_v8, %v20231_v62  ;;  %v10438_v58 = vmul.f32 %v18923_v28, %v10367_v38  ;;  %v19010_v5 = vadd.f32 %v18935_v53, %v10436_v16  ;;  %v20233_v37 = vld [vmem:[#allocation40_spill] sm:$0xff] }
 0xb5a   :  { %v15247_v60 = vpop.eup %15246  ;;  %15266 = vrcp.f32 %v18771_v33  ;;  %v10370_v18 = vmul.f32 %v15245_v22, %v20232_v42  ;;  %v10439_v55 = vmul.f32 %v18923_v28, %v10368_v21  ;;  %v19016_v19 = vadd.f32 %v18935_v53, %v10437_v24  ;;  %v20234_v33 = vld [vmem:[#allocation37_spill] sm:$0xff] }
 0xb5b   :  { %v15249_v27 = vpop.eup %15248  ;;  %15268 = vrcp.f32 %v18774_v31  ;;  %v10371_v8 = vmul.f32 %v15247_v60, %v20233_v37  ;;  %v10440_v38 = vmul.f32 %v18923_v28, %v10369_v0  ;;  %v19022_v16 = vadd.f32 %v18935_v53, %v10438_v58  ;;  %v20235_v31 = vld [vmem:[#allocation41_spill] sm:$0xff] }
 0xb5c   :  { %v15251_v39 = vpop.eup %15250  ;;  %15270 = vrcp.f32 %v18776_v45  ;;  %v10372_v22 = vmul.f32 %v15249_v27, %v20234_v33  ;;  %v10441_v21 = vmul.f32 %v18923_v28, %v10370_v18  ;;  %v19028_v24 = vadd.f32 %v18935_v53, %v10439_v55  ;;  %v20236_v45 = vld [vmem:[#allocation44_spill] sm:$0xff] }
 0xb5d   :  { %v15253_v62 = vpop.eup %15252  ;;  %15272 = vrcp.f32 %v18778_v43  ;;  %v10373_v60 = vmul.f32 %v15251_v39, %v20235_v31  ;;  %v10442_v0 = vmul.f32 %v18923_v28, %v10371_v8  ;;  %v19034_v58 = vadd.f32 %v18935_v53, %v10440_v38  ;;  %v20237_v43 = vld [vmem:[#allocation48_spill] sm:$0xff] }
 0xb5e   :  { %v15255_v42 = vpop.eup %15254  ;;  %15274 = vrcp.f32 %v18781_v52  ;;  %v10374_v27 = vmul.f32 %v15253_v62, %v20236_v45  ;;  %v10443_v18 = vmul.f32 %v18923_v28, %v10372_v22  ;;  %v19040_v55 = vadd.f32 %v18935_v53, %v10441_v21  ;;  %v20238_v52 = vld [vmem:[#allocation45_spill] sm:$0xff] }
 0xb5f   :  { %v15257_v37 = vpop.eup %15256  ;;  %15276 = vrcp.f32 %v18783_v9  ;;  %v10375_v39 = vmul.f32 %v15255_v42, %v20237_v43  ;;  %v10444_v8 = vmul.f32 %v18923_v28, %v10373_v60  ;;  %v19046_v38 = vadd.f32 %v18935_v53, %v10442_v0  ;;  %v20239_v9 = vld [vmem:[#allocation49_spill] sm:$0xff] }
 0xb60   :  { %v15259_v33 = vpop.eup %15258  ;;  %15278 = vrcp.f32 %v18785_v14  ;;  %v10376_v62 = vmul.f32 %v15257_v37, %v20238_v52  ;;  %v10445_v22 = vmul.f32 %v18923_v28, %v10374_v27  ;;  %v19052_v21 = vadd.f32 %v18935_v53, %v10443_v18  ;;  %v20240_v14 = vld [vmem:[#allocation52_spill] sm:$0xff] }
 0xb61   :  { %v15261_v31 = vpop.eup %15260  ;;  %15280 = vrcp.f32 %v18788_v50  ;;  %v10377_v42 = vmul.f32 %v15259_v33, %v20239_v9  ;;  %v10446_v60 = vmul.f32 %v18923_v28, %v10375_v39  ;;  %v19058_v0 = vadd.f32 %v18935_v53, %v10444_v8  ;;  %v20241_v50 = vld [vmem:[#allocation56_spill] sm:$0xff] }
 0xb62   :  { %v15263_v45 = vpop.eup %15262  ;;  %15282 = vrcp.f32 %v18790_v3  ;;  %v10378_v37 = vmul.f32 %v15261_v31, %v20240_v14  ;;  %v10447_v27 = vmul.f32 %v18923_v28, %v10376_v62  ;;  %v19064_v18 = vadd.f32 %v18935_v53, %v10445_v22  ;;  %v20242_v3 = vld [vmem:[#allocation53_spill] sm:$0xff] }
 0xb63   :  { %v15265_v43 = vpop.eup %15264  ;;  %15284 = vrcp.f32 %v18794_v1  ;;  %v10379_v33 = vmul.f32 %v15263_v45, %v20241_v50  ;;  %v10448_v39 = vmul.f32 %v18923_v28, %v10377_v42  ;;  %v19070_v8 = vadd.f32 %v18935_v53, %v10446_v60  ;;  %v20243_v1 = vld [vmem:[#allocation57_spill] sm:$0xff] }
 0xb64   :  { %v15267_v52 = vpop.eup %15266  ;;  %15286 = vrcp.f32 %v18796_v51  ;;  %v10380_v31 = vmul.f32 %v15265_v43, %v20242_v3  ;;  %v10449_v62 = vmul.f32 %v18923_v28, %v10378_v37  ;;  %v19076_v22 = vadd.f32 %v18935_v53, %v10447_v27  ;;  %v20245_v51 = vld [vmem:[#allocation60_spill] sm:$0xff] }
 0xb65   :  { %v15269_v9 = vpop.eup %15268  ;;  %15288 = vrcp.f32 %v18800_v59  ;;  %v10381_v45 = vmul.f32 %v15267_v52, %v20243_v1  ;;  %v10450_v42 = vmul.f32 %v18923_v28, %v10379_v33  ;;  %v19082_v60 = vadd.f32 %v18935_v53, %v10448_v39  ;;  %v20247_v3 = vld [vmem:[#allocation64_spill] sm:$0xff]  ;;  %v20249_v39 = vld [vmem:[#allocation74_spill] sm:$0xff] }
 0xb66   :  { %v15271_v14 = vpop.eup %15270  ;;  %15290 = vrcp.f32 %v18805_v47  ;;  %v10382_v43 = vmul.f32 %v15269_v9, %v20245_v51  ;;  %v10451_v37 = vmul.f32 %v18923_v28, %v10380_v31  ;;  %v19088_v27 = vadd.f32 %v18935_v53, %v10449_v62  ;;  %v20252_v9 = vld [vmem:[#allocation61_spill] sm:$0xff] }
 0xb67   :  { %20244 = vst [vmem:[#allocation87_spill] sm:$0xff] %v19082_v60  ;;  %v15273_v50 = vpop.eup %15272  ;;  %v10383_v59 = vmul.f32 %v15271_v14, %v20247_v3  ;;  %v10452_v52 = vmul.f32 %v18923_v28, %v10381_v45  ;;  %v19093_v33 = vadd.f32 %v18935_v53, %v10450_v42  ;;  %v20250_v1 = vunpack.c.l.bf16 %v20249_v39  ;;  %v20255_v3 = vld [vmem:[#allocation63_spill] sm:$0xff] }
 0xb68   :  { %20246 = vst [vmem:[#allocation92_spill] sm:$0xff] %v19088_v27  ;;  %v15275_v47 = vpop.eup %15274  ;;  %v10384_v51 = vmul.f32 %v15273_v50, %v20252_v9  ;;  %v10453_v31 = vmul.f32 %v18923_v28, %v10382_v43  ;;  %v19103_v62 = vadd.f32 %v18935_v53, %v10451_v37  ;;  %v20253_v14 = vunpack.c.h.bf16 %v20249_v39  ;;  %v20256_v50 = vld [vmem:[#allocation75_spill] sm:$0xff]  ;;  %v20259_v9 = vld [vmem:[#allocation66_spill] sm:$0xff] }
 0xb69   :  { %20248 = vst [vmem:[#allocation93_spill] sm:$0xff] %v19093_v33  ;;  %v19098_v60 = vadd.f32 %v20250_v1, %v18814_v10  ;;  %v15277_v42 = vpop.eup %15276  ;;  %v10385_v33 = vmul.f32 %v15275_v47, %v20255_v3  ;;  %v10454_v27 = vmul.f32 %v18923_v28, %v10383_v59  ;;  %v19113_v10 = vadd.f32 %v18935_v53, %v10452_v52 }
 0xb6a   :  { %v19108_v45 = vadd.f32 %v20253_v14, %v18820_v56  ;;  %v20257_v1 = vunpack.c.l.bf16 %v20256_v50  ;;  %v15279_v37 = vpop.eup %15278  ;;  %v10455_v39 = vmul.f32 %v18923_v28, %v10384_v51  ;;  %v19123_v56 = vadd.f32 %v18935_v53, %v10453_v31  ;;  %v20262_v14 = vld [vmem:[#allocation68_spill] sm:$0xff] }
 0xb6b   :  { %20251 = vst [vmem:[#allocation88_spill] sm:$0xff] %v19098_v60  ;;  %v10386_v60 = vmul.f32 %v15277_v42, %v20259_v9  ;;  %v20260_v47 = vunpack.c.h.bf16 %v20256_v50  ;;  %v15281_v52 = vpop.eup %15280  ;;  %v10387_v3 = vmul.f32 %v15279_v37, %v20262_v14  ;;  %v20263_v42 = vld [vmem:[#allocation96_spill] sm:$0xff]  ;;  %v20266_v9 = vld [vmem:[#allocation65_spill] sm:$0xff] }
 0xb6c   :  { %20254 = vst [vmem:[#allocation89_spill] sm:$0xff] %v19108_v45  ;;  %v19118_v43 = vadd.f32 %v20257_v1, %v18826_v29  ;;  %v10456_v45 = vmul.f32 %v18923_v28, %v10385_v33  ;;  %v19133_v29 = vadd.f32 %v18935_v53, %v10454_v27  ;;  %v20264_v1 = vunpack.c.l.bf16 %v20263_v42  ;;  %v15283_v31 = vpop.eup %15282 }
 0xb6d   :  { %v19128_v59 = vadd.f32 %v20260_v47, %v18832_v11  ;;  %v10457_v50 = vmul.f32 %v18923_v28, %v10386_v60  ;;  %v19143_v11 = vadd.f32 %v18935_v53, %v10455_v39  ;;  %v20267_v37 = vunpack.c.h.bf16 %v20263_v42  ;;  %v15285_v27 = vpop.eup %15284  ;;  %v20269_v47 = vld [vmem:[#allocation67_spill] sm:$0xff] }
 0xb6e   :  { %20258 = vst [vmem:[#allocation94_spill] sm:$0xff] %v19118_v43  ;;  %v19138_v51 = vadd.f32 %v20264_v1, %v18838_v13  ;;  %v10388_v43 = vmul.f32 %v15281_v52, %v20266_v9  ;;  %v10389_v14 = vmul.f32 %v15283_v31, %v20269_v47  ;;  %v19153_v13 = vadd.f32 %v18935_v53, %v10456_v45  ;;  %v20270_v52 = vld [vmem:[#allocation76_spill] sm:$0xff]  ;;  %v15287_v39 = vpop.eup %15286  ;;  %v20273_v9 = vld [vmem:[#allocation70_spill] sm:$0xff] }
 0xb6f   :  { %20261 = vst [vmem:[#allocation79_spill] sm:$0xff] %v19128_v59  ;;  %v19148_v33 = vadd.f32 %v20267_v37, %v18844_v44  ;;  %v10458_v59 = vmul.f32 %v18923_v28, %v10387_v3  ;;  %v20271_v1 = vunpack.c.l.bf16 %v20270_v52  ;;  %v19163_v44 = vadd.f32 %v18935_v53, %v10457_v50  ;;  %v15289_v45 = vpop.eup %15288  ;;  %v20276_v37 = vld [vmem:[#allocation72_spill] sm:$0xff]  ;;  %v20280_v50 = vld [vmem:[#allocation69_spill] sm:$0xff] }
 0xb70   :  { %20265 = vst [vmem:[#allocation90_spill] sm:$0xff] %v19138_v51  ;;  %v10390_v51 = vmul.f32 %v15285_v27, %v20273_v9  ;;  %v10459_v42 = vmul.f32 %v18923_v28, %v10388_v43  ;;  %v20275_v31 = vunpack.c.h.bf16 %v20270_v52  ;;  %v10391_v47 = vmul.f32 %v15287_v39, %v20276_v37  ;;  %v15291_v43 = vpop.eup %15290 }
 0xb71   :  { %20268 = vst [vmem:[#allocation91_spill] sm:$0xff] %v19148_v33  ;;  %v19158_v60 = vadd.f32 %v20271_v1, %v18850_v57  ;;  %20274 = vst [vmem:[#allocation22_spill] sm:$0xff] %v19163_v44  ;;  %v10460_v33 = vmul.f32 %v18923_v28, %v10389_v14  ;;  %v10529_v57 = vadd.f32 %v18935_v53, %v10458_v59  ;;  %v20277_v1 = vld [vmem:[#allocation97_spill] sm:$0xff]  ;;  %v20282_v14 = vld [vmem:[#allocation71_spill] sm:$0xff] }
 0xb72   :  { %v19168_v3 = vadd.f32 %v20275_v31, %v18856_v48  ;;  %v20278_v27 = vunpack.c.l.bf16 %v20277_v1  ;;  %v10461_v44 = vmul.f32 %v18923_v28, %v10390_v51  ;;  %v10530_v48 = vadd.f32 %v18935_v53, %v10459_v42 }
 0xb73   :  { %20272 = vst [vmem:[#allocation78_spill] sm:$0xff] %v19158_v60  ;;  %v10392_v60 = vmul.f32 %v15289_v45, %v20280_v50  ;;  %v20281_v52 = vunpack.c.h.bf16 %v20277_v1  ;;  %v10393_v31 = vmul.f32 %v15291_v43, %v20282_v14  ;;  %v10462_v59 = vmul.f32 %v18923_v28, %v10391_v47  ;;  %v20286_v1 = vld [vmem:[#allocation99_spill] sm:$0xff] }
 0xb74   :  { %v19176_v9 = vadd.f32 %v20278_v27, %v18862_v25  ;;  %v10531_v37 = vadd.f32 %v18935_v53, %v10460_v33  ;;  %v20283_v25 = vld [vmem:[#allocation80_spill] sm:$0xff]  ;;  %v10532_v42 = vadd.f32 %v18935_v53, %v10461_v44  ;;  %v20287_v43 = vunpack.c.l.bf16 %v20286_v1  ;;  %v20289_v44 = vld [vmem:[#allocation98_spill] sm:$0xff] }
 0xb75   :  { %v19184_v39 = vadd.f32 %v20281_v52, %v18868_v30  ;;  %v20284_v27 = vunpack.c.l.bf16 %v20283_v25  ;;  %v10463_v51 = vmul.f32 %v18923_v28, %v10392_v60  ;;  %v20285_v45 = vunpack.c.h.bf16 %v20283_v25 }
 0xb76   :  { %20279 = vst [vmem:[#allocation26_spill] sm:$0xff] %v19176_v9  ;;  %v19204_v47 = vadd.f32 %v20287_v43, %v18886_v36  ;;  %v10464_v33 = vmul.f32 %v18923_v28, %v10393_v31  ;;  %v10533_v50 = vadd.f32 %v18935_v53, %v10462_v59  ;;  %v20290_v52 = vunpack.c.l.bf16 %v20289_v44  ;;  %v20292_v28 = vld [vmem:[#allocation101_spill] sm:$0xff] }
 0xb77   :  { %v19192_v9 = vadd.f32 %v20284_v27, %v18874_v17  ;;  %v19199_v30 = vadd.f32 %v20285_v45, %v18880_v34  ;;  %v20288_v17 = vunpack.c.h.bf16 %v20286_v1  ;;  %v10534_v34 = vadd.f32 %v18935_v53, %v10463_v51  ;;  %v20295_v45 = vld [vmem:[#allocation100_spill] sm:$0xff] }
 0xb78   :  { %v19216_v14 = vadd.f32 %v20290_v52, %v18898_v4  ;;  %v20291_v36 = vunpack.c.h.bf16 %v20289_v44  ;;  %v20293_v31 = vunpack.c.l.bf16 %v20292_v28  ;;  %v10535_v4 = vadd.f32 %v18935_v53, %v10464_v33  ;;  %v20301_v53 = vld [vmem:[#allocation102_spill] sm:$0xff] }
 0xb79   :  { %v19211_v60 = vadd.f32 %v20288_v17, %v18892_v54  ;;  %v20294_v54 = vunpack.c.h.bf16 %v20292_v28  ;;  %v20296_v51 = vunpack.c.l.bf16 %v20295_v45  ;;  %v20302_v33 = vunpack.c.l.bf16 %v20301_v53  ;;  %v20304_v28 = vld [vmem:[#allocation105_spill] sm:$0xff] }
 0xb7a   :  { %v19222_v25 = vadd.f32 %v20291_v36, %v18904_v49  ;;  %v19227_v59 = vadd.f32 %v20293_v31, %v18910_v41  ;;  %v20297_v49 = vunpack.c.h.bf16 %v20295_v45  ;;  %v20298_v41 = vld [vmem:[#allocation103_spill] sm:$0xff]  ;;  %v20303_v36 = vunpack.c.h.bf16 %v20301_v53  ;;  %v20307_v45 = vld [vmem:[#allocation104_spill] sm:$0xff]  ;;  %v20313_v53 = vld [vmem:[#allocation106_spill] sm:$0xff] }
 0xb7b   :  { %v19232_v27 = vadd.f32 %v20294_v54, %v18916_v6  ;;  %v19238_v1 = vadd.f32 %v20296_v51, %v18927_v63  ;;  %v20299_v17 = vunpack.c.l.bf16 %v20298_v41  ;;  %v20300_v6 = vunpack.c.h.bf16 %v20298_v41  ;;  %v20310_v41 = vld [vmem:[#allocation107_spill] sm:$0xff] }
 0xb7c   :  { %v19243_v43 = vadd.f32 %v20297_v49, %v18938_v2  ;;  %v19258_v63 = vadd.f32 %v20302_v33, %v18956_v32  ;;  %v19263_v2 = vadd.f32 %v20303_v36, %v18962_v40  ;;  %v20305_v31 = vunpack.c.l.bf16 %v20304_v28 }
 0xb7d   :  { %v19248_v44 = vadd.f32 %v20299_v17, %v18944_v35  ;;  %v19253_v52 = vadd.f32 %v20300_v6, %v18950_v7  ;;  %v20306_v54 = vunpack.c.h.bf16 %v20304_v28  ;;  %v20308_v51 = vunpack.c.l.bf16 %v20307_v45  ;;  %v20316_v28 = vld [vmem:[#allocation109_spill] sm:$0xff] }
 0xb7e   :  { %v19268_v35 = vadd.f32 %v20305_v31, %v18968_v15  ;;  %v20309_v49 = vunpack.c.h.bf16 %v20307_v45  ;;  %v20311_v17 = vunpack.c.l.bf16 %v20310_v41  ;;  %v20312_v6 = vunpack.c.h.bf16 %v20310_v41  ;;  %v20319_v45 = vld [vmem:[#allocation108_spill] sm:$0xff]  ;;  %v20322_v41 = vld [vmem:[#allocation111_spill] sm:$0xff] }
 0xb7f   :  { %v19273_v7 = vadd.f32 %v20306_v54, %v18974_v61  ;;  %v19278_v32 = vadd.f32 %v20308_v51, %v18980_v20  ;;  %v20314_v33 = vunpack.c.l.bf16 %v20313_v53  ;;  %v20315_v36 = vunpack.c.h.bf16 %v20313_v53  ;;  %v20325_v53 = vld [vmem:[#allocation110_spill] sm:$0xff] }
 0xb80   :  { %v19283_v40 = vadd.f32 %v20309_v49, %v18986_v46  ;;  %v19288_v15 = vadd.f32 %v20311_v17, %v18992_v23  ;;  %v19293_v61 = vadd.f32 %v20312_v6, %v18998_v12  ;;  %v20317_v31 = vunpack.c.l.bf16 %v20316_v28 }
 0xb81   :  { %v19298_v20 = vadd.f32 %v20314_v33, %v19004_v26  ;;  %v19303_v46 = vadd.f32 %v20315_v36, %v19010_v5  ;;  %v20318_v54 = vunpack.c.h.bf16 %v20316_v28  ;;  %v20320_v51 = vunpack.c.l.bf16 %v20319_v45  ;;  %v20328_v28 = vld [vmem:[#allocation113_spill] sm:$0xff] }
 0xb82   :  { %v19308_v23 = vadd.f32 %v20317_v31, %v19016_v19  ;;  %v20321_v49 = vunpack.c.h.bf16 %v20319_v45  ;;  %v20323_v17 = vunpack.c.l.bf16 %v20322_v41  ;;  %v20324_v6 = vunpack.c.h.bf16 %v20322_v41  ;;  %v20331_v45 = vld [vmem:[#allocation112_spill] sm:$0xff] }
 0xb83   :  { %v19313_v12 = vadd.f32 %v20318_v54, %v19022_v16  ;;  %v19318_v26 = vadd.f32 %v20320_v51, %v19028_v24  ;;  %v20326_v33 = vunpack.c.l.bf16 %v20325_v53  ;;  %v20327_v36 = vunpack.c.h.bf16 %v20325_v53 }
 0xb84   :  { %v19323_v5 = vadd.f32 %v20321_v49, %v19034_v58  ;;  %v19328_v19 = vadd.f32 %v20323_v17, %v19040_v55  ;;  %v19333_v16 = vadd.f32 %v20324_v6, %v19046_v38  ;;  %v20329_v31 = vunpack.c.l.bf16 %v20328_v28  ;;  %v20333_v49 = vld [vmem:[#allocation87_spill] sm:$0xff]  ;;  %v20335_v17 = vld [vmem:[#allocation92_spill] sm:$0xff]  ;;  %v20336_v6 = vld [vmem:[#allocation81_spill] sm:$0xff] }
 0xb85   :  { %v19338_v24 = vadd.f32 %v20326_v33, %v19052_v21  ;;  %v19343_v58 = vadd.f32 %v20327_v36, %v19058_v0  ;;  %v20330_v54 = vunpack.c.h.bf16 %v20328_v28  ;;  %v20332_v51 = vunpack.c.l.bf16 %v20331_v45  ;;  %v20338_v33 = vld [vmem:[#allocation93_spill] sm:$0xff]  ;;  %v20340_v28 = vld [vmem:[#allocation114_spill] sm:$0xff] }
 0xb86   :  { %v19348_v55 = vadd.f32 %v20329_v31, %v19064_v18  ;;  %v20334_v41 = vunpack.c.h.bf16 %v20331_v45  ;;  %v20337_v53 = vunpack.c.l.bf16 %v20336_v6  ;;  %v20339_v36 = vunpack.c.h.bf16 %v20336_v6 }
 0xb87   :  { %v19353_v38 = vadd.f32 %v20330_v54, %v19070_v8  ;;  %v19358_v21 = vadd.f32 %v20332_v51, %v19076_v22  ;;  %v20341_v31 = vunpack.c.l.bf16 %v20340_v28  ;;  %v20342_v54 = vunpack.c.h.bf16 %v20340_v28  ;;  %v20343_v51 = vld [vmem:[#allocation83_spill] sm:$0xff]  ;;  %v20351_v28 = vld [vmem:[#allocation22_spill] sm:$0xff] }
 0xb88   :  { %v19363_v0 = vadd.f32 %v20334_v41, %v20333_v49  ;;  %v19368_v18 = vadd.f32 %v20337_v53, %v20335_v17  ;;  %v19373_v8 = vadd.f32 %v20339_v36, %v20338_v33  ;;  %v20344_v49 = vunpack.c.l.bf16 %v20343_v51  ;;  %v20347_v53 = vld [vmem:[#allocation82_spill] sm:$0xff] }
 0xb89   :  { %v19378_v22 = vadd.f32 %v20341_v31, %v19103_v62  ;;  %v19383_v45 = vadd.f32 %v20342_v54, %v19113_v10  ;;  %v20345_v17 = vunpack.c.h.bf16 %v20343_v51  ;;  %v20348_v33 = vunpack.c.l.bf16 %v20347_v53  ;;  %v20352_v31 = vld [vmem:[#allocation85_spill] sm:$0xff] }
 0xb8a   :  { %v19388_v41 = vadd.f32 %v20344_v49, %v19123_v56  ;;  %v20349_v36 = vunpack.c.h.bf16 %v20347_v53  ;;  %v20353_v54 = vunpack.c.l.bf16 %v20352_v31  ;;  %v20354_v49 = vunpack.c.h.bf16 %v20352_v31  ;;  %v20361_v53 = vld [vmem:[#allocation86_spill] sm:$0xff] }
 0xb8b   :  { %v19393_v6 = vadd.f32 %v20345_v17, %v19133_v29  ;;  %v19398_v62 = vadd.f32 %v20348_v33, %v19143_v11  ;;  %v20356_v29 = vld [vmem:[#allocation84_spill] sm:$0xff] }
 0xb8c   :  { %v19403_v10 = vadd.f32 %v20349_v36, %v19153_v13  ;;  %v19408_v56 = vadd.f32 %v20353_v54, %v20351_v28  ;;  %v19412_v51 = vadd.f32 %v20354_v49, %v10529_v57  ;;  %v20357_v17 = vunpack.c.l.bf16 %v20356_v29  ;;  %v20366_v54 = vld [vmem:[#allocation77_spill] sm:$0xff] }
 0xb8d   :  { %20346 = vst [vmem:[#allocation23_spill] sm:$0xff] %v19393_v6  ;;  %v20359_v11 = vunpack.c.h.bf16 %v20356_v29  ;;  %v20362_v13 = vunpack.c.l.bf16 %v20361_v53  ;;  %v20367_v31 = vunpack.c.l.bf16 %v20366_v54  ;;  %v20369_v49 = vunpack.c.h.bf16 %v20366_v54 }
 0xb8e   :  { %20350 = vst [vmem:[#allocation95_spill] sm:$0xff] %v19403_v10  ;;  %20355 = vst [vmem:[#allocation27_spill] sm:$0xff] %v19412_v51  ;;  %v19416_v6 = vadd.f32 %v20357_v17, %v10530_v48  ;;  %v20364_v10 = vunpack.c.h.bf16 %v20361_v53  ;;  %v20371_v17 = vld [vmem:[#allocation88_spill] sm:$0xff] }
 0xb8f   :  { %v19420_v33 = vadd.f32 %v20359_v11, %v10531_v37  ;;  %v19424_v36 = vadd.f32 %v20362_v13, %v10532_v42  ;;  %v19432_v57 = vadd.f32 %v20367_v31, %v10534_v34  ;;  %v19436_v48 = vadd.f32 %v20369_v49, %v10535_v4  ;;  %v20372_v37 = vld [vmem:[#allocation89_spill] sm:$0xff]  ;;  %v20374_v42 = vld [vmem:[#allocation79_spill] sm:$0xff]  ;;  %v20378_v31 = vld [vmem:[#allocation26_spill] sm:$0xff] }
 0xb90   :  { %20358 = vst [vmem:[#allocation30_spill] sm:$0xff] %v19416_v6  ;;  %v19428_v28 = vadd.f32 %v20364_v10, %v10533_v50  ;;  %v10668_v29 = vmax.f32 %v20371_v17, 0.0  ;;  %v10669_v11 = vmax.f32 %v20372_v37, 0.0  ;;  %v10671_v13 = vmax.f32 %v20374_v42, 0.0  ;;  %v20376_v50 = vld [vmem:[#allocation91_spill] sm:$0xff] }
 0xb91   :  { %20360 = vst [vmem:[#allocation73_spill] sm:$0xff] %v19420_v33  ;;  %20363 = vst [vmem:[#allocation34_spill] sm:$0xff] %v19424_v36  ;;  %v20373_v33 = vld [vmem:[#allocation94_spill] sm:$0xff]  ;;  %v10673_v10 = vmax.f32 %v20376_v50, 0.0  ;;  %v10675_v34 = vmax.f32 %v19168_v3, 0.0  ;;  %v10676_v54 = vmax.f32 %v20378_v31, 0.0 }
 0xb92   :  { %20365 = vst [vmem:[#allocation31_spill] sm:$0xff] %v19428_v28  ;;  %20368 = vst [vmem:[#allocation35_spill] sm:$0xff] %v19432_v57  ;;  %v10670_v6 = vmax.f32 %v20373_v33, 0.0  ;;  %v20375_v36 = vld [vmem:[#allocation90_spill] sm:$0xff]  ;;  %v10677_v4 = vmax.f32 %v19184_v39, 0.0  ;;  %v10678_v49 = vmax.f32 %v19192_v9, 0.0 }
 0xb93   :  { %20370 = vst [vmem:[#allocation38_spill] sm:$0xff] %v19436_v48  ;;  %v10672_v53 = vmax.f32 %v20375_v36, 0.0  ;;  %v20377_v28 = vld [vmem:[#allocation78_spill] sm:$0xff]  ;;  %v10679_v17 = vmax.f32 %v19199_v30, 0.0  ;;  %v10680_v33 = vmax.f32 %v19204_v47, 0.0  ;;  %v10681_v37 = vmax.f32 %v19211_v60, 0.0 }
 0xb94   :  { %v10674_v51 = vmax.f32 %v20377_v28, 0.0  ;;  %v10682_v36 = vmax.f32 %v19216_v14, 0.0  ;;  %v10683_v42 = vmax.f32 %v19222_v25, 0.0  ;;  %v10684_v28 = vmax.f32 %v19227_v59, 0.0  ;;  %v20379_v31 = vld [vmem:[#allocation23_spill] sm:$0xff] }
 0xb95   :  { %v10685_v3 = vmax.f32 %v19232_v27, 0.0  ;;  %v10686_v50 = vmax.f32 %v19238_v1, 0.0  ;;  %v10687_v39 = vmax.f32 %v19243_v43, 0.0  ;;  %v10688_v9 = vmax.f32 %v19248_v44, 0.0  ;;  %v20380_v48 = vld [vmem:[#allocation95_spill] sm:$0xff] }
 0xb96   :  { %v10689_v30 = vmax.f32 %v19253_v52, 0.0  ;;  %v10690_v47 = vmax.f32 %v19258_v63, 0.0  ;;  %v10691_v60 = vmax.f32 %v19263_v2, 0.0  ;;  %v10692_v14 = vmax.f32 %v19268_v35, 0.0  ;;  %v20381_v57 = vld [vmem:[#allocation27_spill] sm:$0xff] }
 0xb97   :  { %v10693_v25 = vmax.f32 %v19273_v7, 0.0  ;;  %v10694_v59 = vmax.f32 %v19278_v32, 0.0  ;;  %v10695_v27 = vmax.f32 %v19283_v40, 0.0  ;;  %v10696_v1 = vmax.f32 %v19288_v15, 0.0 }
 0xb98   :  { %v10697_v43 = vmax.f32 %v19293_v61, 0.0  ;;  %v10698_v44 = vmax.f32 %v19298_v20, 0.0  ;;  %v10699_v52 = vmax.f32 %v19303_v46, 0.0  ;;  %v10700_v63 = vmax.f32 %v19308_v23, 0.0 }
 0xb99   :  { %v10701_v2 = vmax.f32 %v19313_v12, 0.0  ;;  %v10702_v35 = vmax.f32 %v19318_v26, 0.0  ;;  %v10703_v7 = vmax.f32 %v19323_v5, 0.0  ;;  %v10704_v32 = vmax.f32 %v19328_v19, 0.0 }
 0xb9a   :  { %v10705_v40 = vmax.f32 %v19333_v16, 0.0  ;;  %v10706_v15 = vmax.f32 %v19338_v24, 0.0  ;;  %v10707_v61 = vmax.f32 %v19343_v58, 0.0  ;;  %v10708_v20 = vmax.f32 %v19348_v55, 0.0 }
 0xb9b   :  { %v10709_v46 = vmax.f32 %v19353_v38, 0.0  ;;  %v10710_v23 = vmax.f32 %v19358_v21, 0.0  ;;  %v10711_v12 = vmax.f32 %v19363_v0, 0.0  ;;  %v10712_v26 = vmax.f32 %v19368_v18, 0.0  ;;  %v20382_v18 = vld [vmem:[#allocation30_spill] sm:$0xff] }
 0xb9c   :  { %v10713_v5 = vmax.f32 %v19373_v8, 0.0  ;;  %v10714_v19 = vmax.f32 %v19378_v22, 0.0  ;;  %v10715_v16 = vmax.f32 %v19383_v45, 0.0  ;;  %v10716_v24 = vmax.f32 %v19388_v41, 0.0  ;;  %v20383_v22 = vld [vmem:[#allocation73_spill] sm:$0xff]  ;;  %v20384_v41 = vld [vmem:[#allocation34_spill] sm:$0xff] }
 0xb9d   :  { %v10717_v58 = vmax.f32 %v20379_v31, 0.0  ;;  %v10718_v55 = vmax.f32 %v19398_v62, 0.0  ;;  %v10719_v38 = vmax.f32 %v20380_v48, 0.0  ;;  %v10720_v21 = vmax.f32 %v19408_v56, 0.0  ;;  %v20385_v62 = vld [vmem:[#allocation31_spill] sm:$0xff] }
 0xb9e   :  { %v10721_v0 = vmax.f32 %v20381_v57, 0.0  ;;  %v10722_v8 = vmax.f32 %v20382_v18, 0.0  ;;  %v10723_v45 = vmax.f32 %v20383_v22, 0.0  ;;  %v10724_v31 = vmax.f32 %v20384_v41, 0.0  ;;  %v20386_v56 = vld [vmem:[#allocation35_spill] sm:$0xff]  ;;  %v20387_v18 = vld [vmem:[#allocation38_spill] sm:$0xff] }
 0xb9f   :  { %v10725_v48 = vmax.f32 %v20385_v62, 0.0  ;;  %v10726_v57 = vmax.f32 %v20386_v56, 0.0  ;;  %v10727_v22 = vmax.f32 %v20387_v18, 0.0  ;;  %v11445_v41 = vpack.c.bf16 %v10669_v11, %v10668_v29 }
 0xba0   :  { %v11450_v62 = vpack.c.bf16 %v10671_v13, %v10670_v6  ;;  %v11455_v56 = vpack.c.bf16 %v10673_v10, %v10672_v53  ;;  %v11460_v18 = vpack.c.bf16 %v10675_v34, %v10674_v51  ;;  %v11465_v11 = vpack.c.bf16 %v10677_v4, %v10676_v54 }
 0xba1   :  { %11446 = vst [vmem:[#allocation9] sm:$0xff] %v11445_v41   ;;  %v11470_v29 = vpack.c.bf16 %v10679_v17, %v10678_v49  ;;  %v11475_v6 = vpack.c.bf16 %v10681_v37, %v10680_v33  ;;  %v11480_v13 = vpack.c.bf16 %v10683_v42, %v10682_v36  ;;  %v11485_v10 = vpack.c.bf16 %v10685_v3, %v10684_v28 }
 0xba2   :  { %11602 = vst [vmem:[#allocation9 + $0x8] sm:$0xff] %v11450_v62   ;;  %11603 = vst [vmem:[#allocation9 + $0x10] sm:$0xff] %v11455_v56   ;;  %v11490_v53 = vpack.c.bf16 %v10687_v39, %v10686_v50  ;;  %v11495_v34 = vpack.c.bf16 %v10689_v30, %v10688_v9  ;;  %v11500_v51 = vpack.c.bf16 %v10691_v60, %v10690_v47 }
 0xba3   :  { %11604 = vst [vmem:[#allocation9 + $0x18] sm:$0xff] %v11460_v18   ;;  %11605 = vst [vmem:[#allocation9 + $0x20] sm:$0xff] %v11465_v11   ;;  %v11505_v4 = vpack.c.bf16 %v10693_v25, %v10692_v14  ;;  %v11510_v54 = vpack.c.bf16 %v10695_v27, %v10694_v59  ;;  %v11515_v41 = vpack.c.bf16 %v10697_v43, %v10696_v1 }
 0xba4   :  { %11606 = vst [vmem:[#allocation9 + $0x28] sm:$0xff] %v11470_v29   ;;  %11607 = vst [vmem:[#allocation9 + $0x30] sm:$0xff] %v11475_v6   ;;  %v11520_v17 = vpack.c.bf16 %v10699_v52, %v10698_v44  ;;  %v11525_v49 = vpack.c.bf16 %v10701_v2, %v10700_v63  ;;  %v11530_v33 = vpack.c.bf16 %v10703_v7, %v10702_v35 }
 0xba5   :  { %11608 = vst [vmem:[#allocation9 + $0x38] sm:$0xff] %v11480_v13   ;;  %11609 = vst [vmem:[#allocation9 + $0x40] sm:$0xff] %v11485_v10   ;;  %v11535_v37 = vpack.c.bf16 %v10705_v40, %v10704_v32  ;;  %v11540_v36 = vpack.c.bf16 %v10707_v61, %v10706_v15  ;;  %v11545_v42 = vpack.c.bf16 %v10709_v46, %v10708_v20 }
 0xba6   :  { %11610 = vst [vmem:[#allocation9 + $0x48] sm:$0xff] %v11490_v53   ;;  %11611 = vst [vmem:[#allocation9 + $0x50] sm:$0xff] %v11495_v34   ;;  %v11550_v28 = vpack.c.bf16 %v10711_v12, %v10710_v23  ;;  %v11555_v3 = vpack.c.bf16 %v10713_v5, %v10712_v26  ;;  %v11560_v50 = vpack.c.bf16 %v10715_v16, %v10714_v19 }
 0xba7   :  { %11612 = vst [vmem:[#allocation9 + $0x58] sm:$0xff] %v11500_v51   ;;  %11613 = vst [vmem:[#allocation9 + $0x60] sm:$0xff] %v11505_v4   ;;  %v11565_v39 = vpack.c.bf16 %v10717_v58, %v10716_v24  ;;  %v11570_v9 = vpack.c.bf16 %v10719_v38, %v10718_v55  ;;  %v11575_v30 = vpack.c.bf16 %v10721_v0, %v10720_v21 }
 0xba8   :  { %11614 = vst [vmem:[#allocation9 + $0x68] sm:$0xff] %v11510_v54   ;;  %11615 = vst [vmem:[#allocation9 + $0x70] sm:$0xff] %v11515_v41   ;;  %v11580_v47 = vpack.c.bf16 %v10723_v45, %v10722_v8  ;;  %v11585_v60 = vpack.c.bf16 %v10725_v48, %v10724_v31  ;;  %v11590_v14 = vpack.c.bf16 %v10727_v22, %v10726_v57 }
 0xba9   :  { %11616 = vst [vmem:[#allocation9 + $0x78] sm:$0xff] %v11520_v17   ;;  %11617 = vst [vmem:[#allocation9 + $0x80] sm:$0xff] %v11525_v49  }
 0xbaa   :  { %11618 = vst [vmem:[#allocation9 + $0x88] sm:$0xff] %v11530_v33   ;;  %11619 = vst [vmem:[#allocation9 + $0x90] sm:$0xff] %v11535_v37  }
 0xbab   :  { %11620 = vst [vmem:[#allocation9 + $0x98] sm:$0xff] %v11540_v36   ;;  %11621 = vst [vmem:[#allocation9 + $0xa0] sm:$0xff] %v11545_v42  }
 0xbac   :  { %11622 = vst [vmem:[#allocation9 + $0xa8] sm:$0xff] %v11550_v28   ;;  %11623 = vst [vmem:[#allocation9 + $0xb0] sm:$0xff] %v11555_v3  }
 0xbad   :  { %11624 = vst [vmem:[#allocation9 + $0xb8] sm:$0xff] %v11560_v50   ;;  %11625 = vst [vmem:[#allocation9 + $0xc0] sm:$0xff] %v11565_v39  }
 0xbae   :  { %11626 = vst [vmem:[#allocation9 + $0xc8] sm:$0xff] %v11570_v9   ;;  %11627 = vst [vmem:[#allocation9 + $0xd0] sm:$0xff] %v11575_v30  }
 0xbaf   :  { %11628 = vst [vmem:[#allocation9 + $0xd8] sm:$0xff] %v11580_v47   ;;  %11629 = vst [vmem:[#allocation9 + $0xe0] sm:$0xff] %v11585_v60  }
 0xbb0   :  { %11630 = vst [vmem:[#allocation9 + $0xe8] sm:$0xff] %v11590_v14  }
 0xbb1   :  { %15405 = shalt.err (!%p15402_p0)
}
 0xbb2   :  { %s15406_s9 = scalar_lea.hbm %s19520_s7, 4096 }
 0xbb3   :  { %p15407_p1 = scmp.ne.s32.totalorder %s19520_s7, %s15406_s9  ;;  %p15410_p2 = scmp.lt.u32.totalorder %s15406_s9, %s19520_s7 }
 0xbb5   :  { %p15412_p3 = pnand %p15410_p2, %p15407_p1 }
 0xbb7   :  { %15415 = shalt.err (!%p15412_p3)
}
 0xbb8   :  { %11063 = dma.vmem_to_hbm [thread:$0]  %s11058_s6, 4096, %s19520_s7, [#allocation5], %s15424_s13, %s15424_s13, %s15425_s14  }
 0xbb9   :  { %15420 = dma.done.wait [#allocation5], 4096  }
 0xbba   :  { %15421 = vsyncadd [#allocation5], 4294963200 }
 0xbbb   :  { %11067 = vsyncpa [#allocation4], 1 }
 0xbbc   :  { %11068 = vsyncpa [#allocation7], 1 }
 0xbbd   :  { %11069 = vsyncpa [#allocation5], 1 }

</bundles_post_ra>
